<compile_context>
chip_gen: v6e
topology: v6e:2x2x1
jax: 0.10.0
libtpu: 0.0.40
codegen_flags: <defaults>
</compile_context>

<pallas_src>
import functools
import math
import numpy as np
import jax
import jax.numpy as jnp
from jax.experimental import pallas as pl
from jax.experimental.pallas import tpu as pltpu

EPS = 1e-5
LANE = 128


def _round_up(x, m):
    return (x + m - 1) // m * m


@functools.lru_cache(maxsize=None)
def _vmem_limit_bytes():
    """Generation-aware scoped-VMEM limit (~70% of per-core VMEM, <= 96 MiB)."""
    try:
        cap = int(pltpu.get_tpu_info().vmem_capacity_bytes)
        if cap > 0:
            return max(32 << 20, min(96 << 20, int(cap * 0.7)))
    except Exception:
        pass
    try:
        kind = jax.devices()[0].device_kind.lower()
        if "v7" in kind:                      # 64 MiB per TensorCore
            return 44 << 20
        return 64 << 20                       # v5e / v6e: 128 MiB physical
    except Exception:
        return 48 << 20


@functools.lru_cache(maxsize=None)
def _def_tile_m():
    """Rows per grid step: ~1024 on v5e/v6e, ~512 on v7x (64 MiB VMEM/TC)."""
    return 512 if _vmem_limit_bytes() < (56 << 20) else 1024


@functools.lru_cache(maxsize=None)
def _compiler_params():
    return pltpu.CompilerParams(
        dimension_semantics=("parallel",),
        vmem_limit_bytes=_vmem_limit_bytes(),
    )


def _cost(flops, args, out_bytes):
    bytes_acc = int(sum(int(np.prod(a.shape)) * a.dtype.itemsize for a in args))
    return pl.CostEstimate(flops=int(flops), transcendentals=0,
                           bytes_accessed=bytes_acc + int(out_bytes))


# ------------------------------ Pallas kernels -------------------------------
def _make_matmul_kernel(relu, has_res):
    """(TILE_M, K) @ (K, Np) + shift (+residual) (+ReLU)."""
    def kernel(*refs):
        if has_res:
            x_ref, w_ref, t_ref, r_ref, o_ref = refs
        else:
            x_ref, w_ref, t_ref, o_ref = refs
        y = jnp.dot(x_ref[...], w_ref[...], preferred_element_type=jnp.float32)
        y = y + t_ref[...]
        if has_res:
            y = y + r_ref[...].astype(jnp.float32)
        if relu:
            y = jnp.maximum(y, 0.0)
        o_ref[...] = y.astype(o_ref.dtype)
    return kernel


def _make_conv3x3_kernel(relu, has_res, has_proj, wo):
    """3x3 stride-1 conv: row-shifts are pre-merged into the channel dim in glue,
    the 3 horizontal taps are sliced in-kernel and accumulated as 3 matmuls.
    With has_proj, a fused 1x1 projection (bottleneck c3) + shift follows the
    3x3+BN+ReLU, so the mid-channel intermediate never leaves VMEM."""
    def kernel(*refs):
        it = iter(refs)
        x_ref = next(it)
        w_ref = next(it)
        t_ref = next(it)
        w3_ref = next(it) if has_proj else None
        t3_ref = next(it) if has_proj else None
        r_ref = next(it) if has_res else None
        o_ref = next(it)

        tile_r = x_ref.shape[0]          # image-rows in this tile
        kdim = w_ref.shape[1]            # 3 * C_in
        m = tile_r * wo                  # output rows in this tile
        acc = None
        for j in range(3):               # horizontal taps (static slices in VMEM)
            tap = x_ref[:, j:j + wo, :]              # (tile_r, wo, 3*C)
            tap = tap.reshape(m, kdim)               # merge leading dims
            part = jnp.dot(tap, w_ref[j], preferred_element_type=jnp.float32)
            acc = part if acc is None else acc + part
        y = acc + t_ref[...]
        if has_proj:                     # bottleneck: ReLU then fused 1x1 (c3)
            y = jnp.maximum(y, 0.0)
            y = jnp.dot(y.astype(w3_ref.dtype), w3_ref[...],
                        preferred_element_type=jnp.float32) + t3_ref[...]
        if has_res:
            y = y + r_ref[...].astype(jnp.float32)
        if relu:
            y = jnp.maximum(y, 0.0)
        o_ref[...] = y.astype(o_ref.dtype)
    return kernel


# ------------------------------- launch glue ---------------------------------
def _matmul_bn_act(x2d, w2, shift, residual, relu, out_dtype, tile_m=None):
    """Gridded fused matmul + shift (+res) (+ReLU). x2d:(M,K) w2:(K,Np)."""
    M, K = x2d.shape
    Np = w2.shape[1]
    if tile_m is None:
        tile_m = _def_tile_m()
    tile_m = min(tile_m, _round_up(M, 8))
    # Aim for >= 2 grid steps (v7x shards the 'parallel' grid over 2 TensorCores).
    tile_m = min(tile_m, max(8, _round_up((M + 1) // 2, 8)))
    m_pad = _round_up(M, tile_m)
    if m_pad != M:
        x2d = jnp.pad(x2d, ((0, m_pad - M), (0, 0)))
        if residual is not None:
            residual = jnp.pad(residual, ((0, m_pad - M), (0, 0)))
    has_res = residual is not None
    args = [x2d, w2, shift] + ([residual] if has_res else [])
    in_specs = [
        pl.BlockSpec((tile_m, K), lambda m: (m, 0)),
        pl.BlockSpec((K, Np), lambda m: (0, 0)),       # grid-invariant
        pl.BlockSpec((1, Np), lambda m: (0, 0)),
    ]
    if has_res:
        in_specs.append(pl.BlockSpec((tile_m, Np), lambda m: (m, 0)))
    out_size = jnp.dtype(out_dtype).itemsize
    out = pl.pallas_call(
        _make_matmul_kernel(relu, has_res),
        out_shape=jax.ShapeDtypeStruct((m_pad, Np), out_dtype),
        grid=(m_pad // tile_m,),
        in_specs=in_specs,
        out_specs=pl.BlockSpec((tile_m, Np), lambda m: (m, 0)),
        compiler_params=_compiler_params(),
        cost_estimate=_cost(2 * m_pad * K * Np, args, m_pad * Np * out_size),
    )(*args)
    if m_pad != M:
        out = out[:M]
    return out


def _conv3x3_bn_act(x, w4, shift, residual, relu, compute_dtype, out_dtype,
                    proj_w=None, proj_shift=None, tile_m=None):
    """3x3, stride 1, pad 1. x:(B,H,W,C) ; w4:(3,3,C,Np_mid) BN-folded & padded.
    If proj_w/proj_shift are given, a 1x1 projection (+shift) is fused after
    the 3x3+shift+ReLU (bottleneck c2+c3 fusion)."""
    B, H, W, C = x.shape
    Np_mid = w4.shape[-1]
    has_proj = proj_w is not None
    Np_out = proj_w.shape[-1] if has_proj else Np_mid
    Ho, Wo, Wp = H, W, W + 2
    if tile_m is None:
        tile_m = _def_tile_m()

    xp = jnp.pad(x, ((0, 0), (1, 1), (1, 1), (0, 0)))
    # TODO(synk): replace this 3x row-shift materialization with an in-kernel
    # halo fetch (memory_space=pl.ANY + manual make_async_copy) to cut the 3x3
    # input HBM traffic from ~6x to ~1x of the activation bytes.
    rows = jnp.concatenate([xp[:, i:i + Ho, :, :] for i in range(3)], axis=-1)
    rows = rows.reshape(B * Ho, Wp, 3 * C).astype(compute_dtype)
    # weight per horizontal tap j: (3*C, Np_mid) with (i, c) merged along K.
    wj = jnp.transpose(w4, (1, 0, 2, 3)).reshape(3, 3 * C, Np_mid).astype(compute_dtype)

    R = B * Ho
    step = 8 // math.gcd(Wo, 8)              # tile_r multiple => tile_r*Wo % 8 == 0
    base = max(1, tile_m // Wo)
    tile_r = max(step, (base // step) * step)
    # Aim for >= 2 grid steps so both v7x TensorCores are used.
    half_r = max(step, _round_up((R + 1) // 2, step))
    tile_r = min(tile_r, half_r)
    r_pad = _round_up(R, tile_r)
    M, m_pad = B * Ho * Wo, r_pad * Wo
    if r_pad != R:
        rows = jnp.pad(rows, ((0, r_pad - R), (0, 0), (0, 0)))
    has_res = residual is not None
    if has_res:
        residual = residual.reshape(M, Np_out)
        if m_pad != M:
            residual = jnp.pad(residual, ((0, m_pad - M), (0, 0)))

    args = [rows, wj, shift]
    in_specs = [
        pl.BlockSpec((tile_r, Wp, 3 * C), lambda r: (r, 0, 0)),
        pl.BlockSpec((3, 3 * C, Np_mid), lambda r: (0, 0, 0)),   # grid-invariant
        pl.BlockSpec((1, Np_mid), lambda r: (0, 0)),
    ]
    if has_proj:
        args += [proj_w.astype(compute_dtype), proj_shift]
        in_specs += [pl.BlockSpec((Np_mid, Np_out), lambda r: (0, 0)),
                     pl.BlockSpec((1, Np_out), lambda r: (0, 0))]
    if has_res:
        args.append(residual)
        in_specs.append(pl.BlockSpec((tile_r * Wo, Np_out), lambda r: (r, 0)))

    flops = 2 * m_pad * (9 * C) * Np_mid
    if has_proj:
        flops += 2 * m_pad * Np_mid * Np_out
    out_size = jnp.dtype(out_dtype).itemsize
    out = pl.pallas_call(
        _make_conv3x3_kernel(relu, has_res, has_proj, Wo),
        out_shape=jax.ShapeDtypeStruct((m_pad, Np_out), out_dtype),
        grid=(r_pad // tile_r,),
        in_specs=in_specs,
        out_specs=pl.BlockSpec((tile_r * Wo, Np_out), lambda r: (r, 0)),
        compiler_params=_compiler_params(),
        cost_estimate=_cost(flops, args, m_pad * Np_out * out_size),
    )(*args)
    if m_pad != M:
        out = out[:M]
    return out.reshape(B, Ho, Wo, Np_out)


def _im2col(x, kh, kw, stride, pad):
    """x:(B,H,W,C) -> (B*Ho*Wo, kh*kw*C); only used by the stride!=1 fallback."""
    B, H, W, C = x.shape
    xp = jnp.pad(x, ((0, 0), (pad, pad), (pad, pad), (0, 0)))
    Ho = (H + 2 * pad - kh) // stride + 1
    Wo = (W + 2 * pad - kw) // stride + 1
    cols = []
    for i in range(kh):
        for j in range(kw):
            cols.append(xp[:, i:i + Ho * stride:stride, j:j + Wo * stride:stride, :])
    patches = jnp.concatenate(cols, axis=-1)
    return patches.reshape(B * Ho * Wo, kh * kw * C), Ho, Wo


def _fold_bn(p, c_act, n_pad):
    """Pad cin->c_act, cout->n_pad and fold BN scale into W. Returns (w4, shift)."""
    kh, kw, cin, cout = p["w"].shape
    scale = p["gamma"] / jnp.sqrt(p["var"] + EPS)                 # (cout,)
    shift = p["beta"] + (p["b"] - p["mean"]) * scale              # (cout,)
    w = p["w"] * scale[None, None, None, :]
    w = jnp.pad(w, ((0, 0), (0, 0), (0, c_act - cin), (0, n_pad - cout)))
    shift = jnp.pad(shift, (0, n_pad - cout)).reshape(1, n_pad).astype(jnp.float32)
    return w, shift


def conv_bn_pallas(x, p, *, stride, pad, relu, residual=None,
                   compute_dtype=jnp.float32, out_dtype=None):
    """Fused Conv2d + BN (+res) (+ReLU). x/residual NHWC; output is channel-padded
    to a multiple of 128 (lane-dense stores) and stored in compute_dtype;
    caller slices channels once at the very end."""
    if out_dtype is None:
        out_dtype = compute_dtype
    kh, kw, cin, cout = p["w"].shape
    c_act = x.shape[-1]                       # activations may already be padded
    n_pad = _round_up(cout, LANE)
    w4, shift = _fold_bn(p, c_act, n_pad)

    if kh == 1 and kw == 1 and stride == 1 and pad == 0:
        B, H, W, _ = x.shape
        x2d = x.reshape(B * H * W, c_act).astype(compute_dtype)
        w2 = w4.reshape(c_act, n_pad).astype(compute_dtype)
        res2d = residual.reshape(B * H * W, n_pad) if residual is not None else None
        out = _matmul_bn_act(x2d, w2, shift, res2d, relu, out_dtype)
        return out.reshape(B, H, W, n_pad)

    if kh == 3 and kw == 3 and stride == 1 and pad == 1:
        return _conv3x3_bn_act(x, w4, shift, residual, relu, compute_dtype,
                               out_dtype)

    # Generic fallback (e.g. stride=2 downsampling).
    # TODO(synk): this path still materializes the im2col patches in HBM.
    patches, Ho, Wo = _im2col(x, kh, kw, stride, pad)
    M, K = patches.shape
    w2 = w4.reshape(K, n_pad).astype(compute_dtype)
    patches = patches.astype(compute_dtype)
    res2d = residual.reshape(M, n_pad) if residual is not None else None
    out = _matmul_bn_act(patches, w2, shift, res2d, relu, out_dtype)
    return out.reshape(x.shape[0], Ho, Wo, n_pad)


def bottleneck_tail_pallas(h, p2, p3, *, residual, compute_dtype=jnp.float32):
    """Fused BottleNeck tail: 3x3(mid->mid)+BN+ReLU -> 1x1(mid->out)+BN
    -> +residual -> ReLU, in ONE pallas_call (mid intermediate stays in VMEM)."""
    c_act = h.shape[-1]
    mid_pad = _round_up(p2["w"].shape[-1], LANE)
    out_pad = _round_up(p3["w"].shape[-1], LANE)
    w2_4, shift2 = _fold_bn(p2, c_act, mid_pad)
    w3_4, shift3 = _fold_bn(p3, mid_pad, out_pad)
    w3 = w3_4.reshape(mid_pad, out_pad)
    return _conv3x3_bn_act(h, w2_4, shift2, residual, relu=True,
                           compute_dtype=compute_dtype, out_dtype=compute_dtype,
                           proj_w=w3, proj_shift=shift3)


# --------------------------- parameter creation ------------------------------
def _conv_bn_params(key, kh, kw, cin, cout):
    k = jax.random.split(key, 6)
    return dict(
        w=jax.random.normal(k[0], (kh, kw, cin, cout), jnp.float32)
          * (1.0 / np.sqrt(kh * kw * cin)),
        b=0.1 * jax.random.normal(k[1], (cout,), jnp.float32),
        gamma=1.0 + 0.1 * jax.random.normal(k[2], (cout,), jnp.float32),
        beta=0.1 * jax.random.normal(k[3], (cout,), jnp.float32),
        mean=0.1 * jax.random.normal(k[4], (cout,), jnp.float32),
        var=jnp.abs(jax.random.normal(k[5], (cout,), jnp.float32)) + 0.5,
    )


def make_residual_params(key, inp_dim, out_dim, stride=1, num_block=2):
    keys = jax.random.split(key, 3 + 3 * num_block)
    params = {
        "conv1_a": _conv_bn_params(keys[0], 3, 3, inp_dim, out_dim),
        "conv1_b": _conv_bn_params(keys[1], 3, 3, out_dim, out_dim),
        "bottlenecks": [],
    }
    if stride == 2 or inp_dim != out_dim:
        params["skip"] = _conv_bn_params(keys[2], 1, 1, inp_dim, out_dim)
    mid = out_dim // 4
    for i in range(num_block):
        params["bottlenecks"].append(dict(
            c1=_conv_bn_params(keys[3 + 3 * i + 0], 1, 1, out_dim, mid),
            c2=_conv_bn_params(keys[3 + 3 * i + 1], 3, 3, mid, mid),
            c3=_conv_bn_params(keys[3 + 3 * i + 2], 1, 1, mid, out_dim),
        ))
    return params


# ------------------------------ forward pass ---------------------------------
def residual_forward(x_nhwc, params, stride=1, compute_dtype=jnp.float32):
    """Residual.forward (rca=False default: attention branch not instantiated)."""
    cdt = compute_dtype
    # BasicBlock: conv3x3+BN+ReLU -> conv3x3+BN, skip(+1x1conv+BN), add, ReLU
    h = conv_bn_pallas(x_nhwc, params["conv1_a"], stride=stride, pad=1, relu=True,
                       compute_dtype=cdt)
    if "skip" in params:
        skip = conv_bn_pallas(x_nhwc, params["skip"], stride=stride, pad=0,
                              relu=False, compute_dtype=cdt)
    else:
        out_dim = params["conv1_a"]["w"].shape[-1]
        n_pad = _round_up(out_dim, LANE)
        # TODO(synk): avoid this HBM pad copy by adding the unpadded residual
        # inside the conv1_b kernel epilogue with a (tile, C) residual block.
        skip = jnp.pad(x_nhwc, ((0, 0), (0, 0), (0, 0),
                                (0, n_pad - x_nhwc.shape[-1]))).astype(cdt)
    out = conv_bn_pallas(h, params["conv1_b"], stride=1, pad=1, relu=True,
                         residual=skip, compute_dtype=cdt)
    # BottleNecks: 1x1 -> [3x3 -> 1x1 fused] with residual add + ReLU.
    # TODO(synk): also fold c1 (1x1) into the fused kernel (halo fetch of the
    # raw input per row-tile) to remove the remaining HBM round trip per block.
    for bp in params["bottlenecks"]:
        hh = conv_bn_pallas(out, bp["c1"], stride=1, pad=0, relu=True,
                            compute_dtype=cdt)
        out = bottleneck_tail_pallas(hh, bp["c2"], bp["c3"], residual=out,
                                     compute_dtype=cdt)
    out_dim = params["conv1_b"]["w"].shape[-1]
    return out[..., :out_dim]                 # drop lane padding once, at the end


# ---------------------------- pure-JAX reference ------------------------------
def _conv_bn_ref(x, p, *, stride, pad, relu, residual=None):
    y = jax.lax.conv_general_dilated(
        x, p["w"], (stride, stride), [(pad, pad), (pad, pad)],
        dimension_numbers=("NHWC", "HWIO", "NHWC"))
    y = y + p["b"]
    sc = p["gamma"] / jnp.sqrt(p["var"] + EPS)
    y = (y - p["mean"]) * sc + p["beta"]
    if residual is not None:
        y = y + residual
    if relu:
        y = jnp.maximum(y, 0.0)
    return y


def residual_forward_ref(x_nhwc, params, stride=1):
    h = _conv_bn_ref(x_nhwc, params["conv1_a"], stride=stride, pad=1, relu=True)
    if "skip" in params:
        skip = _conv_bn_ref(x_nhwc, params["skip"], stride=stride, pad=0, relu=False)
    else:
        skip = x_nhwc
    out = _conv_bn_ref(h, params["conv1_b"], stride=1, pad=1, relu=True,
                       residual=skip)
    for bp in params["bottlenecks"]:
        hh = _conv_bn_ref(out, bp["c1"], stride=1, pad=0, relu=True)
        hh = _conv_bn_ref(hh, bp["c2"], stride=1, pad=1, relu=True)
        out = _conv_bn_ref(hh, bp["c3"], stride=1, pad=0, relu=True, residual=out)
    return out


# ---------------------------------- main -------------------------------------
if __name__ == "__main__":
    key = jax.random.PRNGKey(0)
    k_x, k_p = jax.random.split(key)

    B, C_IN, C_OUT, H, W = 2, 4, 8, 16, 16
    x_nchw = jax.random.normal(k_x, (B, C_IN, H, W), jnp.float32)   # PyTorch layout
    x_nhwc = jnp.transpose(x_nchw, (0, 2, 3, 1))                    # kernel layout

    params = make_residual_params(k_p, C_IN, C_OUT, stride=1, num_block=2)

    ref_nhwc = residual_forward_ref(x_nhwc, params, stride=1)

    # f32 path (tight check).
    fwd_f32 = jax.jit(functools.partial(residual_forward, stride=1,
                                        compute_dtype=jnp.float32))
    out_nhwc = jax.block_until_ready(fwd_f32(x_nhwc, params))
    np.testing.assert_allclose(np.asarray(out_nhwc), np.asarray(ref_nhwc),
                               rtol=1e-4, atol=1e-4)
    out_nchw = jnp.transpose(out_nhwc, (0, 3, 1, 2))                # back to NCHW
    assert out_nchw.shape == (B, C_OUT, H, W)

    # bf16 MXU operands + bf16 activation storage (v6e/v7x), f32 accumulation
    # and epilogue inside the kernels (loose check).
    fwd_bf16 = jax.jit(functools.partial(residual_forward, stride=1,
                                         compute_dtype=jnp.bfloat16))
    out_bf16 = jax.block_until_ready(fwd_bf16(x_nhwc, params))
    out_bf16_f32 = np.asarray(jnp.asarray(out_bf16, jnp.float32))
    np.testing.assert_allclose(out_bf16_f32, np.asarray(ref_nhwc),
                               rtol=2e-1, atol=2e-1)

    print("KERNEL_OK")
</pallas_src>

<mosaic_0001>
module attributes {stable_mosaic.version = 11 : i64} {
  func.func @kernel(%arg0: i32, %arg1: memref<16x18x12xf32, #tpu.memory_space<vmem>>, %arg2: memref<3x12x128xf32, #tpu.memory_space<vmem>>, %arg3: memref<1x128xf32, #tpu.memory_space<vmem>>, %arg4: memref<256x128xf32, #tpu.memory_space<vmem>>) attributes {dimension_semantics = [#tpu.dimension_semantics<parallel>], iteration_bounds = array<i64: 2>, scalar_prefetch = 0 : i64, scratch_operands = 0 : i64, tpu.core_type = #tpu.core_type<tc>, window_params = [{transform_indices = @transform_0, window_bounds = array<i64: 16, 18, 12>}, {pipeline_mode = #tpu.pipeline_mode<synchronous>, transform_indices = @transform_1, window_bounds = array<i64: 3, 12, 128>}, {pipeline_mode = #tpu.pipeline_mode<synchronous>, transform_indices = @transform_2, window_bounds = array<i64: 1, 128>}, {transform_indices = @transform_3, window_bounds = array<i64: 256, 128>}]} {
    %c0 = arith.constant 0 : index
    %c0_0 = arith.constant 0 : index
    %c0_1 = arith.constant 0 : index
    %0 = vector.load %arg1[%c0, %c0_0, %c0_1] : memref<16x18x12xf32, #tpu.memory_space<vmem>>, vector<16x16x12xf32>
    %1 = vector.shape_cast %0 : vector<16x16x12xf32> to vector<256x12xf32>
    %c0_2 = arith.constant 0 : index
    %c0_3 = arith.constant 0 : index
    %c0_4 = arith.constant 0 : index
    %2 = vector.load %arg2[%c0_2, %c0_3, %c0_4] : memref<3x12x128xf32, #tpu.memory_space<vmem>>, vector<1x12x128xf32>
    %3 = vector.shape_cast %2 : vector<1x12x128xf32> to vector<12x128xf32>
    %cst = arith.constant dense<0.000000e+00> : vector<256x128xf32>
    %4 = tpu.matmul %1, %3, %cst {dimension_numbers = #tpu.dot_dimension_numbers<[1], [0], [0], [1], [0, 0, 1, 1], [], []>} : vector<256x12xf32>, vector<12x128xf32>, vector<256x128xf32> -> vector<256x128xf32>
    %c0_5 = arith.constant 0 : index
    %c1 = arith.constant 1 : index
    %c0_6 = arith.constant 0 : index
    %5 = vector.load %arg1[%c0_5, %c1, %c0_6] : memref<16x18x12xf32, #tpu.memory_space<vmem>>, vector<16x16x12xf32>
    %6 = vector.shape_cast %5 : vector<16x16x12xf32> to vector<256x12xf32>
    %c1_7 = arith.constant 1 : index
    %c0_8 = arith.constant 0 : index
    %c0_9 = arith.constant 0 : index
    %7 = vector.load %arg2[%c1_7, %c0_8, %c0_9] : memref<3x12x128xf32, #tpu.memory_space<vmem>>, vector<1x12x128xf32>
    %8 = vector.shape_cast %7 : vector<1x12x128xf32> to vector<12x128xf32>
    %cst_10 = arith.constant dense<0.000000e+00> : vector<256x128xf32>
    %9 = tpu.matmul %6, %8, %cst_10 {dimension_numbers = #tpu.dot_dimension_numbers<[1], [0], [0], [1], [0, 0, 1, 1], [], []>} : vector<256x12xf32>, vector<12x128xf32>, vector<256x128xf32> -> vector<256x128xf32>
    %10 = arith.addf %4, %9 : vector<256x128xf32>
    %c0_11 = arith.constant 0 : index
    %c2 = arith.constant 2 : index
    %c0_12 = arith.constant 0 : index
    %11 = vector.load %arg1[%c0_11, %c2, %c0_12] : memref<16x18x12xf32, #tpu.memory_space<vmem>>, vector<16x16x12xf32>
    %12 = vector.shape_cast %11 : vector<16x16x12xf32> to vector<256x12xf32>
    %c2_13 = arith.constant 2 : index
    %c0_14 = arith.constant 0 : index
    %c0_15 = arith.constant 0 : index
    %13 = vector.load %arg2[%c2_13, %c0_14, %c0_15] : memref<3x12x128xf32, #tpu.memory_space<vmem>>, vector<1x12x128xf32>
    %14 = vector.shape_cast %13 : vector<1x12x128xf32> to vector<12x128xf32>
    %cst_16 = arith.constant dense<0.000000e+00> : vector<256x128xf32>
    %15 = tpu.matmul %12, %14, %cst_16 {dimension_numbers = #tpu.dot_dimension_numbers<[1], [0], [0], [1], [0, 0, 1, 1], [], []>} : vector<256x12xf32>, vector<12x128xf32>, vector<256x128xf32> -> vector<256x128xf32>
    %16 = arith.addf %10, %15 : vector<256x128xf32>
    %c0_17 = arith.constant 0 : index
    %c0_18 = arith.constant 0 : index
    %17 = vector.load %arg3[%c0_17, %c0_18] : memref<1x128xf32, #tpu.memory_space<vmem>>, vector<1x128xf32>
    %18 = vector.broadcast %17 : vector<1x128xf32> to vector<256x128xf32>
    %19 = arith.addf %16, %18 : vector<256x128xf32>
    %cst_19 = arith.constant 0.000000e+00 : f32
    %20 = vector.broadcast %cst_19 : f32 to vector<256x128xf32>
    %21 = arith.maximumf %19, %20 : vector<256x128xf32>
    %c0_20 = arith.constant 0 : index
    %c0_21 = arith.constant 0 : index
    %22 = vector.load %arg4[%c0_20, %c0_21] : memref<256x128xf32, #tpu.memory_space<vmem>>, vector<256x128xf32>
    tpu.vector_store %arg4[%c0_20, %c0_21], %21 {strides = array<i32>} : memref<256x128xf32, #tpu.memory_space<vmem>>, vector<256x128xf32>,
    return
  }
  func.func @transform_0(%arg0: i32) -> (i32, i32, i32) {
    %c0_i32 = arith.constant 0 : i32
    %c0_i32_0 = arith.constant 0 : i32
    %c0_i32_1 = arith.constant 0 : i32
    return %arg0, %c0_i32, %c0_i32_0 : i32, i32, i32
  }
  func.func @transform_1(%arg0: i32) -> (i32, i32, i32) {
    %c0_i32 = arith.constant 0 : i32
    %c0_i32_0 = arith.constant 0 : i32
    %c0_i32_1 = arith.constant 0 : i32
    %c0_i32_2 = arith.constant 0 : i32
    return %c0_i32, %c0_i32_0, %c0_i32_1 : i32, i32, i32
  }
  func.func @transform_2(%arg0: i32) -> (i32, i32) {
    %c0_i32 = arith.constant 0 : i32
    %c0_i32_0 = arith.constant 0 : i32
    %c0_i32_1 = arith.constant 0 : i32
    return %c0_i32, %c0_i32_0 : i32, i32
  }
  func.func @transform_3(%arg0: i32) -> (i32, i32) {
    %c0_i32 = arith.constant 0 : i32
    %c0_i32_0 = arith.constant 0 : i32
    return %arg0, %c0_i32 : i32, i32
  }
}

module attributes {stable_mosaic.version = 11 : i64} {
  func.func @kernel(%arg0: i32, %arg1: memref<16x18x384xf32, #tpu.memory_space<vmem>>, %arg2: memref<3x384x128xf32, #tpu.memory_space<vmem>>, %arg3: memref<1x128xf32, #tpu.memory_space<vmem>>, %arg4: memref<256x128xf32, #tpu.memory_space<vmem>>, %arg5: memref<256x128xf32, #tpu.memory_space<vmem>>) attributes {dimension_semantics = [#tpu.dimension_semantics<parallel>], iteration_bounds = array<i64: 2>, scalar_prefetch = 0 : i64, scratch_operands = 0 : i64, tpu.core_type = #tpu.core_type<tc>, window_params = [{transform_indices = @transform_0, window_bounds = array<i64: 16, 18, 384>}, {pipeline_mode = #tpu.pipeline_mode<synchronous>, transform_indices = @transform_1, window_bounds = array<i64: 3, 384, 128>}, {pipeline_mode = #tpu.pipeline_mode<synchronous>, transform_indices = @transform_2, window_bounds = array<i64: 1, 128>}, {transform_indices = @transform_3, window_bounds = array<i64: 256, 128>}, {transform_indices = @transform_4, window_bounds = array<i64: 256, 128>}]} {
    %c0 = arith.constant 0 : index
    %c0_0 = arith.constant 0 : index
    %c0_1 = arith.constant 0 : index
    %0 = vector.load %arg1[%c0, %c0_0, %c0_1] : memref<16x18x384xf32, #tpu.memory_space<vmem>>, vector<16x16x384xf32>
    %1 = vector.shape_cast %0 : vector<16x16x384xf32> to vector<256x384xf32>
    %c0_2 = arith.constant 0 : index
    %c0_3 = arith.constant 0 : index
    %c0_4 = arith.constant 0 : index
    %2 = vector.load %arg2[%c0_2, %c0_3, %c0_4] : memref<3x384x128xf32, #tpu.memory_space<vmem>>, vector<1x384x128xf32>
    %3 = vector.shape_cast %2 : vector<1x384x128xf32> to vector<384x128xf32>
    %cst = arith.constant dense<0.000000e+00> : vector<256x128xf32>
    %4 = tpu.matmul %1, %3, %cst {dimension_numbers = #tpu.dot_dimension_numbers<[1], [0], [0], [1], [0, 0, 1, 1], [], []>} : vector<256x384xf32>, vector<384x128xf32>, vector<256x128xf32> -> vector<256x128xf32>
    %c0_5 = arith.constant 0 : index
    %c1 = arith.constant 1 : index
    %c0_6 = arith.constant 0 : index
    %5 = vector.load %arg1[%c0_5, %c1, %c0_6] : memref<16x18x384xf32, #tpu.memory_space<vmem>>, vector<16x16x384xf32>
    %6 = vector.shape_cast %5 : vector<16x16x384xf32> to vector<256x384xf32>
    %c1_7 = arith.constant 1 : index
    %c0_8 = arith.constant 0 : index
    %c0_9 = arith.constant 0 : index
    %7 = vector.load %arg2[%c1_7, %c0_8, %c0_9] : memref<3x384x128xf32, #tpu.memory_space<vmem>>, vector<1x384x128xf32>
    %8 = vector.shape_cast %7 : vector<1x384x128xf32> to vector<384x128xf32>
    %cst_10 = arith.constant dense<0.000000e+00> : vector<256x128xf32>
    %9 = tpu.matmul %6, %8, %cst_10 {dimension_numbers = #tpu.dot_dimension_numbers<[1], [0], [0], [1], [0, 0, 1, 1], [], []>} : vector<256x384xf32>, vector<384x128xf32>, vector<256x128xf32> -> vector<256x128xf32>
    %10 = arith.addf %4, %9 : vector<256x128xf32>
    %c0_11 = arith.constant 0 : index
    %c2 = arith.constant 2 : index
    %c0_12 = arith.constant 0 : index
    %11 = vector.load %arg1[%c0_11, %c2, %c0_12] : memref<16x18x384xf32, #tpu.memory_space<vmem>>, vector<16x16x384xf32>
    %12 = vector.shape_cast %11 : vector<16x16x384xf32> to vector<256x384xf32>
    %c2_13 = arith.constant 2 : index
    %c0_14 = arith.constant 0 : index
    %c0_15 = arith.constant 0 : index
    %13 = vector.load %arg2[%c2_13, %c0_14, %c0_15] : memref<3x384x128xf32, #tpu.memory_space<vmem>>, vector<1x384x128xf32>
    %14 = vector.shape_cast %13 : vector<1x384x128xf32> to vector<384x128xf32>
    %cst_16 = arith.constant dense<0.000000e+00> : vector<256x128xf32>
    %15 = tpu.matmul %12, %14, %cst_16 {dimension_numbers = #tpu.dot_dimension_numbers<[1], [0], [0], [1], [0, 0, 1, 1], [], []>} : vector<256x384xf32>, vector<384x128xf32>, vector<256x128xf32> -> vector<256x128xf32>
    %16 = arith.addf %10, %15 : vector<256x128xf32>
    %c0_17 = arith.constant 0 : index
    %c0_18 = arith.constant 0 : index
    %17 = vector.load %arg3[%c0_17, %c0_18] : memref<1x128xf32, #tpu.memory_space<vmem>>, vector<1x128xf32>
    %18 = vector.broadcast %17 : vector<1x128xf32> to vector<256x128xf32>
    %19 = arith.addf %16, %18 : vector<256x128xf32>
    %c0_19 = arith.constant 0 : index
    %c0_20 = arith.constant 0 : index
    %20 = vector.load %arg4[%c0_19, %c0_20] : memref<256x128xf32, #tpu.memory_space<vmem>>, vector<256x128xf32>
    %21 = arith.addf %19, %20 : vector<256x128xf32>
    %cst_21 = arith.constant 0.000000e+00 : f32
    %22 = vector.broadcast %cst_21 : f32 to vector<256x128xf32>
    %23 = arith.maximumf %21, %22 : vector<256x128xf32>
    %c0_22 = arith.constant 0 : index
    %c0_23 = arith.constant 0 : index
    %24 = vector.load %arg5[%c0_22, %c0_23] : memref<256x128xf32, #tpu.memory_space<vmem>>, vector<256x128xf32>
    tpu.vector_store %arg5[%c0_22, %c0_23], %23 {strides = array<i32>} : memref<256x128xf32, #tpu.memory_space<vmem>>, vector<256x128xf32>,
    return
  }
  func.func @transform_0(%arg0: i32) -> (i32, i32, i32) {
    %c0_i32 = arith.constant 0 : i32
    %c0_i32_0 = arith.constant 0 : i32
    %c0_i32_1 = arith.constant 0 : i32
    return %arg0, %c0_i32, %c0_i32_0 : i32, i32, i32
  }
  func.func @transform_1(%arg0: i32) -> (i32, i32, i32) {
    %c0_i32 = arith.constant 0 : i32
    %c0_i32_0 = arith.constant 0 : i32
    %c0_i32_1 = arith.constant 0 : i32
    %c0_i32_2 = arith.constant 0 : i32
    return %c0_i32, %c0_i32_0, %c0_i32_1 : i32, i32, i32
  }
  func.func @transform_2(%arg0: i32) -> (i32, i32) {
    %c0_i32 = arith.constant 0 : i32
    %c0_i32_0 = arith.constant 0 : i32
    %c0_i32_1 = arith.constant 0 : i32
    return %c0_i32, %c0_i32_0 : i32, i32
  }
  func.func @transform_3(%arg0: i32) -> (i32, i32) {
    %c0_i32 = arith.constant 0 : i32
    %c0_i32_0 = arith.constant 0 : i32
    return %arg0, %c0_i32 : i32, i32
  }
  func.func @transform_4(%arg0: i32) -> (i32, i32) {
    %c0_i32 = arith.constant 0 : i32
    %c0_i32_0 = arith.constant 0 : i32
    return %arg0, %c0_i32 : i32, i32
  }
}

module attributes {stable_mosaic.version = 11 : i64} {
  func.func @kernel(%arg0: i32, %arg1: memref<256x4xf32, #tpu.memory_space<vmem>>, %arg2: memref<4x128xf32, #tpu.memory_space<vmem>>, %arg3: memref<1x128xf32, #tpu.memory_space<vmem>>, %arg4: memref<256x128xf32, #tpu.memory_space<vmem>>) attributes {dimension_semantics = [#tpu.dimension_semantics<parallel>], iteration_bounds = array<i64: 2>, scalar_prefetch = 0 : i64, scratch_operands = 0 : i64, tpu.core_type = #tpu.core_type<tc>, window_params = [{transform_indices = @transform_0, window_bounds = array<i64: 256, 4>}, {pipeline_mode = #tpu.pipeline_mode<synchronous>, transform_indices = @transform_1, window_bounds = array<i64: 4, 128>}, {pipeline_mode = #tpu.pipeline_mode<synchronous>, transform_indices = @transform_2, window_bounds = array<i64: 1, 128>}, {transform_indices = @transform_3, window_bounds = array<i64: 256, 128>}]} {
    %c0 = arith.constant 0 : index
    %c0_0 = arith.constant 0 : index
    %0 = vector.load %arg1[%c0, %c0_0] : memref<256x4xf32, #tpu.memory_space<vmem>>, vector<256x4xf32>
    %c0_1 = arith.constant 0 : index
    %c0_2 = arith.constant 0 : index
    %1 = vector.load %arg2[%c0_1, %c0_2] : memref<4x128xf32, #tpu.memory_space<vmem>>, vector<4x128xf32>
    %cst = arith.constant dense<0.000000e+00> : vector<256x128xf32>
    %2 = tpu.matmul %0, %1, %cst {dimension_numbers = #tpu.dot_dimension_numbers<[1], [0], [0], [1], [0, 0, 1, 1], [], []>} : vector<256x4xf32>, vector<4x128xf32>, vector<256x128xf32> -> vector<256x128xf32>
    %c0_3 = arith.constant 0 : index
    %c0_4 = arith.constant 0 : index
    %3 = vector.load %arg3[%c0_3, %c0_4] : memref<1x128xf32, #tpu.memory_space<vmem>>, vector<1x128xf32>
    %4 = vector.broadcast %3 : vector<1x128xf32> to vector<256x128xf32>
    %5 = arith.addf %2, %4 : vector<256x128xf32>
    %c0_5 = arith.constant 0 : index
    %c0_6 = arith.constant 0 : index
    %6 = vector.load %arg4[%c0_5, %c0_6] : memref<256x128xf32, #tpu.memory_space<vmem>>, vector<256x128xf32>
    tpu.vector_store %arg4[%c0_5, %c0_6], %5 {strides = array<i32>} : memref<256x128xf32, #tpu.memory_space<vmem>>, vector<256x128xf32>,
    return
  }
  func.func @transform_0(%arg0: i32) -> (i32, i32) {
    %c0_i32 = arith.constant 0 : i32
    %c0_i32_0 = arith.constant 0 : i32
    return %arg0, %c0_i32 : i32, i32
  }
  func.func @transform_1(%arg0: i32) -> (i32, i32) {
    %c0_i32 = arith.constant 0 : i32
    %c0_i32_0 = arith.constant 0 : i32
    %c0_i32_1 = arith.constant 0 : i32
    return %c0_i32, %c0_i32_0 : i32, i32
  }
  func.func @transform_2(%arg0: i32) -> (i32, i32) {
    %c0_i32 = arith.constant 0 : i32
    %c0_i32_0 = arith.constant 0 : i32
    %c0_i32_1 = arith.constant 0 : i32
    return %c0_i32, %c0_i32_0 : i32, i32
  }
  func.func @transform_3(%arg0: i32) -> (i32, i32) {
    %c0_i32 = arith.constant 0 : i32
    %c0_i32_0 = arith.constant 0 : i32
    return %arg0, %c0_i32 : i32, i32
  }
}

module attributes {stable_mosaic.version = 11 : i64} {
  func.func @kernel(%arg0: i32, %arg1: memref<256x128xf32, #tpu.memory_space<vmem>>, %arg2: memref<128x128xf32, #tpu.memory_space<vmem>>, %arg3: memref<1x128xf32, #tpu.memory_space<vmem>>, %arg4: memref<256x128xf32, #tpu.memory_space<vmem>>) attributes {dimension_semantics = [#tpu.dimension_semantics<parallel>], iteration_bounds = array<i64: 2>, scalar_prefetch = 0 : i64, scratch_operands = 0 : i64, tpu.core_type = #tpu.core_type<tc>, window_params = [{transform_indices = @transform_0, window_bounds = array<i64: 256, 128>}, {pipeline_mode = #tpu.pipeline_mode<synchronous>, transform_indices = @transform_1, window_bounds = array<i64: 128, 128>}, {pipeline_mode = #tpu.pipeline_mode<synchronous>, transform_indices = @transform_2, window_bounds = array<i64: 1, 128>}, {transform_indices = @transform_3, window_bounds = array<i64: 256, 128>}]} {
    %c0 = arith.constant 0 : index
    %c0_0 = arith.constant 0 : index
    %0 = vector.load %arg1[%c0, %c0_0] : memref<256x128xf32, #tpu.memory_space<vmem>>, vector<256x128xf32>
    %c0_1 = arith.constant 0 : index
    %c0_2 = arith.constant 0 : index
    %1 = vector.load %arg2[%c0_1, %c0_2] : memref<128x128xf32, #tpu.memory_space<vmem>>, vector<128x128xf32>
    %cst = arith.constant dense<0.000000e+00> : vector<256x128xf32>
    %2 = tpu.matmul %0, %1, %cst {dimension_numbers = #tpu.dot_dimension_numbers<[1], [0], [0], [1], [0, 0, 1, 1], [], []>} : vector<256x128xf32>, vector<128x128xf32>, vector<256x128xf32> -> vector<256x128xf32>
    %c0_3 = arith.constant 0 : index
    %c0_4 = arith.constant 0 : index
    %3 = vector.load %arg3[%c0_3, %c0_4] : memref<1x128xf32, #tpu.memory_space<vmem>>, vector<1x128xf32>
    %4 = vector.broadcast %3 : vector<1x128xf32> to vector<256x128xf32>
    %5 = arith.addf %2, %4 : vector<256x128xf32>
    %cst_5 = arith.constant 0.000000e+00 : f32
    %6 = vector.broadcast %cst_5 : f32 to vector<256x128xf32>
    %7 = arith.maximumf %5, %6 : vector<256x128xf32>
    %c0_6 = arith.constant 0 : index
    %c0_7 = arith.constant 0 : index
    %8 = vector.load %arg4[%c0_6, %c0_7] : memref<256x128xf32, #tpu.memory_space<vmem>>, vector<256x128xf32>
    tpu.vector_store %arg4[%c0_6, %c0_7], %7 {strides = array<i32>} : memref<256x128xf32, #tpu.memory_space<vmem>>, vector<256x128xf32>,
    return
  }
  func.func @transform_0(%arg0: i32) -> (i32, i32) {
    %c0_i32 = arith.constant 0 : i32
    %c0_i32_0 = arith.constant 0 : i32
    return %arg0, %c0_i32 : i32, i32
  }
  func.func @transform_1(%arg0: i32) -> (i32, i32) {
    %c0_i32 = arith.constant 0 : i32
    %c0_i32_0 = arith.constant 0 : i32
    %c0_i32_1 = arith.constant 0 : i32
    return %c0_i32, %c0_i32_0 : i32, i32
  }
  func.func @transform_2(%arg0: i32) -> (i32, i32) {
    %c0_i32 = arith.constant 0 : i32
    %c0_i32_0 = arith.constant 0 : i32
    %c0_i32_1 = arith.constant 0 : i32
    return %c0_i32, %c0_i32_0 : i32, i32
  }
  func.func @transform_3(%arg0: i32) -> (i32, i32) {
    %c0_i32 = arith.constant 0 : i32
    %c0_i32_0 = arith.constant 0 : i32
    return %arg0, %c0_i32 : i32, i32
  }
}

module attributes {stable_mosaic.version = 11 : i64} {
  func.func @kernel(%arg0: i32, %arg1: memref<16x18x384xf32, #tpu.memory_space<vmem>>, %arg2: memref<3x384x128xf32, #tpu.memory_space<vmem>>, %arg3: memref<1x128xf32, #tpu.memory_space<vmem>>, %arg4: memref<128x128xf32, #tpu.memory_space<vmem>>, %arg5: memref<1x128xf32, #tpu.memory_space<vmem>>, %arg6: memref<256x128xf32, #tpu.memory_space<vmem>>, %arg7: memref<256x128xf32, #tpu.memory_space<vmem>>) attributes {dimension_semantics = [#tpu.dimension_semantics<parallel>], iteration_bounds = array<i64: 2>, scalar_prefetch = 0 : i64, scratch_operands = 0 : i64, tpu.core_type = #tpu.core_type<tc>, window_params = [{transform_indices = @transform_0, window_bounds = array<i64: 16, 18, 384>}, {pipeline_mode = #tpu.pipeline_mode<synchronous>, transform_indices = @transform_1, window_bounds = array<i64: 3, 384, 128>}, {pipeline_mode = #tpu.pipeline_mode<synchronous>, transform_indices = @transform_2, window_bounds = array<i64: 1, 128>}, {pipeline_mode = #tpu.pipeline_mode<synchronous>, transform_indices = @transform_3, window_bounds = array<i64: 128, 128>}, {pipeline_mode = #tpu.pipeline_mode<synchronous>, transform_indices = @transform_4, window_bounds = array<i64: 1, 128>}, {transform_indices = @transform_5, window_bounds = array<i64: 256, 128>}, {transform_indices = @transform_6, window_bounds = array<i64: 256, 128>}]} {
    %c0 = arith.constant 0 : index
    %c0_0 = arith.constant 0 : index
    %c0_1 = arith.constant 0 : index
    %0 = vector.load %arg1[%c0, %c0_0, %c0_1] : memref<16x18x384xf32, #tpu.memory_space<vmem>>, vector<16x16x384xf32>
    %1 = vector.shape_cast %0 : vector<16x16x384xf32> to vector<256x384xf32>
    %c0_2 = arith.constant 0 : index
    %c0_3 = arith.constant 0 : index
    %c0_4 = arith.constant 0 : index
    %2 = vector.load %arg2[%c0_2, %c0_3, %c0_4] : memref<3x384x128xf32, #tpu.memory_space<vmem>>, vector<1x384x128xf32>
    %3 = vector.shape_cast %2 : vector<1x384x128xf32> to vector<384x128xf32>
    %cst = arith.constant dense<0.000000e+00> : vector<256x128xf32>
    %4 = tpu.matmul %1, %3, %cst {dimension_numbers = #tpu.dot_dimension_numbers<[1], [0], [0], [1], [0, 0, 1, 1], [], []>} : vector<256x384xf32>, vector<384x128xf32>, vector<256x128xf32> -> vector<256x128xf32>
    %c0_5 = arith.constant 0 : index
    %c1 = arith.constant 1 : index
    %c0_6 = arith.constant 0 : index
    %5 = vector.load %arg1[%c0_5, %c1, %c0_6] : memref<16x18x384xf32, #tpu.memory_space<vmem>>, vector<16x16x384xf32>
    %6 = vector.shape_cast %5 : vector<16x16x384xf32> to vector<256x384xf32>
    %c1_7 = arith.constant 1 : index
    %c0_8 = arith.constant 0 : index
    %c0_9 = arith.constant 0 : index
    %7 = vector.load %arg2[%c1_7, %c0_8, %c0_9] : memref<3x384x128xf32, #tpu.memory_space<vmem>>, vector<1x384x128xf32>
    %8 = vector.shape_cast %7 : vector<1x384x128xf32> to vector<384x128xf32>
    %cst_10 = arith.constant dense<0.000000e+00> : vector<256x128xf32>
    %9 = tpu.matmul %6, %8, %cst_10 {dimension_numbers = #tpu.dot_dimension_numbers<[1], [0], [0], [1], [0, 0, 1, 1], [], []>} : vector<256x384xf32>, vector<384x128xf32>, vector<256x128xf32> -> vector<256x128xf32>
    %10 = arith.addf %4, %9 : vector<256x128xf32>
    %c0_11 = arith.constant 0 : index
    %c2 = arith.constant 2 : index
    %c0_12 = arith.constant 0 : index
    %11 = vector.load %arg1[%c0_11, %c2, %c0_12] : memref<16x18x384xf32, #tpu.memory_space<vmem>>, vector<16x16x384xf32>
    %12 = vector.shape_cast %11 : vector<16x16x384xf32> to vector<256x384xf32>
    %c2_13 = arith.constant 2 : index
    %c0_14 = arith.constant 0 : index
    %c0_15 = arith.constant 0 : index
    %13 = vector.load %arg2[%c2_13, %c0_14, %c0_15] : memref<3x384x128xf32, #tpu.memory_space<vmem>>, vector<1x384x128xf32>
    %14 = vector.shape_cast %13 : vector<1x384x128xf32> to vector<384x128xf32>
    %cst_16 = arith.constant dense<0.000000e+00> : vector<256x128xf32>
    %15 = tpu.matmul %12, %14, %cst_16 {dimension_numbers = #tpu.dot_dimension_numbers<[1], [0], [0], [1], [0, 0, 1, 1], [], []>} : vector<256x384xf32>, vector<384x128xf32>, vector<256x128xf32> -> vector<256x128xf32>
    %16 = arith.addf %10, %15 : vector<256x128xf32>
    %c0_17 = arith.constant 0 : index
    %c0_18 = arith.constant 0 : index
    %17 = vector.load %arg3[%c0_17, %c0_18] : memref<1x128xf32, #tpu.memory_space<vmem>>, vector<1x128xf32>
    %18 = vector.broadcast %17 : vector<1x128xf32> to vector<256x128xf32>
    %19 = arith.addf %16, %18 : vector<256x128xf32>
    %cst_19 = arith.constant 0.000000e+00 : f32
    %20 = vector.broadcast %cst_19 : f32 to vector<256x128xf32>
    %21 = arith.maximumf %19, %20 : vector<256x128xf32>
    %c0_20 = arith.constant 0 : index
    %c0_21 = arith.constant 0 : index
    %22 = vector.load %arg4[%c0_20, %c0_21] : memref<128x128xf32, #tpu.memory_space<vmem>>, vector<128x128xf32>
    %cst_22 = arith.constant dense<0.000000e+00> : vector<256x128xf32>
    %23 = tpu.matmul %21, %22, %cst_22 {dimension_numbers = #tpu.dot_dimension_numbers<[1], [0], [0], [1], [0, 0, 1, 1], [], []>} : vector<256x128xf32>, vector<128x128xf32>, vector<256x128xf32> -> vector<256x128xf32>
    %c0_23 = arith.constant 0 : index
    %c0_24 = arith.constant 0 : index
    %24 = vector.load %arg5[%c0_23, %c0_24] : memref<1x128xf32, #tpu.memory_space<vmem>>, vector<1x128xf32>
    %25 = vector.broadcast %24 : vector<1x128xf32> to vector<256x128xf32>
    %26 = arith.addf %23, %25 : vector<256x128xf32>
    %c0_25 = arith.constant 0 : index
    %c0_26 = arith.constant 0 : index
    %27 = vector.load %arg6[%c0_25, %c0_26] : memref<256x128xf32, #tpu.memory_space<vmem>>, vector<256x128xf32>
    %28 = arith.addf %26, %27 : vector<256x128xf32>
    %cst_27 = arith.constant 0.000000e+00 : f32
    %29 = vector.broadcast %cst_27 : f32 to vector<256x128xf32>
    %30 = arith.maximumf %28, %29 : vector<256x128xf32>
    %c0_28 = arith.constant 0 : index
    %c0_29 = arith.constant 0 : index
    %31 = vector.load %arg7[%c0_28, %c0_29] : memref<256x128xf32, #tpu.memory_space<vmem>>, vector<256x128xf32>
    tpu.vector_store %arg7[%c0_28, %c0_29], %30 {strides = array<i32>} : memref<256x128xf32, #tpu.memory_space<vmem>>, vector<256x128xf32>,
    return
  }
  func.func @transform_0(%arg0: i32) -> (i32, i32, i32) {
    %c0_i32 = arith.constant 0 : i32
    %c0_i32_0 = arith.constant 0 : i32
    %c0_i32_1 = arith.constant 0 : i32
    return %arg0, %c0_i32, %c0_i32_0 : i32, i32, i32
  }
  func.func @transform_1(%arg0: i32) -> (i32, i32, i32) {
    %c0_i32 = arith.constant 0 : i32
    %c0_i32_0 = arith.constant 0 : i32
    %c0_i32_1 = arith.constant 0 : i32
    %c0_i32_2 = arith.constant 0 : i32
    return %c0_i32, %c0_i32_0, %c0_i32_1 : i32, i32, i32
  }
  func.func @transform_2(%arg0: i32) -> (i32, i32) {
    %c0_i32 = arith.constant 0 : i32
    %c0_i32_0 = arith.constant 0 : i32
    %c0_i32_1 = arith.constant 0 : i32
    return %c0_i32, %c0_i32_0 : i32, i32
  }
  func.func @transform_3(%arg0: i32) -> (i32, i32) {
    %c0_i32 = arith.constant 0 : i32
    %c0_i32_0 = arith.constant 0 : i32
    %c0_i32_1 = arith.constant 0 : i32
    return %c0_i32, %c0_i32_0 : i32, i32
  }
  func.func @transform_4(%arg0: i32) -> (i32, i32) {
    %c0_i32 = arith.constant 0 : i32
    %c0_i32_0 = arith.constant 0 : i32
    %c0_i32_1 = arith.constant 0 : i32
    return %c0_i32, %c0_i32_0 : i32, i32
  }
  func.func @transform_5(%arg0: i32) -> (i32, i32) {
    %c0_i32 = arith.constant 0 : i32
    %c0_i32_0 = arith.constant 0 : i32
    return %arg0, %c0_i32 : i32, i32
  }
  func.func @transform_6(%arg0: i32) -> (i32, i32) {
    %c0_i32 = arith.constant 0 : i32
    %c0_i32_0 = arith.constant 0 : i32
    return %arg0, %c0_i32 : i32, i32
  }
}

</mosaic_0001>

<bundles_post_ra>
// kernel: residual_forward.7
= control target key start
LH: loop header
LB: loop body
LE: loop exit
PB: predicated region body
PF: predicated region fallthrough
CT: control target
= control target key end

     0   :  { %s1860_s12 = smov 0   ;;  %s2250_s0 = inlined_call_operand.vmem [shape: f32[32,18,12], index: 0, kind: input, shape index: {}]   ;;  %s2251_s1 = inlined_call_operand.vmem [shape: f32[3,12,128], index: 1, kind: input, shape index: {}]   ;;  %s2252_s2 = inlined_call_operand.vmem [shape: f32[1,128], index: 2, kind: input, shape index: {}]   ;;  %s2253_s3 = inlined_call_operand.vmem [shape: f32[512,128], index: 3, kind: output, shape index: {}]  }
   0x1 LB: > { %s1446_s13 = sadd.s32 4294967295, %s1838_s12   ;;  %p1450_p0 = scmp.ge.s32.totalorder %s1838_s12, 1  ;;  %s1838_s12 = sphi %s1860_s12, %s13_s12  }
   0x2   : > { %p139_p1 = scmp.lt.s32.totalorder %s1838_s12, 3 }
   0x4   : > { %p140_p2 = pnand %p1450_p0, %p139_p1 }
   0x5   : > { %s1451_s18 = sshll.u32 (!%p140_p2), %s1446_s13, 4  ;;  %s1453_s4 = sshll.u32 (!%p140_p2), %s1446_s13, 5 }
   0x6   : > { %143 = sbr.rel (%p140_p2) target bundleno = 315 (0x13b), region = 32  ;;  %p165_p3 = scmp.lt.s32.totalorder (!%p140_p2), %s1451_s18, 31 }
   0x7   : > { %p172_p4 = scmp.lt.s32.totalorder (!%p140_p2), %s1453_s4, 63 }
   0xb   : > { %v1456_v0 = vld [vmem:[%s2251_s1 + $0x18] sm:$0xf]  ;;  %vm343_vm0 = vcmask 1043456   ;;  %v1455_v1 = vld [vmem:[%s2251_s1 + $0x10] sm:$0xff]  ;;  %v210_v2 = vld [vmem:[%s2251_s1 + $0x8] sm:$0xf] }
   0xc   : > { %1819 = vmatprep.subr.msk.mxu1 %vm343_vm0, %v1456_v0  ;;  %1663 = vmatprep.subr.msk.mxu0 %vm343_vm0, %v1456_v0  ;;  %v1524_v3 = vld [vmem:[%s2251_s1 + $0x28] sm:$0xf]  ;;  %s2255_s18 = smov (!%p165_p3, %s1451_s18), 31  ;;  %vm246_vm1 = vcmask 97280   ;;  %v209_v10 = vld [vmem:[%s2251_s1] sm:$0xff]  ;;  %s2257_s4 = smov (!%p172_p4, %s1453_s4), 63 }
   0xd   : > { %1821 = vmatpush3.msk.msra.mxu1 %vm343_vm0, %v1456_v0  ;;  %1664 = vmatpush3.msk.msra.mxu0 %vm343_vm0, %v1456_v0  ;;  %s1823_s23 = smul.u32 24, %s2255_s18  ;;  %v1523_v11 = vld [vmem:[%s2251_s1 + $0x20] sm:$0xff]  ;;  %s1454_s7 = sshll.u32 %s2257_s4, 3 }
   0xe   : > { %1820 = vmatprep.subr.mxu1 %v1455_v1  ;;  %1665 = vmatprep.subr.mxu0 %v1455_v1  ;;  %s2156_s10 = scalar_lea.vmem %s2253_s3, %s1454_s7 }
   0xf   : > { %1822 = vmatpush3.msra.mxu1 %v1455_v1  ;;  %1666 = vmatpush3.msra.mxu0 %v1455_v1  ;;  %s1891_s26 = scalar_lea.vmem %s2250_s0, %s1823_s23 }
  0x10   : > { %1715 = vmatprep.subr.msk.mxu1 %vm343_vm0, %v210_v2  ;;  %1767 = vmatprep.subr.msk.mxu0 %vm343_vm0, %v1524_v3  ;;  %v211_v4 = vld [vmem:[%s1891_s26 + $0x1] sm:$0xff]  ;;  %v212_v6 = vld [vmem:[%s1891_s26 + $0x9] sm:$0xff]  ;;  %v213_v8 = vld [vmem:[%s1891_s26 + $0x19] sm:$0xff] }
  0x11   : > { %v227_v5 = vld [vmem:[%s1891_s26 + $0xc1] sm:$0xff]  ;;  %1667 = vmatprep.mubr.msk.f32.mxu0 %vm246_vm1, %v211_v4  ;;  %v228_v7 = vld [vmem:[%s1891_s26 + $0xc9] sm:$0xff]  ;;  %v229_v9 = vld [vmem:[%s1891_s26 + $0xd9] sm:$0xff] }
  0x12   : > { %1691 = vmatprep.mubr.msk.f32.mxu1 %vm246_vm1, %v227_v5  ;;  %1668 = vmatmul.mubr.msk.f32.vlgmr.msra.gmra.mxu0 %vm246_vm1, %v212_v6  ;;  %v214_v12 = vld [vmem:[%s1891_s26 + $0x21] sm:$0xff]  ;;  %v215_v14 = vld [vmem:[%s1891_s26 + $0x31] sm:$0xff]  ;;  %v216_v16 = vld [vmem:[%s1891_s26 + $0x39] sm:$0xff] }
  0x13   : > { %1692 = vmatmul.mubr.msk.f32.vlgmr.msra.gmra.mxu1 %vm246_vm1, %v228_v7  ;;  %1768 = vmatpush3.msk.msra.mxu0 %vm343_vm0, %v1524_v3  ;;  %v230_v13 = vld [vmem:[%s1891_s26 + $0xe1] sm:$0xff]  ;;  %v231_v15 = vld [vmem:[%s1891_s26 + $0xf1] sm:$0xff]  ;;  %v232_v17 = vld [vmem:[%s1891_s26 + $0xf9] sm:$0xff] }
  0x14   : > { %1716 = vmatpush3.msk.msra.mxu1 %vm343_vm0, %v210_v2  ;;  %1670 = vmatprep.mubr.msk.f32.mxu0 %vm246_vm1, %v213_v8  ;;  %v217_v18 = vld [vmem:[%s1891_s26 + $0x49] sm:$0xff]  ;;  %v218_v20 = vld [vmem:[%s1891_s26 + $0x51] sm:$0xff]  ;;  %v219_v22 = vld [vmem:[%s1891_s26 + $0x61] sm:$0xff] }
  0x15   : > { %1694 = vmatprep.mubr.msk.f32.mxu1 %vm246_vm1, %v229_v9  ;;  %1717 = vmatprep.subr.mxu1 %v209_v10  ;;  %v233_v19 = vld [vmem:[%s1891_s26 + $0x109] sm:$0xff]  ;;  %v234_v21 = vld [vmem:[%s1891_s26 + $0x111] sm:$0xff]  ;;  %v235_v23 = vld [vmem:[%s1891_s26 + $0x121] sm:$0xff] }
  0x16   : > { %1769 = vmatprep.subr.mxu0 %v1523_v11  ;;  %1671 = vmatmul.mubr.msk.f32.gmra.mxu0 %vm246_vm1, %v214_v12  ;;  %v220_v24 = vld [vmem:[%s1891_s26 + $0x69] sm:$0xff]  ;;  %v221_v26 = vld [vmem:[%s1891_s26 + $0x79] sm:$0xff]  ;;  %v222_v28 = vld [vmem:[%s1891_s26 + $0x81] sm:$0xff] }
  0x17   : > { %1695 = vmatmul.mubr.msk.f32.gmra.mxu1 %vm246_vm1, %v230_v13  ;;  %1673 = vmatprep.mubr.msk.f32.mxu0 %vm246_vm1, %v215_v14  ;;  %v236_v25 = vld [vmem:[%s1891_s26 + $0x129] sm:$0xff]  ;;  %v237_v27 = vld [vmem:[%s1891_s26 + $0x139] sm:$0xff]  ;;  %v238_v29 = vld [vmem:[%s1891_s26 + $0x141] sm:$0xff] }
  0x18   : > { %1697 = vmatprep.mubr.msk.f32.mxu1 %vm246_vm1, %v231_v15  ;;  %1718 = vmatpush3.msra.mxu1 %v209_v10  ;;  %v223_v30 = vld [vmem:[%s1891_s26 + $0x91] sm:$0xff]  ;;  %v224_v32 = vld [vmem:[%s1891_s26 + $0x99] sm:$0xff]  ;;  %v225_v34 = vld [vmem:[%s1891_s26 + $0xa9] sm:$0xff] }
  0x19   : > { %1770 = vmatpush3.msra.mxu0 %v1523_v11  ;;  %v239_v31 = vld [vmem:[%s1891_s26 + $0x151] sm:$0xff]  ;;  %v240_v33 = vld [vmem:[%s1891_s26 + $0x159] sm:$0xff]  ;;  %v241_v35 = vld [vmem:[%s1891_s26 + $0x169] sm:$0xff] }
  0x1a   : > { %1674 = vmatmul.mubr.msk.f32.gmra.mxu0 %vm246_vm1, %v216_v16  ;;  %v226_v36 = vld [vmem:[%s1891_s26 + $0xb1] sm:$0xff]  ;;  %v177_v38 = vld [vmem:[%s1891_s26] sm:$0xff]  ;;  %v178_v40 = vld [vmem:[%s1891_s26 + $0x8] sm:$0xff] }
  0x1b   : > { %1698 = vmatmul.mubr.msk.f32.gmra.mxu1 %vm246_vm1, %v232_v17  ;;  %1676 = vmatprep.mubr.msk.f32.mxu0 %vm246_vm1, %v217_v18  ;;  %v242_v37 = vld [vmem:[%s1891_s26 + $0x171] sm:$0xff]  ;;  %v896_v39 = vld [vmem:[%s1891_s26 + $0x2] sm:$0xff]  ;;  %v898_v43 = vld [vmem:[%s1891_s26 + $0x1a] sm:$0xff] }
  0x1c   : > { %1700 = vmatprep.mubr.msk.f32.mxu1 %vm246_vm1, %v233_v19  ;;  %v897_v41 = vld [vmem:[%s1891_s26 + $0xa] sm:$0xff]  ;;  %v179_v42 = vld [vmem:[%s1891_s26 + $0x18] sm:$0xff]  ;;  %v180_v44 = vld [vmem:[%s1891_s26 + $0x20] sm:$0xff] }
  0x1d   : > { %v899_v45 = vld [vmem:[%s1891_s26 + $0x22] sm:$0xff]  ;;  %v181_v46 = vld [vmem:[%s1891_s26 + $0x30] sm:$0xff]  ;;  %v182_v48 = vld [vmem:[%s1891_s26 + $0x38] sm:$0xff] }
  0x1e   : > { %1677 = vmatmul.mubr.msk.f32.gmra.mxu0 %vm246_vm1, %v218_v20  ;;  %v900_v47 = vld [vmem:[%s1891_s26 + $0x32] sm:$0xff]  ;;  %v901_v49 = vld [vmem:[%s1891_s26 + $0x3a] sm:$0xff]  ;;  %v183_v50 = vld [vmem:[%s1891_s26 + $0x48] sm:$0xff] }
  0x1f   : > { %1701 = vmatmul.mubr.msk.f32.gmra.mxu1 %vm246_vm1, %v234_v21  ;;  %1679 = vmatprep.mubr.msk.f32.mxu0 %vm246_vm1, %v219_v22  ;;  %v902_v51 = vld [vmem:[%s1891_s26 + $0x4a] sm:$0xff]  ;;  %v903_v53 = vld [vmem:[%s1891_s26 + $0x52] sm:$0xff]  ;;  %v185_v54 = vld [vmem:[%s1891_s26 + $0x60] sm:$0xff] }
  0x20   : > { %1703 = vmatprep.mubr.msk.f32.mxu1 %vm246_vm1, %v235_v23  ;;  %v184_v52 = vld [vmem:[%s1891_s26 + $0x50] sm:$0xff]  ;;  %v904_v55 = vld [vmem:[%s1891_s26 + $0x62] sm:$0xff]  ;;  %v187_v58 = vld [vmem:[%s1891_s26 + $0x78] sm:$0xff] }
  0x21   : > { %v186_v56 = vld [vmem:[%s1891_s26 + $0x68] sm:$0xff]  ;;  %v906_v59 = vld [vmem:[%s1891_s26 + $0x7a] sm:$0xff]  ;;  %v189_v62 = vld [vmem:[%s1891_s26 + $0x90] sm:$0xff] }
  0x22   : > { %1680 = vmatmul.mubr.msk.f32.gmra.mxu0 %vm246_vm1, %v220_v24  ;;  %v905_v57 = vld [vmem:[%s1891_s26 + $0x6a] sm:$0xff]  ;;  %v188_v60 = vld [vmem:[%s1891_s26 + $0x80] sm:$0xff]  ;;  %v908_v63 = vld [vmem:[%s1891_s26 + $0x92] sm:$0xff] }
  0x23   : > { %1704 = vmatmul.mubr.msk.f32.gmra.mxu1 %vm246_vm1, %v236_v25  ;;  %1682 = vmatprep.mubr.msk.f32.mxu0 %vm246_vm1, %v221_v26  ;;  %v907_v61 = vld [vmem:[%s1891_s26 + $0x82] sm:$0xff]  ;;  %v190_v0 = vld [vmem:[%s1891_s26 + $0x98] sm:$0xff]  ;;  %v910_v3 = vld [vmem:[%s1891_s26 + $0xaa] sm:$0xff] }
  0x24   : > { %1706 = vmatprep.mubr.msk.f32.mxu1 %vm246_vm1, %v237_v27  ;;  %v909_v1 = vld [vmem:[%s1891_s26 + $0x9a] sm:$0xff]  ;;  %v191_v2 = vld [vmem:[%s1891_s26 + $0xa8] sm:$0xff]  ;;  %v192_v4 = vld [vmem:[%s1891_s26 + $0xb0] sm:$0xff] }
  0x25   : > { %v911_v5 = vld [vmem:[%s1891_s26 + $0xb2] sm:$0xff]  ;;  %v193_v6 = vld [vmem:[%s1891_s26 + $0xc0] sm:$0xff]  ;;  %v194_v8 = vld [vmem:[%s1891_s26 + $0xc8] sm:$0xff] }
  0x26   : > { %1683 = vmatmul.mubr.msk.f32.gmra.mxu0 %vm246_vm1, %v222_v28  ;;  %v912_v7 = vld [vmem:[%s1891_s26 + $0xc2] sm:$0xff]  ;;  %v913_v9 = vld [vmem:[%s1891_s26 + $0xca] sm:$0xff]  ;;  %v195_v10 = vld [vmem:[%s1891_s26 + $0xd8] sm:$0xff] }
  0x27   : > { %1707 = vmatmul.mubr.msk.f32.gmra.mxu1 %vm246_vm1, %v238_v29  ;;  %1685 = vmatprep.mubr.msk.f32.mxu0 %vm246_vm1, %v223_v30  ;;  %v914_v11 = vld [vmem:[%s1891_s26 + $0xda] sm:$0xff]  ;;  %v915_v13 = vld [vmem:[%s1891_s26 + $0xe2] sm:$0xff]  ;;  %v197_v14 = vld [vmem:[%s1891_s26 + $0xf0] sm:$0xff] }
  0x28   : > { %1709 = vmatprep.mubr.msk.f32.mxu1 %vm246_vm1, %v239_v31  ;;  %v196_v12 = vld [vmem:[%s1891_s26 + $0xe0] sm:$0xff]  ;;  %v916_v15 = vld [vmem:[%s1891_s26 + $0xf2] sm:$0xff]  ;;  %v199_v18 = vld [vmem:[%s1891_s26 + $0x108] sm:$0xff] }
  0x29   : > { %v198_v16 = vld [vmem:[%s1891_s26 + $0xf8] sm:$0xff]  ;;  %v918_v19 = vld [vmem:[%s1891_s26 + $0x10a] sm:$0xff]  ;;  %v201_v22 = vld [vmem:[%s1891_s26 + $0x120] sm:$0xff] }
  0x2a   : > { %1686 = vmatmul.mubr.msk.f32.gmra.mxu0 %vm246_vm1, %v224_v32  ;;  %v917_v17 = vld [vmem:[%s1891_s26 + $0xfa] sm:$0xff]  ;;  %v200_v20 = vld [vmem:[%s1891_s26 + $0x110] sm:$0xff]  ;;  %v920_v23 = vld [vmem:[%s1891_s26 + $0x122] sm:$0xff] }
  0x2b   : > { %1710 = vmatmul.mubr.msk.f32.gmra.mxu1 %vm246_vm1, %v240_v33  ;;  %1688 = vmatprep.mubr.msk.f32.mxu0 %vm246_vm1, %v225_v34  ;;  %v919_v21 = vld [vmem:[%s1891_s26 + $0x112] sm:$0xff]  ;;  %v202_v24 = vld [vmem:[%s1891_s26 + $0x128] sm:$0xff]  ;;  %v922_v27 = vld [vmem:[%s1891_s26 + $0x13a] sm:$0xff] }
  0x2c   : > { %1712 = vmatprep.mubr.msk.f32.mxu1 %vm246_vm1, %v241_v35  ;;  %v921_v25 = vld [vmem:[%s1891_s26 + $0x12a] sm:$0xff]  ;;  %v203_v26 = vld [vmem:[%s1891_s26 + $0x138] sm:$0xff]  ;;  %v204_v28 = vld [vmem:[%s1891_s26 + $0x140] sm:$0xff] }
  0x2d   : > { %v923_v29 = vld [vmem:[%s1891_s26 + $0x142] sm:$0xff]  ;;  %v205_v30 = vld [vmem:[%s1891_s26 + $0x150] sm:$0xff]  ;;  %v206_v32 = vld [vmem:[%s1891_s26 + $0x158] sm:$0xff] }
  0x2e   : > { %1689 = vmatmul.mubr.msk.f32.gmra.mxu0 %vm246_vm1, %v226_v36  ;;  %v924_v31 = vld [vmem:[%s1891_s26 + $0x152] sm:$0xff]  ;;  %v925_v33 = vld [vmem:[%s1891_s26 + $0x15a] sm:$0xff]  ;;  %v207_v34 = vld [vmem:[%s1891_s26 + $0x168] sm:$0xff] }
  0x2f   : > { %1713 = vmatmul.mubr.msk.f32.gmra.mxu1 %vm246_vm1, %v242_v37  ;;  %1771 = vmatprep.mubr.msk.f32.mxu0 %vm246_vm1, %v896_v39  ;;  %v926_v35 = vld [vmem:[%s1891_s26 + $0x16a] sm:$0xff]  ;;  %v927_v37 = vld [vmem:[%s1891_s26 + $0x172] sm:$0xff] }
  0x30   : > { %1719 = vmatprep.mubr.msk.f32.mxu1 %vm246_vm1, %v177_v38  ;;  %v208_v36 = vld [vmem:[%s1891_s26 + $0x170] sm:$0xff] }
  0x32   : > { %1772 = vmatmul.mubr.msk.f32.vlgmr.msra.gmra.mxu0 %vm246_vm1, %v897_v41 }
  0x33   : > { %1720 = vmatmul.mubr.msk.f32.vlgmr.msra.gmra.mxu1 %vm246_vm1, %v178_v40  ;;  %1774 = vmatprep.mubr.msk.f32.mxu0 %vm246_vm1, %v898_v43 }
  0x34   : > { %1722 = vmatprep.mubr.msk.f32.mxu1 %vm246_vm1, %v179_v42 }
  0x36   : > { %1775 = vmatmul.mubr.msk.f32.gmra.mxu0 %vm246_vm1, %v899_v45 }
  0x37   : > { %1723 = vmatmul.mubr.msk.f32.gmra.mxu1 %vm246_vm1, %v180_v44  ;;  %1777 = vmatprep.mubr.msk.f32.mxu0 %vm246_vm1, %v900_v47 }
  0x38   : > { %1725 = vmatprep.mubr.msk.f32.mxu1 %vm246_vm1, %v181_v46 }
  0x3a   : > { %1778 = vmatmul.mubr.msk.f32.gmra.mxu0 %vm246_vm1, %v901_v49 }
  0x3b   : > { %1726 = vmatmul.mubr.msk.f32.gmra.mxu1 %vm246_vm1, %v182_v48  ;;  %1780 = vmatprep.mubr.msk.f32.mxu0 %vm246_vm1, %v902_v51 }
  0x3c   : > { %1728 = vmatprep.mubr.msk.f32.mxu1 %vm246_vm1, %v183_v50 }
  0x3e   : > { %1781 = vmatmul.mubr.msk.f32.gmra.mxu0 %vm246_vm1, %v903_v53 }
  0x3f   : > { %1729 = vmatmul.mubr.msk.f32.gmra.mxu1 %vm246_vm1, %v184_v52  ;;  %1783 = vmatprep.mubr.msk.f32.mxu0 %vm246_vm1, %v904_v55 }
  0x40   : > { %1731 = vmatprep.mubr.msk.f32.mxu1 %vm246_vm1, %v185_v54 }
  0x42   : > { %1784 = vmatmul.mubr.msk.f32.gmra.mxu0 %vm246_vm1, %v905_v57 }
  0x43   : > { %1732 = vmatmul.mubr.msk.f32.gmra.mxu1 %vm246_vm1, %v186_v56  ;;  %1786 = vmatprep.mubr.msk.f32.mxu0 %vm246_vm1, %v906_v59 }
  0x44   : > { %1734 = vmatprep.mubr.msk.f32.mxu1 %vm246_vm1, %v187_v58 }
  0x46   : > { %1787 = vmatmul.mubr.msk.f32.gmra.mxu0 %vm246_vm1, %v907_v61 }
  0x47   : > { %1735 = vmatmul.mubr.msk.f32.gmra.mxu1 %vm246_vm1, %v188_v60  ;;  %1789 = vmatprep.mubr.msk.f32.mxu0 %vm246_vm1, %v908_v63 }
  0x48   : > { %1737 = vmatprep.mubr.msk.f32.mxu1 %vm246_vm1, %v189_v62 }
  0x4a   : > { %1790 = vmatmul.mubr.msk.f32.gmra.mxu0 %vm246_vm1, %v909_v1 }
  0x4b   : > { %1738 = vmatmul.mubr.msk.f32.gmra.mxu1 %vm246_vm1, %v190_v0  ;;  %1792 = vmatprep.mubr.msk.f32.mxu0 %vm246_vm1, %v910_v3 }
  0x4c   : > { %1740 = vmatprep.mubr.msk.f32.mxu1 %vm246_vm1, %v191_v2 }
  0x4e   : > { %1793 = vmatmul.mubr.msk.f32.gmra.mxu0 %vm246_vm1, %v911_v5 }
  0x4f   : > { %1741 = vmatmul.mubr.msk.f32.gmra.mxu1 %vm246_vm1, %v192_v4  ;;  %1795 = vmatprep.mubr.msk.f32.mxu0 %vm246_vm1, %v912_v7 }
  0x50   : > { %1743 = vmatprep.mubr.msk.f32.mxu1 %vm246_vm1, %v193_v6 }
  0x52   : > { %1796 = vmatmul.mubr.msk.f32.gmra.mxu0 %vm246_vm1, %v913_v9  ;;  %v2150_v9 = vld [vmem:[%s2252_s2] ss:$0 sm:$0xff] }
  0x53   : > { %1744 = vmatmul.mubr.msk.f32.gmra.mxu1 %vm246_vm1, %v194_v8  ;;  %1798 = vmatprep.mubr.msk.f32.mxu0 %vm246_vm1, %v914_v11 }
  0x54   : > { %1746 = vmatprep.mubr.msk.f32.mxu1 %vm246_vm1, %v195_v10 }
  0x56   : > { %1799 = vmatmul.mubr.msk.f32.gmra.mxu0 %vm246_vm1, %v915_v13 }
  0x57   : > { %1747 = vmatmul.mubr.msk.f32.gmra.mxu1 %vm246_vm1, %v196_v12  ;;  %1801 = vmatprep.mubr.msk.f32.mxu0 %vm246_vm1, %v916_v15 }
  0x58   : > { %1749 = vmatprep.mubr.msk.f32.mxu1 %vm246_vm1, %v197_v14 }
  0x5a   : > { %1802 = vmatmul.mubr.msk.f32.gmra.mxu0 %vm246_vm1, %v917_v17 }
  0x5b   : > { %1750 = vmatmul.mubr.msk.f32.gmra.mxu1 %vm246_vm1, %v198_v16  ;;  %1804 = vmatprep.mubr.msk.f32.mxu0 %vm246_vm1, %v918_v19 }
  0x5c   : > { %1752 = vmatprep.mubr.msk.f32.mxu1 %vm246_vm1, %v199_v18 }
  0x5e   : > { %1805 = vmatmul.mubr.msk.f32.gmra.mxu0 %vm246_vm1, %v919_v21 }
  0x5f   : > { %1753 = vmatmul.mubr.msk.f32.gmra.mxu1 %vm246_vm1, %v200_v20  ;;  %1807 = vmatprep.mubr.msk.f32.mxu0 %vm246_vm1, %v920_v23 }
  0x60   : > { %1755 = vmatprep.mubr.msk.f32.mxu1 %vm246_vm1, %v201_v22 }
  0x62   : > { %1808 = vmatmul.mubr.msk.f32.gmra.mxu0 %vm246_vm1, %v921_v25 }
  0x63   : > { %1756 = vmatmul.mubr.msk.f32.gmra.mxu1 %vm246_vm1, %v202_v24  ;;  %1810 = vmatprep.mubr.msk.f32.mxu0 %vm246_vm1, %v922_v27 }
  0x64   : > { %1758 = vmatprep.mubr.msk.f32.mxu1 %vm246_vm1, %v203_v26 }
  0x66   : > { %1811 = vmatmul.mubr.msk.f32.gmra.mxu0 %vm246_vm1, %v923_v29 }
  0x67   : > { %1759 = vmatmul.mubr.msk.f32.gmra.mxu1 %vm246_vm1, %v204_v28  ;;  %1813 = vmatprep.mubr.msk.f32.mxu0 %vm246_vm1, %v924_v31 }
  0x68   : > { %1761 = vmatprep.mubr.msk.f32.mxu1 %vm246_vm1, %v205_v30 }
  0x6a   : > { %1814 = vmatmul.mubr.msk.f32.gmra.mxu0 %vm246_vm1, %v925_v33 }
  0x6b   : > { %1762 = vmatmul.mubr.msk.f32.gmra.mxu1 %vm246_vm1, %v206_v32  ;;  %1816 = vmatprep.mubr.msk.f32.mxu0 %vm246_vm1, %v926_v35 }
  0x6c   : > { %1764 = vmatprep.mubr.msk.f32.mxu1 %vm246_vm1, %v207_v34 }
  0x6e   : > { %1817 = vmatmul.mubr.msk.f32.gmra.mxu0 %vm246_vm1, %v927_v37 }
  0x6f   : > { %1765 = vmatmul.mubr.msk.f32.gmra.mxu1 %vm246_vm1, %v208_v36 }
  0xd2   : > { %v1669_v38 = vpop.f32.mrf.mxu0 }
  0xd3   : > { %v2093_v39 = vpop.f32.mrf.mxu1 }
  0xd4   : > { %v413_v40 = vpop.f32.mrf.mxu0 }
  0xd5   : > { %v2095_v41 = vpop.f32.mrf.mxu1 }
  0xd6   : > { %v1672_v42 = vpop.f32.mrf.mxu0 }
  0xd7   : > { %v2097_v43 = vpop.f32.mrf.mxu1 }
  0xd8   : > { %v423_v44 = vpop.f32.mrf.mxu0 }
  0xd9   : > { %v2099_v45 = vpop.f32.mrf.mxu1 }
  0xda   : > { %v1675_v46 = vpop.f32.mrf.mxu0 }
  0xdb   : > { %v2101_v47 = vpop.f32.mrf.mxu1 }
  0xdc   : > { %v433_v48 = vpop.f32.mrf.mxu0 }
  0xdd   : > { %v2103_v49 = vpop.f32.mrf.mxu1 }
  0xde   : > { %v2105_v50 = vpop.f32.mrf.mxu0 }
  0xdf   : > { %v2107_v51 = vpop.f32.mrf.mxu1 }
  0xe0   : > { %v2109_v52 = vpop.f32.mrf.mxu0 }
  0xe1   : > { %v2111_v53 = vpop.f32.mrf.mxu1 }
  0xe2   : > { %v2113_v54 = vpop.f32.mrf.mxu0 }
  0xe3   : > { %v2115_v55 = vpop.f32.mrf.mxu1 }
  0xe4   : > { %v2117_v56 = vpop.f32.mrf.mxu0 }
  0xe5   : > { %v2119_v57 = vpop.f32.mrf.mxu1 }
  0xe6   : > { %v2121_v58 = vpop.f32.mrf.mxu0 }
  0xe7   : > { %v2123_v59 = vpop.f32.mrf.mxu1 }
  0xe8   : > { %v2125_v60 = vpop.f32.mrf.mxu0 }
  0xe9   : > { %v2127_v61 = vpop.f32.mrf.mxu1 }
  0xea   : > { %v2129_v62 = vpop.f32.mrf.mxu0 }
  0xeb   : > { %v2131_v63 = vpop.f32.mrf.mxu1 }
  0xec   : > { %v2135_v0 = vpop.f32.mrf.mxu0 }
  0xed   : > { %v2137_v1 = vpop.f32.mrf.mxu1 }
  0xee   : > { %v2139_v2 = vpop.f32.mrf.mxu0 }
  0xef   : > { %v2141_v3 = vpop.f32.mrf.mxu1 }
  0xf0   : > { %v2143_v4 = vpop.f32.mrf.mxu0 }
  0xf1   : > { %v2145_v5 = vpop.f32.mrf.mxu1 }
  0xf2   : > { %v1773_v7 = vpop.f32.mrf.mxu0 }
  0xf3   : > { %v1721_v6 = vpop.f32.mrf.mxu1 }
  0xf4   : > { %v743_v8 = vadd.f32 %v1721_v6, %v1669_v38  ;;  %v1096_v11 = vpop.f32.mrf.mxu0 }
  0xf5   : > { %v737_v10 = vpop.f32.mrf.mxu1 }
  0xf6   : > { %v1256_v12 = vadd.f32 %v1773_v7, %v743_v8  ;;  %v738_v13 = vadd.f32 %v737_v10, %v413_v40  ;;  %v1776_v15 = vpop.f32.mrf.mxu0 }
  0xf7   : > { %v1724_v14 = vpop.f32.mrf.mxu1 }
  0xf8   : > { %v1295_v16 = vadd.f32 %v2150_v9, %v1256_v12  ;;  %v1255_v17 = vadd.f32 %v1096_v11, %v738_v13  ;;  %v753_v18 = vadd.f32 %v1724_v14, %v1672_v42  ;;  %v1106_v20 = vpop.f32.mrf.mxu0 }
  0xf9   : > { %v747_v19 = vpop.f32.mrf.mxu1 }
  0xfa   : > { %v1327_v21 = vmax.f32 %v1295_v16, 0.0  ;;  %v1294_v22 = vadd.f32 %v2150_v9, %v1255_v17  ;;  %v1258_v23 = vadd.f32 %v1776_v15, %v753_v18  ;;  %v748_v24 = vadd.f32 %v747_v19, %v423_v44  ;;  %v1779_v26 = vpop.f32.mrf.mxu0 }
  0xfb   : > { %v1727_v25 = vpop.f32.mrf.mxu1 }
  0xfc   : > { %1359 = vst [vmem:[%s2156_s10 + $0x8] sm:$0xff] %v1327_v21  ;;  %v1326_v27 = vmax.f32 %v1294_v22, 0.0  ;;  %v1297_v28 = vadd.f32 %v2150_v9, %v1258_v23  ;;  %v1257_v29 = vadd.f32 %v1106_v20, %v748_v24  ;;  %v763_v30 = vadd.f32 %v1727_v25, %v1675_v46  ;;  %v1116_v32 = vpop.f32.mrf.mxu0 }
  0xfd   : > { %v757_v31 = vpop.f32.mrf.mxu1 }
  0xfe   : > { %1358 = vst [vmem:[%s2156_s10] sm:$0xff] %v1326_v27  ;;  %v1329_v33 = vmax.f32 %v1297_v28, 0.0  ;;  %v1296_v34 = vadd.f32 %v2150_v9, %v1257_v29  ;;  %v1260_v35 = vadd.f32 %v1779_v26, %v763_v30  ;;  %v758_v36 = vadd.f32 %v757_v31, %v433_v48  ;;  %v1782_v38 = vpop.f32.mrf.mxu0 }
  0xff   : > { %v1730_v37 = vpop.f32.mrf.mxu1 }
 0x100   : > { %1361 = vst [vmem:[%s2156_s10 + $0x18] sm:$0xff] %v1329_v33  ;;  %v1328_v40 = vmax.f32 %v1296_v34, 0.0  ;;  %v1299_v42 = vadd.f32 %v2150_v9, %v1260_v35  ;;  %v1259_v44 = vadd.f32 %v1116_v32, %v758_v36  ;;  %v773_v6 = vadd.f32 %v1730_v37, %v2105_v50  ;;  %v1126_v7 = vpop.f32.mrf.mxu0 }
 0x101   : > { %v767_v46 = vpop.f32.mrf.mxu1 }
 0x102   : > { %1360 = vst [vmem:[%s2156_s10 + $0x10] sm:$0xff] %v1328_v40  ;;  %v1331_v8 = vmax.f32 %v1299_v42, 0.0  ;;  %v1298_v10 = vadd.f32 %v2150_v9, %v1259_v44  ;;  %v1262_v11 = vadd.f32 %v1782_v38, %v773_v6  ;;  %v768_v48 = vadd.f32 %v767_v46, %v2109_v52  ;;  %v1785_v13 = vpop.f32.mrf.mxu0 }
 0x103   : > { %v1733_v12 = vpop.f32.mrf.mxu1 }
 0x104   : > { %1363 = vst [vmem:[%s2156_s10 + $0x28] sm:$0xff] %v1331_v8  ;;  %v1330_v14 = vmax.f32 %v1298_v10, 0.0  ;;  %v1301_v15 = vadd.f32 %v2150_v9, %v1262_v11  ;;  %v1261_v16 = vadd.f32 %v1126_v7, %v768_v48  ;;  %v783_v50 = vadd.f32 %v1733_v12, %v2113_v54  ;;  %v1136_v18 = vpop.f32.mrf.mxu0 }
 0x105   : > { %v777_v17 = vpop.f32.mrf.mxu1 }
 0x106   : > { %1362 = vst [vmem:[%s2156_s10 + $0x20] sm:$0xff] %v1330_v14  ;;  %v1333_v19 = vmax.f32 %v1301_v15, 0.0  ;;  %v1300_v20 = vadd.f32 %v2150_v9, %v1261_v16  ;;  %v1264_v21 = vadd.f32 %v1785_v13, %v783_v50  ;;  %v778_v52 = vadd.f32 %v777_v17, %v2117_v56  ;;  %v1788_v23 = vpop.f32.mrf.mxu0 }
 0x107   : > { %v1736_v22 = vpop.f32.mrf.mxu1 }
 0x108   : > { %1365 = vst [vmem:[%s2156_s10 + $0x38] sm:$0xff] %v1333_v19  ;;  %v1332_v24 = vmax.f32 %v1300_v20, 0.0  ;;  %v1303_v25 = vadd.f32 %v2150_v9, %v1264_v21  ;;  %v1263_v26 = vadd.f32 %v1136_v18, %v778_v52  ;;  %v793_v54 = vadd.f32 %v1736_v22, %v2121_v58  ;;  %v1146_v28 = vpop.f32.mrf.mxu0 }
 0x109   : > { %v787_v27 = vpop.f32.mrf.mxu1 }
 0x10a   : > { %1364 = vst [vmem:[%s2156_s10 + $0x30] sm:$0xff] %v1332_v24  ;;  %v1335_v29 = vmax.f32 %v1303_v25, 0.0  ;;  %v1302_v30 = vadd.f32 %v2150_v9, %v1263_v26  ;;  %v1266_v31 = vadd.f32 %v1788_v23, %v793_v54  ;;  %v788_v56 = vadd.f32 %v787_v27, %v2125_v60  ;;  %v1791_v33 = vpop.f32.mrf.mxu0 }
 0x10b   : > { %v1739_v32 = vpop.f32.mrf.mxu1 }
 0x10c   : > { %1367 = vst [vmem:[%s2156_s10 + $0x48] sm:$0xff] %v1335_v29  ;;  %v1334_v34 = vmax.f32 %v1302_v30, 0.0  ;;  %v1305_v35 = vadd.f32 %v2150_v9, %v1266_v31  ;;  %v1265_v36 = vadd.f32 %v1146_v28, %v788_v56  ;;  %v803_v58 = vadd.f32 %v1739_v32, %v2129_v62  ;;  %v1156_v38 = vpop.f32.mrf.mxu0 }
 0x10d   : > { %v797_v37 = vpop.f32.mrf.mxu1 }
 0x10e   : > { %1366 = vst [vmem:[%s2156_s10 + $0x40] sm:$0xff] %v1334_v34  ;;  %v1337_v40 = vmax.f32 %v1305_v35, 0.0  ;;  %v1304_v42 = vadd.f32 %v2150_v9, %v1265_v36  ;;  %v1268_v44 = vadd.f32 %v1791_v33, %v803_v58  ;;  %v798_v60 = vadd.f32 %v797_v37, %v2135_v0  ;;  %v1794_v46 = vpop.f32.mrf.mxu0 }
 0x10f   : > { %v1742_v6 = vpop.f32.mrf.mxu1 }
 0x110   : > { %1369 = vst [vmem:[%s2156_s10 + $0x58] sm:$0xff] %v1337_v40  ;;  %v1336_v7 = vmax.f32 %v1304_v42, 0.0  ;;  %v1307_v8 = vadd.f32 %v2150_v9, %v1268_v44  ;;  %v1267_v10 = vadd.f32 %v1156_v38, %v798_v60  ;;  %v813_v62 = vadd.f32 %v1742_v6, %v2139_v2  ;;  %v1166_v48 = vpop.f32.mrf.mxu0 }
 0x111   : > { %v807_v11 = vpop.f32.mrf.mxu1 }
 0x112   : > { %1368 = vst [vmem:[%s2156_s10 + $0x50] sm:$0xff] %v1336_v7  ;;  %v1339_v12 = vmax.f32 %v1307_v8, 0.0  ;;  %v1306_v13 = vadd.f32 %v2150_v9, %v1267_v10  ;;  %v1270_v14 = vadd.f32 %v1794_v46, %v813_v62  ;;  %v808_v0 = vadd.f32 %v807_v11, %v2143_v4  ;;  %v1797_v16 = vpop.f32.mrf.mxu0 }
 0x113   : > { %v1745_v15 = vpop.f32.mrf.mxu1 }
 0x114   : > { %1371 = vst [vmem:[%s2156_s10 + $0x68] sm:$0xff] %v1339_v12  ;;  %v1338_v50 = vmax.f32 %v1306_v13, 0.0  ;;  %v1309_v17 = vadd.f32 %v2150_v9, %v1270_v14  ;;  %v1269_v18 = vadd.f32 %v1166_v48, %v808_v0  ;;  %v823_v2 = vadd.f32 %v1745_v15, %v2093_v39  ;;  %v1176_v20 = vpop.f32.mrf.mxu0 }
 0x115   : > { %v817_v19 = vpop.f32.mrf.mxu1 }
 0x116   : > { %1370 = vst [vmem:[%s2156_s10 + $0x60] sm:$0xff] %v1338_v50  ;;  %v1341_v21 = vmax.f32 %v1309_v17, 0.0  ;;  %v1308_v52 = vadd.f32 %v2150_v9, %v1269_v18  ;;  %v1272_v22 = vadd.f32 %v1797_v16, %v823_v2  ;;  %v818_v4 = vadd.f32 %v817_v19, %v2095_v41  ;;  %v1800_v24 = vpop.f32.mrf.mxu0 }
 0x117   : > { %v1748_v23 = vpop.f32.mrf.mxu1 }
 0x118   : > { %1373 = vst [vmem:[%s2156_s10 + $0x78] sm:$0xff] %v1341_v21  ;;  %v1340_v25 = vmax.f32 %v1308_v52, 0.0  ;;  %v1311_v26 = vadd.f32 %v2150_v9, %v1272_v22  ;;  %v1271_v54 = vadd.f32 %v1176_v20, %v818_v4  ;;  %v833_v39 = vadd.f32 %v1748_v23, %v2097_v43  ;;  %v1186_v28 = vpop.f32.mrf.mxu0 }
 0x119   : > { %v827_v27 = vpop.f32.mrf.mxu1 }
 0x11a   : > { %1372 = vst [vmem:[%s2156_s10 + $0x70] sm:$0xff] %v1340_v25  ;;  %v1343_v29 = vmax.f32 %v1311_v26, 0.0  ;;  %v1310_v30 = vadd.f32 %v2150_v9, %v1271_v54  ;;  %v1274_v31 = vadd.f32 %v1800_v24, %v833_v39  ;;  %v828_v41 = vadd.f32 %v827_v27, %v2099_v45  ;;  %v1803_v32 = vpop.f32.mrf.mxu0 }
 0x11b   : > { %v1751_v56 = vpop.f32.mrf.mxu1 }
 0x11c   : > { %1375 = vst [vmem:[%s2156_s10 + $0x88] sm:$0xff] %v1343_v29  ;;  %v1342_v33 = vmax.f32 %v1310_v30, 0.0  ;;  %v1313_v34 = vadd.f32 %v2150_v9, %v1274_v31  ;;  %v1273_v35 = vadd.f32 %v1186_v28, %v828_v41  ;;  %v843_v43 = vadd.f32 %v1751_v56, %v2101_v47  ;;  %v1196_v58 = vpop.f32.mrf.mxu0 }
 0x11d   : > { %v837_v36 = vpop.f32.mrf.mxu1 }
 0x11e   : > { %1374 = vst [vmem:[%s2156_s10 + $0x80] sm:$0xff] %v1342_v33  ;;  %v1345_v37 = vmax.f32 %v1313_v34, 0.0  ;;  %v1312_v38 = vadd.f32 %v2150_v9, %v1273_v35  ;;  %v1276_v40 = vadd.f32 %v1803_v32, %v843_v43  ;;  %v838_v45 = vadd.f32 %v837_v36, %v2103_v49  ;;  %v1806_v44 = vpop.f32.mrf.mxu0 }
 0x11f   : > { %v1754_v42 = vpop.f32.mrf.mxu1 }
 0x120   : > { %1377 = vst [vmem:[%s2156_s10 + $0x98] sm:$0xff] %v1345_v37  ;;  %v1344_v60 = vmax.f32 %v1312_v38, 0.0  ;;  %v1315_v6 = vadd.f32 %v2150_v9, %v1276_v40  ;;  %v1275_v46 = vadd.f32 %v1196_v58, %v838_v45  ;;  %v853_v47 = vadd.f32 %v1754_v42, %v2107_v51  ;;  %v1206_v8 = vpop.f32.mrf.mxu0 }
 0x121   : > { %v847_v7 = vpop.f32.mrf.mxu1 }
 0x122   : > { %1376 = vst [vmem:[%s2156_s10 + $0x90] sm:$0xff] %v1344_v60  ;;  %v1347_v10 = vmax.f32 %v1315_v6, 0.0  ;;  %v1314_v62 = vadd.f32 %v2150_v9, %v1275_v46  ;;  %v1278_v11 = vadd.f32 %v1806_v44, %v853_v47  ;;  %v848_v49 = vadd.f32 %v847_v7, %v2111_v53  ;;  %v1809_v12 = vpop.f32.mrf.mxu0 }
 0x123   : > { %v1757_v48 = vpop.f32.mrf.mxu1 }
 0x124   : > { %1379 = vst [vmem:[%s2156_s10 + $0xa8] sm:$0xff] %v1347_v10  ;;  %v1346_v13 = vmax.f32 %v1314_v62, 0.0  ;;  %v1317_v14 = vadd.f32 %v2150_v9, %v1278_v11  ;;  %v1277_v0 = vadd.f32 %v1206_v8, %v848_v49  ;;  %v863_v51 = vadd.f32 %v1757_v48, %v2115_v55  ;;  %v1216_v16 = vpop.f32.mrf.mxu0 }
 0x125   : > { %v857_v15 = vpop.f32.mrf.mxu1 }
 0x126   : > { %1378 = vst [vmem:[%s2156_s10 + $0xa0] sm:$0xff] %v1346_v13  ;;  %v1349_v50 = vmax.f32 %v1317_v14, 0.0  ;;  %v1316_v17 = vadd.f32 %v2150_v9, %v1277_v0  ;;  %v1280_v18 = vadd.f32 %v1809_v12, %v863_v51  ;;  %v858_v53 = vadd.f32 %v857_v15, %v2119_v57  ;;  %v1812_v19 = vpop.f32.mrf.mxu0 }
 0x127   : > { %v1760_v2 = vpop.f32.mrf.mxu1 }
 0x128   : > { %1381 = vst [vmem:[%s2156_s10 + $0xb8] sm:$0xff] %v1349_v50  ;;  %v1348_v20 = vmax.f32 %v1316_v17, 0.0  ;;  %v1319_v21 = vadd.f32 %v2150_v9, %v1280_v18  ;;  %v1279_v52 = vadd.f32 %v1216_v16, %v858_v53  ;;  %v873_v55 = vadd.f32 %v1760_v2, %v2123_v59  ;;  %v1226_v4 = vpop.f32.mrf.mxu0 }
 0x129   : > { %v867_v22 = vpop.f32.mrf.mxu1 }
 0x12a   : > { %1380 = vst [vmem:[%s2156_s10 + $0xb0] sm:$0xff] %v1348_v20  ;;  %v1351_v23 = vmax.f32 %v1319_v21, 0.0  ;;  %v1318_v24 = vadd.f32 %v2150_v9, %v1279_v52  ;;  %v1282_v25 = vadd.f32 %v1812_v19, %v873_v55  ;;  %v868_v57 = vadd.f32 %v867_v22, %v2127_v61  ;;  %v1815_v54 = vpop.f32.mrf.mxu0 }
 0x12b   : > { %v1763_v26 = vpop.f32.mrf.mxu1 }
 0x12c   : > { %1383 = vst [vmem:[%s2156_s10 + $0xc8] sm:$0xff] %v1351_v23  ;;  %v1350_v39 = vmax.f32 %v1318_v24, 0.0  ;;  %v1321_v27 = vadd.f32 %v2150_v9, %v1282_v25  ;;  %v1281_v28 = vadd.f32 %v1226_v4, %v868_v57  ;;  %v883_v59 = vadd.f32 %v1763_v26, %v2131_v63  ;;  %v1236_v30 = vpop.f32.mrf.mxu0 }
 0x12d   : > { %v877_v29 = vpop.f32.mrf.mxu1 }
 0x12e   : > { %1382 = vst [vmem:[%s2156_s10 + $0xc0] sm:$0xff] %v1350_v39  ;;  %v1353_v31 = vmax.f32 %v1321_v27, 0.0  ;;  %v1320_v41 = vadd.f32 %v2150_v9, %v1281_v28  ;;  %v1284_v56 = vadd.f32 %v1815_v54, %v883_v59  ;;  %v878_v61 = vadd.f32 %v877_v29, %v2137_v1  ;;  %v1818_v33 = vpop.f32.mrf.mxu0 }
 0x12f   : > { %v1766_v32 = vpop.f32.mrf.mxu1 }
 0x130   : > { %1385 = vst [vmem:[%s2156_s10 + $0xd8] sm:$0xff] %v1353_v31  ;;  %v1352_v34 = vmax.f32 %v1320_v41, 0.0  ;;  %v1323_v35 = vadd.f32 %v2150_v9, %v1284_v56  ;;  %v1283_v43 = vadd.f32 %v1236_v30, %v878_v61  ;;  %v893_v63 = vadd.f32 %v1766_v32, %v2141_v3  ;;  %v1246_v40 = vpop.f32.mrf.mxu0 }
 0x131   : > { %v887_v36 = vpop.f32.mrf.mxu1 }
 0x132   : > { %1384 = vst [vmem:[%s2156_s10 + $0xd0] sm:$0xff] %v1352_v34  ;;  %v1355_v58 = vmax.f32 %v1323_v35, 0.0  ;;  %v1322_v37 = vadd.f32 %v2150_v9, %v1283_v43  ;;  %v1286_v38 = vadd.f32 %v1818_v33, %v893_v63  ;;  %v888_v1 = vadd.f32 %v887_v36, %v2145_v5 }
 0x134   : > { %1387 = vst [vmem:[%s2156_s10 + $0xe8] sm:$0xff] %v1355_v58  ;;  %v1354_v45 = vmax.f32 %v1322_v37, 0.0  ;;  %v1325_v42 = vadd.f32 %v2150_v9, %v1286_v38  ;;  %v1285_v44 = vadd.f32 %v1246_v40, %v888_v1 }
 0x136   : > { %1386 = vst [vmem:[%s2156_s10 + $0xe0] sm:$0xff] %v1354_v45  ;;  %v1357_v60 = vmax.f32 %v1325_v42, 0.0  ;;  %v1324_v6 = vadd.f32 %v2150_v9, %v1285_v44 }
 0x138   : > { %1389 = vst [vmem:[%s2156_s10 + $0xf8] sm:$0xff] %v1357_v60  ;;  %v1356_v3 = vmax.f32 %v1324_v6, 0.0 }
 0x13a   : > { %1388 = vst [vmem:[%s2156_s10 + $0xf0] sm:$0xff] %v1356_v3 }
 0x13b PF: > { %s13_s12 = sadd.s32 1, %s1838_s12  }
 0x13c   : > { %p10_p5 = scmp.ge.s32.totalorder %s13_s12, 4  }
 0x13e   :  { %12 = sbr.rel (!%p10_p5) target bundleno = 1 (0x1), region = 64 }

// kernel: residual_forward.8
= control target key start
LH: loop header
LB: loop body
LE: loop exit
PB: predicated region body
PF: predicated region fallthrough
CT: control target
= control target key end

     0   :  { %s794_s12 = smov 0   ;;  %s958_s0 = inlined_call_operand.vmem [shape: f32[512,4], index: 0, kind: input, shape index: {}]   ;;  %s959_s1 = inlined_call_operand.vmem [shape: f32[4,128], index: 1, kind: input, shape index: {}]   ;;  %s960_s2 = inlined_call_operand.vmem [shape: f32[1,128], index: 2, kind: input, shape index: {}]   ;;  %s961_s3 = inlined_call_operand.vmem [shape: f32[512,128], index: 3, kind: output, shape index: {}]  }
   0x1 LB: > { %s628_s13 = sadd.s32 4294967295, %s772_s12   ;;  %p632_p0 = scmp.ge.s32.totalorder %s772_s12, 1  ;;  %s772_s12 = sphi %s794_s12, %s13_s12  }
   0x2   : > { %p138_p1 = scmp.lt.s32.totalorder %s772_s12, 3 }
   0x4   : > { %p139_p2 = pnand %p632_p0, %p138_p1 }
   0x5   : > { %s633_s16 = sshll.u32 (!%p139_p2), %s628_s13, 5 }
   0x6   : > { %142 = sbr.rel (%p139_p2) target bundleno = 243 (0xf3), region = 32  ;;  %p163_p3 = scmp.lt.s32.totalorder (!%p139_p2), %s633_s16, 63 }
   0xb   : > { %v206_v0 = vld [vmem:[%s959_s1] sm:$0xf]  ;;  %vm311_vm0 = vcmask 1043456   ;;  %s963_s16 = smov (!%p163_p3, %s633_s16), 63  ;;  %vm214_vm1 = vcmask 31744  }
   0xc   : > { %706 = vmatprep.subr.msk.mxu0 %vm311_vm0, %v206_v0  ;;  %756 = vmatprep.subr.msk.mxu1 %vm311_vm0, %v206_v0  ;;  %s634_s17 = sshll.u32 %s963_s16, 3  ;;  %v882_v33 = vld [vmem:[%s960_s2] ss:$0 sm:$0xff] }
   0xd   : > { %707 = vmatpush3.msk.msra.mxu0 %vm311_vm0, %v206_v0  ;;  %757 = vmatpush3.msk.msra.mxu1 %vm311_vm0, %v206_v0  ;;  %s813_s20 = scalar_lea.vmem %s958_s0, %s634_s17  ;;  %s889_s25 = scalar_lea.vmem %s961_s3, %s634_s17 }
   0xe   : > { %v174_v1 = vld [vmem:[%s813_s20] sm:$0xff]  ;;  %v175_v3 = vld [vmem:[%s813_s20 + $0x8] sm:$0xff]  ;;  %v176_v5 = vld [vmem:[%s813_s20 + $0x10] sm:$0xff] }
   0xf   : > { %v190_v2 = vld [vmem:[%s813_s20 + $0x80] sm:$0xff]  ;;  %708 = vmatprep.mubr.msk.f32.mxu0 %vm214_vm1, %v174_v1  ;;  %v191_v4 = vld [vmem:[%s813_s20 + $0x88] sm:$0xff]  ;;  %v192_v6 = vld [vmem:[%s813_s20 + $0x90] sm:$0xff] }
  0x10   : > { %732 = vmatprep.mubr.msk.f32.mxu1 %vm214_vm1, %v190_v2  ;;  %709 = vmatmul.mubr.msk.f32.vlgmr.msra.gmra.mxu0 %vm214_vm1, %v175_v3  ;;  %v177_v7 = vld [vmem:[%s813_s20 + $0x18] sm:$0xff]  ;;  %v178_v9 = vld [vmem:[%s813_s20 + $0x20] sm:$0xff]  ;;  %v179_v11 = vld [vmem:[%s813_s20 + $0x28] sm:$0xff] }
  0x11   : > { %733 = vmatmul.mubr.msk.f32.vlgmr.msra.gmra.mxu1 %vm214_vm1, %v191_v4  ;;  %711 = vmatprep.mubr.msk.f32.mxu0 %vm214_vm1, %v176_v5  ;;  %v193_v8 = vld [vmem:[%s813_s20 + $0x98] sm:$0xff]  ;;  %v194_v10 = vld [vmem:[%s813_s20 + $0xa0] sm:$0xff]  ;;  %v195_v12 = vld [vmem:[%s813_s20 + $0xa8] sm:$0xff] }
  0x12   : > { %735 = vmatprep.mubr.msk.f32.mxu1 %vm214_vm1, %v192_v6  ;;  %v180_v13 = vld [vmem:[%s813_s20 + $0x30] sm:$0xff]  ;;  %v181_v15 = vld [vmem:[%s813_s20 + $0x38] sm:$0xff]  ;;  %v182_v17 = vld [vmem:[%s813_s20 + $0x40] sm:$0xff] }
  0x13   : > { %v196_v14 = vld [vmem:[%s813_s20 + $0xb0] sm:$0xff]  ;;  %v197_v16 = vld [vmem:[%s813_s20 + $0xb8] sm:$0xff]  ;;  %v198_v18 = vld [vmem:[%s813_s20 + $0xc0] sm:$0xff] }
  0x14   : > { %712 = vmatmul.mubr.msk.f32.gmra.mxu0 %vm214_vm1, %v177_v7  ;;  %v183_v19 = vld [vmem:[%s813_s20 + $0x48] sm:$0xff]  ;;  %v184_v21 = vld [vmem:[%s813_s20 + $0x50] sm:$0xff]  ;;  %v185_v23 = vld [vmem:[%s813_s20 + $0x58] sm:$0xff] }
  0x15   : > { %736 = vmatmul.mubr.msk.f32.gmra.mxu1 %vm214_vm1, %v193_v8  ;;  %714 = vmatprep.mubr.msk.f32.mxu0 %vm214_vm1, %v178_v9  ;;  %v199_v20 = vld [vmem:[%s813_s20 + $0xc8] sm:$0xff]  ;;  %v200_v22 = vld [vmem:[%s813_s20 + $0xd0] sm:$0xff]  ;;  %v201_v24 = vld [vmem:[%s813_s20 + $0xd8] sm:$0xff] }
  0x16   : > { %738 = vmatprep.mubr.msk.f32.mxu1 %vm214_vm1, %v194_v10  ;;  %v186_v25 = vld [vmem:[%s813_s20 + $0x60] sm:$0xff]  ;;  %v187_v27 = vld [vmem:[%s813_s20 + $0x68] sm:$0xff]  ;;  %v188_v29 = vld [vmem:[%s813_s20 + $0x70] sm:$0xff] }
  0x17   : > { %v202_v26 = vld [vmem:[%s813_s20 + $0xe0] sm:$0xff]  ;;  %v203_v28 = vld [vmem:[%s813_s20 + $0xe8] sm:$0xff]  ;;  %v204_v30 = vld [vmem:[%s813_s20 + $0xf0] sm:$0xff] }
  0x18   : > { %715 = vmatmul.mubr.msk.f32.gmra.mxu0 %vm214_vm1, %v179_v11  ;;  %v189_v31 = vld [vmem:[%s813_s20 + $0x78] sm:$0xff] }
  0x19   : > { %739 = vmatmul.mubr.msk.f32.gmra.mxu1 %vm214_vm1, %v195_v12  ;;  %717 = vmatprep.mubr.msk.f32.mxu0 %vm214_vm1, %v180_v13  ;;  %v205_v32 = vld [vmem:[%s813_s20 + $0xf8] sm:$0xff] }
  0x1a   : > { %741 = vmatprep.mubr.msk.f32.mxu1 %vm214_vm1, %v196_v14 }
  0x1c   : > { %718 = vmatmul.mubr.msk.f32.gmra.mxu0 %vm214_vm1, %v181_v15 }
  0x1d   : > { %742 = vmatmul.mubr.msk.f32.gmra.mxu1 %vm214_vm1, %v197_v16  ;;  %720 = vmatprep.mubr.msk.f32.mxu0 %vm214_vm1, %v182_v17 }
  0x1e   : > { %744 = vmatprep.mubr.msk.f32.mxu1 %vm214_vm1, %v198_v18 }
  0x20   : > { %721 = vmatmul.mubr.msk.f32.gmra.mxu0 %vm214_vm1, %v183_v19 }
  0x21   : > { %745 = vmatmul.mubr.msk.f32.gmra.mxu1 %vm214_vm1, %v199_v20  ;;  %723 = vmatprep.mubr.msk.f32.mxu0 %vm214_vm1, %v184_v21 }
  0x22   : > { %747 = vmatprep.mubr.msk.f32.mxu1 %vm214_vm1, %v200_v22 }
  0x24   : > { %724 = vmatmul.mubr.msk.f32.gmra.mxu0 %vm214_vm1, %v185_v23 }
  0x25   : > { %748 = vmatmul.mubr.msk.f32.gmra.mxu1 %vm214_vm1, %v201_v24  ;;  %726 = vmatprep.mubr.msk.f32.mxu0 %vm214_vm1, %v186_v25 }
  0x26   : > { %750 = vmatprep.mubr.msk.f32.mxu1 %vm214_vm1, %v202_v26 }
  0x28   : > { %727 = vmatmul.mubr.msk.f32.gmra.mxu0 %vm214_vm1, %v187_v27 }
  0x29   : > { %751 = vmatmul.mubr.msk.f32.gmra.mxu1 %vm214_vm1, %v203_v28  ;;  %729 = vmatprep.mubr.msk.f32.mxu0 %vm214_vm1, %v188_v29 }
  0x2a   : > { %753 = vmatprep.mubr.msk.f32.mxu1 %vm214_vm1, %v204_v30 }
  0x2c   : > { %730 = vmatmul.mubr.msk.f32.gmra.mxu0 %vm214_vm1, %v189_v31 }
  0x2d   : > { %754 = vmatmul.mubr.msk.f32.gmra.mxu1 %vm214_vm1, %v205_v32 }
  0xd0   : > { %v710_v34 = vpop.f32.mrf.mxu0 }
  0xd1   : > { %v734_v35 = vpop.f32.mrf.mxu1  ;;  %v387_v36 = vadd.f32 %v710_v34, %v882_v33 }
  0xd2   : > { %v467_v37 = vadd.f32 %v734_v35, %v882_v33  ;;  %v381_v38 = vpop.f32.mrf.mxu0 }
  0xd3   : > { %v461_v39 = vpop.f32.mrf.mxu1  ;;  %541 = vst [vmem:[%s889_s25 + $0x8] sm:$0xff] %v387_v36  ;;  %v382_v40 = vadd.f32 %v882_v33, %v381_v38 }
  0xd4   : > { %557 = vst [vmem:[%s889_s25 + $0x88] sm:$0xff] %v467_v37  ;;  %v462_v41 = vadd.f32 %v882_v33, %v461_v39  ;;  %v713_v42 = vpop.f32.mrf.mxu0 }
  0xd5   : > { %v737_v43 = vpop.f32.mrf.mxu1  ;;  %540 = vst [vmem:[%s889_s25] sm:$0xff] %v382_v40  ;;  %v397_v44 = vadd.f32 %v713_v42, %v882_v33 }
  0xd6   : > { %556 = vst [vmem:[%s889_s25 + $0x80] sm:$0xff] %v462_v41  ;;  %v477_v45 = vadd.f32 %v737_v43, %v882_v33  ;;  %v391_v46 = vpop.f32.mrf.mxu0 }
  0xd7   : > { %v471_v47 = vpop.f32.mrf.mxu1  ;;  %543 = vst [vmem:[%s889_s25 + $0x18] sm:$0xff] %v397_v44  ;;  %v392_v48 = vadd.f32 %v882_v33, %v391_v46 }
  0xd8   : > { %559 = vst [vmem:[%s889_s25 + $0x98] sm:$0xff] %v477_v45  ;;  %v472_v49 = vadd.f32 %v882_v33, %v471_v47  ;;  %v716_v50 = vpop.f32.mrf.mxu0 }
  0xd9   : > { %v740_v51 = vpop.f32.mrf.mxu1  ;;  %542 = vst [vmem:[%s889_s25 + $0x10] sm:$0xff] %v392_v48  ;;  %v407_v52 = vadd.f32 %v716_v50, %v882_v33 }
  0xda   : > { %558 = vst [vmem:[%s889_s25 + $0x90] sm:$0xff] %v472_v49  ;;  %v487_v53 = vadd.f32 %v740_v51, %v882_v33  ;;  %v401_v54 = vpop.f32.mrf.mxu0 }
  0xdb   : > { %v481_v55 = vpop.f32.mrf.mxu1  ;;  %545 = vst [vmem:[%s889_s25 + $0x28] sm:$0xff] %v407_v52  ;;  %v402_v56 = vadd.f32 %v882_v33, %v401_v54 }
  0xdc   : > { %561 = vst [vmem:[%s889_s25 + $0xa8] sm:$0xff] %v487_v53  ;;  %v482_v57 = vadd.f32 %v882_v33, %v481_v55  ;;  %v719_v58 = vpop.f32.mrf.mxu0 }
  0xdd   : > { %v743_v59 = vpop.f32.mrf.mxu1  ;;  %544 = vst [vmem:[%s889_s25 + $0x20] sm:$0xff] %v402_v56  ;;  %v417_v60 = vadd.f32 %v719_v58, %v882_v33 }
  0xde   : > { %560 = vst [vmem:[%s889_s25 + $0xa0] sm:$0xff] %v482_v57  ;;  %v497_v61 = vadd.f32 %v743_v59, %v882_v33  ;;  %v411_v62 = vpop.f32.mrf.mxu0 }
  0xdf   : > { %v491_v63 = vpop.f32.mrf.mxu1  ;;  %547 = vst [vmem:[%s889_s25 + $0x38] sm:$0xff] %v417_v60  ;;  %v412_v0 = vadd.f32 %v882_v33, %v411_v62 }
  0xe0   : > { %563 = vst [vmem:[%s889_s25 + $0xb8] sm:$0xff] %v497_v61  ;;  %v492_v1 = vadd.f32 %v882_v33, %v491_v63  ;;  %v722_v2 = vpop.f32.mrf.mxu0 }
  0xe1   : > { %v746_v3 = vpop.f32.mrf.mxu1  ;;  %546 = vst [vmem:[%s889_s25 + $0x30] sm:$0xff] %v412_v0  ;;  %v427_v4 = vadd.f32 %v722_v2, %v882_v33 }
  0xe2   : > { %562 = vst [vmem:[%s889_s25 + $0xb0] sm:$0xff] %v492_v1  ;;  %v507_v5 = vadd.f32 %v746_v3, %v882_v33  ;;  %v421_v6 = vpop.f32.mrf.mxu0 }
  0xe3   : > { %v501_v7 = vpop.f32.mrf.mxu1  ;;  %549 = vst [vmem:[%s889_s25 + $0x48] sm:$0xff] %v427_v4  ;;  %v422_v8 = vadd.f32 %v882_v33, %v421_v6 }
  0xe4   : > { %565 = vst [vmem:[%s889_s25 + $0xc8] sm:$0xff] %v507_v5  ;;  %v502_v9 = vadd.f32 %v882_v33, %v501_v7  ;;  %v725_v10 = vpop.f32.mrf.mxu0 }
  0xe5   : > { %v749_v11 = vpop.f32.mrf.mxu1  ;;  %548 = vst [vmem:[%s889_s25 + $0x40] sm:$0xff] %v422_v8  ;;  %v437_v12 = vadd.f32 %v725_v10, %v882_v33 }
  0xe6   : > { %564 = vst [vmem:[%s889_s25 + $0xc0] sm:$0xff] %v502_v9  ;;  %v517_v13 = vadd.f32 %v749_v11, %v882_v33  ;;  %v431_v14 = vpop.f32.mrf.mxu0 }
  0xe7   : > { %v511_v15 = vpop.f32.mrf.mxu1  ;;  %551 = vst [vmem:[%s889_s25 + $0x58] sm:$0xff] %v437_v12  ;;  %v432_v16 = vadd.f32 %v882_v33, %v431_v14 }
  0xe8   : > { %567 = vst [vmem:[%s889_s25 + $0xd8] sm:$0xff] %v517_v13  ;;  %v512_v17 = vadd.f32 %v882_v33, %v511_v15  ;;  %v728_v18 = vpop.f32.mrf.mxu0 }
  0xe9   : > { %v752_v19 = vpop.f32.mrf.mxu1  ;;  %550 = vst [vmem:[%s889_s25 + $0x50] sm:$0xff] %v432_v16  ;;  %v447_v20 = vadd.f32 %v728_v18, %v882_v33 }
  0xea   : > { %566 = vst [vmem:[%s889_s25 + $0xd0] sm:$0xff] %v512_v17  ;;  %v527_v21 = vadd.f32 %v752_v19, %v882_v33  ;;  %v441_v22 = vpop.f32.mrf.mxu0 }
  0xeb   : > { %v521_v23 = vpop.f32.mrf.mxu1  ;;  %553 = vst [vmem:[%s889_s25 + $0x68] sm:$0xff] %v447_v20  ;;  %v442_v24 = vadd.f32 %v882_v33, %v441_v22 }
  0xec   : > { %569 = vst [vmem:[%s889_s25 + $0xe8] sm:$0xff] %v527_v21  ;;  %v522_v25 = vadd.f32 %v882_v33, %v521_v23  ;;  %v731_v26 = vpop.f32.mrf.mxu0 }
  0xed   : > { %v755_v27 = vpop.f32.mrf.mxu1  ;;  %552 = vst [vmem:[%s889_s25 + $0x60] sm:$0xff] %v442_v24  ;;  %v457_v28 = vadd.f32 %v731_v26, %v882_v33 }
  0xee   : > { %568 = vst [vmem:[%s889_s25 + $0xe0] sm:$0xff] %v522_v25  ;;  %v537_v29 = vadd.f32 %v755_v27, %v882_v33  ;;  %v451_v30 = vpop.f32.mrf.mxu0 }
  0xef   : > { %v531_v31 = vpop.f32.mrf.mxu1  ;;  %555 = vst [vmem:[%s889_s25 + $0x78] sm:$0xff] %v457_v28  ;;  %v452_v32 = vadd.f32 %v882_v33, %v451_v30 }
  0xf0   : > { %571 = vst [vmem:[%s889_s25 + $0xf8] sm:$0xff] %v537_v29  ;;  %v532_v34 = vadd.f32 %v882_v33, %v531_v31 }
  0xf1   : > { %554 = vst [vmem:[%s889_s25 + $0x70] sm:$0xff] %v452_v32 }
  0xf2   : > { %570 = vst [vmem:[%s889_s25 + $0xf0] sm:$0xff] %v532_v34 }
  0xf3 PF: > { %s13_s12 = sadd.s32 1, %s772_s12  }
  0xf4   : > { %p10_p4 = scmp.ge.s32.totalorder %s13_s12, 4  }
  0xf6   :  { %12 = sbr.rel (!%p10_p4) target bundleno = 1 (0x1), region = 62 }

// kernel: residual_forward.10
= control target key start
LH: loop header
LB: loop body
LE: loop exit
PB: predicated region body
PF: predicated region fallthrough
CT: control target
= control target key end

     0   :  { %s782_s12 = smov 0   ;;  %s961_s0 = inlined_call_operand.vmem [shape: f32[512,128], index: 0, kind: input, shape index: {}]   ;;  %s962_s1 = inlined_call_operand.vmem [shape: f32[128,128], index: 1, kind: input, shape index: {}]   ;;  %s963_s2 = inlined_call_operand.vmem [shape: f32[1,128], index: 2, kind: input, shape index: {}]   ;;  %s964_s3 = inlined_call_operand.vmem [shape: f32[512,128], index: 3, kind: output, shape index: {}]  }
   0x1 LB: > { %s574_s13 = sadd.s32 4294967295, %s760_s12   ;;  %p578_p0 = scmp.ge.s32.totalorder %s760_s12, 1  ;;  %s760_s12 = sphi %s782_s12, %s13_s12  }
   0x2   : > { %p138_p1 = scmp.lt.s32.totalorder %s760_s12, 3 }
   0x4   : > { %p139_p2 = pnand %p578_p0, %p138_p1 }
   0x5   : > { %s579_s30 = sshll.u32 (!%p139_p2), %s574_s13, 5 }
   0x6   : > { %142 = sbr.rel (%p139_p2) target bundleno = 273 (0x111), region = 32  ;;  %p163_p3 = scmp.lt.s32.totalorder (!%p139_p2), %s579_s30, 63 }
   0xb   : > { %v221_v0 = vld [vmem:[%s962_s1 + $0x78] sm:$0xff]  ;;  %v220_v1 = vld [vmem:[%s962_s1 + $0x70] sm:$0xff]  ;;  %v219_v2 = vld [vmem:[%s962_s1 + $0x68] sm:$0xff]  ;;  %s966_s30 = smov (!%p163_p3, %s579_s30), 63 }
   0xc   : > { %634 = vmatprep.subr.mxu0 %v221_v0  ;;  %714 = vmatprep.subr.mxu1 %v221_v0  ;;  %v218_v3 = vld [vmem:[%s962_s1 + $0x60] sm:$0xff]  ;;  %v217_v4 = vld [vmem:[%s962_s1 + $0x58] sm:$0xff]  ;;  %v216_v5 = vld [vmem:[%s962_s1 + $0x50] sm:$0xff]  ;;  %s580_s17 = sshll.u32 %s966_s30, 3 }
   0xd   : > { %635 = vmatpush3.msra.mxu0 %v221_v0  ;;  %730 = vmatpush3.msra.mxu1 %v221_v0  ;;  %v215_v6 = vld [vmem:[%s962_s1 + $0x48] sm:$0xff]  ;;  %v214_v7 = vld [vmem:[%s962_s1 + $0x40] sm:$0xff]  ;;  %v213_v8 = vld [vmem:[%s962_s1 + $0x38] sm:$0xff]  ;;  %s845_s22 = scalar_lea.vmem %s961_s0, %s580_s17  ;;  %s894_s29 = scalar_lea.vmem %s964_s3, %s580_s17 }
   0xe   : > { %636 = vmatprep.subr.mxu0 %v220_v1  ;;  %715 = vmatprep.subr.mxu1 %v220_v1  ;;  %v212_v9 = vld [vmem:[%s962_s1 + $0x30] sm:$0xff]  ;;  %v211_v10 = vld [vmem:[%s962_s1 + $0x28] sm:$0xff]  ;;  %v210_v11 = vld [vmem:[%s962_s1 + $0x20] sm:$0xff] }
   0xf   : > { %637 = vmatpush3.msra.mxu0 %v220_v1  ;;  %731 = vmatpush3.msra.mxu1 %v220_v1  ;;  %v209_v12 = vld [vmem:[%s962_s1 + $0x18] sm:$0xff]  ;;  %v208_v13 = vld [vmem:[%s962_s1 + $0x10] sm:$0xff]  ;;  %v207_v14 = vld [vmem:[%s962_s1 + $0x8] sm:$0xff] }
  0x10   : > { %638 = vmatprep.subr.mxu0 %v219_v2  ;;  %716 = vmatprep.subr.mxu1 %v219_v2  ;;  %v206_v15 = vld [vmem:[%s962_s1] sm:$0xff]  ;;  %v175_v18 = vld [vmem:[%s845_s22 + $0x8] sm:$0xff]  ;;  %v176_v20 = vld [vmem:[%s845_s22 + $0x10] sm:$0xff] }
  0x11   : > { %639 = vmatpush3.msra.mxu0 %v219_v2  ;;  %732 = vmatpush3.msra.mxu1 %v219_v2  ;;  %v174_v16 = vld [vmem:[%s845_s22] sm:$0xff]  ;;  %v191_v19 = vld [vmem:[%s845_s22 + $0x88] sm:$0xff]  ;;  %v192_v21 = vld [vmem:[%s845_s22 + $0x90] sm:$0xff] }
  0x12   : > { %640 = vmatprep.subr.mxu0 %v218_v3  ;;  %717 = vmatprep.subr.mxu1 %v218_v3  ;;  %v190_v17 = vld [vmem:[%s845_s22 + $0x80] sm:$0xff]  ;;  %v177_v22 = vld [vmem:[%s845_s22 + $0x18] sm:$0xff]  ;;  %v179_v26 = vld [vmem:[%s845_s22 + $0x28] sm:$0xff] }
  0x13   : > { %641 = vmatpush3.msra.mxu0 %v218_v3  ;;  %733 = vmatpush3.msra.mxu1 %v218_v3  ;;  %v193_v23 = vld [vmem:[%s845_s22 + $0x98] sm:$0xff]  ;;  %v178_v24 = vld [vmem:[%s845_s22 + $0x20] sm:$0xff]  ;;  %v195_v27 = vld [vmem:[%s845_s22 + $0xa8] sm:$0xff] }
  0x14   : > { %642 = vmatprep.subr.mxu0 %v217_v4  ;;  %718 = vmatprep.subr.mxu1 %v217_v4  ;;  %v194_v25 = vld [vmem:[%s845_s22 + $0xa0] sm:$0xff]  ;;  %v180_v28 = vld [vmem:[%s845_s22 + $0x30] sm:$0xff]  ;;  %v181_v30 = vld [vmem:[%s845_s22 + $0x38] sm:$0xff] }
  0x15   : > { %643 = vmatpush3.msra.mxu0 %v217_v4  ;;  %734 = vmatpush3.msra.mxu1 %v217_v4  ;;  %v196_v29 = vld [vmem:[%s845_s22 + $0xb0] sm:$0xff]  ;;  %v197_v31 = vld [vmem:[%s845_s22 + $0xb8] sm:$0xff]  ;;  %v182_v32 = vld [vmem:[%s845_s22 + $0x40] sm:$0xff] }
  0x16   : > { %644 = vmatprep.subr.mxu0 %v216_v5  ;;  %719 = vmatprep.subr.mxu1 %v216_v5  ;;  %v198_v33 = vld [vmem:[%s845_s22 + $0xc0] sm:$0xff]  ;;  %v183_v34 = vld [vmem:[%s845_s22 + $0x48] sm:$0xff]  ;;  %v184_v36 = vld [vmem:[%s845_s22 + $0x50] sm:$0xff] }
  0x17   : > { %645 = vmatpush3.msra.mxu0 %v216_v5  ;;  %735 = vmatpush3.msra.mxu1 %v216_v5  ;;  %v199_v35 = vld [vmem:[%s845_s22 + $0xc8] sm:$0xff]  ;;  %v200_v37 = vld [vmem:[%s845_s22 + $0xd0] sm:$0xff]  ;;  %v185_v38 = vld [vmem:[%s845_s22 + $0x58] sm:$0xff] }
  0x18   : > { %646 = vmatprep.subr.mxu0 %v215_v6  ;;  %720 = vmatprep.subr.mxu1 %v215_v6  ;;  %v201_v39 = vld [vmem:[%s845_s22 + $0xd8] sm:$0xff]  ;;  %v186_v40 = vld [vmem:[%s845_s22 + $0x60] sm:$0xff]  ;;  %v187_v42 = vld [vmem:[%s845_s22 + $0x68] sm:$0xff] }
  0x19   : > { %647 = vmatpush3.msra.mxu0 %v215_v6  ;;  %736 = vmatpush3.msra.mxu1 %v215_v6  ;;  %v202_v41 = vld [vmem:[%s845_s22 + $0xe0] sm:$0xff]  ;;  %v203_v43 = vld [vmem:[%s845_s22 + $0xe8] sm:$0xff]  ;;  %v188_v44 = vld [vmem:[%s845_s22 + $0x70] sm:$0xff] }
  0x1a   : > { %648 = vmatprep.subr.mxu0 %v214_v7  ;;  %721 = vmatprep.subr.mxu1 %v214_v7  ;;  %v204_v45 = vld [vmem:[%s845_s22 + $0xf0] sm:$0xff]  ;;  %v189_v46 = vld [vmem:[%s845_s22 + $0x78] sm:$0xff]  ;;  %v885_v48 = vld [vmem:[%s963_s2] ss:$0 sm:$0xff] }
  0x1b   : > { %649 = vmatpush3.msra.mxu0 %v214_v7  ;;  %737 = vmatpush3.msra.mxu1 %v214_v7  ;;  %v205_v47 = vld [vmem:[%s845_s22 + $0xf8] sm:$0xff] }
  0x1c   : > { %650 = vmatprep.subr.mxu0 %v213_v8  ;;  %722 = vmatprep.subr.mxu1 %v213_v8 }
  0x1d   : > { %651 = vmatpush3.msra.mxu0 %v213_v8  ;;  %738 = vmatpush3.msra.mxu1 %v213_v8 }
  0x1e   : > { %652 = vmatprep.subr.mxu0 %v212_v9  ;;  %723 = vmatprep.subr.mxu1 %v212_v9 }
  0x1f   : > { %653 = vmatpush3.msra.mxu0 %v212_v9  ;;  %739 = vmatpush3.msra.mxu1 %v212_v9 }
  0x20   : > { %654 = vmatprep.subr.mxu0 %v211_v10  ;;  %724 = vmatprep.subr.mxu1 %v211_v10 }
  0x21   : > { %655 = vmatpush3.msra.mxu0 %v211_v10  ;;  %740 = vmatpush3.msra.mxu1 %v211_v10 }
  0x22   : > { %656 = vmatprep.subr.mxu0 %v210_v11  ;;  %725 = vmatprep.subr.mxu1 %v210_v11 }
  0x23   : > { %657 = vmatpush3.msra.mxu0 %v210_v11  ;;  %741 = vmatpush3.msra.mxu1 %v210_v11 }
  0x24   : > { %658 = vmatprep.subr.mxu0 %v209_v12  ;;  %726 = vmatprep.subr.mxu1 %v209_v12 }
  0x25   : > { %659 = vmatpush3.msra.mxu0 %v209_v12  ;;  %742 = vmatpush3.msra.mxu1 %v209_v12 }
  0x26   : > { %660 = vmatprep.subr.mxu0 %v208_v13  ;;  %727 = vmatprep.subr.mxu1 %v208_v13 }
  0x27   : > { %661 = vmatpush3.msra.mxu0 %v208_v13  ;;  %743 = vmatpush3.msra.mxu1 %v208_v13 }
  0x28   : > { %662 = vmatprep.subr.mxu0 %v207_v14  ;;  %728 = vmatprep.subr.mxu1 %v207_v14 }
  0x29   : > { %663 = vmatpush3.msra.mxu0 %v207_v14  ;;  %744 = vmatpush3.msra.mxu1 %v207_v14 }
  0x2a   : > { %664 = vmatprep.subr.mxu0 %v206_v15  ;;  %729 = vmatprep.subr.mxu1 %v206_v15 }
  0x2b   : > { %665 = vmatpush3.msra.mxu0 %v206_v15  ;;  %745 = vmatpush3.msra.mxu1 %v206_v15 }
  0x2c   : > { %666 = vmatprep.mubr.f32.mxu0 %v174_v16  ;;  %690 = vmatprep.mubr.f32.mxu1 %v190_v17 }
  0x2d   : > { %667 = vmatmul.mubr.f32.vlgmr.msra.gmra.mxu0 %v175_v18  ;;  %691 = vmatmul.mubr.f32.vlgmr.msra.gmra.mxu1 %v191_v19 }
  0x2e   : > { %669 = vmatprep.mubr.f32.mxu0 %v176_v20  ;;  %693 = vmatprep.mubr.f32.mxu1 %v192_v21 }
  0x31   : > { %670 = vmatmul.mubr.f32.gmra.mxu0 %v177_v22  ;;  %694 = vmatmul.mubr.f32.gmra.mxu1 %v193_v23 }
  0x32   : > { %672 = vmatprep.mubr.f32.mxu0 %v178_v24  ;;  %696 = vmatprep.mubr.f32.mxu1 %v194_v25 }
  0x35   : > { %673 = vmatmul.mubr.f32.gmra.mxu0 %v179_v26  ;;  %697 = vmatmul.mubr.f32.gmra.mxu1 %v195_v27 }
  0x36   : > { %675 = vmatprep.mubr.f32.mxu0 %v180_v28  ;;  %699 = vmatprep.mubr.f32.mxu1 %v196_v29 }
  0x39   : > { %676 = vmatmul.mubr.f32.gmra.mxu0 %v181_v30  ;;  %700 = vmatmul.mubr.f32.gmra.mxu1 %v197_v31 }
  0x3a   : > { %678 = vmatprep.mubr.f32.mxu0 %v182_v32  ;;  %702 = vmatprep.mubr.f32.mxu1 %v198_v33 }
  0x3d   : > { %679 = vmatmul.mubr.f32.gmra.mxu0 %v183_v34  ;;  %703 = vmatmul.mubr.f32.gmra.mxu1 %v199_v35 }
  0x3e   : > { %681 = vmatprep.mubr.f32.mxu0 %v184_v36  ;;  %705 = vmatprep.mubr.f32.mxu1 %v200_v37 }
  0x41   : > { %682 = vmatmul.mubr.f32.gmra.mxu0 %v185_v38  ;;  %706 = vmatmul.mubr.f32.gmra.mxu1 %v201_v39 }
  0x42   : > { %684 = vmatprep.mubr.f32.mxu0 %v186_v40  ;;  %708 = vmatprep.mubr.f32.mxu1 %v202_v41 }
  0x45   : > { %685 = vmatmul.mubr.f32.gmra.mxu0 %v187_v42  ;;  %709 = vmatmul.mubr.f32.gmra.mxu1 %v203_v43 }
  0x46   : > { %687 = vmatprep.mubr.f32.mxu0 %v188_v44  ;;  %711 = vmatprep.mubr.f32.mxu1 %v204_v45 }
  0x49   : > { %688 = vmatmul.mubr.f32.gmra.mxu0 %v189_v46  ;;  %712 = vmatmul.mubr.f32.gmra.mxu1 %v205_v47 }
  0xed   : > { %v668_v49 = vpop.f32.mrf.mxu0  ;;  %v692_v50 = vpop.f32.mrf.mxu1 }
  0xee   : > { %v301_v51 = vadd.f32 %v668_v49, %v885_v48  ;;  %v381_v52 = vadd.f32 %v692_v50, %v885_v48 }
  0xef   : > { %v295_v53 = vpop.f32.mrf.mxu0  ;;  %v375_v54 = vpop.f32.mrf.mxu1 }
  0xf0   : > { %v455_v55 = vmax.f32 %v301_v51, 0.0  ;;  %v471_v56 = vmax.f32 %v381_v52, 0.0  ;;  %v296_v57 = vadd.f32 %v885_v48, %v295_v53  ;;  %v376_v58 = vadd.f32 %v885_v48, %v375_v54 }
  0xf1   : > { %v671_v59 = vpop.f32.mrf.mxu0  ;;  %v695_v60 = vpop.f32.mrf.mxu1 }
  0xf2   : > { %487 = vst [vmem:[%s894_s29 + $0x8] sm:$0xff] %v455_v55  ;;  %503 = vst [vmem:[%s894_s29 + $0x88] sm:$0xff] %v471_v56  ;;  %v454_v61 = vmax.f32 %v296_v57, 0.0  ;;  %v470_v62 = vmax.f32 %v376_v58, 0.0  ;;  %v311_v63 = vadd.f32 %v671_v59, %v885_v48  ;;  %v391_v0 = vadd.f32 %v695_v60, %v885_v48 }
  0xf3   : > { %v305_v1 = vpop.f32.mrf.mxu0  ;;  %v385_v2 = vpop.f32.mrf.mxu1 }
  0xf4   : > { %486 = vst [vmem:[%s894_s29] sm:$0xff] %v454_v61  ;;  %502 = vst [vmem:[%s894_s29 + $0x80] sm:$0xff] %v470_v62  ;;  %v457_v3 = vmax.f32 %v311_v63, 0.0  ;;  %v473_v4 = vmax.f32 %v391_v0, 0.0  ;;  %v306_v5 = vadd.f32 %v885_v48, %v305_v1  ;;  %v386_v6 = vadd.f32 %v885_v48, %v385_v2 }
  0xf5   : > { %v674_v7 = vpop.f32.mrf.mxu0  ;;  %v698_v8 = vpop.f32.mrf.mxu1 }
  0xf6   : > { %489 = vst [vmem:[%s894_s29 + $0x18] sm:$0xff] %v457_v3  ;;  %505 = vst [vmem:[%s894_s29 + $0x98] sm:$0xff] %v473_v4  ;;  %v456_v9 = vmax.f32 %v306_v5, 0.0  ;;  %v472_v10 = vmax.f32 %v386_v6, 0.0  ;;  %v321_v11 = vadd.f32 %v674_v7, %v885_v48  ;;  %v401_v12 = vadd.f32 %v698_v8, %v885_v48 }
  0xf7   : > { %v315_v13 = vpop.f32.mrf.mxu0  ;;  %v395_v14 = vpop.f32.mrf.mxu1 }
  0xf8   : > { %488 = vst [vmem:[%s894_s29 + $0x10] sm:$0xff] %v456_v9  ;;  %504 = vst [vmem:[%s894_s29 + $0x90] sm:$0xff] %v472_v10  ;;  %v459_v15 = vmax.f32 %v321_v11, 0.0  ;;  %v475_v16 = vmax.f32 %v401_v12, 0.0  ;;  %v316_v17 = vadd.f32 %v885_v48, %v315_v13  ;;  %v396_v18 = vadd.f32 %v885_v48, %v395_v14 }
  0xf9   : > { %v677_v19 = vpop.f32.mrf.mxu0  ;;  %v701_v20 = vpop.f32.mrf.mxu1 }
  0xfa   : > { %491 = vst [vmem:[%s894_s29 + $0x28] sm:$0xff] %v459_v15  ;;  %507 = vst [vmem:[%s894_s29 + $0xa8] sm:$0xff] %v475_v16  ;;  %v458_v21 = vmax.f32 %v316_v17, 0.0  ;;  %v474_v22 = vmax.f32 %v396_v18, 0.0  ;;  %v331_v23 = vadd.f32 %v677_v19, %v885_v48  ;;  %v411_v24 = vadd.f32 %v701_v20, %v885_v48 }
  0xfb   : > { %v325_v25 = vpop.f32.mrf.mxu0  ;;  %v405_v26 = vpop.f32.mrf.mxu1 }
  0xfc   : > { %490 = vst [vmem:[%s894_s29 + $0x20] sm:$0xff] %v458_v21  ;;  %506 = vst [vmem:[%s894_s29 + $0xa0] sm:$0xff] %v474_v22  ;;  %v461_v27 = vmax.f32 %v331_v23, 0.0  ;;  %v477_v28 = vmax.f32 %v411_v24, 0.0  ;;  %v326_v29 = vadd.f32 %v885_v48, %v325_v25  ;;  %v406_v30 = vadd.f32 %v885_v48, %v405_v26 }
  0xfd   : > { %v680_v31 = vpop.f32.mrf.mxu0  ;;  %v704_v32 = vpop.f32.mrf.mxu1 }
  0xfe   : > { %493 = vst [vmem:[%s894_s29 + $0x38] sm:$0xff] %v461_v27  ;;  %509 = vst [vmem:[%s894_s29 + $0xb8] sm:$0xff] %v477_v28  ;;  %v460_v33 = vmax.f32 %v326_v29, 0.0  ;;  %v476_v34 = vmax.f32 %v406_v30, 0.0  ;;  %v341_v35 = vadd.f32 %v680_v31, %v885_v48  ;;  %v421_v36 = vadd.f32 %v704_v32, %v885_v48 }
  0xff   : > { %v335_v37 = vpop.f32.mrf.mxu0  ;;  %v415_v38 = vpop.f32.mrf.mxu1 }
 0x100   : > { %492 = vst [vmem:[%s894_s29 + $0x30] sm:$0xff] %v460_v33  ;;  %508 = vst [vmem:[%s894_s29 + $0xb0] sm:$0xff] %v476_v34  ;;  %v463_v39 = vmax.f32 %v341_v35, 0.0  ;;  %v479_v40 = vmax.f32 %v421_v36, 0.0  ;;  %v336_v41 = vadd.f32 %v885_v48, %v335_v37  ;;  %v416_v42 = vadd.f32 %v885_v48, %v415_v38 }
 0x101   : > { %v683_v43 = vpop.f32.mrf.mxu0  ;;  %v707_v44 = vpop.f32.mrf.mxu1 }
 0x102   : > { %495 = vst [vmem:[%s894_s29 + $0x48] sm:$0xff] %v463_v39  ;;  %511 = vst [vmem:[%s894_s29 + $0xc8] sm:$0xff] %v479_v40  ;;  %v462_v45 = vmax.f32 %v336_v41, 0.0  ;;  %v478_v46 = vmax.f32 %v416_v42, 0.0  ;;  %v351_v47 = vadd.f32 %v683_v43, %v885_v48  ;;  %v431_v49 = vadd.f32 %v707_v44, %v885_v48 }
 0x103   : > { %v345_v50 = vpop.f32.mrf.mxu0  ;;  %v425_v51 = vpop.f32.mrf.mxu1 }
 0x104   : > { %494 = vst [vmem:[%s894_s29 + $0x40] sm:$0xff] %v462_v45  ;;  %510 = vst [vmem:[%s894_s29 + $0xc0] sm:$0xff] %v478_v46  ;;  %v465_v52 = vmax.f32 %v351_v47, 0.0  ;;  %v481_v53 = vmax.f32 %v431_v49, 0.0  ;;  %v346_v54 = vadd.f32 %v885_v48, %v345_v50  ;;  %v426_v55 = vadd.f32 %v885_v48, %v425_v51 }
 0x105   : > { %v686_v56 = vpop.f32.mrf.mxu0  ;;  %v710_v57 = vpop.f32.mrf.mxu1 }
 0x106   : > { %497 = vst [vmem:[%s894_s29 + $0x58] sm:$0xff] %v465_v52  ;;  %513 = vst [vmem:[%s894_s29 + $0xd8] sm:$0xff] %v481_v53  ;;  %v464_v58 = vmax.f32 %v346_v54, 0.0  ;;  %v480_v59 = vmax.f32 %v426_v55, 0.0  ;;  %v361_v60 = vadd.f32 %v686_v56, %v885_v48  ;;  %v441_v61 = vadd.f32 %v710_v57, %v885_v48 }
 0x107   : > { %v355_v62 = vpop.f32.mrf.mxu0  ;;  %v435_v63 = vpop.f32.mrf.mxu1 }
 0x108   : > { %496 = vst [vmem:[%s894_s29 + $0x50] sm:$0xff] %v464_v58  ;;  %512 = vst [vmem:[%s894_s29 + $0xd0] sm:$0xff] %v480_v59  ;;  %v467_v0 = vmax.f32 %v361_v60, 0.0  ;;  %v483_v1 = vmax.f32 %v441_v61, 0.0  ;;  %v356_v2 = vadd.f32 %v885_v48, %v355_v62  ;;  %v436_v3 = vadd.f32 %v885_v48, %v435_v63 }
 0x109   : > { %v689_v4 = vpop.f32.mrf.mxu0  ;;  %v713_v5 = vpop.f32.mrf.mxu1 }
 0x10a   : > { %499 = vst [vmem:[%s894_s29 + $0x68] sm:$0xff] %v467_v0  ;;  %515 = vst [vmem:[%s894_s29 + $0xe8] sm:$0xff] %v483_v1  ;;  %v466_v6 = vmax.f32 %v356_v2, 0.0  ;;  %v482_v7 = vmax.f32 %v436_v3, 0.0  ;;  %v371_v8 = vadd.f32 %v689_v4, %v885_v48  ;;  %v451_v9 = vadd.f32 %v713_v5, %v885_v48 }
 0x10b   : > { %v365_v10 = vpop.f32.mrf.mxu0  ;;  %v445_v11 = vpop.f32.mrf.mxu1 }
 0x10c   : > { %498 = vst [vmem:[%s894_s29 + $0x60] sm:$0xff] %v466_v6  ;;  %514 = vst [vmem:[%s894_s29 + $0xe0] sm:$0xff] %v482_v7  ;;  %v469_v12 = vmax.f32 %v371_v8, 0.0  ;;  %v485_v13 = vmax.f32 %v451_v9, 0.0  ;;  %v366_v14 = vadd.f32 %v885_v48, %v365_v10  ;;  %v446_v15 = vadd.f32 %v885_v48, %v445_v11 }
 0x10e   : > { %501 = vst [vmem:[%s894_s29 + $0x78] sm:$0xff] %v469_v12  ;;  %517 = vst [vmem:[%s894_s29 + $0xf8] sm:$0xff] %v485_v13  ;;  %v468_v16 = vmax.f32 %v366_v14, 0.0  ;;  %v484_v17 = vmax.f32 %v446_v15, 0.0 }
 0x110   : > { %500 = vst [vmem:[%s894_s29 + $0x70] sm:$0xff] %v468_v16  ;;  %516 = vst [vmem:[%s894_s29 + $0xf0] sm:$0xff] %v484_v17 }
 0x111 PF: > { %s13_s12 = sadd.s32 1, %s760_s12  }
 0x112   : > { %p10_p4 = scmp.ge.s32.totalorder %s13_s12, 4  }
 0x114   :  { %12 = sbr.rel (!%p10_p4) target bundleno = 1 (0x1), region = 62 }

// kernel: residual_forward.9
= control target key start
LH: loop header
LB: loop body
LE: loop exit
PB: predicated region body
PF: predicated region fallthrough
CT: control target
= control target key end

     0   :  { %s3777_s15 = smov 0   ;;  %s5527_s0 = inlined_call_operand.vmem [shape: f32[32,18,384], index: 0, kind: input, shape index: {}]   ;;  %s5528_s1 = inlined_call_operand.vmem [shape: f32[3,384,128], index: 1, kind: input, shape index: {}]   ;;  %s5529_s2 = inlined_call_operand.vmem [shape: f32[1,128], index: 2, kind: input, shape index: {}]   ;;  %s5530_s3 = inlined_call_operand.vmem [shape: f32[512,128], index: 3, kind: input, shape index: {}]   ;;  %s5531_s4 = inlined_call_operand.vmem [shape: f32[512,128], index: 4, kind: output, shape index: {}]  }
   0x1 LB: > { %s3191_s16 = sadd.s32 4294967295, %s3749_s15   ;;  %p3195_p0 = scmp.ge.s32.totalorder %s3749_s15, 1  ;;  %s3749_s15 = sphi %s3777_s15, %s14_s15  }
   0x2   : > { %p175_p1 = scmp.lt.s32.totalorder %s3749_s15, 3 }
   0x4   : > { %p176_p2 = pnand %p3195_p0, %p175_p1 }
   0x5   : > { %s3196_s7 = sshll.u32 (!%p176_p2), %s3191_s16, 4 }
   0x6   : > { %179 = sbr.rel (%p176_p2) target bundleno = 574 (0x23e), region = 36  ;;  %p208_p3 = scmp.lt.s32.totalorder (!%p176_p2), %s3196_s7, 31 }
   0xb   : > { %v3249_v0 = vld [vmem:[%s5528_s1 + $0x2f8] sm:$0xff]  ;;  %v3248_v2 = vld [vmem:[%s5528_s1 + $0x2f0] sm:$0xff]  ;;  %v3751_v3 = vmov 0.0   ;;  %v3247_v5 = vld [vmem:[%s5528_s1 + $0x2e8] sm:$0xff]  ;;  %s5533_s7 = smov (!%p208_p3, %s3196_s7), 31  ;;  %vm610_vm0 = vcmask 1046528  }
   0xc   : > { %v3217_v1 = vld [vmem:[%s5528_s1 + $0x1f8] sm:$0xff]  ;;  %996 = vmatprep.subr.mxu0 %v3751_v3  ;;  %3445 = vmatprep.subr.mxu1 %v3249_v0  ;;  %v3216_v4 = vld [vmem:[%s5528_s1 + $0x1f0] sm:$0xff]  ;;  %v3215_v6 = vld [vmem:[%s5528_s1 + $0x1e8] sm:$0xff]  ;;  %s3685_s6 = smul.u32 72, %s5533_s7  ;;  %vm2088_vm1 = vcmask 1045504  }
   0xd   : > { %997 = vmatpush1.msra.mxu0 %v3217_v1  ;;  %3446 = vmatpush3.msra.mxu1 %v3249_v0  ;;  %v3246_v7 = vld [vmem:[%s5528_s1 + $0x2e0] sm:$0xff]  ;;  %v3245_v9 = vld [vmem:[%s5528_s1 + $0x2d8] sm:$0xff]  ;;  %v3244_v11 = vld [vmem:[%s5528_s1 + $0x2d0] sm:$0xff] }
   0xe   : > { %998 = vmatprep.subr.mxu0 %v3751_v3  ;;  %3447 = vmatprep.subr.mxu1 %v3248_v2  ;;  %v3214_v8 = vld [vmem:[%s5528_s1 + $0x1e0] sm:$0xff]  ;;  %v3213_v10 = vld [vmem:[%s5528_s1 + $0x1d8] sm:$0xff]  ;;  %v3212_v12 = vld [vmem:[%s5528_s1 + $0x1d0] sm:$0xff]  ;;  %s3869_s19 = scalar_lea.vmem %s5527_s0, %s3685_s6 }
   0xf   : > { %999 = vmatpush1.msra.mxu0 %v3216_v4  ;;  %3448 = vmatpush3.msra.mxu1 %v3248_v2  ;;  %v3243_v13 = vld [vmem:[%s5528_s1 + $0x2c8] sm:$0xff]  ;;  %v3242_v15 = vld [vmem:[%s5528_s1 + $0x2c0] sm:$0xff]  ;;  %v3241_v17 = vld [vmem:[%s5528_s1 + $0x2b8] sm:$0xff] }
  0x10   : > { %1000 = vmatprep.subr.mxu0 %v3751_v3  ;;  %3449 = vmatprep.subr.mxu1 %v3247_v5  ;;  %v3211_v14 = vld [vmem:[%s5528_s1 + $0x1c8] sm:$0xff]  ;;  %v3210_v16 = vld [vmem:[%s5528_s1 + $0x1c0] sm:$0xff]  ;;  %v3209_v18 = vld [vmem:[%s5528_s1 + $0x1b8] sm:$0xff] }
  0x11   : > { %1001 = vmatpush1.msra.mxu0 %v3215_v6  ;;  %3450 = vmatpush3.msra.mxu1 %v3247_v5  ;;  %v3240_v19 = vld [vmem:[%s5528_s1 + $0x2b0] sm:$0xff]  ;;  %v3239_v21 = vld [vmem:[%s5528_s1 + $0x2a8] sm:$0xff]  ;;  %v3238_v23 = vld [vmem:[%s5528_s1 + $0x2a0] sm:$0xff] }
  0x12   : > { %1002 = vmatprep.subr.mxu0 %v3751_v3  ;;  %3451 = vmatprep.subr.mxu1 %v3246_v7  ;;  %v3208_v20 = vld [vmem:[%s5528_s1 + $0x1b0] sm:$0xff]  ;;  %v3207_v22 = vld [vmem:[%s5528_s1 + $0x1a8] sm:$0xff]  ;;  %v3206_v24 = vld [vmem:[%s5528_s1 + $0x1a0] sm:$0xff] }
  0x13   : > { %1003 = vmatpush1.msra.mxu0 %v3214_v8  ;;  %3452 = vmatpush3.msra.mxu1 %v3246_v7  ;;  %v3237_v25 = vld [vmem:[%s5528_s1 + $0x298] sm:$0xff]  ;;  %v231_v27 = vld [vmem:[%s3869_s19 + $0x28] sm:$0xff]  ;;  %v372_v28 = vld [vmem:[%s3869_s19 + $0x10] sm:$0xfe] }
  0x14   : > { %1004 = vmatprep.subr.mxu0 %v3751_v3  ;;  %3453 = vmatprep.subr.mxu1 %v3245_v9  ;;  %v3205_v26 = vld [vmem:[%s5528_s1 + $0x198] sm:$0xff]  ;;  %v3236_v29 = vld [vmem:[%s5528_s1 + $0x290] sm:$0xff]  ;;  %v375_v30 = vld [vmem:[%s3869_s19 + $0x40] sm:$0x1]  ;;  %v617_v33 = vrot.slane %v372_v28, 1  ;;  %v618_v34 = vrot.slane %v231_v27, 1 }
  0x15   : > { %1005 = vmatpush1.msra.mxu0 %v3213_v10  ;;  %3454 = vmatpush3.msra.mxu1 %v3245_v9  ;;  %v3204_v31 = vld [vmem:[%s5528_s1 + $0x190] sm:$0xff]  ;;  %v3235_v32 = vld [vmem:[%s5528_s1 + $0x288] sm:$0xff]  ;;  %v624_v36 = vrot.slane %v375_v30, 1  ;;  %v378_v38 = vld [vmem:[%s3869_s19 + $0x58] sm:$0xfe] }
  0x16   : > { %1006 = vmatprep.subr.mxu0 %v3751_v3  ;;  %3455 = vmatprep.subr.mxu1 %v3244_v11  ;;  %v3203_v35 = vld [vmem:[%s5528_s1 + $0x188] sm:$0xff]  ;;  %v237_v37 = vld [vmem:[%s3869_s19 + $0x70] sm:$0xff]  ;;  %v3234_v39 = vld [vmem:[%s5528_s1 + $0x280] sm:$0xff]  ;;  %v619_v42 = vsel %vm610_vm0, %v617_v33, %v618_v34  ;;  %v632_v43 = vrot.slane %v378_v38, 1 }
  0x17   : > { %1007 = vmatpush1.msra.mxu0 %v3212_v12  ;;  %3456 = vmatpush3.msra.mxu1 %v3244_v11  ;;  %v3202_v40 = vld [vmem:[%s5528_s1 + $0x180] sm:$0xff]  ;;  %v381_v41 = vld [vmem:[%s3869_s19 + $0x88] sm:$0x1]  ;;  %v633_v44 = vrot.slane %v237_v37, 1  ;;  %v625_v45 = vsel %vm610_vm0, %v618_v34, %v624_v36  ;;  %v3233_v46 = vld [vmem:[%s5528_s1 + $0x278] sm:$0xff] }
  0x18   : > { %1008 = vmatprep.subr.mxu0 %v3751_v3  ;;  %3457 = vmatprep.subr.mxu1 %v3243_v13  ;;  %v337_v47 = vld [vmem:[%s5528_s1 + $0x78] sm:$0xff]  ;;  %v639_v48 = vrot.slane %v381_v41, 1  ;;  %v384_v50 = vld [vmem:[%s3869_s19 + $0xa0] sm:$0xfe]  ;;  %v3232_v51 = vld [vmem:[%s5528_s1 + $0x270] sm:$0xff] }
  0x19   : > { %1009 = vmatpush1.msra.mxu0 %v3211_v14  ;;  %3458 = vmatpush3.msra.mxu1 %v3243_v13  ;;  %v243_v49 = vld [vmem:[%s3869_s19 + $0xb8] sm:$0xff]  ;;  %v634_v52 = vsel %vm610_vm0, %v632_v43, %v633_v44  ;;  %v387_v53 = vld [vmem:[%s3869_s19 + $0xd0] sm:$0x1]  ;;  %v647_v55 = vrot.slane %v384_v50, 1  ;;  %v3231_v58 = vld [vmem:[%s5528_s1 + $0x268] sm:$0xff] }
  0x1a   : > { %1010 = vmatprep.subr.mxu0 %v3751_v3  ;;  %3459 = vmatprep.subr.mxu1 %v3242_v15  ;;  %v336_v54 = vld [vmem:[%s5528_s1 + $0x70] sm:$0xff]  ;;  %v648_v56 = vrot.slane %v243_v49, 1  ;;  %v640_v57 = vsel %vm610_vm0, %v633_v44, %v639_v48  ;;  %v335_v59 = vld [vmem:[%s5528_s1 + $0x68] sm:$0xff]  ;;  %v654_v60 = vrot.slane %v387_v53, 1  ;;  %v249_v61 = vld [vmem:[%s3869_s19 + $0x100] sm:$0xff] }
  0x1b   : > { %1011 = vmatpush1.msra.mxu0 %v3210_v16  ;;  %3460 = vmatpush3.msra.mxu1 %v3242_v15  ;;  %v390_v62 = vld [vmem:[%s3869_s19 + $0xe8] sm:$0xfe]  ;;  %v3230_v63 = vld [vmem:[%s5528_s1 + $0x260] sm:$0xff]  ;;  %v393_v1 = vld [vmem:[%s3869_s19 + $0x118] sm:$0x1]  ;;  %v663_v5 = vrot.slane %v249_v61, 1 }
  0x1c   : > { %1012 = vmatprep.subr.mxu0 %v3751_v3  ;;  %3461 = vmatprep.subr.mxu1 %v3241_v17  ;;  %v649_v0 = vsel %vm610_vm0, %v647_v55, %v648_v56  ;;  %v334_v2 = vld [vmem:[%s5528_s1 + $0x60] sm:$0xff]  ;;  %v662_v4 = vrot.slane %v390_v62, 1  ;;  %v655_v6 = vsel %vm610_vm0, %v648_v56, %v654_v60  ;;  %v3229_v7 = vld [vmem:[%s5528_s1 + $0x258] sm:$0xff]  ;;  %v669_v9 = vrot.slane %v393_v1, 1  ;;  %v255_v10 = vld [vmem:[%s3869_s19 + $0x148] sm:$0xff] }
  0x1d   : > { %1013 = vmatpush1.msra.mxu0 %v3209_v18  ;;  %3462 = vmatpush3.msra.mxu1 %v3241_v17  ;;  %v333_v8 = vld [vmem:[%s5528_s1 + $0x58] sm:$0xff]  ;;  %v396_v11 = vld [vmem:[%s3869_s19 + $0x130] sm:$0xfe]  ;;  %v399_v14 = vld [vmem:[%s3869_s19 + $0x160] sm:$0x1]  ;;  %v678_v17 = vrot.slane %v255_v10, 1 }
  0x1e   : > { %1014 = vmatprep.subr.mxu0 %v3751_v3  ;;  %3463 = vmatprep.subr.mxu1 %v3240_v19  ;;  %v3228_v12 = vld [vmem:[%s5528_s1 + $0x250] sm:$0xff]  ;;  %v664_v13 = vsel %vm610_vm0, %v662_v4, %v663_v5  ;;  %v677_v16 = vrot.slane %v396_v11, 1  ;;  %v670_v18 = vsel %vm610_vm0, %v663_v5, %v669_v9  ;;  %v330_v27 = vld [vmem:[%s5528_s1 + $0x40] sm:$0xff]  ;;  %v267_v34 = vld [vmem:[%s3869_s19 + $0x1d8] sm:$0xff] }
  0x1f   : > { %1015 = vmatpush1.msra.mxu0 %v3208_v20  ;;  %3464 = vmatpush3.msra.mxu1 %v3240_v19  ;;  %v332_v15 = vld [vmem:[%s5528_s1 + $0x50] sm:$0xff]  ;;  %v3227_v19 = vld [vmem:[%s5528_s1 + $0x248] sm:$0xff]  ;;  %v708_v41 = vrot.slane %v267_v34, 1  ;;  %v3222_v48 = vld [vmem:[%s5528_s1 + $0x220] sm:$0xff] }
  0x20   : > { %1016 = vmatprep.subr.mxu0 %v3751_v3  ;;  %3465 = vmatprep.subr.mxu1 %v3239_v21  ;;  %v331_v20 = vld [vmem:[%s5528_s1 + $0x48] sm:$0xff]  ;;  %v3224_v36 = vld [vmem:[%s5528_s1 + $0x230] sm:$0xff]  ;;  %v417_v50 = vld [vmem:[%s3869_s19 + $0x238] sm:$0x1] }
  0x21   : > { %1017 = vmatpush1.msra.mxu0 %v3207_v22  ;;  %3466 = vmatpush3.msra.mxu1 %v3239_v21  ;;  %v684_v21 = vrot.slane %v399_v14, 1  ;;  %v261_v22 = vld [vmem:[%s3869_s19 + $0x190] sm:$0xff]  ;;  %v3223_v43 = vld [vmem:[%s5528_s1 + $0x228] sm:$0xff]  ;;  %v3221_v55 = vld [vmem:[%s5528_s1 + $0x218] sm:$0xff] }
  0x22   : > { %1018 = vmatprep.subr.mxu0 %v3751_v3  ;;  %3467 = vmatprep.subr.mxu1 %v3238_v23  ;;  %v411_v38 = vld [vmem:[%s3869_s19 + $0x1f0] sm:$0x1]  ;;  %v327_v44 = vld [vmem:[%s5528_s1 + $0x28] sm:$0xff]  ;;  %v325_v56 = vld [vmem:[%s5528_s1 + $0x18] sm:$0xff] }
  0x23   : > { %1019 = vmatpush1.msra.mxu0 %v3206_v24  ;;  %3468 = vmatpush3.msra.mxu1 %v3238_v23  ;;  %v402_v23 = vld [vmem:[%s3869_s19 + $0x178] sm:$0xfe]  ;;  %v3226_v24 = vld [vmem:[%s5528_s1 + $0x240] sm:$0xff]  ;;  %v685_v30 = vsel %vm610_vm0, %v678_v17, %v684_v21  ;;  %v3220_v60 = vld [vmem:[%s5528_s1 + $0x210] sm:$0xff] }
  0x24   : > { %1020 = vmatprep.subr.mxu0 %v3751_v3  ;;  %3469 = vmatprep.subr.mxu1 %v3237_v25  ;;  %v692_v28 = vrot.slane %v402_v23, 1  ;;  %v279_v61 = vld [vmem:[%s3869_s19 + $0x268] sm:$0xff]  ;;  %v420_v62 = vld [vmem:[%s3869_s19 + $0x250] sm:$0xfe]  ;;  %v370_v1 = vld [vmem:[%s3869_s19] sm:$0xfe] }
  0x25   : > { %1021 = vmatpush1.msra.mxu0 %v3205_v26  ;;  %3470 = vmatpush3.msra.mxu1 %v3237_v25  ;;  %v679_v25 = vsel %vm610_vm0, %v677_v16, %v678_v17  ;;  %v405_v26 = vld [vmem:[%s3869_s19 + $0x1a8] sm:$0x1]  ;;  %v324_v4 = vld [vmem:[%s5528_s1 + $0x10] sm:$0xff]  ;;  %v737_v9 = vrot.slane %v420_v62, 1  ;;  %v738_v10 = vrot.slane %v279_v61, 1 }
  0x26   : > { %1022 = vmatprep.subr.mxu0 %v3751_v3  ;;  %3471 = vmatprep.subr.mxu1 %v3236_v29  ;;  %v699_v33 = vrot.slane %v405_v26, 1  ;;  %v4070_v11 = vld [vmem:[%s3869_s19 + $0x2b0] sm:$0xff]  ;;  %v323_v14 = vld [vmem:[%s5528_s1 + $0x8] sm:$0xff]  ;;  %v322_v26 = vld [vmem:[%s5528_s1] sm:$0xff] }
  0x27   : > { %1023 = vmatpush1.msra.mxu0 %v3204_v31  ;;  %3472 = vmatpush3.msra.mxu1 %v3236_v29  ;;  %v693_v29 = vrot.slane %v261_v22, 1  ;;  %v3225_v31 = vld [vmem:[%s5528_s1 + $0x238] sm:$0xff]  ;;  %v753_v23 = vrot.slane %v4070_v11, 1  ;;  %v4151_v11 = vld [vmem:[%s3869_s19 + $0xa8] sm:$0xff] }
  0x28   : > { %1024 = vmatprep.subr.mxu0 %v3751_v3  ;;  %3473 = vmatprep.subr.mxu1 %v3235_v32 }
  0x29   : > { %1025 = vmatpush1.msra.mxu0 %v3203_v35  ;;  %3474 = vmatpush3.msra.mxu1 %v3235_v32  ;;  %v329_v32 = vld [vmem:[%s5528_s1 + $0x38] sm:$0xff]  ;;  %v408_v35 = vld [vmem:[%s3869_s19 + $0x1c0] sm:$0xfe]  ;;  %v694_v37 = vsel %vm610_vm0, %v692_v28, %v693_v29  ;;  %v377_v28 = vld [vmem:[%s3869_s19 + $0x50] sm:$0xfe] }
  0x2a   : > { %1026 = vmatprep.subr.mxu0 %v3751_v3  ;;  %3475 = vmatprep.subr.mxu1 %v3234_v39 }
  0x2b   : > { %1027 = vmatpush1.msra.mxu0 %v3202_v40  ;;  %3476 = vmatpush3.msra.mxu1 %v3234_v39  ;;  %v328_v39 = vld [vmem:[%s5528_s1 + $0x30] sm:$0xff]  ;;  %v707_v40 = vrot.slane %v408_v35, 1 }
  0x2c   : > { %3477 = vmatprep.mubr.f32.mxu1 %v619_v42  ;;  %1028 = vmatprep.subr.mxu0 %v3751_v3  ;;  %v700_v42 = vsel %vm610_vm0, %v693_v29, %v699_v33  ;;  %v432_v33 = vld [vmem:[%s3869_s19 + $0x2e0] sm:$0xfe] }
  0x2d   : > { %3478 = vmatmul.mubr.f32.vlgmr.msra.gmra.mxu1 %v625_v45  ;;  %1446 = vmatprep.subr.mxu1 %v3751_v3  ;;  %v714_v45 = vrot.slane %v411_v38, 1  ;;  %v709_v49 = vsel %vm610_vm0, %v707_v40, %v708_v41  ;;  %v353_v38 = vld [vmem:[%s5528_s1 + $0xf8] sm:$0xff]  ;;  %v629_v40 = vrot.slane %v377_v28, 1 }
  0x2e   : > { %1029 = vmatpush2.msra.mxu0 %v3233_v46  ;;  %1447 = vmatpush1.msra.mxu1 %v337_v47  ;;  %v273_v46 = vld [vmem:[%s3869_s19 + $0x220] sm:$0xff]  ;;  %v414_v47 = vld [vmem:[%s3869_s19 + $0x208] sm:$0xfe]  ;;  %v450_v28 = vld [vmem:[%s3869_s19 + $0x3b8] sm:$0xfe] }
  0x2f   : > { %1030 = vmatprep.subr.mxu0 %v3751_v3  ;;  %1448 = vmatprep.subr.mxu1 %v3751_v3  ;;  %v723_v53 = vrot.slane %v273_v46, 1  ;;  %v4118_v46 = vld [vmem:[%s5528_s1 + $0x178] sm:$0xff] }
  0x30   : > { %1031 = vmatpush2.msra.mxu0 %v3232_v51  ;;  %3480 = vmatprep.mubr.f32.mxu1 %v634_v52  ;;  %v326_v51 = vld [vmem:[%s5528_s1 + $0x20] sm:$0xff]  ;;  %v722_v52 = vrot.slane %v414_v47, 1  ;;  %v352_v47 = vld [vmem:[%s5528_s1 + $0xf0] sm:$0xff] }
  0x31   : > { %1449 = vmatpush1.msra.mxu1 %v336_v54  ;;  %1032 = vmatprep.subr.mxu0 %v3751_v3  ;;  %v715_v54 = vsel %vm610_vm0, %v708_v41, %v714_v45  ;;  %v380_v45 = vld [vmem:[%s3869_s19 + $0x80] sm:$0x1] }
  0x32   : > { %3481 = vmatmul.mubr.f32.gmra.mxu1 %v640_v57  ;;  %1450 = vmatprep.subr.mxu1 %v3751_v3  ;;  %v729_v57 = vrot.slane %v417_v50, 1 }
  0x33   : > { %1033 = vmatpush2.msra.mxu0 %v3231_v58  ;;  %1451 = vmatpush1.msra.mxu1 %v335_v59  ;;  %v4045_v58 = vld [vmem:[%s3869_s19 + $0x20] sm:$0xff]  ;;  %v371_v59 = vld [vmem:[%s3869_s19 + $0x8] sm:$0xfe] }
  0x34   : > { %1034 = vmatprep.subr.mxu0 %v3751_v3  ;;  %1452 = vmatprep.subr.mxu1 %v3751_v3  ;;  %v614_v5 = vrot.slane %v371_v59, 1  ;;  %v637_v59 = vrot.slane %v380_v45, 1  ;;  %v315_v45 = vld [vmem:[%s3869_s19 + $0x418] sm:$0xff] }
  0x35   : > { %1035 = vmatpush2.msra.mxu0 %v3230_v63  ;;  %3483 = vmatprep.mubr.f32.mxu1 %v649_v0  ;;  %v724_v63 = vsel %vm610_vm0, %v722_v52, %v723_v53  ;;  %v4057_v0 = vld [vmem:[%s3869_s19 + $0x18] sm:$0xff]  ;;  %v438_v52 = vld [vmem:[%s3869_s19 + $0x328] sm:$0xfe] }
  0x36   : > { %1453 = vmatpush1.msra.mxu1 %v334_v2  ;;  %1036 = vmatprep.subr.mxu0 %v3751_v3  ;;  %v423_v2 = vld [vmem:[%s3869_s19 + $0x280] sm:$0x1]  ;;  %v612_v16 = vrot.slane %v4057_v0, 1  ;;  %v782_v62 = vrot.slane %v438_v52, 1  ;;  %v345_v52 = vld [vmem:[%s5528_s1 + $0xb8] sm:$0xff] }
  0x37   : > { %3484 = vmatmul.mubr.f32.gmra.mxu1 %v655_v6  ;;  %1454 = vmatprep.subr.mxu1 %v3751_v3  ;;  %v615_v6 = vrot.slane %v4045_v58, 1  ;;  %v744_v17 = vrot.slane %v423_v2, 1  ;;  %v383_v2 = vld [vmem:[%s3869_s19 + $0x98] sm:$0xfe] }
  0x38   : > { %1037 = vmatpush2.msra.mxu0 %v3229_v7  ;;  %1455 = vmatpush1.msra.mxu1 %v333_v8  ;;  %v374_v7 = vld [vmem:[%s3869_s19 + $0x38] sm:$0x1]  ;;  %v730_v8 = vsel %vm610_vm0, %v723_v53, %v729_v57 }
  0x39   : > { %1038 = vmatprep.subr.mxu0 %v3751_v3  ;;  %1456 = vmatprep.subr.mxu1 %v3751_v3  ;;  %v616_v21 = vsel %vm610_vm0, %v614_v5, %v615_v6 }
  0x3a   : > { %1039 = vmatpush2.msra.mxu0 %v3228_v12  ;;  %3486 = vmatprep.mubr.f32.mxu1 %v664_v13  ;;  %v426_v12 = vld [vmem:[%s3869_s19 + $0x298] sm:$0xfe]  ;;  %v3219_v13 = vld [vmem:[%s5528_s1 + $0x208] sm:$0xff] }
  0x3b   : > { %1457 = vmatpush1.msra.mxu1 %v332_v15  ;;  %1040 = vmatprep.subr.mxu0 %v3751_v3  ;;  %v611_v15 = vrot.slane %v370_v1, 1  ;;  %v752_v22 = vrot.slane %v426_v12, 1  ;;  %v4139_v1 = vld [vmem:[%s3869_s19 + $0xb0] sm:$0xff] }
  0x3c   : > { %3487 = vmatmul.mubr.f32.gmra.mxu1 %v670_v18  ;;  %1458 = vmatprep.subr.mxu1 %v3751_v3  ;;  %v622_v18 = vrot.slane %v374_v7, 1  ;;  %v303_v7 = vld [vmem:[%s3869_s19 + $0x388] sm:$0xff]  ;;  %v382_v12 = vld [vmem:[%s3869_s19 + $0x90] sm:$0xfe] }
  0x3d   : > { %1041 = vmatpush2.msra.mxu0 %v3227_v19  ;;  %1459 = vmatpush1.msra.mxu1 %v331_v20  ;;  %v373_v19 = vld [vmem:[%s3869_s19 + $0x30] sm:$0x1]  ;;  %v3218_v20 = vld [vmem:[%s5528_s1 + $0x200] sm:$0xff]  ;;  %v613_v29 = vsel %vm610_vm0, %v611_v15, %v612_v16  ;;  %v644_v15 = vrot.slane %v383_v2, 1 }
  0x3e   : > { %1042 = vmatprep.subr.mxu0 %v3751_v3  ;;  %1460 = vmatprep.subr.mxu1 %v3751_v3  ;;  %v623_v34 = vsel %vm610_vm0, %v615_v6, %v622_v18 }
  0x3f   : > { %1043 = vmatpush2.msra.mxu0 %v3226_v24  ;;  %3489 = vmatprep.mubr.f32.mxu1 %v679_v25  ;;  %v429_v24 = vld [vmem:[%s3869_s19 + $0x2c8] sm:$0x1]  ;;  %v739_v25 = vsel %vm610_vm0, %v737_v9, %v738_v10 }
  0x40   : > { %1461 = vmatpush1.msra.mxu1 %v330_v27  ;;  %1044 = vmatprep.subr.mxu0 %v3751_v3  ;;  %v4094_v27 = vld [vmem:[%s3869_s19 + $0x68] sm:$0xff]  ;;  %v759_v35 = vrot.slane %v429_v24, 1  ;;  %v641_v24 = vrot.slane %v382_v12, 1 }
  0x41   : > { %3490 = vmatmul.mubr.f32.gmra.mxu1 %v685_v30  ;;  %1462 = vmatprep.subr.mxu1 %v3751_v3  ;;  %v745_v30 = vsel %vm610_vm0, %v738_v10, %v744_v17  ;;  %v630_v41 = vrot.slane %v4094_v27, 1  ;;  %v447_v17 = vld [vmem:[%s3869_s19 + $0x3a0] sm:$0x1] }
  0x42   : > { %1045 = vmatpush2.msra.mxu0 %v3225_v31  ;;  %1463 = vmatpush1.msra.mxu1 %v329_v32  ;;  %v620_v31 = vrot.slane %v373_v19, 1  ;;  %v291_v32 = vld [vmem:[%s3869_s19 + $0x2f8] sm:$0xff]  ;;  %v760_v53 = vsel %vm610_vm0, %v753_v23, %v759_v35  ;;  %v453_v35 = vld [vmem:[%s3869_s19 + $0x3e8] sm:$0x1] }
  0x43   : > { %1046 = vmatprep.subr.mxu0 %v3751_v3  ;;  %1464 = vmatprep.subr.mxu1 %v3751_v3  ;;  %v631_v57 = vsel %vm610_vm0, %v629_v40, %v630_v41  ;;  %v4181_v40 = vld [vmem:[%s3869_s19 + $0xf8] sm:$0xff] }
  0x44   : > { %1047 = vmatpush2.msra.mxu0 %v3224_v36  ;;  %3492 = vmatprep.mubr.f32.mxu1 %v694_v37  ;;  %v4105_v36 = vld [vmem:[%s3869_s19 + $0x60] sm:$0xff]  ;;  %v376_v37 = vld [vmem:[%s3869_s19 + $0x48] sm:$0xfe] }
  0x45   : > { %1465 = vmatpush1.msra.mxu1 %v328_v39  ;;  %1048 = vmatprep.subr.mxu0 %v3751_v3  ;;  %v754_v39 = vsel %vm610_vm0, %v752_v22, %v753_v23  ;;  %v627_v50 = vrot.slane %v4105_v36, 1  ;;  %v348_v22 = vld [vmem:[%s5528_s1 + $0xd0] sm:$0xff] }
  0x46   : > { %3493 = vmatmul.mubr.f32.gmra.mxu1 %v700_v42  ;;  %1466 = vmatprep.subr.mxu1 %v3751_v3  ;;  %v435_v42 = vld [vmem:[%s3869_s19 + $0x310] sm:$0x1] }
  0x47   : > { %1049 = vmatpush2.msra.mxu0 %v3223_v43  ;;  %1467 = vmatpush1.msra.mxu1 %v327_v44  ;;  %v767_v43 = vrot.slane %v432_v33, 1  ;;  %v768_v44 = vrot.slane %v291_v32, 1  ;;  %v347_v32 = vld [vmem:[%s5528_s1 + $0xc8] sm:$0xff] }
  0x48   : > { %1050 = vmatprep.subr.mxu0 %v3751_v3  ;;  %1468 = vmatprep.subr.mxu1 %v3751_v3 }
  0x49   : > { %1051 = vmatpush2.msra.mxu0 %v3222_v48  ;;  %3495 = vmatprep.mubr.f32.mxu1 %v709_v49  ;;  %v621_v48 = vsel %vm610_vm0, %v612_v16, %v620_v31  ;;  %v626_v49 = vrot.slane %v376_v37, 1  ;;  %v769_v61 = vsel %vm610_vm0, %v767_v43, %v768_v44  ;;  %v645_v16 = vrot.slane %v4139_v1, 1  ;;  %v385_v31 = vld [vmem:[%s3869_s19 + $0xc0] sm:$0x1] }
  0x4a   : > { %1469 = vmatpush1.msra.mxu1 %v326_v51  ;;  %1052 = vmatprep.subr.mxu0 %v3751_v3  ;;  %v297_v51 = vld [vmem:[%s3869_s19 + $0x340] sm:$0xff] }
  0x4b   : > { %3496 = vmatmul.mubr.f32.gmra.mxu1 %v715_v54  ;;  %1470 = vmatprep.subr.mxu1 %v3751_v3  ;;  %v774_v54 = vrot.slane %v435_v42, 1  ;;  %v628_v5 = vsel %vm610_vm0, %v626_v49, %v627_v50  ;;  %v646_v33 = vsel %vm610_vm0, %v644_v15, %v645_v16  ;;  %v346_v42 = vld [vmem:[%s5528_s1 + $0xc0] sm:$0xff]  ;;  %v819_v49 = vrot.slane %v453_v35, 1 }
  0x4c   : > { %1053 = vmatpush2.msra.mxu0 %v3221_v55  ;;  %1471 = vmatpush1.msra.mxu1 %v325_v56  ;;  %v379_v55 = vld [vmem:[%s3869_s19 + $0x78] sm:$0x1]  ;;  %v351_v56 = vld [vmem:[%s5528_s1 + $0xe8] sm:$0xff] }
  0x4d   : > { %1054 = vmatprep.subr.mxu0 %v3751_v3  ;;  %1472 = vmatprep.subr.mxu1 %v3751_v3  ;;  %v635_v6 = vrot.slane %v379_v55, 1  ;;  %v775_v9 = vsel %vm610_vm0, %v768_v44, %v774_v54  ;;  %v650_v44 = vrot.slane %v385_v31, 1  ;;  %v660_v55 = vrot.slane %v4181_v40, 1  ;;  %v394_v31 = vld [vmem:[%s3869_s19 + $0x120] sm:$0xfe] }
  0x4e   : > { %1055 = vmatpush2.msra.mxu0 %v3220_v60  ;;  %3498 = vmatprep.mubr.f32.mxu1 %v724_v63  ;;  %v441_v60 = vld [vmem:[%s3869_s19 + $0x358] sm:$0x1]  ;;  %v783_v63 = vrot.slane %v297_v51, 1  ;;  %v388_v51 = vld [vmem:[%s3869_s19 + $0xd8] sm:$0xfe] }
  0x4f   : > { %1473 = vmatpush1.msra.mxu1 %v324_v4  ;;  %1056 = vmatprep.subr.mxu0 %v3751_v3  ;;  %v350_v4 = vld [vmem:[%s5528_s1 + $0xe0] sm:$0xff]  ;;  %v789_v10 = vrot.slane %v441_v60, 1  ;;  %v636_v23 = vsel %vm610_vm0, %v627_v50, %v635_v6  ;;  %v4193_v50 = vld [vmem:[%s3869_s19 + $0xf0] sm:$0xff]  ;;  %v828_v60 = vrot.slane %v315_v45, 1  ;;  %v656_v2 = vrot.slane %v388_v51, 1  ;;  %v227_v45 = vld [vmem:[%s3869_s19 + $0x8] sm:$0xff] }
  0x50   : > { %3499 = vmatmul.mubr.f32.gmra.mxu1 %v730_v8  ;;  %1474 = vmatprep.subr.mxu1 %v3751_v3  ;;  %v444_v8 = vld [vmem:[%s3869_s19 + $0x370] sm:$0xfe]  ;;  %v784_v18 = vsel %vm610_vm0, %v782_v62, %v783_v63  ;;  %v462_v6 = vld [vmem:[%s3869_s19 + $0x448] sm:$0xfe] }
  0x51   : > { %1057 = vmatpush2.msra.mxu0 %v3219_v13  ;;  %1475 = vmatpush1.msra.mxu1 %v323_v14  ;;  %v349_v13 = vld [vmem:[%s5528_s1 + $0xd8] sm:$0xff]  ;;  %v638_v14 = vsel %vm610_vm0, %v630_v41, %v637_v59  ;;  %v797_v19 = vrot.slane %v444_v8, 1  ;;  %v389_v41 = vld [vmem:[%s3869_s19 + $0xe0] sm:$0xfe]  ;;  %v344_v62 = vld [vmem:[%s5528_s1 + $0xb0] sm:$0xff] }
  0x52   : > { %1058 = vmatprep.subr.mxu0 %v3751_v3  ;;  %1476 = vmatprep.subr.mxu1 %v3751_v3  ;;  %v659_v54 = vrot.slane %v389_v41, 1  ;;  %v339_v41 = vld [vmem:[%s5528_s1 + $0x88] sm:$0xff] }
  0x53   : > { %1059 = vmatpush2.msra.mxu0 %v3218_v20  ;;  %1060 = vmatprep.mubr.f32.mxu0 %v616_v21  ;;  %v798_v20 = vrot.slane %v303_v7, 1  ;;  %v386_v21 = vld [vmem:[%s3869_s19 + $0xc8] sm:$0x1] }
  0x54   : > { %3501 = vmatprep.mubr.f32.mxu1 %v739_v25  ;;  %1477 = vmatpush1.msra.mxu1 %v322_v26  ;;  %v642_v25 = vrot.slane %v4151_v11, 1  ;;  %v309_v26 = vld [vmem:[%s3869_s19 + $0x3d0] sm:$0xff]  ;;  %v661_v12 = vsel %vm610_vm0, %v659_v54, %v660_v55 }
  0x55   : > { %1061 = vmatmul.mubr.f32.vlgmr.msra.gmra.mxu0 %v613_v29  ;;  %3502 = vmatmul.mubr.f32.gmra.mxu1 %v745_v30  ;;  %v790_v29 = vsel %vm610_vm0, %v783_v63, %v789_v10  ;;  %v804_v30 = vrot.slane %v447_v17, 1  ;;  %v799_v37 = vsel %vm610_vm0, %v797_v19, %v798_v20  ;;  %v343_v10 = vld [vmem:[%s5528_s1 + $0xa8] sm:$0xff] }
  0x56   : > { %1478 = vmatprep.subr.mxu1 %v3751_v3  ;;  %1065 = vmatprep.mubr.f32.mxu0 %v623_v34  ;;  %v652_v34 = vrot.slane %v386_v21, 1  ;;  %v643_v43 = vsel %vm610_vm0, %v641_v24, %v642_v25  ;;  %v651_v63 = vsel %vm610_vm0, %v642_v25, %v650_v44  ;;  %v395_v19 = vld [vmem:[%s3869_s19 + $0x128] sm:$0xfe]  ;;  %v341_v25 = vld [vmem:[%s5528_s1 + $0x98] sm:$0xff]  ;;  %v397_v44 = vld [vmem:[%s3869_s19 + $0x150] sm:$0x1] }
  0x57   : > { %1479 = vmatpush2.msra.mxu1 %v353_v38  ;;  %3504 = vmatprep.mubr.f32.mxu1 %v754_v39  ;;  %v812_v38 = vrot.slane %v450_v28, 1  ;;  %v813_v39 = vrot.slane %v309_v26, 1  ;;  %v674_v28 = vrot.slane %v395_v19, 1  ;;  %v4310_v19 = vld [vmem:[%s3869_s19 + $0x1c8] sm:$0xff] }
  0x58   : > { %1480 = vmatprep.subr.mxu1 %v3751_v3  ;;  %3525 = vmatprep.subr.mxu0 %v4118_v46 }
  0x59   : > { %1481 = vmatpush2.msra.mxu1 %v352_v47  ;;  %1066 = vmatmul.mubr.f32.gmra.mxu0 %v621_v48  ;;  %v456_v47 = vld [vmem:[%s3869_s19 + $0x400] sm:$0xfe]  ;;  %v805_v48 = vsel %vm610_vm0, %v798_v20, %v804_v30  ;;  %v820_v7 = vsel %vm610_vm0, %v813_v39, %v819_v49  ;;  %v4239_v30 = vld [vmem:[%s3869_s19 + $0x138] sm:$0xff] }
  0x5a   : > { %3505 = vmatmul.mubr.f32.gmra.mxu1 %v760_v53  ;;  %1482 = vmatprep.subr.mxu1 %v3751_v3  ;;  %v653_v53 = vsel %vm610_vm0, %v645_v16, %v652_v34  ;;  %v827_v59 = vrot.slane %v456_v47, 1  ;;  %v842_v16 = vrot.slane %v462_v6, 1  ;;  %v342_v20 = vld [vmem:[%s5528_s1 + $0xa0] sm:$0xff]  ;;  %v340_v34 = vld [vmem:[%s5528_s1 + $0x90] sm:$0xff]  ;;  %v4259_v47 = vld [vmem:[%s3869_s19 + $0x188] sm:$0xff] }
  0x5b   : > { %1483 = vmatpush2.msra.mxu1 %v351_v56  ;;  %1070 = vmatprep.mubr.f32.mxu0 %v631_v57  ;;  %v459_v56 = vld [vmem:[%s3869_s19 + $0x430] sm:$0x1]  ;;  %v814_v57 = vsel %vm610_vm0, %v812_v38, %v813_v39  ;;  %v671_v38 = vrot.slane %v394_v31, 1  ;;  %v672_v39 = vrot.slane %v4239_v30, 1  ;;  %v338_v49 = vld [vmem:[%s5528_s1 + $0x80] sm:$0xff] }
  0x5c   : > { %1484 = vmatprep.subr.mxu1 %v3751_v3  ;;  %3507 = vmatprep.mubr.f32.mxu1 %v769_v61  ;;  %v392_v61 = vld [vmem:[%s3869_s19 + $0x110] sm:$0x1]  ;;  %v834_v8 = vrot.slane %v459_v56, 1  ;;  %v829_v15 = vsel %vm610_vm0, %v827_v59, %v828_v60  ;;  %v690_v56 = vrot.slane %v4259_v47, 1  ;;  %v400_v59 = vld [vmem:[%s3869_s19 + $0x168] sm:$0xfe] }
  0x5d   : > { %1485 = vmatpush2.msra.mxu1 %v350_v4  ;;  %1071 = vmatmul.mubr.f32.gmra.mxu0 %v628_v5  ;;  %v657_v4 = vrot.slane %v4193_v50, 1  ;;  %v321_v5 = vld [vmem:[%s3869_s19 + $0x460] sm:$0xff]  ;;  %v673_v51 = vsel %vm610_vm0, %v671_v38, %v672_v39 }
  0x5e   : > { %3508 = vmatmul.mubr.f32.gmra.mxu1 %v775_v9  ;;  %1486 = vmatprep.subr.mxu1 %v3751_v3  ;;  %v391_v9 = vld [vmem:[%s3869_s19 + $0x108] sm:$0x1]  ;;  %v843_v17 = vrot.slane %v321_v5, 1  ;;  %v409_v31 = vld [vmem:[%s3869_s19 + $0x1e0] sm:$0x1] }
  0x5f   : > { %1487 = vmatpush2.msra.mxu1 %v349_v13  ;;  %1075 = vmatprep.mubr.f32.mxu0 %v638_v14  ;;  %v667_v13 = vrot.slane %v392_v61, 1  ;;  %v465_v14 = vld [vmem:[%s3869_s19 + $0x478] sm:$0x1]  ;;  %v658_v21 = vsel %vm610_vm0, %v656_v2, %v657_v4  ;;  %v404_v61 = vld [vmem:[%s3869_s19 + $0x1a0] sm:$0x1]  ;;  %v710_v38 = vrot.slane %v409_v31, 1 }
  0x60   : > { %1488 = vmatprep.subr.mxu1 %v3751_v3  ;;  %3510 = vmatprep.mubr.f32.mxu1 %v784_v18  ;;  %v4223_v18 = vld [vmem:[%s3869_s19 + $0x140] sm:$0xff]  ;;  %v849_v24 = vrot.slane %v465_v14, 1  ;;  %v697_v6 = vrot.slane %v404_v61, 1  ;;  %v3259_v61 = vld [vmem:[%s5528_s1 + $0x348] sm:$0xff] }
  0x61   : > { %1489 = vmatpush2.msra.mxu1 %v348_v22  ;;  %1076 = vmatmul.mubr.f32.gmra.mxu0 %v636_v23  ;;  %v665_v22 = vrot.slane %v391_v9, 1  ;;  %v835_v23 = vsel %vm610_vm0, %v828_v60, %v834_v8  ;;  %v668_v26 = vsel %vm610_vm0, %v660_v55, %v667_v13  ;;  %v3265_v60 = vld [vmem:[%s5528_s1 + $0x378] sm:$0xff]  ;;  %v233_v8 = vld [vmem:[%s3869_s19 + $0x50] sm:$0xff]  ;;  %v232_v13 = vld [vmem:[%s3869_s19 + $0x48] sm:$0xff] }
  0x62   : > { %3511 = vmatmul.mubr.f32.gmra.mxu1 %v790_v29  ;;  %1490 = vmatprep.subr.mxu1 %v3751_v3  ;;  %v675_v29 = vrot.slane %v4223_v18, 1  ;;  %v4295_v9 = vld [vmem:[%s3869_s19 + $0x1d0] sm:$0xff]  ;;  %v428_v31 = vld [vmem:[%s3869_s19 + $0x2c0] sm:$0x1] }
  0x63   : > { %1491 = vmatpush2.msra.mxu1 %v347_v32  ;;  %1080 = vmatprep.mubr.f32.mxu0 %v646_v33  ;;  %v844_v32 = vsel %vm610_vm0, %v842_v16, %v843_v17  ;;  %v398_v33 = vld [vmem:[%s3869_s19 + $0x158] sm:$0x1]  ;;  %v666_v35 = vsel %vm610_vm0, %v657_v4, %v665_v22  ;;  %v3264_v4 = vld [vmem:[%s5528_s1 + $0x370] sm:$0xff]  ;;  %v698_v16 = vsel %vm610_vm0, %v690_v56, %v697_v6  ;;  %v3262_v22 = vld [vmem:[%s5528_s1 + $0x360] sm:$0xff] }
  0x64   : > { %1492 = vmatprep.subr.mxu1 %v3751_v3  ;;  %3513 = vmatprep.mubr.f32.mxu1 %v799_v37  ;;  %v850_v37 = vsel %vm610_vm0, %v843_v17, %v849_v24  ;;  %v705_v17 = vrot.slane %v4295_v9, 1  ;;  %v4376_v6 = vld [vmem:[%s3869_s19 + $0x258] sm:$0xff] }
  0x65   : > { %1493 = vmatpush2.msra.mxu1 %v346_v42  ;;  %1081 = vmatmul.mubr.f32.gmra.mxu0 %v643_v43  ;;  %v676_v42 = vsel %vm610_vm0, %v674_v28, %v675_v29  ;;  %v682_v43 = vrot.slane %v398_v33, 1  ;;  %v239_v28 = vld [vmem:[%s3869_s19 + $0x98] sm:$0xff] }
  0x66   : > { %3514 = vmatmul.mubr.f32.gmra.mxu1 %v805_v48  ;;  %1494 = vmatprep.subr.mxu1 %v3751_v3  ;;  %v401_v48 = vld [vmem:[%s3869_s19 + $0x170] sm:$0xfe]  ;;  %v4329_v33 = vld [vmem:[%s3869_s19 + $0x218] sm:$0xff] }
  0x67   : > { %1495 = vmatpush2.msra.mxu1 %v345_v52  ;;  %1085 = vmatprep.mubr.f32.mxu0 %v653_v53  ;;  %v226_v52 = vld [vmem:[%s3869_s19] sm:$0xff]  ;;  %v680_v53 = vrot.slane %v397_v44, 1  ;;  %v683_v54 = vsel %vm610_vm0, %v675_v29, %v682_v43  ;;  %v689_v55 = vrot.slane %v401_v48, 1  ;;  %v412_v43 = vld [vmem:[%s3869_s19 + $0x1f8] sm:$0xfe]  ;;  %v3260_v48 = vld [vmem:[%s5528_s1 + $0x350] sm:$0xff] }
  0x68   : > { %1496 = vmatprep.subr.mxu1 %v3751_v3  ;;  %3516 = vmatprep.mubr.f32.mxu1 %v814_v57  ;;  %v4272_v57 = vld [vmem:[%s3869_s19 + $0x180] sm:$0xff]  ;;  %v416_v44 = vld [vmem:[%s3869_s19 + $0x230] sm:$0x1] }
  0x69   : > { %1497 = vmatpush2.msra.mxu1 %v344_v62  ;;  %1086 = vmatmul.mubr.f32.gmra.mxu0 %v651_v63  ;;  %v368_v62 = vld [vmem:[%s5528_s1 + $0x170] sm:$0xff]  ;;  %v686_v63 = vrot.slane %v400_v59, 1  ;;  %v687_v2 = vrot.slane %v4272_v57, 1  ;;  %v691_v5 = vsel %vm610_vm0, %v689_v55, %v690_v56  ;;  %v727_v55 = vrot.slane %v416_v44, 1  ;;  %v415_v56 = vld [vmem:[%s3869_s19 + $0x228] sm:$0x1] }
  0x6a   : > { %3517 = vmatmul.mubr.f32.gmra.mxu1 %v820_v7  ;;  %1498 = vmatprep.subr.mxu1 %v3751_v3  ;;  %v403_v7 = vld [vmem:[%s3869_s19 + $0x198] sm:$0x1]  ;;  %v4360_v59 = vld [vmem:[%s3869_s19 + $0x260] sm:$0xff]  ;;  %v431_v44 = vld [vmem:[%s3869_s19 + $0x2d8] sm:$0xfe] }
  0x6b   : > { %1499 = vmatpush2.msra.mxu1 %v343_v10  ;;  %1090 = vmatprep.mubr.f32.mxu0 %v661_v12  ;;  %v407_v10 = vld [vmem:[%s3869_s19 + $0x1b8] sm:$0xfe]  ;;  %v688_v12 = vsel %vm610_vm0, %v686_v63, %v687_v2  ;;  %v695_v14 = vrot.slane %v403_v7, 1  ;;  %v725_v63 = vrot.slane %v415_v56, 1  ;;  %v422_v7 = vld [vmem:[%s3869_s19 + $0x278] sm:$0x1] }
  0x6c   : > { %1500 = vmatprep.subr.mxu1 %v3751_v3  ;;  %3519 = vmatprep.mubr.f32.mxu1 %v829_v15  ;;  %v3263_v15 = vld [vmem:[%s5528_s1 + $0x368] sm:$0xff] }
  0x6d   : > { %1501 = vmatpush2.msra.mxu1 %v342_v20  ;;  %1091 = vmatmul.mubr.f32.gmra.mxu0 %v658_v21  ;;  %v406_v20 = vld [vmem:[%s3869_s19 + $0x1b0] sm:$0xfe]  ;;  %v410_v21 = vld [vmem:[%s3869_s19 + $0x1e8] sm:$0x1] }
  0x6e   : > { %3520 = vmatmul.mubr.f32.gmra.mxu1 %v835_v23  ;;  %1502 = vmatprep.subr.mxu1 %v3751_v3  ;;  %v696_v23 = vsel %vm610_vm0, %v687_v2, %v695_v14  ;;  %v701_v24 = vrot.slane %v406_v20, 1  ;;  %v712_v29 = vrot.slane %v410_v21, 1  ;;  %v425_v20 = vld [vmem:[%s3869_s19 + $0x290] sm:$0xfe]  ;;  %v3257_v21 = vld [vmem:[%s5528_s1 + $0x338] sm:$0xff] }
  0x6f   : > { %1503 = vmatpush2.msra.mxu1 %v341_v25  ;;  %1095 = vmatprep.mubr.f32.mxu0 %v668_v26  ;;  %v702_v25 = vrot.slane %v4310_v19, 1  ;;  %v434_v56 = vld [vmem:[%s3869_s19 + $0x308] sm:$0x1] }
  0x70   : > { %1504 = vmatprep.subr.mxu1 %v3751_v3  ;;  %3522 = vmatprep.mubr.f32.mxu1 %v844_v32  ;;  %v366_v32 = vld [vmem:[%s5528_s1 + $0x160] sm:$0xff] }
  0x71   : > { %1505 = vmatpush2.msra.mxu1 %v340_v34  ;;  %1096 = vmatmul.mubr.f32.gmra.mxu0 %v666_v35  ;;  %v413_v34 = vld [vmem:[%s3869_s19 + $0x200] sm:$0xfe]  ;;  %v703_v35 = vsel %vm610_vm0, %v701_v24, %v702_v25 }
  0x72   : > { %3523 = vmatmul.mubr.f32.gmra.mxu1 %v850_v37  ;;  %1506 = vmatprep.subr.mxu1 %v3751_v3  ;;  %v238_v37 = vld [vmem:[%s3869_s19 + $0x90] sm:$0xff] }
  0x73   : > { %1507 = vmatpush2.msra.mxu1 %v339_v41  ;;  %1100 = vmatprep.mubr.f32.mxu0 %v676_v42  ;;  %v719_v41 = vrot.slane %v413_v34, 1  ;;  %v720_v42 = vrot.slane %v4329_v33, 1  ;;  %v3256_v34 = vld [vmem:[%s5528_s1 + $0x330] sm:$0xff] }
  0x74   : > { %1508 = vmatprep.subr.mxu1 %v3751_v3  ;;  %1510 = vmatprep.mubr.f32.mxu1 %v227_v45  ;;  %v365_v45 = vld [vmem:[%s5528_s1 + $0x158] sm:$0xff] }
  0x75   : > { %1509 = vmatpush2.msra.mxu1 %v338_v49  ;;  %3526 = vmatpush3.msra.mxu0 %v4118_v46  ;;  %v681_v46 = vsel %vm610_vm0, %v672_v39, %v680_v53  ;;  %v713_v39 = vsel %vm610_vm0, %v705_v17, %v712_v29  ;;  %v711_v49 = vsel %vm610_vm0, %v702_v25, %v710_v38  ;;  %v4410_v29 = vld [vmem:[%s3869_s19 + $0x2a0] sm:$0xff] }
  0x76   : > { %1101 = vmatmul.mubr.f32.gmra.mxu0 %v673_v51  ;;  %1511 = vmatmul.mubr.f32.vlgmr.msra.gmra.mxu1 %v226_v52  ;;  %v716_v51 = vrot.slane %v412_v43, 1  ;;  %v721_v53 = vsel %vm610_vm0, %v719_v41, %v720_v42  ;;  %v728_v2 = vsel %vm610_vm0, %v720_v42, %v727_v55  ;;  %v757_v41 = vrot.slane %v428_v31, 1  ;;  %v427_v42 = vld [vmem:[%s3869_s19 + $0x2b8] sm:$0x1]  ;;  %v4428_v43 = vld [vmem:[%s3869_s19 + $0x2f0] sm:$0xff]  ;;  %v4444_v55 = vld [vmem:[%s3869_s19 + $0x2e8] sm:$0xff] }
  0x77   : > { %2474 = vmatprep.subr.mxu1 %v3751_v3  ;;  %1105 = vmatprep.mubr.f32.mxu0 %v683_v54  ;;  %v245_v54 = vld [vmem:[%s3869_s19 + $0xe0] sm:$0xff]  ;;  %v443_v31 = vld [vmem:[%s3869_s19 + $0x368] sm:$0xfe] }
  0x78   : > { %2475 = vmatpush1.msra.mxu1 %v3265_v60  ;;  %1515 = vmatprep.mubr.f32.mxu1 %v4045_v58  ;;  %v367_v58 = vld [vmem:[%s5528_s1 + $0x168] sm:$0xff] }
  0x79   : > { %2476 = vmatprep.subr.mxu1 %v3751_v3  ;;  %3527 = vmatprep.subr.mxu0 %v368_v62  ;;  %v419_v60 = vld [vmem:[%s3869_s19 + $0x248] sm:$0xfe] }
  0x7a   : > { %1106 = vmatmul.mubr.f32.gmra.mxu0 %v681_v46  ;;  %1516 = vmatmul.mubr.f32.gmra.mxu1 %v4057_v0  ;;  %v704_v0 = vrot.slane %v407_v10, 1  ;;  %v244_v46 = vld [vmem:[%s3869_s19 + $0xd8] sm:$0xff]  ;;  %v3258_v10 = vld [vmem:[%s5528_s1 + $0x340] sm:$0xff] }
  0x7b   : > { %2477 = vmatpush1.msra.mxu1 %v3264_v4  ;;  %1110 = vmatprep.mubr.f32.mxu0 %v691_v5  ;;  %v734_v4 = vrot.slane %v419_v60, 1  ;;  %v735_v5 = vrot.slane %v4360_v59, 1  ;;  %v359_v60 = vld [vmem:[%s5528_s1 + $0x128] sm:$0xff] }
  0x7c   : > { %1520 = vmatprep.mubr.f32.mxu1 %v233_v8  ;;  %3528 = vmatpush3.msra.mxu0 %v368_v62  ;;  %v706_v26 = vsel %vm610_vm0, %v704_v0, %v705_v17  ;;  %v363_v8 = vld [vmem:[%s5528_s1 + $0x148] sm:$0xff]  ;;  %v421_v0 = vld [vmem:[%s3869_s19 + $0x270] sm:$0x1] }
  0x7d   : > { %2478 = vmatprep.subr.mxu1 %v3751_v3  ;;  %3529 = vmatprep.subr.mxu0 %v367_v58  ;;  %v736_v14 = vsel %vm610_vm0, %v734_v4, %v735_v5  ;;  %v4394_v17 = vld [vmem:[%s3869_s19 + $0x2a8] sm:$0xff]  ;;  %v740_v24 = vrot.slane %v421_v0, 1  ;;  %v772_v4 = vrot.slane %v434_v56, 1  ;;  %v440_v0 = vld [vmem:[%s3869_s19 + $0x350] sm:$0x1] }
  0x7e   : > { %1111 = vmatmul.mubr.f32.gmra.mxu0 %v688_v12  ;;  %1521 = vmatmul.mubr.f32.gmra.mxu1 %v232_v13  ;;  %v732_v13 = vrot.slane %v4376_v6, 1  ;;  %v449_v56 = vld [vmem:[%s3869_s19 + $0x3b0] sm:$0xfe] }
  0x7f   : > { %2479 = vmatpush1.msra.mxu1 %v3263_v15  ;;  %1115 = vmatprep.mubr.f32.mxu0 %v698_v16  ;;  %v251_v15 = vld [vmem:[%s3869_s19 + $0x128] sm:$0xff]  ;;  %v742_v16 = vrot.slane %v422_v7, 1  ;;  %v437_v7 = vld [vmem:[%s3869_s19 + $0x320] sm:$0xfe] }
  0x80   : > { %1525 = vmatprep.mubr.f32.mxu1 %v4094_v27  ;;  %2480 = vmatprep.subr.mxu1 %v3751_v3  ;;  %v3261_v27 = vld [vmem:[%s5528_s1 + $0x358] sm:$0xff] }
  0x81   : > { %2481 = vmatpush1.msra.mxu1 %v3262_v22  ;;  %3530 = vmatpush3.msra.mxu0 %v367_v58  ;;  %v743_v25 = vsel %vm610_vm0, %v735_v5, %v742_v16  ;;  %v433_v5 = vld [vmem:[%s3869_s19 + $0x300] sm:$0x1]  ;;  %v4478_v16 = vld [vmem:[%s3869_s19 + $0x330] sm:$0xff] }
  0x82   : > { %1116 = vmatmul.mubr.f32.gmra.mxu0 %v696_v23  ;;  %1526 = vmatmul.mubr.f32.gmra.mxu1 %v4105_v36  ;;  %v4342_v36 = vld [vmem:[%s3869_s19 + $0x210] sm:$0xff]  ;;  %v250_v23 = vld [vmem:[%s3869_s19 + $0x120] sm:$0xff] }
  0x83   : > { %1120 = vmatprep.mubr.f32.mxu0 %v706_v26  ;;  %1530 = vmatprep.mubr.f32.mxu1 %v239_v28  ;;  %v717_v52 = vrot.slane %v4342_v36, 1  ;;  %v749_v26 = vrot.slane %v425_v20, 1  ;;  %v750_v28 = vrot.slane %v4394_v17, 1  ;;  %v357_v20 = vld [vmem:[%s5528_s1 + $0x118] sm:$0xff] }
  0x84   : > { %2482 = vmatprep.subr.mxu1 %v3751_v3  ;;  %3531 = vmatprep.subr.mxu0 %v366_v32 }
  0x85   : > { %2483 = vmatpush1.msra.mxu1 %v3261_v27  ;;  %3532 = vmatpush3.msra.mxu0 %v366_v32  ;;  %v718_v62 = vsel %vm610_vm0, %v716_v51, %v717_v52  ;;  %v726_v58 = vsel %vm610_vm0, %v717_v52, %v725_v63  ;;  %v361_v32 = vld [vmem:[%s5528_s1 + $0x138] sm:$0xff]  ;;  %v741_v27 = vsel %vm610_vm0, %v732_v13, %v740_v24  ;;  %v755_v51 = vrot.slane %v427_v42, 1 }
  0x86   : > { %1121 = vmatmul.mubr.f32.gmra.mxu0 %v703_v35  ;;  %1531 = vmatmul.mubr.f32.gmra.mxu1 %v238_v37  ;;  %v747_v37 = vrot.slane %v4410_v29, 1  ;;  %v751_v38 = vsel %vm610_vm0, %v749_v26, %v750_v28  ;;  %v758_v52 = vsel %vm610_vm0, %v750_v28, %v757_v41  ;;  %v787_v26 = vrot.slane %v440_v0, 1  ;;  %v439_v28 = vld [vmem:[%s3869_s19 + $0x348] sm:$0x1]  ;;  %v4512_v41 = vld [vmem:[%s3869_s19 + $0x378] sm:$0xff] }
  0x87   : > { %1125 = vmatprep.mubr.f32.mxu0 %v713_v39  ;;  %1535 = vmatprep.mubr.f32.mxu1 %v4139_v1  ;;  %v364_v1 = vld [vmem:[%s5528_s1 + $0x150] sm:$0xff]  ;;  %v446_v42 = vld [vmem:[%s3869_s19 + $0x398] sm:$0x1]  ;;  %v3279_v0 = vld [vmem:[%s5528_s1 + $0x3e8] sm:$0xff] }
  0x88   : > { %2484 = vmatprep.subr.mxu1 %v3751_v3  ;;  %3533 = vmatprep.subr.mxu0 %v365_v45  ;;  %v257_v39 = vld [vmem:[%s3869_s19 + $0x170] sm:$0xff] }
  0x89   : > { %2485 = vmatpush1.msra.mxu1 %v3260_v48  ;;  %3534 = vmatpush3.msra.mxu0 %v365_v45  ;;  %v3255_v45 = vld [vmem:[%s5528_s1 + $0x328] sm:$0xff] }
  0x8a   : > { %1126 = vmatmul.mubr.f32.gmra.mxu0 %v711_v49  ;;  %1536 = vmatmul.mubr.f32.gmra.mxu1 %v4151_v11  ;;  %v418_v11 = vld [vmem:[%s3869_s19 + $0x240] sm:$0xfe]  ;;  %v256_v49 = vld [vmem:[%s3869_s19 + $0x168] sm:$0xff] }
  0x8b   : > { %1130 = vmatprep.mubr.f32.mxu0 %v721_v53  ;;  %1540 = vmatprep.mubr.f32.mxu1 %v245_v54  ;;  %v731_v12 = vrot.slane %v418_v11, 1  ;;  %v764_v53 = vrot.slane %v431_v44, 1  ;;  %v765_v54 = vrot.slane %v4428_v43, 1  ;;  %v4462_v11 = vld [vmem:[%s3869_s19 + $0x338] sm:$0xff]  ;;  %v355_v44 = vld [vmem:[%s5528_s1 + $0x108] sm:$0xff] }
  0x8c   : > { %2486 = vmatprep.subr.mxu1 %v3751_v3  ;;  %3535 = vmatprep.subr.mxu0 %v364_v1 }
  0x8d   : > { %2487 = vmatpush1.msra.mxu1 %v3259_v61  ;;  %3536 = vmatpush3.msra.mxu0 %v364_v1  ;;  %v733_v22 = vsel %vm610_vm0, %v731_v12, %v732_v13  ;;  %v3254_v1 = vld [vmem:[%s5528_s1 + $0x320] sm:$0xff]  ;;  %v756_v61 = vsel %vm610_vm0, %v747_v37, %v755_v51  ;;  %v766_v63 = vsel %vm610_vm0, %v764_v53, %v765_v54  ;;  %v770_v12 = vrot.slane %v433_v5, 1 }
  0x8e   : > { %1131 = vmatmul.mubr.f32.gmra.mxu0 %v718_v62  ;;  %1541 = vmatmul.mubr.f32.gmra.mxu1 %v244_v46  ;;  %v762_v46 = vrot.slane %v4444_v55, 1  ;;  %v773_v13 = vsel %vm610_vm0, %v765_v54, %v772_v4  ;;  %v802_v53 = vrot.slane %v446_v42, 1  ;;  %v445_v54 = vld [vmem:[%s3869_s19 + $0x390] sm:$0x1]  ;;  %v4546_v4 = vld [vmem:[%s3869_s19 + $0x3c0] sm:$0xff] }
  0x8f   : > { %1135 = vmatprep.mubr.f32.mxu0 %v728_v2  ;;  %1545 = vmatprep.mubr.f32.mxu1 %v4181_v40  ;;  %v362_v40 = vld [vmem:[%s5528_s1 + $0x140] sm:$0xff]  ;;  %v263_v2 = vld [vmem:[%s3869_s19 + $0x1b8] sm:$0xff]  ;;  %v286_v42 = vld [vmem:[%s3869_s19 + $0x2d0] sm:$0xff] }
  0x90   : > { %2488 = vmatprep.subr.mxu1 %v3751_v3  ;;  %3537 = vmatprep.subr.mxu0 %v363_v8  ;;  %v452_v5 = vld [vmem:[%s3869_s19 + $0x3e0] sm:$0x1] }
  0x91   : > { %2489 = vmatpush1.msra.mxu1 %v3258_v10  ;;  %3538 = vmatpush3.msra.mxu0 %v363_v8  ;;  %v3253_v8 = vld [vmem:[%s5528_s1 + $0x318] sm:$0xff] }
  0x92   : > { %1136 = vmatmul.mubr.f32.gmra.mxu0 %v726_v58  ;;  %1546 = vmatmul.mubr.f32.gmra.mxu1 %v4193_v50  ;;  %v424_v50 = vld [vmem:[%s3869_s19 + $0x288] sm:$0xfe]  ;;  %v262_v58 = vld [vmem:[%s3869_s19 + $0x1b0] sm:$0xff] }
  0x93   : > { %1140 = vmatprep.mubr.f32.mxu0 %v736_v14  ;;  %1550 = vmatprep.mubr.f32.mxu1 %v251_v15  ;;  %v746_v35 = vrot.slane %v424_v50, 1  ;;  %v779_v14 = vrot.slane %v437_v7, 1  ;;  %v780_v15 = vrot.slane %v4462_v11, 1  ;;  %v4496_v50 = vld [vmem:[%s3869_s19 + $0x380] sm:$0xff]  ;;  %v4553_v7 = vld [vmem:[%s5528_s1 + $0x478] sm:$0xff] }
  0x94   : > { %2490 = vmatprep.subr.mxu1 %v3751_v3  ;;  %3539 = vmatprep.subr.mxu0 %v362_v40 }
  0x95   : > { %2491 = vmatpush1.msra.mxu1 %v3257_v21  ;;  %3540 = vmatpush3.msra.mxu0 %v362_v40  ;;  %v748_v48 = vsel %vm610_vm0, %v746_v35, %v747_v37  ;;  %v3252_v40 = vld [vmem:[%s5528_s1 + $0x310] sm:$0xff]  ;;  %v771_v21 = vsel %vm610_vm0, %v762_v46, %v770_v12  ;;  %v781_v24 = vsel %vm610_vm0, %v779_v14, %v780_v15  ;;  %v785_v35 = vrot.slane %v439_v28, 1  ;;  %v3278_v28 = vld [vmem:[%s5528_s1 + $0x3e0] sm:$0xff] }
  0x96   : > { %1141 = vmatmul.mubr.f32.gmra.mxu0 %v733_v22  ;;  %1551 = vmatmul.mubr.f32.gmra.mxu1 %v250_v23  ;;  %v777_v23 = vrot.slane %v4478_v16, 1  ;;  %v788_v37 = vsel %vm610_vm0, %v780_v15, %v787_v26  ;;  %v817_v14 = vrot.slane %v452_v5, 1  ;;  %v451_v15 = vld [vmem:[%s3869_s19 + $0x3d8] sm:$0x1]  ;;  %v458_v26 = vld [vmem:[%s3869_s19 + $0x428] sm:$0x1] }
  0x97   : > { %1145 = vmatprep.mubr.f32.mxu0 %v743_v25  ;;  %1555 = vmatprep.mubr.f32.mxu1 %v4223_v18  ;;  %v360_v18 = vld [vmem:[%s5528_s1 + $0x130] sm:$0xff]  ;;  %v269_v25 = vld [vmem:[%s3869_s19 + $0x200] sm:$0xff]  ;;  %v299_v5 = vld [vmem:[%s3869_s19 + $0x368] sm:$0xff] }
  0x98   : > { %2492 = vmatprep.subr.mxu1 %v3751_v3  ;;  %3541 = vmatprep.subr.mxu0 %v361_v32 }
  0x99   : > { %2493 = vmatpush1.msra.mxu1 %v3256_v34  ;;  %3542 = vmatpush3.msra.mxu0 %v361_v32  ;;  %v3251_v32 = vld [vmem:[%s5528_s1 + $0x308] sm:$0xff] }
  0x9a   : > { %1146 = vmatmul.mubr.f32.gmra.mxu0 %v741_v27  ;;  %1556 = vmatmul.mubr.f32.gmra.mxu1 %v4239_v30  ;;  %v430_v30 = vld [vmem:[%s3869_s19 + $0x2d0] sm:$0xfe]  ;;  %v268_v27 = vld [vmem:[%s3869_s19 + $0x1f8] sm:$0xff] }
  0x9b   : > { %1150 = vmatprep.mubr.f32.mxu0 %v751_v38  ;;  %1560 = vmatprep.mubr.f32.mxu1 %v257_v39  ;;  %v761_v62 = vrot.slane %v430_v30, 1  ;;  %v794_v38 = vrot.slane %v443_v31, 1  ;;  %v795_v39 = vrot.slane %v4496_v50, 1  ;;  %v4530_v30 = vld [vmem:[%s3869_s19 + $0x3c8] sm:$0xff] }
  0x9c   : > { %2494 = vmatprep.subr.mxu1 %v3751_v3  ;;  %3543 = vmatprep.subr.mxu0 %v360_v18 }
  0x9d   : > { %2495 = vmatpush1.msra.mxu1 %v3255_v45  ;;  %3544 = vmatpush3.msra.mxu0 %v360_v18  ;;  %v763_v10 = vsel %vm610_vm0, %v761_v62, %v762_v46  ;;  %v3250_v18 = vld [vmem:[%s5528_s1 + $0x300] sm:$0xff]  ;;  %v786_v45 = vsel %vm610_vm0, %v777_v23, %v785_v35  ;;  %v796_v51 = vsel %vm610_vm0, %v794_v38, %v795_v39  ;;  %v800_v62 = vrot.slane %v445_v54, 1  ;;  %v4595_v38 = vld [vmem:[%s3869_s19 + $0x458] sm:$0xff] }
  0x9e   : > { %1151 = vmatmul.mubr.f32.gmra.mxu0 %v748_v48  ;;  %1561 = vmatmul.mubr.f32.gmra.mxu1 %v256_v49  ;;  %v792_v49 = vrot.slane %v4512_v41, 1  ;;  %v803_v46 = vsel %vm610_vm0, %v795_v39, %v802_v53  ;;  %v832_v35 = vrot.slane %v458_v26, 1  ;;  %v461_v39 = vld [vmem:[%s3869_s19 + $0x440] sm:$0xfe]  ;;  %v4703_v26 = vld [vmem:[%s3869_s19 + $0x148] sm:$0xff] }
  0x9f   : > { %1155 = vmatprep.mubr.f32.mxu0 %v758_v52  ;;  %1565 = vmatprep.mubr.f32.mxu1 %v4259_v47  ;;  %v358_v47 = vld [vmem:[%s5528_s1 + $0x120] sm:$0xff]  ;;  %v275_v52 = vld [vmem:[%s3869_s19 + $0x248] sm:$0xff] }
  0xa0   : > { %2496 = vmatprep.subr.mxu1 %v3751_v3  ;;  %3545 = vmatprep.subr.mxu0 %v359_v60 }
  0xa1   : > { %2497 = vmatpush1.msra.mxu1 %v3254_v1  ;;  %3546 = vmatpush3.msra.mxu0 %v359_v60  ;;  %v3281_v60 = vld [vmem:[%s5528_s1 + $0x3f8] sm:$0xff] }
  0xa2   : > { %1156 = vmatmul.mubr.f32.gmra.mxu0 %v756_v61  ;;  %1566 = vmatmul.mubr.f32.gmra.mxu1 %v4272_v57  ;;  %v436_v57 = vld [vmem:[%s3869_s19 + $0x318] sm:$0xfe]  ;;  %v274_v61 = vld [vmem:[%s3869_s19 + $0x240] sm:$0xff] }
  0xa3   : > { %1160 = vmatprep.mubr.f32.mxu0 %v766_v63  ;;  %1570 = vmatprep.mubr.f32.mxu1 %v263_v2  ;;  %v776_v22 = vrot.slane %v436_v57, 1  ;;  %v809_v63 = vrot.slane %v449_v56, 1  ;;  %v810_v2 = vrot.slane %v4530_v30, 1  ;;  %v4567_v57 = vld [vmem:[%s3869_s19 + $0x410] sm:$0xff] }
  0xa4   : > { %2498 = vmatprep.subr.mxu1 %v3751_v3  ;;  %3547 = vmatprep.subr.mxu0 %v358_v47 }
  0xa5   : > { %2499 = vmatpush1.msra.mxu1 %v3253_v8  ;;  %3548 = vmatpush3.msra.mxu0 %v358_v47  ;;  %v778_v34 = vsel %vm610_vm0, %v776_v22, %v777_v23  ;;  %v3280_v47 = vld [vmem:[%s5528_s1 + $0x3f0] sm:$0xff]  ;;  %v801_v8 = vsel %vm610_vm0, %v792_v49, %v800_v62  ;;  %v811_v12 = vsel %vm610_vm0, %v809_v63, %v810_v2 }
  0xa6   : > { %1161 = vmatmul.mubr.f32.gmra.mxu0 %v763_v10  ;;  %1571 = vmatmul.mubr.f32.gmra.mxu1 %v262_v58  ;;  %v807_v58 = vrot.slane %v4546_v4, 1  ;;  %v818_v22 = vsel %vm610_vm0, %v810_v2, %v817_v14  ;;  %v240_v14 = vld [vmem:[%s3869_s19 + $0xa0] sm:$0xff] }
  0xa7   : > { %1165 = vmatprep.mubr.f32.mxu0 %v773_v13  ;;  %1575 = vmatprep.mubr.f32.mxu1 %v4295_v9  ;;  %v356_v9 = vld [vmem:[%s5528_s1 + $0x110] sm:$0xff] }
  0xa8   : > { %2500 = vmatprep.subr.mxu1 %v3751_v3  ;;  %3549 = vmatprep.subr.mxu0 %v357_v20  ;;  %v281_v13 = vld [vmem:[%s3869_s19 + $0x290] sm:$0xff] }
  0xa9   : > { %2501 = vmatpush1.msra.mxu1 %v3252_v40  ;;  %3550 = vmatpush3.msra.mxu0 %v357_v20  ;;  %v280_v40 = vld [vmem:[%s3869_s19 + $0x288] sm:$0xff] }
  0xaa   : > { %1166 = vmatmul.mubr.f32.gmra.mxu0 %v771_v21  ;;  %1576 = vmatmul.mubr.f32.gmra.mxu1 %v4310_v19  ;;  %v442_v19 = vld [vmem:[%s3869_s19 + $0x360] sm:$0xfe]  ;;  %v815_v21 = vrot.slane %v451_v15, 1  ;;  %v4662_v15 = vld [vmem:[%s3869_s19 + $0x70] sm:$0xff] }
  0xab   : > { %1170 = vmatprep.mubr.f32.mxu0 %v781_v24  ;;  %1580 = vmatprep.mubr.f32.mxu1 %v269_v25  ;;  %v791_v48 = vrot.slane %v442_v19, 1  ;;  %v825_v24 = vrot.slane %v4567_v57, 1  ;;  %v4580_v25 = vld [vmem:[%s3869_s19 + $0x408] sm:$0xff] }
  0xac   : > { %2502 = vmatprep.subr.mxu1 %v3751_v3  ;;  %3551 = vmatprep.subr.mxu0 %v356_v9  ;;  %v816_v31 = vsel %vm610_vm0, %v807_v58, %v815_v21  ;;  %v311_v21 = vld [vmem:[%s3869_s19 + $0x3f8] sm:$0xff] }
  0xad   : > { %2503 = vmatpush1.msra.mxu1 %v3251_v32  ;;  %3552 = vmatpush3.msra.mxu0 %v356_v9  ;;  %v793_v1 = vsel %vm610_vm0, %v791_v48, %v792_v49  ;;  %v822_v32 = vrot.slane %v4580_v25, 1  ;;  %v840_v48 = vrot.slane %v4595_v38, 1  ;;  %v4608_v49 = vld [vmem:[%s3869_s19 + $0x450] sm:$0xff] }
  0xae   : > { %1171 = vmatmul.mubr.f32.gmra.mxu0 %v778_v34  ;;  %1581 = vmatmul.mubr.f32.gmra.mxu1 %v268_v27  ;;  %v287_v27 = vld [vmem:[%s3869_s19 + $0x2d8] sm:$0xff]  ;;  %v837_v56 = vrot.slane %v4608_v49, 1 }
  0xaf   : > { %1175 = vmatprep.mubr.f32.mxu0 %v788_v37  ;;  %1585 = vmatprep.mubr.f32.mxu1 %v4329_v33  ;;  %v354_v33 = vld [vmem:[%s5528_s1 + $0x100] sm:$0xff] }
  0xb0   : > { %2504 = vmatprep.subr.mxu1 %v3751_v3  ;;  %3553 = vmatprep.subr.mxu0 %v355_v44  ;;  %v457_v37 = vld [vmem:[%s3869_s19 + $0x420] sm:$0x1] }
  0xb1   : > { %2505 = vmatpush1.msra.mxu1 %v3250_v18  ;;  %3554 = vmatpush3.msra.mxu0 %v355_v44  ;;  %v830_v44 = vrot.slane %v457_v37, 1  ;;  %v833_v18 = vsel %vm610_vm0, %v825_v24, %v832_v35  ;;  %v3291_v35 = vld [vmem:[%s5528_s1 + $0x448] sm:$0xff]  ;;  %v316_v37 = vld [vmem:[%s3869_s19 + $0x438] sm:$0xff] }
  0xb2   : > { %1176 = vmatmul.mubr.f32.gmra.mxu0 %v786_v45  ;;  %1586 = vmatmul.mubr.f32.gmra.mxu1 %v4342_v36  ;;  %v448_v36 = vld [vmem:[%s3869_s19 + $0x3a8] sm:$0xfe]  ;;  %v839_v45 = vrot.slane %v461_v39, 1 }
  0xb3   : > { %1180 = vmatprep.mubr.f32.mxu0 %v796_v51  ;;  %1590 = vmatprep.mubr.f32.mxu1 %v275_v52  ;;  %v806_v10 = vrot.slane %v448_v36, 1  ;;  %v464_v51 = vld [vmem:[%s3869_s19 + $0x470] sm:$0x1]  ;;  %v831_v53 = vsel %vm610_vm0, %v822_v32, %v830_v44 }
  0xb4   : > { %2506 = vmatprep.subr.mxu1 %v3751_v3  ;;  %3555 = vmatprep.subr.mxu0 %v354_v33  ;;  %v3276_v52 = vld [vmem:[%s5528_s1 + $0x3d0] sm:$0xff] }
  0xb5   : > { %2507 = vmatpush2.msra.mxu1 %v3281_v60  ;;  %3556 = vmatpush3.msra.mxu0 %v354_v33  ;;  %v808_v20 = vsel %vm610_vm0, %v806_v10, %v807_v58  ;;  %v841_v33 = vsel %vm610_vm0, %v839_v45, %v840_v48  ;;  %v293_v60 = vld [vmem:[%s3869_s19 + $0x320] sm:$0xff]  ;;  %v234_v10 = vld [vmem:[%s3869_s19 + $0x58] sm:$0xff]  ;;  %v4646_v58 = vld [vmem:[%s3869_s19 + $0x28] sm:$0xff] }
  0xb6   : > { %1181 = vmatmul.mubr.f32.gmra.mxu0 %v793_v1  ;;  %1591 = vmatmul.mubr.f32.gmra.mxu1 %v274_v61  ;;  %v847_v1 = vrot.slane %v464_v51, 1  ;;  %v463_v61 = vld [vmem:[%s3869_s19 + $0x468] sm:$0x1]  ;;  %v4737_v45 = vld [vmem:[%s3869_s19 + $0x1d8] sm:$0xff] }
  0xb7   : > { %1185 = vmatprep.mubr.f32.mxu0 %v803_v46  ;;  %1595 = vmatprep.mubr.f32.mxu1 %v4360_v59  ;;  %v455_v59 = vld [vmem:[%s3869_s19 + $0x3f8] sm:$0xfe]  ;;  %v845_v63 = vrot.slane %v463_v61, 1  ;;  %v1903_v61 = vld [vmem:[%s3869_s19 + $0x50] sm:$0xfc] }
  0xb8   : > { %2508 = vmatprep.subr.mxu1 %v3751_v3  ;;  %3605 = vmatprep.subr.mxu0 %v4553_v7  ;;  %v824_v23 = vrot.slane %v455_v59, 1  ;;  %v292_v46 = vld [vmem:[%s3869_s19 + $0x318] sm:$0xff]  ;;  %v848_v2 = vsel %vm610_vm0, %v840_v48, %v847_v1  ;;  %v3295_v59 = vld [vmem:[%s5528_s1 + $0x468] sm:$0xff]  ;;  %v3266_v48 = vld [vmem:[%s5528_s1 + $0x380] sm:$0xff] }
  0xb9   : > { %2509 = vmatpush2.msra.mxu1 %v3280_v47  ;;  %v846_v36 = vsel %vm610_vm0, %v837_v56, %v845_v63  ;;  %v228_v47 = vld [vmem:[%s3869_s19 + $0x10] sm:$0xff]  ;;  %v282_v63 = vld [vmem:[%s3869_s19 + $0x298] sm:$0xff] }
  0xba   : > { %1186 = vmatmul.mubr.f32.gmra.mxu0 %v801_v8  ;;  %1596 = vmatmul.mubr.f32.gmra.mxu1 %v4376_v6  ;;  %v454_v6 = vld [vmem:[%s3869_s19 + $0x3f0] sm:$0xfe]  ;;  %v826_v34 = vsel %vm610_vm0, %v824_v23, %v825_v24  ;;  %v3273_v8 = vld [vmem:[%s5528_s1 + $0x3b8] sm:$0xff]  ;;  %v4690_v23 = vld [vmem:[%s3869_s19 + $0x100] sm:$0xff] }
  0xbb   : > { %1190 = vmatprep.mubr.f32.mxu0 %v811_v12  ;;  %1600 = vmatprep.mubr.f32.mxu1 %v281_v13  ;;  %v821_v9 = vrot.slane %v454_v6, 1  ;;  %v3296_v12 = vld [vmem:[%s5528_s1 + $0x470] sm:$0xff]  ;;  %v3293_v24 = vld [vmem:[%s5528_s1 + $0x458] sm:$0xff] }
  0xbc   : > { %2510 = vmatprep.subr.mxu1 %v3751_v3  ;;  %v305_v13 = vld [vmem:[%s3869_s19 + $0x3b0] sm:$0xff] }
  0xbd   : > { %2511 = vmatpush2.msra.mxu1 %v3279_v0  ;;  %v823_v19 = vsel %vm610_vm0, %v821_v9, %v822_v32  ;;  %v4675_v0 = vld [vmem:[%s3869_s19 + $0xb8] sm:$0xff]  ;;  %v310_v6 = vld [vmem:[%s3869_s19 + $0x3f0] sm:$0xff]  ;;  %v317_v9 = vld [vmem:[%s3869_s19 + $0x440] sm:$0xff] }
  0xbe   : > { %1191 = vmatmul.mubr.f32.gmra.mxu0 %v808_v20  ;;  %1601 = vmatmul.mubr.f32.gmra.mxu1 %v280_v40  ;;  %v3270_v20 = vld [vmem:[%s5528_s1 + $0x3a0] sm:$0xff]  ;;  %v1899_v1 = vld [vmem:[%s3869_s19 + $0x30] sm:$0x3] }
  0xbf   : > { %1195 = vmatprep.mubr.f32.mxu0 %v818_v22  ;;  %1605 = vmatprep.mubr.f32.mxu1 %v4394_v17  ;;  %v3277_v17 = vld [vmem:[%s5528_s1 + $0x3d8] sm:$0xff]  ;;  %v3294_v40 = vld [vmem:[%s5528_s1 + $0x460] sm:$0xff]  ;;  %v252_v22 = vld [vmem:[%s3869_s19 + $0x130] sm:$0xff] }
  0xc0   : > { %2512 = vmatprep.subr.mxu1 %v3751_v3  ;;  %v264_v32 = vld [vmem:[%s3869_s19 + $0x1c0] sm:$0xff] }
  0xc1   : > { %2513 = vmatpush2.msra.mxu1 %v3278_v28  ;;  %v3268_v28 = vld [vmem:[%s5528_s1 + $0x390] sm:$0xff] }
  0xc2   : > { %1196 = vmatmul.mubr.f32.gmra.mxu0 %v816_v31  ;;  %1606 = vmatmul.mubr.f32.gmra.mxu1 %v4410_v29  ;;  %v460_v29 = vld [vmem:[%s3869_s19 + $0x438] sm:$0xfe]  ;;  %v3292_v31 = vld [vmem:[%s5528_s1 + $0x450] sm:$0xff] }
  0xc3   : > { %1200 = vmatprep.mubr.f32.mxu0 %v826_v34  ;;  %1610 = vmatprep.mubr.f32.mxu1 %v287_v27  ;;  %v836_v54 = vrot.slane %v460_v29, 1  ;;  %v1897_v34 = vld [vmem:[%s3869_s19 + $0x8] sm:$0xfc]  ;;  %v4719_v27 = vld [vmem:[%s3869_s19 + $0x190] sm:$0xff]  ;;  %v3290_v29 = vld [vmem:[%s5528_s1 + $0x440] sm:$0xff] }
  0xc4   : > { %2514 = vmatprep.subr.mxu1 %v3751_v3  ;;  %v2092_v39 = vrot.slane %v1897_v34, 2 }
  0xc5   : > { %2515 = vmatpush2.msra.mxu1 %v3277_v17  ;;  %v838_v62 = vsel %vm610_vm0, %v836_v54, %v837_v56  ;;  %v3701_v17 = vld [vmem:[%s3869_s19 + $0x20] sm:$0xff]  ;;  %v276_v56 = vld [vmem:[%s3869_s19 + $0x250] sm:$0xff] }
  0xc6   : > { %1201 = vmatmul.mubr.f32.gmra.mxu0 %v823_v19  ;;  %1611 = vmatmul.mubr.f32.gmra.mxu1 %v286_v42  ;;  %v2093_v19 = vrot.slane %v3701_v17, 2  ;;  %v1896_v42 = vld [vmem:[%s3869_s19] sm:$0xfc] }
  0xc7   : > { %1205 = vmatprep.mubr.f32.mxu0 %v833_v18  ;;  %1615 = vmatprep.mubr.f32.mxu1 %v4428_v43  ;;  %v3275_v43 = vld [vmem:[%s5528_s1 + $0x3c8] sm:$0xff]  ;;  %v1900_v18 = vld [vmem:[%s3869_s19 + $0x38] sm:$0x3]  ;;  %v2089_v51 = vrot.slane %v1896_v42, 2 }
  0xc8   : > { %2516 = vmatprep.subr.mxu1 %v3751_v3  ;;  %v3711_v42 = vld [vmem:[%s3869_s19 + $0xa8] sm:$0xff] }
  0xc9   : > { %2517 = vmatpush2.msra.mxu1 %v3276_v52  ;;  %v3703_v52 = vld [vmem:[%s3869_s19 + $0x18] sm:$0xff] }
  0xca   : > { %1206 = vmatmul.mubr.f32.gmra.mxu0 %v831_v53  ;;  %1616 = vmatmul.mubr.f32.gmra.mxu1 %v4444_v55  ;;  %v3274_v55 = vld [vmem:[%s5528_s1 + $0x3c0] sm:$0xff]  ;;  %v2090_v53 = vrot.slane %v3703_v52, 2 }
  0xcb   : > { %1210 = vmatprep.mubr.f32.mxu0 %v841_v33  ;;  %1620 = vmatprep.mubr.f32.mxu1 %v293_v60  ;;  %v2094_v33 = vsel %vm2088_vm1, %v2092_v39, %v2093_v19  ;;  %v2100_v60 = vrot.slane %v1900_v18, 2  ;;  %v3286_v39 = vld [vmem:[%s5528_s1 + $0x420] sm:$0xff]  ;;  %v2120_v18 = vrot.slane %v3711_v42, 2 }
  0xcc   : > { %2518 = vmatprep.subr.mxu1 %v3751_v3  ;;  %v1911_v52 = vld [vmem:[%s3869_s19 + $0xc0] sm:$0x3] }
  0xcd   : > { %2519 = vmatpush2.msra.mxu1 %v3275_v43  ;;  %v3289_v43 = vld [vmem:[%s5528_s1 + $0x438] sm:$0xff]  ;;  %v1901_v42 = vld [vmem:[%s3869_s19 + $0x40] sm:$0x3] }
  0xce   : > { %1211 = vmatmul.mubr.f32.gmra.mxu0 %v838_v62  ;;  %1621 = vmatmul.mubr.f32.gmra.mxu1 %v292_v46  ;;  %v2091_v62 = vsel %vm2088_vm1, %v2089_v51, %v2090_v53  ;;  %v2098_v46 = vrot.slane %v1899_v1, 2 }
  0xcf   : > { %1215 = vmatprep.mubr.f32.mxu0 %v848_v2  ;;  %1625 = vmatprep.mubr.f32.mxu1 %v4462_v11  ;;  %v298_v11 = vld [vmem:[%s3869_s19 + $0x360] sm:$0xff] }
  0xd0   : > { %2520 = vmatprep.subr.mxu1 %v3751_v3 }
  0xd1   : > { %2521 = vmatpush2.msra.mxu1 %v3274_v55  ;;  %v2107_v55 = vrot.slane %v1903_v61, 2 }
  0xd2   : > { %1216 = vmatmul.mubr.f32.gmra.mxu0 %v846_v36  ;;  %1626 = vmatmul.mubr.f32.gmra.mxu1 %v4478_v16  ;;  %v3272_v16 = vld [vmem:[%s5528_s1 + $0x3b0] sm:$0xff]  ;;  %v3705_v36 = vld [vmem:[%s3869_s19 + $0x68] sm:$0xff] }
  0xd3   : > { %1630 = vmatprep.mubr.f32.mxu1 %v299_v5  ;;  %3557 = vmatprep.mubr.f32.mxu0 %v228_v47  ;;  %v2108_v5 = vrot.slane %v3705_v36, 2  ;;  %v1902_v47 = vld [vmem:[%s3869_s19 + $0x48] sm:$0xfc]  ;;  %v1914_v36 = vld [vmem:[%s3869_s19 + $0xd8] sm:$0xfc] }
  0xd4   : > { %2522 = vmatprep.subr.mxu1 %v3751_v3 }
  0xd5   : > { %2523 = vmatpush2.msra.mxu1 %v3273_v8  ;;  %v1906_v8 = vld [vmem:[%s3869_s19 + $0x80] sm:$0x3] }
  0xd6   : > { %1631 = vmatmul.mubr.f32.gmra.mxu1 %v298_v11  ;;  %3558 = vmatmul.mubr.f32.vlgmr.msra.gmra.mxu0 %v4646_v58  ;;  %v4774_v11 = vld [vmem:[%s3869_s19 + $0x268] sm:$0xff] }
  0xd7   : > { %1635 = vmatprep.mubr.f32.mxu1 %v4496_v50  ;;  %3560 = vmatprep.mubr.f32.mxu0 %v234_v10  ;;  %v3271_v50 = vld [vmem:[%s5528_s1 + $0x3a8] sm:$0xff]  ;;  %v3288_v10 = vld [vmem:[%s5528_s1 + $0x430] sm:$0xff] }
  0xd8   : > { %2524 = vmatprep.subr.mxu1 %v3751_v3  ;;  %3606 = vmatpush3.msra.mxu0 %v4553_v7  ;;  %v304_v7 = vld [vmem:[%s3869_s19 + $0x3a8] sm:$0xff] }
  0xd9   : > { %2525 = vmatpush2.msra.mxu1 %v3272_v16  ;;  %3607 = vmatprep.subr.mxu0 %v3296_v12  ;;  %v2099_v16 = vsel %vm2088_vm1, %v2090_v53, %v2098_v46 }
  0xda   : > { %1636 = vmatmul.mubr.f32.gmra.mxu1 %v4512_v41  ;;  %3561 = vmatmul.mubr.f32.gmra.mxu0 %v4662_v15  ;;  %v246_v41 = vld [vmem:[%s3869_s19 + $0xe8] sm:$0xff] }
  0xdb   : > { %1640 = vmatprep.mubr.f32.mxu1 %v305_v13  ;;  %3563 = vmatprep.mubr.f32.mxu0 %v240_v14  ;;  %v2104_v13 = vrot.slane %v1902_v47, 2  ;;  %v3707_v14 = vld [vmem:[%s3869_s19 + $0x60] sm:$0xff]  ;;  %v4838_v47 = vld [vmem:[%s3869_s19 + $0x388] sm:$0xff] }
  0xdc   : > { %2526 = vmatprep.subr.mxu1 %v3751_v3  ;;  %3608 = vmatpush3.msra.mxu0 %v3296_v12 }
  0xdd   : > { %2527 = vmatpush2.msra.mxu1 %v3271_v50  ;;  %3609 = vmatprep.subr.mxu0 %v3295_v59  ;;  %v2105_v50 = vrot.slane %v3707_v14, 2  ;;  %v3715_v14 = vld [vmem:[%s3869_s19 + $0xf0] sm:$0xff] }
  0xde   : > { %1641 = vmatmul.mubr.f32.gmra.mxu1 %v304_v7  ;;  %3564 = vmatmul.mubr.f32.gmra.mxu0 %v4675_v0  ;;  %v2109_v7 = vsel %vm2088_vm1, %v2107_v55, %v2108_v5 }
  0xdf   : > { %1645 = vmatprep.mubr.f32.mxu1 %v4530_v30  ;;  %3566 = vmatprep.mubr.f32.mxu0 %v246_v41  ;;  %v3269_v30 = vld [vmem:[%s5528_s1 + $0x398] sm:$0xff]  ;;  %v2115_v41 = vrot.slane %v1906_v8, 2 }
  0xe0   : > { %2528 = vmatprep.subr.mxu1 %v3751_v3  ;;  %3610 = vmatpush3.msra.mxu0 %v3295_v59  ;;  %v288_v59 = vld [vmem:[%s3869_s19 + $0x2e0] sm:$0xff] }
  0xe1   : > { %2529 = vmatpush2.msra.mxu1 %v3270_v20  ;;  %3611 = vmatprep.subr.mxu0 %v3294_v40  ;;  %v1905_v20 = vld [vmem:[%s3869_s19 + $0x78] sm:$0x3] }
  0xe2   : > { %1646 = vmatmul.mubr.f32.gmra.mxu1 %v4546_v4  ;;  %3567 = vmatmul.mubr.f32.gmra.mxu0 %v4690_v23  ;;  %v258_v4 = vld [vmem:[%s3869_s19 + $0x178] sm:$0xff] }
  0xe3   : > { %1650 = vmatprep.mubr.f32.mxu1 %v311_v21  ;;  %3569 = vmatprep.mubr.f32.mxu0 %v252_v22  ;;  %v1909_v21 = vld [vmem:[%s3869_s19 + $0x98] sm:$0xfc]  ;;  %v4791_v22 = vld [vmem:[%s3869_s19 + $0x2b0] sm:$0xff] }
  0xe4   : > { %2530 = vmatprep.subr.mxu1 %v3751_v3  ;;  %3612 = vmatpush3.msra.mxu0 %v3294_v40 }
  0xe5   : > { %2531 = vmatpush2.msra.mxu1 %v3269_v30  ;;  %3613 = vmatprep.subr.mxu0 %v3293_v24  ;;  %v3287_v30 = vld [vmem:[%s5528_s1 + $0x428] sm:$0xff] }
  0xe6   : > { %1651 = vmatmul.mubr.f32.gmra.mxu1 %v310_v6  ;;  %3570 = vmatmul.mubr.f32.gmra.mxu0 %v4703_v26  ;;  %v2113_v6 = vrot.slane %v1905_v20, 2 }
  0xe7   : > { %1655 = vmatprep.mubr.f32.mxu1 %v4567_v57  ;;  %3572 = vmatprep.mubr.f32.mxu0 %v258_v4  ;;  %v3267_v57 = vld [vmem:[%s5528_s1 + $0x388] sm:$0xff] }
  0xe8   : > { %2532 = vmatprep.subr.mxu1 %v3751_v3  ;;  %3614 = vmatpush3.msra.mxu0 %v3293_v24  ;;  %v2106_v24 = vsel %vm2088_vm1, %v2104_v13, %v2105_v50  ;;  %v294_v4 = vld [vmem:[%s3869_s19 + $0x328] sm:$0xff]  ;;  %v2114_v17 = vsel %vm2088_vm1, %v2105_v50, %v2113_v6  ;;  %v2134_v13 = vrot.slane %v1914_v36, 2  ;;  %v2135_v50 = vrot.slane %v3715_v14, 2 }
  0xe9   : > { %2533 = vmatpush2.msra.mxu1 %v3268_v28  ;;  %3615 = vmatprep.subr.mxu0 %v3292_v31  ;;  %v2116_v28 = vsel %vm2088_vm1, %v2108_v5, %v2115_v41  ;;  %v1918_v5 = vld [vmem:[%s3869_s19 + $0x110] sm:$0x3]  ;;  %v3283_v6 = vld [vmem:[%s5528_s1 + $0x408] sm:$0xff] }
  0xea   : > { %1656 = vmatmul.mubr.f32.gmra.mxu1 %v4580_v25  ;;  %3573 = vmatmul.mubr.f32.gmra.mxu0 %v4719_v27  ;;  %v270_v25 = vld [vmem:[%s3869_s19 + $0x208] sm:$0xff]  ;;  %v2145_v20 = vrot.slane %v1918_v5, 2 }
  0xeb   : > { %1660 = vmatprep.mubr.f32.mxu1 %v317_v9  ;;  %3575 = vmatprep.mubr.f32.mxu0 %v264_v32  ;;  %v2122_v9 = vrot.slane %v1909_v21, 2  ;;  %v3709_v32 = vld [vmem:[%s3869_s19 + $0xb0] sm:$0xff]  ;;  %v1917_v21 = vld [vmem:[%s3869_s19 + $0x108] sm:$0x3] }
  0xec   : > { %2534 = vmatprep.subr.mxu1 %v3751_v3  ;;  %3616 = vmatpush3.msra.mxu0 %v3292_v31  ;;  %v2123_v34 = vrot.slane %v3709_v32, 2  ;;  %v318_v32 = vld [vmem:[%s3869_s19 + $0x448] sm:$0xff] }
  0xed   : > { %2535 = vmatpush2.msra.mxu1 %v3267_v57  ;;  %v4733_v44 = vpop.f32.mrf.mxu1  ;;  %3617 = vmatprep.subr.mxu0 %v3291_v35  ;;  %v1908_v57 = vld [vmem:[%s3869_s19 + $0x90] sm:$0xfc] }
  0xee   : > { %1661 = vmatmul.mubr.f32.gmra.mxu1 %v316_v37  ;;  %3576 = vmatmul.mubr.f32.gmra.mxu0 %v4737_v45  ;;  %v4806_v37 = vld [vmem:[%s3869_s19 + $0x2f8] sm:$0xff] }
  0xef   : > { %1665 = vmatprep.mubr.f32.mxu1 %v4595_v38  ;;  %3578 = vmatprep.mubr.f32.mxu0 %v270_v25  ;;  %v4748_v54 = vpop.f32.mrf.mxu1  ;;  %v4757_v38 = vld [vmem:[%s3869_s19 + $0x220] sm:$0xff] }
  0xf0   : > { %2536 = vmatprep.subr.mxu1 %v3751_v3  ;;  %3618 = vmatpush3.msra.mxu0 %v3291_v35  ;;  %v1912_v35 = vld [vmem:[%s3869_s19 + $0xc8] sm:$0x3] }
  0xf1   : > { %2537 = vmatpush2.msra.mxu1 %v3266_v48  ;;  %3619 = vmatprep.subr.mxu0 %v3290_v29  ;;  %v300_v48 = vld [vmem:[%s3869_s19 + $0x370] sm:$0xff]  ;;  %v2130_v51 = vrot.slane %v1912_v35, 2 }
  0xf2   : > { %1666 = vmatmul.mubr.f32.gmra.mxu1 %v4608_v49  ;;  %3579 = vmatmul.mubr.f32.gmra.mxu0 %v4757_v38  ;;  %v4760_v3 = vpop.f32.mrf.mxu1  ;;  %v2101_v49 = vsel %vm2088_vm1, %v2093_v19, %v2100_v60  ;;  %v2119_v19 = vrot.slane %v1908_v57, 2  ;;  %v3285_v60 = vld [vmem:[%s5528_s1 + $0x418] sm:$0xff] }
  0xf3   : > { %3581 = vmatprep.mubr.f32.mxu0 %v276_v56  ;;  %2538 = vmatprep.mubr.f32.mxu1 %v2094_v33  ;;  %v1915_v56 = vld [vmem:[%s3869_s19 + $0xe0] sm:$0xfc]  ;;  %v2131_v46 = vsel %vm2088_vm1, %v2123_v34, %v2130_v51  ;;  %v1924_v51 = vld [vmem:[%s3869_s19 + $0x158] sm:$0x3] }
  0xf4   : > { %v4768_v2 = vpop.f32.mrf.mxu1  ;;  %3620 = vmatpush3.msra.mxu0 %v3290_v29  ;;  %v2124_v29 = vsel %vm2088_vm1, %v2122_v9, %v2123_v34  ;;  %v4823_v33 = vld [vmem:[%s3869_s19 + $0x340] sm:$0xff]  ;;  %v2121_v1 = vsel %vm2088_vm1, %v2119_v19, %v2120_v18  ;;  %v2136_v9 = vsel %vm2088_vm1, %v2134_v13, %v2135_v50  ;;  %v2143_v34 = vrot.slane %v1917_v21, 2  ;;  %v1927_v13 = vld [vmem:[%s3869_s19 + $0x170] sm:$0xfc] }
  0xf5   : > { %3621 = vmatprep.subr.mxu0 %v3289_v43  ;;  %v1920_v19 = vld [vmem:[%s3869_s19 + $0x120] sm:$0xfc]  ;;  %v2160_v5 = vrot.slane %v1924_v51, 2  ;;  %v1930_v51 = vld [vmem:[%s3869_s19 + $0x1a0] sm:$0x3] }
  0xf6   : > { %3582 = vmatmul.mubr.f32.gmra.mxu0 %v4774_v11  ;;  %2539 = vmatmul.mubr.f32.vlgmr.msra.gmra.mxu1 %v2091_v62  ;;  %v306_v62 = vld [vmem:[%s3869_s19 + $0x3b8] sm:$0xff] }
  0xf7   : > { %3584 = vmatprep.mubr.f32.mxu0 %v282_v63  ;;  %2543 = vmatprep.mubr.f32.mxu1 %v2101_v49  ;;  %v4781_v12 = vpop.f32.mrf.mxu1  ;;  %v2137_v63 = vrot.slane %v1915_v56, 2  ;;  %v3713_v49 = vld [vmem:[%s3869_s19 + $0xf8] sm:$0xff] }
  0xf8   : > { %3622 = vmatpush3.msra.mxu0 %v3289_v43  ;;  %v2128_v43 = vrot.slane %v1911_v52, 2  ;;  %v2138_v55 = vrot.slane %v3713_v49, 2  ;;  %v1904_v52 = vld [vmem:[%s3869_s19 + $0x58] sm:$0xfc]  ;;  %v1907_v49 = vld [vmem:[%s3869_s19 + $0x88] sm:$0x3] }
  0xf9   : > { %v4787_v40 = vpop.f32.mrf.mxu1  ;;  %3623 = vmatprep.subr.mxu0 %v3288_v10  ;;  %v4876_v56 = vld [vmem:[%s3869_s19 + $0x418] sm:$0xff]  ;;  %v2117_v21 = vrot.slane %v1907_v49, 2 }
  0xfa   : > { %3585 = vmatmul.mubr.f32.gmra.mxu0 %v4791_v22  ;;  %2544 = vmatmul.mubr.f32.gmra.mxu1 %v2099_v16  ;;  %v2129_v16 = vsel %vm2088_vm1, %v2120_v18, %v2128_v43  ;;  %v2139_v41 = vsel %vm2088_vm1, %v2137_v63, %v2138_v55  ;;  %v2146_v57 = vsel %vm2088_vm1, %v2138_v55, %v2145_v20  ;;  %v1923_v63 = vld [vmem:[%s3869_s19 + $0x150] sm:$0x3] }
  0xfb   : > { %3587 = vmatprep.mubr.f32.mxu0 %v288_v59  ;;  %2548 = vmatprep.mubr.f32.mxu1 %v2109_v7  ;;  %v312_v7 = vld [vmem:[%s3869_s19 + $0x400] sm:$0xff]  ;;  %v2158_v20 = vrot.slane %v1923_v63, 2 }
  0xfc   : > { %v4800_v31 = vpop.f32.mrf.mxu1  ;;  %3624 = vmatpush3.msra.mxu0 %v3288_v10  ;;  %v3284_v10 = vld [vmem:[%s5528_s1 + $0x410] sm:$0xff]  ;;  %v3722_v63 = vld [vmem:[%s3869_s19 + $0x180] sm:$0xff] }
  0xfd   : > { %3625 = vmatprep.subr.mxu0 %v3287_v30 }
  0xfe   : > { %3588 = vmatmul.mubr.f32.gmra.mxu0 %v4806_v37  ;;  %2549 = vmatmul.mubr.f32.gmra.mxu1 %v2106_v24  ;;  %v4809_v25 = vpop.f32.mrf.mxu1  ;;  %v4855_v24 = vld [vmem:[%s3869_s19 + $0x3d0] sm:$0xff] }
  0xff   : > { %3590 = vmatprep.mubr.f32.mxu0 %v294_v4  ;;  %2553 = vmatprep.mubr.f32.mxu1 %v2116_v28  ;;  %v1898_v4 = vld [vmem:[%s3869_s19 + $0x10] sm:$0xfc] }
 0x100   : > { %3626 = vmatpush3.msra.mxu0 %v3287_v30  ;;  %v1921_v30 = vld [vmem:[%s3869_s19 + $0x128] sm:$0xfc] }
 0x101   : > { %v4819_v53 = vpop.f32.mrf.mxu1  ;;  %3627 = vmatprep.subr.mxu0 %v3286_v39  ;;  %v2152_v35 = vrot.slane %v1921_v30, 2 }
 0x102   : > { %3591 = vmatmul.mubr.f32.gmra.mxu0 %v4823_v33  ;;  %2554 = vmatmul.mubr.f32.gmra.mxu1 %v2114_v17 }
 0x103   : > { %3593 = vmatprep.mubr.f32.mxu0 %v300_v48  ;;  %2558 = vmatprep.mubr.f32.mxu1 %v2124_v29  ;;  %v4830_v61 = vpop.f32.mrf.mxu1  ;;  %v2095_v48 = vrot.slane %v1898_v4, 2  ;;  %v2096_v29 = vrot.slane %v4646_v58, 2  ;;  %v2144_v58 = vsel %vm2088_vm1, %v2135_v50, %v2143_v34  ;;  %v4894_v50 = vld [vmem:[%s3869_s19 + $0x460] sm:$0xff]  ;;  %v3721_v4 = vld [vmem:[%s3869_s19 + $0x188] sm:$0xff] }
 0x104   : > { %3628 = vmatpush3.msra.mxu0 %v3286_v39  ;;  %v3717_v39 = vld [vmem:[%s3869_s19 + $0x140] sm:$0xff] }
 0x105   : > { %3629 = vmatprep.subr.mxu0 %v3285_v60  ;;  %v2153_v17 = vrot.slane %v3717_v39, 2  ;;  %v2097_v14 = vsel %vm2088_vm1, %v2095_v48, %v2096_v29  ;;  %v1926_v39 = vld [vmem:[%s3869_s19 + $0x168] sm:$0xfc] }
 0x106   : > { %3594 = vmatmul.mubr.f32.gmra.mxu0 %v4838_v47  ;;  %2559 = vmatmul.mubr.f32.gmra.mxu1 %v2121_v1  ;;  %v4841_v8 = vpop.f32.mrf.mxu1  ;;  %v3719_v1 = vld [vmem:[%s3869_s19 + $0x138] sm:$0xff] }
 0x107   : > { %3596 = vmatprep.mubr.f32.mxu0 %v306_v62  ;;  %2563 = vmatprep.mubr.f32.mxu1 %v2131_v46  ;;  %v2150_v43 = vrot.slane %v3719_v1, 2  ;;  %v2149_v62 = vrot.slane %v1920_v19, 2  ;;  %v2102_v46 = vrot.slane %v1901_v42, 2  ;;  %v2154_v36 = vsel %vm2088_vm1, %v2152_v35, %v2153_v17  ;;  %v1913_v19 = vld [vmem:[%s3869_s19 + $0xd0] sm:$0x3] }
 0x108   : > { %v4848_v59 = vpop.f32.mrf.mxu1  ;;  %3630 = vmatpush3.msra.mxu0 %v3285_v60  ;;  %v3282_v60 = vld [vmem:[%s5528_s1 + $0x400] sm:$0xff]  ;;  %v2126_v35 = vrot.slane %v4675_v0, 2  ;;  %v1929_v0 = vld [vmem:[%s3869_s19 + $0x198] sm:$0x3]  ;;  %v2132_v49 = vrot.slane %v1913_v19, 2 }
 0x109   : > { %3631 = vmatprep.subr.mxu0 %v3284_v10  ;;  %v2103_v30 = vsel %vm2088_vm1, %v2096_v29, %v2102_v46  ;;  %v1916_v29 = vld [vmem:[%s3869_s19 + $0xe8] sm:$0xfc]  ;;  %v2164_v46 = vrot.slane %v1926_v39, 2  ;;  %v1932_v39 = vld [vmem:[%s3869_s19 + $0x1b0] sm:$0xfc] }
 0x10a   : > { %3597 = vmatmul.mubr.f32.gmra.mxu0 %v4855_v24  ;;  %2564 = vmatmul.mubr.f32.gmra.mxu1 %v2129_v16  ;;  %v2111_v16 = vrot.slane %v4662_v15, 2  ;;  %v2151_v15 = vsel %vm2088_vm1, %v2149_v62, %v2150_v43 }
 0x10b   : > { %3599 = vmatprep.mubr.f32.mxu0 %v312_v7  ;;  %2568 = vmatprep.mubr.f32.mxu1 %v2139_v41  ;;  %v4862_v28 = vpop.f32.mrf.mxu1  ;;  %v1910_v7 = vld [vmem:[%s3869_s19 + $0xa0] sm:$0xfc] }
 0x10c   : > { %3632 = vmatpush3.msra.mxu0 %v3284_v10  ;;  %v2110_v10 = vrot.slane %v1904_v52, 2 }
 0x10d   : > { %v4870_v18 = vpop.f32.mrf.mxu1  ;;  %3633 = vmatprep.subr.mxu0 %v3283_v6 }
 0x10e   : > { %3600 = vmatmul.mubr.f32.gmra.mxu0 %v4876_v56  ;;  %2569 = vmatmul.mubr.f32.gmra.mxu1 %v2136_v9  ;;  %v2168_v9 = vrot.slane %v3721_v4, 2  ;;  %v2112_v34 = vsel %vm2088_vm1, %v2110_v10, %v2111_v16  ;;  %v2140_v10 = vrot.slane %v1916_v29, 2  ;;  %v2133_v4 = vsel %vm2088_vm1, %v2126_v35, %v2132_v49 }
 0x10f   : > { %3602 = vmatprep.mubr.f32.mxu0 %v318_v32  ;;  %2573 = vmatprep.mubr.f32.mxu1 %v2146_v57  ;;  %v2161_v32 = vsel %vm2088_vm1, %v2153_v17, %v2160_v5  ;;  %v2125_v57 = vrot.slane %v1910_v7, 2  ;;  %v2159_v17 = vsel %vm2088_vm1, %v2150_v43, %v2158_v20  ;;  %v2175_v43 = vrot.slane %v1930_v51, 2  ;;  %v1922_v20 = vld [vmem:[%s3869_s19 + $0x130] sm:$0xfc] }
 0x110   : > { %v4886_v55 = vpop.f32.mrf.mxu1  ;;  %3634 = vmatpush3.msra.mxu0 %v3283_v6  ;;  %v2167_v6 = vrot.slane %v1927_v13, 2  ;;  %v1933_v13 = vld [vmem:[%s3869_s19 + $0x1b8] sm:$0xfc]  ;;  %v2173_v7 = vrot.slane %v1929_v0, 2  ;;  %v2155_v29 = vrot.slane %v1922_v20, 2 }
 0x111   : > { %3635 = vmatprep.subr.mxu0 %v3282_v60  ;;  %v2127_v5 = vsel %vm2088_vm1, %v2125_v57, %v2126_v35  ;;  %v1928_v0 = vld [vmem:[%s3869_s19 + $0x178] sm:$0xfc]  ;;  %v1931_v20 = vld [vmem:[%s3869_s19 + $0x1a8] sm:$0x3] }
 0x112   : > { %3603 = vmatmul.mubr.f32.gmra.mxu0 %v4894_v50  ;;  %2574 = vmatmul.mubr.f32.gmra.mxu1 %v2144_v58  ;;  %v4897_v41 = vpop.f32.mrf.mxu1  ;;  %v2169_v62 = vsel %vm2088_vm1, %v2167_v6, %v2168_v9 }
 0x113   : > { %2578 = vmatprep.mubr.f32.mxu1 %v2154_v36  ;;  %3636 = vmatpush3.msra.mxu0 %v3282_v60  ;;  %v2118_v60 = vsel %vm2088_vm1, %v2111_v16, %v2117_v21  ;;  %v1919_v36 = vld [vmem:[%s3869_s19 + $0x118] sm:$0x3]  ;;  %v2141_v16 = vrot.slane %v4690_v23, 2 }
 0x114   : > { %3637 = vmatprep.mubr.f32.mxu0 %v2097_v14 }
 0x115   : > { %v1062_v42 = vpop.f32.mrf.mxu0  ;;  %v4907_v48 = vpop.f32.mrf.mxu1  ;;  %v2142_v51 = vsel %vm2088_vm1, %v2140_v10, %v2141_v16 }
 0x116   : > { %v4912_v52 = vadd.f32 %v4748_v54, %v1062_v42  ;;  %2579 = vmatmul.mubr.f32.gmra.mxu1 %v2151_v15  ;;  %3638 = vmatmul.mubr.f32.vlgmr.msra.gmra.mxu0 %v2103_v30  ;;  %v2165_v54 = vrot.slane %v3722_v63, 2  ;;  %v2147_v30 = vrot.slane %v1919_v36, 2  ;;  %v2176_v42 = vsel %vm2088_vm1, %v2168_v9, %v2175_v43  ;;  %v3724_v63 = vld [vmem:[%s3869_s19 + $0x1c8] sm:$0xff] }
 0x117   : > { %v1064_v1 = vpop.f32.mrf.mxu0  ;;  %v4917_v58 = vpop.f32.mrf.mxu1  ;;  %2583 = vmatprep.mubr.f32.mxu1 %v2161_v32  ;;  %3640 = vmatprep.mubr.f32.mxu0 %v2112_v34  ;;  %v2182_v32 = vrot.slane %v1933_v13, 2  ;;  %v3723_v34 = vld [vmem:[%s3869_s19 + $0x1d0] sm:$0xff]  ;;  %v2179_v9 = vrot.slane %v1932_v39, 2  ;;  %v2180_v49 = vrot.slane %v3724_v63, 2  ;;  %v2171_v43 = vrot.slane %v4719_v27, 2 }
 0x118   : > { %v2166_v23 = vsel %vm2088_vm1, %v2164_v46, %v2165_v54  ;;  %v2183_v57 = vrot.slane %v3723_v34, 2  ;;  %v2174_v35 = vsel %vm2088_vm1, %v2165_v54, %v2173_v7  ;;  %v2148_v54 = vsel %vm2088_vm1, %v2141_v16, %v2147_v30  ;;  %v1935_v7 = vld [vmem:[%s3869_s19 + $0x1e0] sm:$0x3]  ;;  %v1942_v63 = vld [vmem:[%s3869_s19 + $0x230] sm:$0x3] }
 0x119   : > { %v1067_v14 = vpop.f32.mrf.mxu0  ;;  %v2181_v27 = vsel %vm2088_vm1, %v2179_v9, %v2180_v49  ;;  %v2188_v39 = vrot.slane %v1935_v7, 2  ;;  %v1937_v9 = vld [vmem:[%s3869_s19 + $0x1f0] sm:$0x3] }
 0x11a   : > { %v4927_v21 = vadd.f32 %v4733_v44, %v1067_v14  ;;  %v4929_v15 = vpop.f32.mrf.mxu1  ;;  %2584 = vmatmul.mubr.f32.gmra.mxu1 %v2159_v17  ;;  %3641 = vmatmul.mubr.f32.gmra.mxu0 %v2118_v60  ;;  %v1925_v44 = vld [vmem:[%s3869_s19 + $0x160] sm:$0x3]  ;;  %v2156_v17 = vrot.slane %v4703_v26, 2  ;;  %v1936_v60 = vld [vmem:[%s3869_s19 + $0x1e8] sm:$0x3]  ;;  %v2184_v13 = vsel %vm2088_vm1, %v2182_v32, %v2183_v57 }
 0x11b   : > { %v1069_v6 = vpop.f32.mrf.mxu0  ;;  %2588 = vmatprep.mubr.f32.mxu1 %v2169_v62  ;;  %3643 = vmatprep.mubr.f32.mxu0 %v2127_v5  ;;  %v2162_v26 = vrot.slane %v1925_v44, 2  ;;  %v2190_v5 = vrot.slane %v1936_v60, 2  ;;  %v2177_v44 = vrot.slane %v1931_v20, 2  ;;  %v2192_v20 = vrot.slane %v1937_v9, 2 }
 0x11c   : > { %v4936_v19 = vpop.f32.mrf.mxu1  ;;  %v2157_v14 = vsel %vm2088_vm1, %v2155_v29, %v2156_v17  ;;  %v1939_v6 = vld [vmem:[%s3869_s19 + $0x200] sm:$0xfc]  ;;  %v1938_v29 = vld [vmem:[%s3869_s19 + $0x1f8] sm:$0xfc] }
 0x11d   : > { %v1072_v1 = vpop.f32.mrf.mxu0  ;;  %v2163_v30 = vsel %vm2088_vm1, %v2156_v17, %v2162_v26  ;;  %v2186_v17 = vrot.slane %v4737_v45, 2  ;;  %v2189_v45 = vsel %vm2088_vm1, %v2180_v49, %v2188_v39  ;;  %v2178_v7 = vsel %vm2088_vm1, %v2171_v43, %v2177_v44  ;;  %v1946_v49 = vld [vmem:[%s3869_s19 + $0x250] sm:$0xfc] }
 0x11e   : > { %v4945_v62 = vadd.f32 %v4768_v2, %v1072_v1  ;;  %v4947_v46 = vpop.f32.mrf.mxu1  ;;  %2589 = vmatmul.mubr.f32.gmra.mxu1 %v2166_v23  ;;  %3644 = vmatmul.mubr.f32.gmra.mxu0 %v2133_v4  ;;  %v2170_v2 = vrot.slane %v1928_v0, 2  ;;  %v1934_v4 = vld [vmem:[%s3869_s19 + $0x1c0] sm:$0xfc]  ;;  %v2191_v0 = vsel %vm2088_vm1, %v2183_v57, %v2190_v5  ;;  %v3726_v57 = vld [vmem:[%s3869_s19 + $0x210] sm:$0xff] }
 0x11f   : > { %v1074_v36 = vpop.f32.mrf.mxu0  ;;  %2593 = vmatprep.mubr.f32.mxu1 %v2176_v42  ;;  %3646 = vmatprep.mubr.f32.mxu0 %v2142_v51  ;;  %v2197_v42 = vrot.slane %v1939_v6, 2  ;;  %v3725_v51 = vld [vmem:[%s3869_s19 + $0x218] sm:$0xff]  ;;  %v2195_v5 = vrot.slane %v3726_v57, 2  ;;  %v1941_v6 = vld [vmem:[%s3869_s19 + $0x228] sm:$0x3] }
 0x120   : > { %v4952_v10 = vpop.f32.mrf.mxu1  ;;  %v2172_v1 = vsel %vm2088_vm1, %v2170_v2, %v2171_v43  ;;  %v1940_v36 = vld [vmem:[%s3869_s19 + $0x208] sm:$0xfc] }
 0x121   : > { %v1077_v23 = vpop.f32.mrf.mxu0 }
 0x122   : > { %v4961_v34 = vadd.f32 %v4760_v3, %v1077_v23  ;;  %v4963_v16 = vpop.f32.mrf.mxu1  ;;  %2594 = vmatmul.mubr.f32.gmra.mxu1 %v2174_v35  ;;  %3647 = vmatmul.mubr.f32.gmra.mxu0 %v2148_v54  ;;  %v2198_v3 = vrot.slane %v3725_v51, 2  ;;  %v2185_v35 = vrot.slane %v1934_v4, 2  ;;  %v1943_v51 = vld [vmem:[%s3869_s19 + $0x238] sm:$0x3] }
 0x123   : > { %v1079_v32 = vpop.f32.mrf.mxu0  ;;  %2598 = vmatprep.mubr.f32.mxu1 %v2184_v13  ;;  %3649 = vmatprep.mubr.f32.mxu0 %v2157_v14  ;;  %v2194_v14 = vrot.slane %v1938_v29, 2  ;;  %v1945_v29 = vld [vmem:[%s3869_s19 + $0x248] sm:$0xfc] }
 0x124   : > { %v4969_v60 = vpop.f32.mrf.mxu1  ;;  %v2199_v4 = vsel %vm2088_vm1, %v2197_v42, %v2198_v3  ;;  %v2201_v32 = vrot.slane %v4757_v38, 2  ;;  %v2203_v42 = vrot.slane %v1941_v6, 2  ;;  %v2193_v38 = vsel %vm2088_vm1, %v2186_v17, %v2192_v20 }
 0x125   : > { %v1082_v26 = vpop.f32.mrf.mxu0  ;;  %v2196_v44 = vsel %vm2088_vm1, %v2194_v14, %v2195_v5  ;;  %v2212_v9 = vrot.slane %v1945_v29, 2  ;;  %v3728_v29 = vld [vmem:[%s3869_s19 + $0x258] sm:$0xff] }
 0x126   : > { %v4978_v54 = vadd.f32 %v4787_v40, %v1082_v26  ;;  %v4980_v13 = vpop.f32.mrf.mxu1  ;;  %2599 = vmatmul.mubr.f32.gmra.mxu1 %v2181_v27  ;;  %3650 = vmatmul.mubr.f32.gmra.mxu0 %v2163_v30  ;;  %v2205_v40 = vrot.slane %v1942_v63, 2  ;;  %v2187_v27 = vsel %vm2088_vm1, %v2185_v35, %v2186_v17  ;;  %v2200_v30 = vrot.slane %v1940_v36, 2  ;;  %v3727_v63 = vld [vmem:[%s3869_s19 + $0x260] sm:$0xff]  ;;  %v1952_v17 = vld [vmem:[%s3869_s19 + $0x298] sm:$0xfc] }
 0x127   : > { %v1084_v2 = vpop.f32.mrf.mxu0  ;;  %2603 = vmatprep.mubr.f32.mxu1 %v2191_v0  ;;  %3652 = vmatprep.mubr.f32.mxu0 %v2172_v1  ;;  %v2207_v35 = vrot.slane %v1943_v51, 2  ;;  %v1944_v26 = vld [vmem:[%s3869_s19 + $0x240] sm:$0xfc] }
 0x128   : > { %v4986_v23 = vpop.f32.mrf.mxu1  ;;  %v2206_v57 = vsel %vm2088_vm1, %v2198_v3, %v2205_v40  ;;  %v2202_v14 = vsel %vm2088_vm1, %v2200_v30, %v2201_v32  ;;  %v2215_v2 = vrot.slane %v1946_v49, 2  ;;  %v2204_v3 = vsel %vm2088_vm1, %v2195_v5, %v2203_v42  ;;  %v1947_v49 = vld [vmem:[%s3869_s19 + $0x270] sm:$0x3] }
 0x129   : > { %v1087_v0 = vpop.f32.mrf.mxu0  ;;  %v2209_v40 = vrot.slane %v1944_v26, 2  ;;  %v2230_v42 = vrot.slane %v1952_v17, 2  ;;  %v1951_v26 = vld [vmem:[%s3869_s19 + $0x290] sm:$0xfc]  ;;  %v3729_v17 = vld [vmem:[%s3869_s19 + $0x2a8] sm:$0xff] }
 0x12a   : > { %v4995_v43 = vadd.f32 %v4781_v12, %v1087_v0  ;;  %v4997_v39 = vpop.f32.mrf.mxu1  ;;  %2604 = vmatmul.mubr.f32.gmra.mxu1 %v2189_v45  ;;  %3653 = vmatmul.mubr.f32.gmra.mxu0 %v2178_v7  ;;  %v2213_v12 = vrot.slane %v3727_v63, 2  ;;  %v2216_v45 = vrot.slane %v4774_v11, 2  ;;  %v1949_v7 = vld [vmem:[%s3869_s19 + $0x280] sm:$0x3]  ;;  %v2208_v11 = vsel %vm2088_vm1, %v2201_v32, %v2207_v35  ;;  %v1958_v32 = vld [vmem:[%s3869_s19 + $0x2e0] sm:$0xfc] }
 0x12b   : > { %v1089_v1 = vpop.f32.mrf.mxu0  ;;  %2608 = vmatprep.mubr.f32.mxu1 %v2199_v4  ;;  %3655 = vmatprep.mubr.f32.mxu0 %v2187_v27  ;;  %v1948_v4 = vld [vmem:[%s3869_s19 + $0x278] sm:$0x3]  ;;  %v2210_v0 = vrot.slane %v3728_v29, 2 }
 0x12c   : > { %v5003_v36 = vpop.f32.mrf.mxu1  ;;  %v2214_v51 = vsel %vm2088_vm1, %v2212_v9, %v2213_v12  ;;  %v1955_v1 = vld [vmem:[%s3869_s19 + $0x2c8] sm:$0x3]  ;;  %v2220_v5 = vrot.slane %v1948_v4, 2  ;;  %v2227_v4 = vrot.slane %v1951_v26, 2 }
 0x12d   : > { %v1092_v6 = vpop.f32.mrf.mxu0 }
 0x12e   : > { %v5012_v20 = vadd.f32 %v4809_v25, %v1092_v6  ;;  %v5014_v27 = vpop.f32.mrf.mxu1  ;;  %2609 = vmatmul.mubr.f32.gmra.mxu1 %v2196_v44  ;;  %3656 = vmatmul.mubr.f32.gmra.mxu0 %v2193_v38  ;;  %v2222_v25 = vrot.slane %v1949_v7, 2  ;;  %v2217_v44 = vsel %vm2088_vm1, %v2215_v2, %v2216_v45  ;;  %v2231_v38 = vrot.slane %v4791_v22, 2 }
 0x12f   : > { %v1094_v30 = vpop.f32.mrf.mxu0  ;;  %2613 = vmatprep.mubr.f32.mxu1 %v2206_v57  ;;  %3658 = vmatprep.mubr.f32.mxu0 %v2202_v14  ;;  %v2218_v14 = vrot.slane %v1947_v49, 2  ;;  %v2237_v7 = vrot.slane %v1955_v1, 2  ;;  %v2211_v22 = vsel %vm2088_vm1, %v2209_v40, %v2210_v0  ;;  %v2245_v49 = vrot.slane %v1958_v32, 2  ;;  %v1964_v40 = vld [vmem:[%s3869_s19 + $0x328] sm:$0xfc] }
 0x130   : > { %v5022_v63 = vpop.f32.mrf.mxu1  ;;  %v2223_v6 = vsel %vm2088_vm1, %v2216_v45, %v2222_v25  ;;  %v1950_v30 = vld [vmem:[%s3869_s19 + $0x288] sm:$0xfc]  ;;  %v2246_v1 = vrot.slane %v4806_v37, 2 }
 0x131   : > { %v1097_v57 = vpop.f32.mrf.mxu0  ;;  %v2219_v25 = vsel %vm2088_vm1, %v2210_v0, %v2218_v14  ;;  %v2238_v26 = vsel %vm2088_vm1, %v2231_v38, %v2237_v7  ;;  %v1957_v0 = vld [vmem:[%s3869_s19 + $0x2d8] sm:$0xfc] }
 0x132   : > { %v5029_v35 = vadd.f32 %v4800_v31, %v1097_v57  ;;  %v5031_v9 = vpop.f32.mrf.mxu1  ;;  %2614 = vmatmul.mubr.f32.gmra.mxu1 %v2204_v3  ;;  %3659 = vmatmul.mubr.f32.gmra.mxu0 %v2208_v11  ;;  %v2228_v31 = vrot.slane %v3729_v17, 2  ;;  %v2221_v3 = vsel %vm2088_vm1, %v2213_v12, %v2220_v5  ;;  %v2232_v11 = vsel %vm2088_vm1, %v2230_v42, %v2231_v38  ;;  %v3730_v12 = vld [vmem:[%s3869_s19 + $0x2a0] sm:$0xff] }
 0x133   : > { %v1099_v2 = vpop.f32.mrf.mxu0  ;;  %2618 = vmatprep.mubr.f32.mxu1 %v2214_v51  ;;  %3661 = vmatprep.mubr.f32.mxu0 %v2217_v44  ;;  %v1961_v51 = vld [vmem:[%s3869_s19 + $0x310] sm:$0x3]  ;;  %v1954_v44 = vld [vmem:[%s3869_s19 + $0x2c0] sm:$0x3]  ;;  %v2225_v5 = vrot.slane %v3730_v12, 2  ;;  %v2247_v17 = vsel %vm2088_vm1, %v2245_v49, %v2246_v1 }
 0x134   : > { %v5037_v29 = vpop.f32.mrf.mxu1  ;;  %v2224_v2 = vrot.slane %v1950_v30, 2  ;;  %v2229_v32 = vsel %vm2088_vm1, %v2227_v4, %v2228_v31  ;;  %v2235_v7 = vrot.slane %v1954_v44, 2  ;;  %v2260_v30 = vrot.slane %v1964_v40, 2  ;;  %v5063_v12 = vld [vmem:[%s3869_s19 + $0x2f0] sm:$0xff] }
 0x135   : > { %v2243_v49 = vrot.slane %v5063_v12, 2 }
 0x136   : > { %v1102_v57 = vpop.f32.mrf.mxu0  ;;  %v1512_v45 = vpop.f32.mrf.mxu1  ;;  %2619 = vmatmul.mubr.f32.gmra.mxu1 %v2211_v22  ;;  %3662 = vmatmul.mubr.f32.gmra.mxu0 %v2223_v6  ;;  %v1953_v22 = vld [vmem:[%s3869_s19 + $0x2b8] sm:$0x3]  ;;  %v2252_v6 = vrot.slane %v1961_v51, 2  ;;  %v2226_v4 = vsel %vm2088_vm1, %v2224_v2, %v2225_v5  ;;  %v2242_v51 = vrot.slane %v1957_v0, 2  ;;  %v2236_v0 = vsel %vm2088_vm1, %v2228_v31, %v2235_v7  ;;  %v3732_v31 = vld [vmem:[%s3869_s19 + $0x2e8] sm:$0xff] }
 0x137   : > { %v5049_v37 = vadd.f32 %v4830_v61, %v1102_v57  ;;  %v5052_v42 = vadd.f32 %v1512_v45, %v4912_v52  ;;  %2623 = vmatprep.mubr.f32.mxu1 %v2221_v3  ;;  %3664 = vmatprep.mubr.f32.mxu0 %v2232_v11  ;;  %v2261_v61 = vrot.slane %v4823_v33, 2  ;;  %v1967_v57 = vld [vmem:[%s3869_s19 + $0x358] sm:$0x3]  ;;  %v1970_v52 = vld [vmem:[%s3869_s19 + $0x370] sm:$0xfc]  ;;  %v2233_v11 = vrot.slane %v1953_v22, 2 }
 0x138   : > { %v1104_v38 = vpop.f32.mrf.mxu0  ;;  %v1514_v14 = vpop.f32.mrf.mxu1  ;;  %v2253_v40 = vsel %vm2088_vm1, %v2246_v1, %v2252_v6  ;;  %v2244_v6 = vsel %vm2088_vm1, %v2242_v51, %v2243_v49  ;;  %v2240_v7 = vrot.slane %v3732_v31, 2 }
 0x139   : > { %v2262_v38 = vsel %vm2088_vm1, %v2260_v30, %v2261_v61  ;;  %v2275_v14 = vrot.slane %v1970_v52, 2  ;;  %v2234_v1 = vsel %vm2088_vm1, %v2225_v5, %v2233_v11  ;;  %v1959_v52 = vld [vmem:[%s3869_s19 + $0x300] sm:$0x3]  ;;  %v1963_v5 = vld [vmem:[%s3869_s19 + $0x320] sm:$0xfc] }
 0x13a   : > { %v1107_v45 = vpop.f32.mrf.mxu0  ;;  %v1517_v3 = vpop.f32.mrf.mxu1  ;;  %2624 = vmatmul.mubr.f32.gmra.mxu1 %v2219_v25  ;;  %3665 = vmatmul.mubr.f32.gmra.mxu0 %v2238_v26  ;;  %v1956_v25 = vld [vmem:[%s3869_s19 + $0x2d0] sm:$0xfc]  ;;  %v2267_v26 = vrot.slane %v1967_v57, 2 }
 0x13b   : > { %v5067_v33 = vadd.f32 %v4819_v53, %v1107_v45  ;;  %v5070_v44 = vadd.f32 %v1517_v3, %v4927_v21  ;;  %2628 = vmatprep.mubr.f32.mxu1 %v2229_v32  ;;  %3667 = vmatprep.mubr.f32.mxu0 %v2247_v17  ;;  %v2276_v53 = vrot.slane %v4838_v47, 2  ;;  %v1973_v45 = vld [vmem:[%s3869_s19 + $0x3a0] sm:$0x3]  ;;  %v1960_v21 = vld [vmem:[%s3869_s19 + $0x308] sm:$0x3]  ;;  %v2239_v57 = vrot.slane %v1956_v25, 2 }
 0x13c   : > { %v1109_v2 = vpop.f32.mrf.mxu0  ;;  %v1519_v22 = vpop.f32.mrf.mxu1  ;;  %v1976_v3 = vld [vmem:[%s3869_s19 + $0x3b8] sm:$0xfc]  ;;  %v2282_v11 = vrot.slane %v1973_v45, 2 }
 0x13d   : > { %v2277_v25 = vsel %vm2088_vm1, %v2275_v14, %v2276_v53  ;;  %v2290_v2 = vrot.slane %v1976_v3, 2  ;;  %v1979_v22 = vld [vmem:[%s3869_s19 + $0x3e8] sm:$0x3]  ;;  %v3733_v45 = vld [vmem:[%s3869_s19 + $0x338] sm:$0xff] }
 0x13e   : > { %v1112_v32 = vpop.f32.mrf.mxu0  ;;  %v1522_v17 = vpop.f32.mrf.mxu1  ;;  %2629 = vmatmul.mubr.f32.gmra.mxu1 %v2226_v4  ;;  %3668 = vmatmul.mubr.f32.gmra.mxu0 %v2253_v40  ;;  %v2268_v4 = vsel %vm2088_vm1, %v2261_v61, %v2267_v26  ;;  %v2250_v40 = vrot.slane %v1960_v21, 2  ;;  %v2248_v61 = vrot.slane %v1959_v52, 2  ;;  %v2257_v26 = vrot.slane %v1963_v5, 2  ;;  %v1962_v3 = vld [vmem:[%s3869_s19 + $0x318] sm:$0xfc] }
 0x13f   : > { %v5084_v47 = vadd.f32 %v4848_v59, %v1112_v32  ;;  %v5087_v30 = vadd.f32 %v1522_v17, %v4945_v62  ;;  %2633 = vmatprep.mubr.f32.mxu1 %v2236_v0  ;;  %3670 = vmatprep.mubr.f32.mxu0 %v2262_v38  ;;  %v2291_v59 = vrot.slane %v4855_v24, 2  ;;  %v1982_v62 = vld [vmem:[%s3869_s19 + $0x400] sm:$0xfc]  ;;  %v2241_v38 = vsel %vm2088_vm1, %v2239_v57, %v2240_v7 }
 0x140   : > { %v1114_v51 = vpop.f32.mrf.mxu0  ;;  %v1524_v12 = vpop.f32.mrf.mxu1  ;;  %v2258_v21 = vrot.slane %v3733_v45, 2  ;;  %v2283_v17 = vsel %vm2088_vm1, %v2276_v53, %v2282_v11  ;;  %v2251_v52 = vsel %vm2088_vm1, %v2243_v49, %v2250_v40  ;;  %v2305_v5 = vrot.slane %v1982_v62, 2 }
 0x141   : > { %v1985_v51 = vld [vmem:[%s3869_s19 + $0x430] sm:$0x3]  ;;  %v1988_v12 = vld [vmem:[%s3869_s19 + $0x448] sm:$0xfc]  ;;  %v2249_v53 = vsel %vm2088_vm1, %v2240_v7, %v2248_v61 }
 0x142   : > { %v1117_v32 = vpop.f32.mrf.mxu0  ;;  %v1527_v0 = vpop.f32.mrf.mxu1  ;;  %2634 = vmatmul.mubr.f32.gmra.mxu1 %v2234_v1  ;;  %3671 = vmatmul.mubr.f32.gmra.mxu0 %v2268_v4  ;;  %v2297_v1 = vrot.slane %v1979_v22, 2  ;;  %v2292_v4 = vsel %vm2088_vm1, %v2290_v2, %v2291_v59  ;;  %v2259_v11 = vsel %vm2088_vm1, %v2257_v26, %v2258_v21  ;;  %v3734_v22 = vld [vmem:[%s3869_s19 + $0x330] sm:$0xff]  ;;  %v1965_v2 = vld [vmem:[%s3869_s19 + $0x348] sm:$0x3]  ;;  %v2312_v7 = vrot.slane %v1985_v51, 2 }
 0x143   : > { %v5099_v14 = vadd.f32 %v4841_v8, %v1117_v32  ;;  %v5102_v24 = vadd.f32 %v1527_v0, %v4961_v34  ;;  %2638 = vmatprep.mubr.f32.mxu1 %v2244_v6  ;;  %3673 = vmatprep.mubr.f32.mxu0 %v2277_v25  ;;  %v2306_v8 = vrot.slane %v4876_v56, 2  ;;  %v1966_v34 = vld [vmem:[%s3869_s19 + $0x350] sm:$0x3]  ;;  %v2254_v25 = vrot.slane %v1962_v3, 2 }
 0x144   : > { %v1119_v57 = vpop.f32.mrf.mxu0  ;;  %v1529_v31 = vpop.f32.mrf.mxu1  ;;  %v2255_v49 = vrot.slane %v3734_v22, 2  ;;  %v2298_v62 = vsel %vm2088_vm1, %v2291_v59, %v2297_v1  ;;  %v2265_v61 = vrot.slane %v1966_v34, 2  ;;  %v2320_v45 = vrot.slane %v1988_v12, 2 }
 0x145   : > { %v2307_v26 = vsel %vm2088_vm1, %v2305_v5, %v2306_v8  ;;  %v2321_v3 = vrot.slane %v4894_v50, 2  ;;  %v2313_v50 = vsel %vm2088_vm1, %v2306_v8, %v2312_v7 }
 0x146   : > { %v1122_v6 = vpop.f32.mrf.mxu0  ;;  %v1532_v32 = vpop.f32.mrf.mxu1  ;;  %2639 = vmatmul.mubr.f32.gmra.mxu1 %v2241_v38  ;;  %3674 = vmatmul.mubr.f32.gmra.mxu0 %v2283_v17  ;;  %v1969_v17 = vld [vmem:[%s3869_s19 + $0x368] sm:$0xfc]  ;;  %v2256_v31 = vsel %vm2088_vm1, %v2254_v25, %v2255_v49  ;;  %v2266_v12 = vsel %vm2088_vm1, %v2258_v21, %v2265_v61  ;;  %v1972_v25 = vld [vmem:[%s3869_s19 + $0x398] sm:$0x3] }
 0x147   : > { %v5116_v40 = vadd.f32 %v4870_v18, %v1122_v6  ;;  %v5119_v56 = vadd.f32 %v1532_v32, %v4978_v54  ;;  %2643 = vmatprep.mubr.f32.mxu1 %v2251_v52  ;;  %3676 = vmatprep.mubr.f32.mxu0 %v2292_v4  ;;  %v1991_v18 = vld [vmem:[%s3869_s19 + $0x478] sm:$0x3]  ;;  %v2263_v52 = vrot.slane %v1965_v2, 2  ;;  %v1968_v4 = vld [vmem:[%s3869_s19 + $0x360] sm:$0xfc]  ;;  %v2272_v6 = vrot.slane %v1969_v17, 2 }
 0x148   : > { %v1124_v0 = vpop.f32.mrf.mxu0  ;;  %v1534_v38 = vpop.f32.mrf.mxu1  ;;  %v2327_v5 = vrot.slane %v1991_v18, 2  ;;  %v3735_v32 = vld [vmem:[%s3869_s19 + $0x380] sm:$0xff]  ;;  %v2269_v8 = vrot.slane %v1968_v4, 2  ;;  %v1975_v18 = vld [vmem:[%s3869_s19 + $0x3b0] sm:$0xfc] }
 0x149   : > { %v1971_v0 = vld [vmem:[%s3869_s19 + $0x390] sm:$0x3]  ;;  %v2287_v4 = vrot.slane %v1975_v18, 2 }
 0x14a   : > { %v1127_v57 = vpop.f32.mrf.mxu0  ;;  %v1537_v54 = vpop.f32.mrf.mxu1  ;;  %2644 = vmatmul.mubr.f32.gmra.mxu1 %v2249_v53  ;;  %3677 = vmatmul.mubr.f32.gmra.mxu0 %v2298_v62  ;;  %v2273_v53 = vrot.slane %v3735_v32, 2  ;;  %v3736_v62 = vld [vmem:[%s3869_s19 + $0x378] sm:$0xff]  ;;  %v2328_v38 = vsel %vm2088_vm1, %v2321_v3, %v2327_v5  ;;  %v2278_v17 = vrot.slane %v1971_v0, 2 }
 0x14b   : > { %v5129_v59 = vadd.f32 %v4862_v28, %v1127_v57  ;;  %v5132_v1 = vadd.f32 %v1537_v54, %v4995_v43  ;;  %2648 = vmatprep.mubr.f32.mxu1 %v2259_v11  ;;  %3679 = vmatprep.mubr.f32.mxu0 %v2307_v26  ;;  %v2322_v28 = vsel %vm2088_vm1, %v2320_v45, %v2321_v3  ;;  %v2270_v7 = vrot.slane %v3736_v62, 2  ;;  %v1977_v0 = vld [vmem:[%s3869_s19 + $0x3d8] sm:$0x3] }
 0x14c   : > { %v1129_v51 = vpop.f32.mrf.mxu0  ;;  %v1539_v34 = vpop.f32.mrf.mxu1  ;;  %v2264_v11 = vsel %vm2088_vm1, %v2255_v49, %v2263_v52  ;;  %v2274_v49 = vsel %vm2088_vm1, %v2272_v6, %v2273_v53  ;;  %v2280_v45 = vrot.slane %v1972_v25, 2  ;;  %v3738_v25 = vld [vmem:[%s3869_s19 + $0x3c0] sm:$0xff] }
 0x14d   : > { %v2271_v3 = vsel %vm2088_vm1, %v2269_v8, %v2270_v7  ;;  %v1974_v51 = vld [vmem:[%s3869_s19 + $0x3a8] sm:$0xfc]  ;;  %v1978_v34 = vld [vmem:[%s3869_s19 + $0x3e0] sm:$0x3] }
 0x14e   : > { %v1132_v43 = vpop.f32.mrf.mxu0  ;;  %v1542_v22 = vpop.f32.mrf.mxu1  ;;  %2649 = vmatmul.mubr.f32.gmra.mxu1 %v2256_v31  ;;  %3680 = vmatmul.mubr.f32.gmra.mxu0 %v2313_v50  ;;  %v2281_v52 = vsel %vm2088_vm1, %v2273_v53, %v2280_v45  ;;  %v3737_v50 = vld [vmem:[%s3869_s19 + $0x3c8] sm:$0xff]  ;;  %v2284_v53 = vrot.slane %v1974_v51, 2  ;;  %v2295_v62 = vrot.slane %v1978_v34, 2 }
 0x14f   : > { %v5142_v2 = vadd.f32 %v4897_v41, %v1132_v43  ;;  %v5145_v21 = vadd.f32 %v1542_v22, %v5012_v20  ;;  %2653 = vmatprep.mubr.f32.mxu1 %v2266_v12  ;;  %3682 = vmatprep.mubr.f32.mxu0 %v2322_v28  ;;  %v2288_v5 = vrot.slane %v3737_v50, 2  ;;  %v2285_v43 = vrot.slane %v3738_v25, 2  ;;  %v3740_v34 = vld [vmem:[%s3869_s19 + $0x408] sm:$0xff]  ;;  %v1983_v25 = vld [vmem:[%s3869_s19 + $0x420] sm:$0x3] }
 0x150   : > { %v1134_v61 = vpop.f32.mrf.mxu0  ;;  %v1544_v26 = vpop.f32.mrf.mxu1 }
 0x151   : > { %v2289_v8 = vsel %vm2088_vm1, %v2287_v4, %v2288_v5  ;;  %v2286_v61 = vsel %vm2088_vm1, %v2284_v53, %v2285_v43  ;;  %v2293_v26 = vrot.slane %v1977_v0, 2  ;;  %v2296_v18 = vsel %vm2088_vm1, %v2288_v5, %v2295_v62 }
 0x152   : > { %v5152_v41 = vpop.f32.mrf.mxu0  ;;  %v1547_v20 = vpop.f32.mrf.mxu1  ;;  %2654 = vmatmul.mubr.f32.gmra.mxu1 %v2264_v11  ;;  %3683 = vmatmul.mubr.f32.gmra.mxu0 %v2328_v38  ;;  %v2300_v5 = vrot.slane %v3740_v34, 2  ;;  %v2308_v62 = vrot.slane %v1983_v25, 2 }
 0x153   : > { %v5155_v57 = vadd.f32 %v1547_v20, %v5029_v35  ;;  %2658 = vmatprep.mubr.f32.mxu1 %v2274_v49  ;;  %v2279_v35 = vsel %vm2088_vm1, %v2270_v7, %v2278_v17  ;;  %v1981_v7 = vld [vmem:[%s3869_s19 + $0x3f8] sm:$0xfc]  ;;  %v3739_v17 = vld [vmem:[%s3869_s19 + $0x410] sm:$0xff]  ;;  %v2294_v50 = vsel %vm2088_vm1, %v2285_v43, %v2293_v26 }
 0x154   : > { %v1139_v54 = vpop.f32.mrf.mxu0  ;;  %v1549_v31 = vpop.f32.mrf.mxu1  ;;  %v2302_v20 = vrot.slane %v1981_v7, 2  ;;  %v3741_v26 = vld [vmem:[%s3869_s19 + $0x458] sm:$0xff] }
 0x155   : > { %v1980_v54 = vld [vmem:[%s3869_s19 + $0x3f0] sm:$0xfc]  ;;  %v1984_v31 = vld [vmem:[%s3869_s19 + $0x428] sm:$0x3] }
 0x156   : > { %v1142_v12 = vpop.f32.mrf.mxu0  ;;  %v1552_v6 = vpop.f32.mrf.mxu1  ;;  %2659 = vmatmul.mubr.f32.gmra.mxu1 %v2271_v3  ;;  %v2303_v3 = vrot.slane %v3739_v17, 2  ;;  %v2299_v51 = vrot.slane %v1980_v54, 2  ;;  %v2310_v53 = vrot.slane %v1984_v31, 2  ;;  %v2309_v54 = vsel %vm2088_vm1, %v2300_v5, %v2308_v62 }
 0x157   : > { %v5164_v32 = vadd.f32 %v4917_v58, %v1142_v12  ;;  %v5167_v28 = vadd.f32 %v1552_v6, %v5049_v37  ;;  %2663 = vmatprep.mubr.f32.mxu1 %v2281_v52 }
 0x158   : > { %v1144_v22 = vpop.f32.mrf.mxu0  ;;  %v1554_v11 = vpop.f32.mrf.mxu1  ;;  %v2301_v43 = vsel %vm2088_vm1, %v2299_v51, %v2300_v5 }
 0x159   : > { %v1987_v22 = vld [vmem:[%s3869_s19 + $0x440] sm:$0xfc] }
 0x15a   : > { %v5173_v38 = vpop.f32.mrf.mxu0  ;;  %v1557_v58 = vpop.f32.mrf.mxu1  ;;  %2664 = vmatmul.mubr.f32.gmra.mxu1 %v2279_v35  ;;  %v2304_v35 = vsel %vm2088_vm1, %v2302_v20, %v2303_v3 }
 0x15b   : > { %v5176_v37 = vadd.f32 %v1557_v58, %v5067_v33  ;;  %2668 = vmatprep.mubr.f32.mxu1 %v2289_v8  ;;  %v2311_v58 = vsel %vm2088_vm1, %v2303_v3, %v2310_v53 }
 0x15c   : > { %v1149_v49 = vpop.f32.mrf.mxu0  ;;  %v1559_v45 = vpop.f32.mrf.mxu1 }
 0x15d   : > { %v2318_v49 = vrot.slane %v3741_v26, 2  ;;  %v1986_v45 = vld [vmem:[%s3869_s19 + $0x438] sm:$0xfc]  ;;  %v1363_v26 = vadd.f32 %v4886_v55, %v5152_v41 }
 0x15e   : > { %v5183_v52 = vpop.f32.mrf.mxu0  ;;  %v1562_v33 = vpop.f32.mrf.mxu1  ;;  %2669 = vmatmul.mubr.f32.gmra.mxu1 %v2286_v61  ;;  %v2317_v61 = vrot.slane %v1987_v22, 2  ;;  %v2314_v31 = vrot.slane %v1986_v45, 2 }
 0x15f   : > { %v5186_v4 = vadd.f32 %v1562_v33, %v5084_v47  ;;  %2673 = vmatprep.mubr.f32.mxu1 %v2296_v18  ;;  %v1990_v18 = vld [vmem:[%s3869_s19 + $0x470] sm:$0x3] }
 0x160   : > { %v1154_v12 = vpop.f32.mrf.mxu0  ;;  %v1564_v6 = vpop.f32.mrf.mxu1  ;;  %v3742_v33 = vld [vmem:[%s3869_s19 + $0x450] sm:$0xff]  ;;  %v2319_v34 = vsel %vm2088_vm1, %v2317_v61, %v2318_v49 }
 0x161   : > { %v2325_v12 = vrot.slane %v1990_v18, 2  ;;  %v1989_v6 = vld [vmem:[%s3869_s19 + $0x468] sm:$0x3]  ;;  %s3198_s19 = sshll.u32 %s3191_s16, 5 }
 0x162   : > { %v5193_v11 = vpop.f32.mrf.mxu0  ;;  %v1567_v47 = vpop.f32.mrf.mxu1  ;;  %2674 = vmatmul.mubr.f32.gmra.mxu1 %v2294_v50  ;;  %v2315_v50 = vrot.slane %v3742_v33, 2  ;;  %v2323_v22 = vrot.slane %v1989_v6, 2  ;;  %p215_p4 = scmp.lt.s32.totalorder %s3198_s19, 63 }
 0x163   : > { %v5196_v8 = vadd.f32 %v1567_v47, %v5099_v14  ;;  %2678 = vmatprep.mubr.f32.mxu1 %v2304_v35 }
 0x164   : > { %v1159_v0 = vpop.f32.mrf.mxu0  ;;  %v1569_v7 = vpop.f32.mrf.mxu1  ;;  %s5535_s19 = smov (!%p215_p4, %s3198_s19), 63 }
 0x165   : > { %s3199_s16 = sshll.u32 %s5535_s19, 3 }
 0x166   : > { %v1162_v20 = vpop.f32.mrf.mxu0  ;;  %v1572_v17 = vpop.f32.mrf.mxu1  ;;  %2679 = vmatmul.mubr.f32.gmra.mxu1 %v2301_v43  ;;  %v2326_v43 = vsel %vm2088_vm1, %v2318_v49, %v2325_v12  ;;  %s5378_s9 = scalar_lea.vmem %s5530_s3, %s3199_s16  ;;  %s5395_s7 = scalar_lea.vmem %s5531_s4, %s3199_s16 }
 0x167   : > { %v5204_v14 = vadd.f32 %v1572_v17, %v5116_v40  ;;  %2683 = vmatprep.mubr.f32.mxu1 %v2311_v58  ;;  %v2316_v40 = vsel %vm2088_vm1, %v2314_v31, %v2315_v50  ;;  %v2324_v58 = vsel %vm2088_vm1, %v2315_v50, %v2323_v22  ;;  %v1373_v50 = vadd.f32 %v4907_v48, %v5173_v38 }
 0x168   : > { %v1164_v51 = vpop.f32.mrf.mxu0  ;;  %v1574_v3 = vpop.f32.mrf.mxu1 }
 0x16a   : > { %v1167_v35 = vpop.f32.mrf.mxu0  ;;  %v1577_v53 = vpop.f32.mrf.mxu1  ;;  %2684 = vmatmul.mubr.f32.gmra.mxu1 %v2309_v54 }
 0x16b   : > { %v5211_v25 = vadd.f32 %v1577_v53, %v5129_v59  ;;  %2688 = vmatprep.mubr.f32.mxu1 %v2319_v34  ;;  %v1378_v53 = vadd.f32 %v4936_v19, %v5183_v52 }
 0x16c   : > { %v1169_v5 = vpop.f32.mrf.mxu0  ;;  %v1579_v47 = vpop.f32.mrf.mxu1 }
 0x16e   : > { %v1172_v62 = vpop.f32.mrf.mxu0  ;;  %v1582_v0 = vpop.f32.mrf.mxu1  ;;  %2689 = vmatmul.mubr.f32.gmra.mxu1 %v2316_v40 }
 0x16f   : > { %v5216_v7 = vadd.f32 %v1582_v0, %v5142_v2  ;;  %2693 = vmatprep.mubr.f32.mxu1 %v2326_v43  ;;  %v1383_v43 = vadd.f32 %v4929_v15, %v5193_v11 }
 0x170   : > { %v1174_v61 = vpop.f32.mrf.mxu0  ;;  %v1584_v59 = vpop.f32.mrf.mxu1 }
 0x171   : > { %v1388_v59 = vadd.f32 %v4952_v10, %v1162_v20 }
 0x172   : > { %v1177_v45 = vpop.f32.mrf.mxu0  ;;  %v1587_v18 = vpop.f32.mrf.mxu1  ;;  %2694 = vmatmul.mubr.f32.gmra.mxu1 %v2324_v58 }
 0x173   : > { %v5221_v17 = vadd.f32 %v1587_v18, %v1363_v26 }
 0x174   : > { %v1179_v49 = vpop.f32.mrf.mxu0  ;;  %v1589_v54 = vpop.f32.mrf.mxu1 }
 0x175   : > { %v1393_v54 = vadd.f32 %v4947_v46, %v1167_v35 }
 0x176   : > { %v1182_v31 = vpop.f32.mrf.mxu0  ;;  %v1592_v33 = vpop.f32.mrf.mxu1 }
 0x177   : > { %v5224_v2 = vadd.f32 %v1592_v33, %v5164_v32 }
 0x178   : > { %v1184_v51 = vpop.f32.mrf.mxu0  ;;  %v1594_v3 = vpop.f32.mrf.mxu1 }
 0x17a   : > { %v1187_v34 = vpop.f32.mrf.mxu0  ;;  %v1597_v12 = vpop.f32.mrf.mxu1 }
 0x17b   : > { %v5228_v55 = vadd.f32 %v1597_v12, %v1373_v50  ;;  %v1398_v50 = vadd.f32 %v4969_v60, %v1172_v62 }
 0x17c   : > { %v1189_v41 = vpop.f32.mrf.mxu0  ;;  %v1599_v6 = vpop.f32.mrf.mxu1 }
 0x17e   : > { %v1192_v40 = vpop.f32.mrf.mxu0  ;;  %v1602_v22 = vpop.f32.mrf.mxu1 }
 0x17f   : > { %v5232_v5 = vadd.f32 %v1602_v22, %v1378_v53  ;;  %v1403_v53 = vadd.f32 %v4963_v16, %v1177_v45 }
 0x180   : > { %v1194_v32 = vpop.f32.mrf.mxu0  ;;  %v1604_v47 = vpop.f32.mrf.mxu1 }
 0x182   : > { %v1197_v0 = vpop.f32.mrf.mxu0  ;;  %v1607_v48 = vpop.f32.mrf.mxu1 }
 0x183   : > { %v5236_v38 = vadd.f32 %v1607_v48, %v1383_v43  ;;  %v1408_v43 = vadd.f32 %v4986_v23, %v1182_v31 }
 0x184   : > { %v1199_v58 = vpop.f32.mrf.mxu0  ;;  %v1609_v61 = vpop.f32.mrf.mxu1 }
 0x186   : > { %v1202_v26 = vpop.f32.mrf.mxu0  ;;  %v1612_v18 = vpop.f32.mrf.mxu1 }
 0x187   : > { %v5239_v19 = vadd.f32 %v1612_v18, %v1388_v59  ;;  %v1413_v18 = vadd.f32 %v4980_v13, %v1187_v34 }
 0x188   : > { %v1204_v52 = vpop.f32.mrf.mxu0  ;;  %v1614_v49 = vpop.f32.mrf.mxu1 }
 0x18a   : > { %v1207_v33 = vpop.f32.mrf.mxu0  ;;  %v1617_v51 = vpop.f32.mrf.mxu1 }
 0x18b   : > { %v5242_v3 = vadd.f32 %v1617_v51, %v1393_v54  ;;  %v1418_v51 = vadd.f32 %v5003_v36, %v1192_v40 }
 0x18c   : > { %v1209_v15 = vpop.f32.mrf.mxu0  ;;  %v1619_v11 = vpop.f32.mrf.mxu1 }
 0x18e   : > { %v1212_v12 = vpop.f32.mrf.mxu0  ;;  %v1622_v41 = vpop.f32.mrf.mxu1 }
 0x18f   : > { %v5245_v6 = vadd.f32 %v1622_v41, %v1398_v50  ;;  %v1423_v41 = vadd.f32 %v4997_v39, %v1197_v0 }
 0x190   : > { %v1214_v10 = vpop.f32.mrf.mxu0  ;;  %v1624_v20 = vpop.f32.mrf.mxu1 }
 0x192   : > { %v1217_v22 = vpop.f32.mrf.mxu0  ;;  %v1627_v32 = vpop.f32.mrf.mxu1 }
 0x193   : > { %v5248_v47 = vadd.f32 %v1627_v32, %v1403_v53  ;;  %v1428_v32 = vadd.f32 %v5022_v63, %v1202_v26 }
 0x194   : > { %v1219_v46 = vpop.f32.mrf.mxu0  ;;  %v1629_v35 = vpop.f32.mrf.mxu1 }
 0x196   : > { %v1632_v48 = vpop.f32.mrf.mxu1  ;;  %v3559_v58 = vpop.f32.mrf.mxu0 }
 0x197   : > { %v5251_v61 = vadd.f32 %v1632_v48, %v1408_v43  ;;  %v5254_v60 = vadd.f32 %v3559_v58, %v5070_v44  ;;  %v1433_v48 = vadd.f32 %v5014_v27, %v1207_v33 }
 0x198   : > { %v1634_v62 = vpop.f32.mrf.mxu1  ;;  %v1737_v59 = vpop.f32.mrf.mxu0 }
 0x199   : > { %v5258_v16 = vadd.f32 %v1737_v59, %v5052_v42 }
 0x19a   : > { %v1637_v45 = vpop.f32.mrf.mxu1  ;;  %v3562_v52 = vpop.f32.mrf.mxu0 }
 0x19b   : > { %v5260_v49 = vadd.f32 %v1637_v45, %v1413_v18  ;;  %v5263_v23 = vadd.f32 %v3562_v52, %v5102_v24  ;;  %v1438_v18 = vadd.f32 %v5037_v29, %v1212_v12 }
 0x19c   : > { %v1639_v31 = vpop.f32.mrf.mxu1  ;;  %v1747_v54 = vpop.f32.mrf.mxu0 }
 0x19d   : > { %v5267_v44 = vadd.f32 %v1747_v54, %v5087_v30  ;;  %v1443_v54 = vadd.f32 %v5031_v9, %v1217_v22 }
 0x19e   : > { %v1642_v15 = vpop.f32.mrf.mxu1  ;;  %v3565_v11 = vpop.f32.mrf.mxu0 }
 0x19f   : > { %v5269_v13 = vadd.f32 %v1642_v15, %v1418_v51  ;;  %v5272_v42 = vadd.f32 %v3565_v11, %v5132_v1 }
 0x1a0   : > { %v1644_v34 = vpop.f32.mrf.mxu1  ;;  %v1757_v50 = vpop.f32.mrf.mxu0 }
 0x1a1   : > { %v5276_v24 = vadd.f32 %v1757_v50, %v5119_v56 }
 0x1a2   : > { %v1647_v10 = vpop.f32.mrf.mxu1  ;;  %v3568_v20 = vpop.f32.mrf.mxu0 }
 0x1a3   : > { %v5278_v36 = vadd.f32 %v1647_v10, %v1423_v41  ;;  %v5281_v30 = vadd.f32 %v3568_v20, %v5155_v57 }
 0x1a4   : > { %v1649_v40 = vpop.f32.mrf.mxu1  ;;  %v1767_v53 = vpop.f32.mrf.mxu0 }
 0x1a5   : > { %v5285_v1 = vadd.f32 %v1767_v53, %v5145_v21 }
 0x1a6   : > { %v1652_v46 = vpop.f32.mrf.mxu1  ;;  %v3571_v35 = vpop.f32.mrf.mxu0 }
 0x1a7   : > { %v5287_v39 = vadd.f32 %v1652_v46, %v1428_v32  ;;  %v5290_v56 = vadd.f32 %v3571_v35, %v5176_v37 }
 0x1a8   : > { %v1654_v0 = vpop.f32.mrf.mxu1  ;;  %v1777_v43 = vpop.f32.mrf.mxu0 }
 0x1a9   : > { %v5294_v57 = vadd.f32 %v1777_v43, %v5167_v28 }
 0x1aa   : > { %v1657_v58 = vpop.f32.mrf.mxu1  ;;  %v3574_v62 = vpop.f32.mrf.mxu0 }
 0x1ab   : > { %v1658_v63 = vadd.f32 %v1657_v58, %v1433_v48  ;;  %v5297_v21 = vadd.f32 %v3574_v62, %v5196_v8 }
 0x1ac   : > { %v1659_v26 = vpop.f32.mrf.mxu1  ;;  %v1787_v59 = vpop.f32.mrf.mxu0 }
 0x1ad   : > { %v5301_v37 = vadd.f32 %v1787_v59, %v5186_v4 }
 0x1ae   : > { %v1662_v45 = vpop.f32.mrf.mxu1  ;;  %v3577_v52 = vpop.f32.mrf.mxu0 }
 0x1af   : > { %v5303_v31 = vadd.f32 %v1662_v45, %v1438_v18  ;;  %v5306_v27 = vadd.f32 %v3577_v52, %v5211_v25 }
 0x1b0   : > { %v1664_v28 = vpop.f32.mrf.mxu1  ;;  %v1797_v33 = vpop.f32.mrf.mxu0 }
 0x1b1   : > { %v5310_v8 = vadd.f32 %v1797_v33, %v5204_v14 }
 0x1b2   : > { %v1667_v51 = vpop.f32.mrf.mxu1  ;;  %v3580_v15 = vpop.f32.mrf.mxu0 }
 0x1b3   : > { %v1668_v29 = vadd.f32 %v1667_v51, %v1443_v54  ;;  %v5313_v4 = vadd.f32 %v3580_v15, %v5221_v17 }
 0x1b4   : > { %v1669_v12 = vpop.f32.mrf.mxu1  ;;  %v1807_v11 = vpop.f32.mrf.mxu0 }
 0x1b5   : > { %v5316_v34 = vadd.f32 %v1807_v11, %v5216_v7 }
 0x1b6   : > { %v3583_v25 = vpop.f32.mrf.mxu0  ;;  %v2540_v50 = vpop.f32.mrf.mxu1 }
 0x1b7   : > { %v5319_v41 = vadd.f32 %v3583_v25, %v5228_v55 }
 0x1b8   : > { %v1817_v9 = vpop.f32.mrf.mxu0  ;;  %v2542_v22 = vpop.f32.mrf.mxu1 }
 0x1b9   : > { %v5322_v14 = vadd.f32 %v1817_v9, %v5224_v2 }
 0x1ba   : > { %v3586_v10 = vpop.f32.mrf.mxu0  ;;  %v2545_v20 = vpop.f32.mrf.mxu1 }
 0x1bb   : > { %v5325_v17 = vadd.f32 %v3586_v10, %v5236_v38 }
 0x1bc   : > { %v1827_v40 = vpop.f32.mrf.mxu0  ;;  %v2547_v53 = vpop.f32.mrf.mxu1 }
 0x1bd   : > { %v5328_v7 = vadd.f32 %v1827_v40, %v5232_v5 }
 0x1be   : > { %v3589_v32 = vpop.f32.mrf.mxu0  ;;  %v2550_v46 = vpop.f32.mrf.mxu1 }
 0x1bf   : > { %v5331_v55 = vadd.f32 %v3589_v32, %v5242_v3 }
 0x1c0   : > { %v1837_v35 = vpop.f32.mrf.mxu0  ;;  %v2552_v0 = vpop.f32.mrf.mxu1 }
 0x1c1   : > { %v5334_v2 = vadd.f32 %v1837_v35, %v5239_v19  ;;  %v2996_v0 = vld [vmem:[%s5378_s9 + $0x8] sm:$0xff] }
 0x1c2   : > { %v3592_v43 = vpop.f32.mrf.mxu0  ;;  %v2555_v48 = vpop.f32.mrf.mxu1 }
 0x1c3   : > { %v5337_v38 = vadd.f32 %v3592_v43, %v5248_v47 }
 0x1c4   : > { %v1847_v58 = vpop.f32.mrf.mxu0  ;;  %v2557_v62 = vpop.f32.mrf.mxu1 }
 0x1c5   : > { %v5340_v5 = vadd.f32 %v1847_v58, %v5245_v6 }
 0x1c6   : > { %v3595_v26 = vpop.f32.mrf.mxu0  ;;  %v5342_v59 = vpop.f32.mrf.mxu1 }
 0x1c7   : > { %v5345_v3 = vadd.f32 %v3595_v26, %v5260_v49 }
 0x1c8   : > { %v1857_v18 = vpop.f32.mrf.mxu0  ;;  %v2562_v45 = vpop.f32.mrf.mxu1 }
 0x1c9   : > { %v5348_v19 = vadd.f32 %v1857_v18, %v5251_v61 }
 0x1ca   : > { %v3598_v47 = vpop.f32.mrf.mxu0  ;;  %v2565_v52 = vpop.f32.mrf.mxu1 }
 0x1cb   : > { %v5353_v28 = vadd.f32 %v3598_v47, %v5278_v36 }
 0x1cc   : > { %v1867_v6 = vpop.f32.mrf.mxu0  ;;  %v2567_v33 = vpop.f32.mrf.mxu1 }
 0x1cd   : > { %v5356_v54 = vadd.f32 %v1867_v6, %v5269_v13 }
 0x1ce   : > { %v3601_v49 = vpop.f32.mrf.mxu0  ;;  %v5358_v51 = vpop.f32.mrf.mxu1 }
 0x1cf   : > { %v5360_v15 = vadd.f32 %v3601_v49, %v1658_v63 }
 0x1d0   : > { %v1877_v61 = vpop.f32.mrf.mxu0  ;;  %v2572_v12 = vpop.f32.mrf.mxu1 }
 0x1d1   : > { %v5365_v11 = vadd.f32 %v1877_v61, %v5287_v39 }
 0x1d2   : > { %v3604_v36 = vpop.f32.mrf.mxu0  ;;  %v2575_v25 = vpop.f32.mrf.mxu1 }
 0x1d3   : > { %v5367_v9 = vadd.f32 %v3604_v36, %v1668_v29  ;;  %v5383_v29 = vld [vmem:[%s5529_s2] ss:$0 sm:$0xff] }
 0x1d4   : > { %v1887_v22 = vpop.f32.mrf.mxu0  ;;  %v2577_v13 = vpop.f32.mrf.mxu1 }
 0x1d5   : > { %v5371_v10 = vadd.f32 %v1887_v22, %v5303_v31 }
 0x1d6   : > { %v5373_v63 = vpop.f32.mrf.mxu1  ;;  %v3639_v40 = vpop.f32.mrf.mxu0 }
 0x1d7   : > { %v2771_v39 = vadd.f32 %v3639_v40, %v2545_v20  ;;  %v2995_v20 = vld [vmem:[%s5378_s9] sm:$0xff] }
 0x1d8   : > { %v2582_v53 = vpop.f32.mrf.mxu1  ;;  %v2765_v32 = vpop.f32.mrf.mxu0 }
 0x1d9   : > { %v2925_v31 = vadd.f32 %v2771_v39, %v5254_v60  ;;  %v2766_v35 = vadd.f32 %v2765_v32, %v2540_v50  ;;  %v2998_v50 = vld [vmem:[%s5378_s9 + $0x18] sm:$0xff] }
 0x1da   : > { %v2585_v43 = vpop.f32.mrf.mxu1  ;;  %v3642_v58 = vpop.f32.mrf.mxu0 }
 0x1db   : > { %v2964_v62 = vadd.f32 %v5383_v29, %v2925_v31  ;;  %v2924_v26 = vadd.f32 %v2766_v35, %v5258_v16  ;;  %v2781_v18 = vadd.f32 %v3642_v58, %v2555_v48 }
 0x1dc   : > { %v2587_v45 = vpop.f32.mrf.mxu1  ;;  %v2775_v47 = vpop.f32.mrf.mxu0 }
 0x1dd   : > { %v3028_v6 = vadd.f32 %v2996_v0, %v2964_v62  ;;  %v2963_v33 = vadd.f32 %v5383_v29, %v2924_v26  ;;  %v2927_v49 = vadd.f32 %v2781_v18, %v5263_v23  ;;  %v2776_v60 = vadd.f32 %v2775_v47, %v2550_v46  ;;  %v2997_v23 = vld [vmem:[%s5378_s9 + $0x10] sm:$0xff]  ;;  %v2999_v45 = vld [vmem:[%s5378_s9 + $0x20] sm:$0xff] }
 0x1de   : > { %v5398_v61 = vpop.f32.mrf.mxu1  ;;  %v3645_v16 = vpop.f32.mrf.mxu0 }
 0x1df   : > { %v3060_v48 = vmax.f32 %v3028_v6, 0.0  ;;  %v3027_v12 = vadd.f32 %v2995_v20, %v2963_v33  ;;  %v2966_v36 = vadd.f32 %v5383_v29, %v2927_v49  ;;  %v2926_v22 = vadd.f32 %v2776_v60, %v5267_v44 }
 0x1e0   : > { %v2791_v46 = vadd.f32 %v3645_v16, %v2565_v52  ;;  %v2592_v13 = vpop.f32.mrf.mxu1  ;;  %v2785_v40 = vpop.f32.mrf.mxu0  ;;  %v3000_v52 = vld [vmem:[%s5378_s9 + $0x28] sm:$0xff] }
 0x1e1   : > { %3092 = vst [vmem:[%s5395_s7 + $0x8] sm:$0xff] %v3060_v48  ;;  %v3059_v39 = vmax.f32 %v3027_v12, 0.0  ;;  %v3030_v53 = vadd.f32 %v2998_v50, %v2966_v36  ;;  %v2965_v32 = vadd.f32 %v5383_v29, %v2926_v22  ;;  %v2786_v31 = vadd.f32 %v2785_v40, %v5342_v59  ;;  %v3002_v50 = vld [vmem:[%s5378_s9 + $0x38] sm:$0xff] }
 0x1e2   : > { %v2929_v35 = vadd.f32 %v2791_v46, %v5272_v42  ;;  %v2595_v0 = vpop.f32.mrf.mxu1  ;;  %v3648_v58 = vpop.f32.mrf.mxu0 }
 0x1e3   : > { %3091 = vst [vmem:[%s5395_s7] sm:$0xff] %v3059_v39  ;;  %v3062_v44 = vmax.f32 %v3030_v53, 0.0  ;;  %v3029_v62 = vadd.f32 %v2997_v23, %v2965_v32  ;;  %v2928_v26 = vadd.f32 %v2786_v31, %v5276_v24  ;;  %v2801_v18 = vadd.f32 %v3648_v58, %v2575_v25  ;;  %v3001_v23 = vld [vmem:[%s5378_s9 + $0x30] sm:$0xff]  ;;  %v3004_v53 = vld [vmem:[%s5378_s9 + $0x48] sm:$0xff] }
 0x1e4   : > { %v2968_v20 = vadd.f32 %v5383_v29, %v2929_v35  ;;  %v2597_v47 = vpop.f32.mrf.mxu1  ;;  %v2795_v6 = vpop.f32.mrf.mxu0 }
 0x1e5   : > { %3094 = vst [vmem:[%s5395_s7 + $0x18] sm:$0xff] %v3062_v44  ;;  %v3061_v59 = vmax.f32 %v3029_v62, 0.0  ;;  %v2967_v42 = vadd.f32 %v5383_v29, %v2928_v26  ;;  %v2931_v33 = vadd.f32 %v2801_v18, %v5281_v30  ;;  %v2796_v49 = vadd.f32 %v2795_v6, %v5358_v51  ;;  %v3006_v6 = vld [vmem:[%s5378_s9 + $0x58] sm:$0xff] }
 0x1e6   : > { %v3032_v60 = vadd.f32 %v3000_v52, %v2968_v20  ;;  %v2600_v16 = vpop.f32.mrf.mxu1  ;;  %v3651_v24 = vpop.f32.mrf.mxu0  ;;  %v3003_v20 = vld [vmem:[%s5378_s9 + $0x40] sm:$0xff] }
 0x1e7   : > { %3093 = vst [vmem:[%s5395_s7 + $0x10] sm:$0xff] %v3061_v59  ;;  %v3031_v25 = vadd.f32 %v2999_v45, %v2967_v42  ;;  %v2970_v48 = vadd.f32 %v5383_v29, %v2931_v33  ;;  %v2930_v12 = vadd.f32 %v2796_v49, %v5285_v1  ;;  %v2811_v36 = vadd.f32 %v3651_v24, %v2585_v43 }
 0x1e8   : > { %v3064_v22 = vmax.f32 %v3032_v60, 0.0  ;;  %v2602_v46 = vpop.f32.mrf.mxu1  ;;  %v2805_v30 = vpop.f32.mrf.mxu0 }
 0x1e9   : > { %v3063_v13 = vmax.f32 %v3031_v25, 0.0  ;;  %v3034_v51 = vadd.f32 %v3002_v50, %v2970_v48  ;;  %v2969_v40 = vadd.f32 %v5383_v29, %v2930_v12  ;;  %v2933_v39 = vadd.f32 %v2811_v36, %v5290_v56  ;;  %v3005_v50 = vld [vmem:[%s5378_s9 + $0x50] sm:$0xff] }
 0x1ea   : > { %3096 = vst [vmem:[%s5395_s7 + $0x28] sm:$0xff] %v3064_v22  ;;  %v2806_v32 = vadd.f32 %v2805_v30, %v5373_v63  ;;  %v2605_v31 = vpop.f32.mrf.mxu1  ;;  %v3654_v35 = vpop.f32.mrf.mxu0  ;;  %v3008_v22 = vld [vmem:[%s5378_s9 + $0x68] sm:$0xff] }
 0x1eb   : > { %3095 = vst [vmem:[%s5395_s7 + $0x20] sm:$0xff] %v3063_v13  ;;  %v3066_v1 = vmax.f32 %v3034_v51, 0.0  ;;  %v3033_v43 = vadd.f32 %v3001_v23, %v2969_v40  ;;  %v2972_v58 = vadd.f32 %v5383_v29, %v2933_v39  ;;  %v2821_v44 = vadd.f32 %v3654_v35, %v2595_v0  ;;  %v3007_v40 = vld [vmem:[%s5378_s9 + $0x60] sm:$0xff] }
 0x1ec   : > { %v2932_v62 = vadd.f32 %v2806_v32, %v5294_v57  ;;  %v2607_v52 = vpop.f32.mrf.mxu1  ;;  %v2815_v26 = vpop.f32.mrf.mxu0 }
 0x1ed   : > { %3098 = vst [vmem:[%s5395_s7 + $0x38] sm:$0xff] %v3066_v1  ;;  %v3065_v56 = vmax.f32 %v3033_v43, 0.0  ;;  %v3036_v18 = vadd.f32 %v3004_v53, %v2972_v58  ;;  %v2935_v63 = vadd.f32 %v2821_v44, %v5297_v21  ;;  %v2816_v45 = vadd.f32 %v2815_v26, %v5398_v61 }
 0x1ee   : > { %v2971_v47 = vadd.f32 %v5383_v29, %v2932_v62  ;;  %v2610_v59 = vpop.f32.mrf.mxu1  ;;  %v3657_v42 = vpop.f32.mrf.mxu0  ;;  %v3010_v62 = vld [vmem:[%s5378_s9 + $0x78] sm:$0xff] }
 0x1ef   : > { %3097 = vst [vmem:[%s5395_s7 + $0x30] sm:$0xff] %v3065_v56  ;;  %v3068_v57 = vmax.f32 %v3036_v18, 0.0  ;;  %v2974_v0 = vadd.f32 %v5383_v29, %v2935_v63  ;;  %v2934_v33 = vadd.f32 %v2816_v45, %v5301_v37  ;;  %v2831_v49 = vadd.f32 %v3657_v42, %v2605_v31  ;;  %v3009_v56 = vld [vmem:[%s5378_s9 + $0x70] sm:$0xff] }
 0x1f0   : > { %v3035_v60 = vadd.f32 %v3003_v20, %v2971_v47  ;;  %v2612_v24 = vpop.f32.mrf.mxu1  ;;  %v2825_v21 = vpop.f32.mrf.mxu0 }
 0x1f1   : > { %3100 = vst [vmem:[%s5395_s7 + $0x48] sm:$0xff] %v3068_v57  ;;  %v3038_v61 = vadd.f32 %v3006_v6, %v2974_v0  ;;  %v2973_v25 = vadd.f32 %v5383_v29, %v2934_v33  ;;  %v2937_v48 = vadd.f32 %v2831_v49, %v5306_v27  ;;  %v2826_v12 = vadd.f32 %v2825_v21, %v2600_v16  ;;  %v3011_v33 = vld [vmem:[%s5378_s9 + $0x80] sm:$0xff] }
 0x1f2   : > { %v3067_v36 = vmax.f32 %v3035_v60, 0.0  ;;  %v2615_v23 = vpop.f32.mrf.mxu1  ;;  %v3660_v46 = vpop.f32.mrf.mxu0 }
 0x1f3   : > { %v3070_v37 = vmax.f32 %v3038_v61, 0.0  ;;  %v3037_v30 = vadd.f32 %v3005_v50, %v2973_v25  ;;  %v2976_v13 = vadd.f32 %v5383_v29, %v2937_v48  ;;  %v2936_v51 = vadd.f32 %v2826_v12, %v5310_v8  ;;  %v3012_v61 = vld [vmem:[%s5378_s9 + $0x88] sm:$0xff] }
 0x1f4   : > { %3099 = vst [vmem:[%s5395_s7 + $0x40] sm:$0xff] %v3067_v36  ;;  %v2841_v39 = vadd.f32 %v3660_v46, %v2615_v23  ;;  %v2617_v53 = vpop.f32.mrf.mxu1  ;;  %v2835_v32 = vpop.f32.mrf.mxu0 }
 0x1f5   : > { %3102 = vst [vmem:[%s5395_s7 + $0x58] sm:$0xff] %v3070_v37  ;;  %v3069_v27 = vmax.f32 %v3037_v30, 0.0  ;;  %v3040_v16 = vadd.f32 %v3008_v22, %v2976_v13  ;;  %v2975_v31 = vadd.f32 %v5383_v29, %v2936_v51  ;;  %v2836_v35 = vadd.f32 %v2835_v32, %v2610_v59  ;;  %v3013_v30 = vld [vmem:[%s5378_s9 + $0x90] sm:$0xff] }
 0x1f6   : > { %v2939_v1 = vadd.f32 %v2841_v39, %v5313_v4  ;;  %v2620_v43 = vpop.f32.mrf.mxu1  ;;  %v3663_v58 = vpop.f32.mrf.mxu0 }
 0x1f7   : > { %3101 = vst [vmem:[%s5395_s7 + $0x50] sm:$0xff] %v3069_v27  ;;  %v3072_v8 = vmax.f32 %v3040_v16, 0.0  ;;  %v3039_v44 = vadd.f32 %v3007_v40, %v2975_v31  ;;  %v2938_v52 = vadd.f32 %v2836_v35, %v5316_v34  ;;  %v3014_v16 = vld [vmem:[%s5378_s9 + $0x98] sm:$0xff] }
 0x1f8   : > { %v2978_v26 = vadd.f32 %v5383_v29, %v2939_v1  ;;  %v2622_v18 = vpop.f32.mrf.mxu1  ;;  %v2845_v20 = vpop.f32.mrf.mxu0 }
 0x1f9   : > { %3104 = vst [vmem:[%s5395_s7 + $0x68] sm:$0xff] %v3072_v8  ;;  %v3071_v63 = vmax.f32 %v3039_v44, 0.0  ;;  %v2977_v45 = vadd.f32 %v5383_v29, %v2938_v52  ;;  %v2846_v4 = vadd.f32 %v2845_v20, %v2620_v43 }
 0x1fa   : > { %v3042_v47 = vadd.f32 %v3010_v62, %v2978_v26  ;;  %v2625_v6 = vpop.f32.mrf.mxu1  ;;  %v3666_v59 = vpop.f32.mrf.mxu0  ;;  %v3015_v62 = vld [vmem:[%s5378_s9 + $0xa0] sm:$0xff] }
 0x1fb   : > { %3103 = vst [vmem:[%s5395_s7 + $0x60] sm:$0xff] %v3071_v63  ;;  %v3041_v42 = vadd.f32 %v3009_v56, %v2977_v45  ;;  %v2940_v34 = vadd.f32 %v2846_v4, %v5322_v14  ;;  %v2851_v57 = vadd.f32 %v3663_v58, %v2625_v6  ;;  %v3016_v4 = vld [vmem:[%s5378_s9 + $0xa8] sm:$0xff] }
 0x1fc   : > { %v3074_v0 = vmax.f32 %v3042_v47, 0.0  ;;  %v2627_v49 = vpop.f32.mrf.mxu1  ;;  %v2855_v60 = vpop.f32.mrf.mxu0 }
 0x1fd   : > { %v3073_v50 = vmax.f32 %v3041_v42, 0.0  ;;  %v2979_v24 = vadd.f32 %v5383_v29, %v2940_v34  ;;  %v2941_v21 = vadd.f32 %v2851_v57, %v5319_v41 }
 0x1fe   : > { %3106 = vst [vmem:[%s5395_s7 + $0x78] sm:$0xff] %v3074_v0  ;;  %v2630_v25 = vpop.f32.mrf.mxu1  ;;  %v3669_v22 = vpop.f32.mrf.mxu0 }
 0x1ff   : > { %3105 = vst [vmem:[%s5395_s7 + $0x70] sm:$0xff] %v3073_v50  ;;  %v3043_v48 = vadd.f32 %v3011_v33, %v2979_v24  ;;  %v2980_v14 = vadd.f32 %v5383_v29, %v2941_v21  ;;  %v2856_v12 = vadd.f32 %v2855_v60, %v2630_v25  ;;  %v3017_v33 = vld [vmem:[%s5378_s9 + $0xb0] sm:$0xff] }
 0x200   : > { %v2632_v36 = vpop.f32.mrf.mxu1  ;;  %v2865_v53 = vpop.f32.mrf.mxu0 }
 0x201   : > { %v3075_v23 = vmax.f32 %v3043_v48, 0.0  ;;  %v3044_v46 = vadd.f32 %v3012_v61, %v2980_v14  ;;  %v2942_v37 = vadd.f32 %v2856_v12, %v5328_v7  ;;  %v3018_v48 = vld [vmem:[%s5378_s9 + $0xb8] sm:$0xff] }
 0x202   : > { %v2635_v13 = vpop.f32.mrf.mxu1  ;;  %v3672_v58 = vpop.f32.mrf.mxu0 }
 0x203   : > { %3107 = vst [vmem:[%s5395_s7 + $0x80] sm:$0xff] %v3075_v23  ;;  %v3076_v41 = vmax.f32 %v3044_v46, 0.0  ;;  %v2981_v51 = vadd.f32 %v5383_v29, %v2942_v37  ;;  %v2861_v40 = vadd.f32 %v3666_v59, %v2635_v13 }
 0x204   : > { %v2637_v39 = vpop.f32.mrf.mxu1  ;;  %v2875_v20 = vpop.f32.mrf.mxu0 }
 0x205   : > { %3108 = vst [vmem:[%s5395_s7 + $0x88] sm:$0xff] %v3076_v41  ;;  %v3045_v32 = vadd.f32 %v3013_v30, %v2981_v51  ;;  %v2943_v27 = vadd.f32 %v2861_v40, %v5325_v17  ;;  %v3019_v30 = vld [vmem:[%s5378_s9 + $0xc0] sm:$0xff] }
 0x206   : > { %v2640_v31 = vpop.f32.mrf.mxu1  ;;  %v3675_v34 = vpop.f32.mrf.mxu0 }
 0x207   : > { %v3077_v35 = vmax.f32 %v3045_v32, 0.0  ;;  %v2982_v7 = vadd.f32 %v5383_v29, %v2943_v27  ;;  %v2866_v1 = vadd.f32 %v2865_v53, %v2640_v31  ;;  %v3020_v27 = vld [vmem:[%s5378_s9 + $0xc8] sm:$0xff] }
 0x208   : > { %v2642_v43 = vpop.f32.mrf.mxu1  ;;  %v2885_v21 = vpop.f32.mrf.mxu0 }
 0x209   : > { %3109 = vst [vmem:[%s5395_s7 + $0x90] sm:$0xff] %v3077_v35  ;;  %v3046_v8 = vadd.f32 %v3014_v16, %v2982_v7  ;;  %v2944_v44 = vadd.f32 %v2866_v1, %v5334_v2 }
 0x20a   : > { %v2645_v52 = vpop.f32.mrf.mxu1  ;;  %v3678_v23 = vpop.f32.mrf.mxu0 }
 0x20b   : > { %v3078_v26 = vmax.f32 %v3046_v8, 0.0  ;;  %v2983_v17 = vadd.f32 %v5383_v29, %v2944_v44  ;;  %v2871_v56 = vadd.f32 %v3669_v22, %v2645_v52  ;;  %v3021_v8 = vld [vmem:[%s5378_s9 + $0xd0] sm:$0xff] }
 0x20c   : > { %v2647_v18 = vpop.f32.mrf.mxu1  ;;  %v2895_v39 = vpop.f32.mrf.mxu0 }
 0x20d   : > { %3110 = vst [vmem:[%s5395_s7 + $0x98] sm:$0xff] %v3078_v26  ;;  %v3047_v63 = vadd.f32 %v3015_v62, %v2983_v17  ;;  %v2945_v45 = vadd.f32 %v2871_v56, %v5331_v55 }
 0x20e   : > { %v2650_v47 = vpop.f32.mrf.mxu1  ;;  %v3681_v1 = vpop.f32.mrf.mxu0 }
 0x20f   : > { %v3079_v6 = vmax.f32 %v3047_v63, 0.0  ;;  %v2984_v2 = vadd.f32 %v5383_v29, %v2945_v45  ;;  %v2876_v59 = vadd.f32 %v2875_v20, %v2650_v47  ;;  %v3022_v20 = vld [vmem:[%s5378_s9 + $0xd8] sm:$0xff] }
 0x210   : > { %v2652_v42 = vpop.f32.mrf.mxu1  ;;  %v2905_v17 = vpop.f32.mrf.mxu0 }
 0x211   : > { %3111 = vst [vmem:[%s5395_s7 + $0xa0] sm:$0xff] %v3079_v6  ;;  %v3048_v57 = vadd.f32 %v3016_v4, %v2984_v2  ;;  %v2946_v0 = vadd.f32 %v2876_v59, %v5340_v5  ;;  %v3023_v42 = vld [vmem:[%s5378_s9 + $0xe0] sm:$0xff] }
 0x212   : > { %v2655_v49 = vpop.f32.mrf.mxu1  ;;  %v3684_v6 = vpop.f32.mrf.mxu0 }
 0x213   : > { %v3080_v60 = vmax.f32 %v3048_v57, 0.0  ;;  %v2985_v55 = vadd.f32 %v5383_v29, %v2946_v0  ;;  %v2881_v50 = vadd.f32 %v3672_v58, %v2655_v49 }
 0x214   : > { %v2657_v24 = vpop.f32.mrf.mxu1  ;;  %v2915_v49 = vpop.f32.mrf.mxu0 }
 0x215   : > { %3112 = vst [vmem:[%s5395_s7 + $0xa8] sm:$0xff] %v3080_v60  ;;  %v3049_v61 = vadd.f32 %v3017_v33, %v2985_v55  ;;  %v2947_v25 = vadd.f32 %v2881_v50, %v5337_v38  ;;  %v3024_v50 = vld [vmem:[%s5378_s9 + $0xe8] sm:$0xff] }
 0x216   : > { %v2660_v14 = vpop.f32.mrf.mxu1 }
 0x217   : > { %v3081_v12 = vmax.f32 %v3049_v61, 0.0  ;;  %v2986_v5 = vadd.f32 %v5383_v29, %v2947_v25  ;;  %v2886_v36 = vadd.f32 %v2885_v21, %v2660_v14 }
 0x218   : > { %v2662_v22 = vpop.f32.mrf.mxu1 }
 0x219   : > { %3113 = vst [vmem:[%s5395_s7 + $0xb0] sm:$0xff] %v3081_v12  ;;  %v3050_v46 = vadd.f32 %v3018_v48, %v2986_v5  ;;  %v2948_v37 = vadd.f32 %v2886_v36, %v5348_v19  ;;  %v3025_v12 = vld [vmem:[%s5378_s9 + $0xf0] sm:$0xff] }
 0x21a   : > { %v2665_v13 = vpop.f32.mrf.mxu1 }
 0x21b   : > { %v3082_v41 = vmax.f32 %v3050_v46, 0.0  ;;  %v2987_v38 = vadd.f32 %v5383_v29, %v2948_v37  ;;  %v2891_v51 = vadd.f32 %v3675_v34, %v2665_v13 }
 0x21c   : > { %v2667_v40 = vpop.f32.mrf.mxu1 }
 0x21d   : > { %3114 = vst [vmem:[%s5395_s7 + $0xb8] sm:$0xff] %v3082_v41  ;;  %v3051_v53 = vadd.f32 %v3019_v30, %v2987_v38  ;;  %v2949_v32 = vadd.f32 %v2891_v51, %v5345_v3  ;;  %v3026_v30 = vld [vmem:[%s5378_s9 + $0xf8] sm:$0xff] }
 0x21e   : > { %v2670_v16 = vpop.f32.mrf.mxu1 }
 0x21f   : > { %v3083_v31 = vmax.f32 %v3051_v53, 0.0  ;;  %v2988_v19 = vadd.f32 %v5383_v29, %v2949_v32  ;;  %v2896_v35 = vadd.f32 %v2895_v39, %v2670_v16 }
 0x220   : > { %v2672_v7 = vpop.f32.mrf.mxu1 }
 0x221   : > { %3115 = vst [vmem:[%s5395_s7 + $0xc0] sm:$0xff] %v3083_v31  ;;  %v3052_v43 = vadd.f32 %v3020_v27, %v2988_v19  ;;  %v2950_v58 = vadd.f32 %v2896_v35, %v5356_v54 }
 0x222   : > { %v2675_v44 = vpop.f32.mrf.mxu1 }
 0x223   : > { %v3084_v62 = vmax.f32 %v3052_v43, 0.0  ;;  %v2989_v3 = vadd.f32 %v5383_v29, %v2950_v58  ;;  %v2901_v52 = vadd.f32 %v3678_v23, %v2675_v44 }
 0x224   : > { %v2677_v26 = vpop.f32.mrf.mxu1 }
 0x225   : > { %3116 = vst [vmem:[%s5395_s7 + $0xc8] sm:$0xff] %v3084_v62  ;;  %v3053_v56 = vadd.f32 %v3021_v8, %v2989_v3  ;;  %v2951_v18 = vadd.f32 %v2901_v52, %v5353_v28 }
 0x226   : > { %v2680_v63 = vpop.f32.mrf.mxu1 }
 0x227   : > { %v3085_v45 = vmax.f32 %v3053_v56, 0.0  ;;  %v2990_v54 = vadd.f32 %v5383_v29, %v2951_v18  ;;  %v2906_v4 = vadd.f32 %v2905_v17, %v2680_v63 }
 0x228   : > { %v2682_v47 = vpop.f32.mrf.mxu1 }
 0x229   : > { %3117 = vst [vmem:[%s5395_s7 + $0xd0] sm:$0xff] %v3085_v45  ;;  %v3054_v2 = vadd.f32 %v3022_v20, %v2990_v54  ;;  %v2952_v59 = vadd.f32 %v2906_v4, %v5365_v11 }
 0x22a   : > { %v2685_v34 = vpop.f32.mrf.mxu1 }
 0x22b   : > { %v3086_v57 = vmax.f32 %v3054_v2, 0.0  ;;  %v2991_v28 = vadd.f32 %v5383_v29, %v2952_v59  ;;  %v2911_v0 = vadd.f32 %v3681_v1, %v2685_v34 }
 0x22c   : > { %v2687_v33 = vpop.f32.mrf.mxu1 }
 0x22d   : > { %3118 = vst [vmem:[%s5395_s7 + $0xd8] sm:$0xff] %v3086_v57  ;;  %v3055_v60 = vadd.f32 %v3023_v42, %v2991_v28  ;;  %v2953_v55 = vadd.f32 %v2911_v0, %v5360_v15 }
 0x22e   : > { %v2690_v24 = vpop.f32.mrf.mxu1 }
 0x22f   : > { %v3087_v21 = vmax.f32 %v3055_v60, 0.0  ;;  %v2992_v11 = vadd.f32 %v5383_v29, %v2953_v55  ;;  %v2916_v61 = vadd.f32 %v2915_v49, %v2690_v24 }
 0x230   : > { %v2692_v25 = vpop.f32.mrf.mxu1 }
 0x231   : > { %3119 = vst [vmem:[%s5395_s7 + $0xe0] sm:$0xff] %v3087_v21  ;;  %v3056_v48 = vadd.f32 %v3024_v50, %v2992_v11  ;;  %v2954_v14 = vadd.f32 %v2916_v61, %v5371_v10 }
 0x232   : > { %v2695_v5 = vpop.f32.mrf.mxu1 }
 0x233   : > { %v3088_v36 = vmax.f32 %v3056_v48, 0.0  ;;  %v2993_v15 = vadd.f32 %v5383_v29, %v2954_v14  ;;  %v2921_v22 = vadd.f32 %v3684_v6, %v2695_v5 }
 0x234   : > { %v2697_v23 = vpop.f32.mrf.mxu1 }
 0x235   : > { %3120 = vst [vmem:[%s5395_s7 + $0xe8] sm:$0xff] %v3088_v36  ;;  %v3057_v46 = vadd.f32 %v3025_v12, %v2993_v15  ;;  %v2955_v37 = vadd.f32 %v2921_v22, %v5367_v9 }
 0x237   : > { %v3089_v13 = vmax.f32 %v3057_v46, 0.0  ;;  %v2994_v41 = vadd.f32 %v5383_v29, %v2955_v37 }
 0x239   : > { %3121 = vst [vmem:[%s5395_s7 + $0xf0] sm:$0xff] %v3089_v13  ;;  %v3058_v38 = vadd.f32 %v3026_v30, %v2994_v41 }
 0x23b   : > { %v3090_v51 = vmax.f32 %v3058_v38, 0.0 }
 0x23d   : > { %3122 = vst [vmem:[%s5395_s7 + $0xf8] sm:$0xff] %v3090_v51 }
 0x23e PF: > { %s14_s15 = sadd.s32 1, %s3749_s15  }
 0x23f   : > { %p11_p5 = scmp.ge.s32.totalorder %s14_s15, 4  }
 0x241   :  { %13 = sbr.rel (!%p11_p5) target bundleno = 1 (0x1), region = 71 }

// kernel: residual_forward.11
= control target key start
LH: loop header
LB: loop body
LE: loop exit
PB: predicated region body
PF: predicated region fallthrough
CT: control target
= control target key end

     0   :  { %s4286_s21 = smov 0   ;;  %s6195_s0 = inlined_call_operand.vmem [shape: f32[32,18,384], index: 0, kind: input, shape index: {}]   ;;  %s6196_s1 = inlined_call_operand.vmem [shape: f32[3,384,128], index: 1, kind: input, shape index: {}]   ;;  %s6197_s2 = inlined_call_operand.vmem [shape: f32[1,128], index: 2, kind: input, shape index: {}]   ;;  %s6198_s3 = inlined_call_operand.vmem [shape: f32[128,128], index: 3, kind: input, shape index: {}]   ;;  %s6199_s4 = inlined_call_operand.vmem [shape: f32[1,128], index: 4, kind: input, shape index: {}]   ;;  %s6200_s5 = inlined_call_operand.vmem [shape: f32[512,128], index: 5, kind: input, shape index: {}]   ;;  %s6201_s6 = inlined_call_operand.vmem [shape: f32[512,128], index: 6, kind: output, shape index: {}]  }
   0x1 LB: > { %s3525_s22 = sadd.s32 4294967295, %s4248_s21   ;;  %p3529_p0 = scmp.ge.s32.totalorder %s4248_s21, 1  ;;  %s4248_s21 = sphi %s4286_s21, %s16_s21  }
   0x2   : > { %p225_p1 = scmp.lt.s32.totalorder %s4248_s21, 3 }
   0x4   : > { %p226_p2 = pnand %p3529_p0, %p225_p1 }
   0x5   : > { %s3530_s15 = sshll.u32 (!%p226_p2), %s3525_s22, 4  ;;  %s3532_s8 = sshll.u32 (!%p226_p2), %s3525_s22, 5 }
   0x6   : > { %229 = sbr.rel (%p226_p2) target bundleno = 792 (0x318), region = 44  ;;  %p262_p3 = scmp.lt.s32.totalorder (!%p226_p2), %s3530_s15, 31 }
   0x7   : > { %p269_p4 = scmp.lt.s32.totalorder (!%p226_p2), %s3532_s8, 63 }
   0xb   : > { %v3583_v0 = vld [vmem:[%s6196_s1 + $0x2f8] sm:$0xff]  ;;  %v3582_v2 = vld [vmem:[%s6196_s1 + $0x2f0] sm:$0xff]  ;;  %v4250_v3 = vmov 0.0   ;;  %v3581_v5 = vld [vmem:[%s6196_s1 + $0x2e8] sm:$0xff]  ;;  %s6203_s15 = smov (!%p262_p3, %s3530_s15), 31  ;;  %vm664_vm0 = vcmask 1046528  }
   0xc   : > { %v3551_v1 = vld [vmem:[%s6196_s1 + $0x1f8] sm:$0xff]  ;;  %1050 = vmatprep.subr.mxu0 %v4250_v3  ;;  %3828 = vmatprep.subr.mxu1 %v3583_v0  ;;  %v3550_v4 = vld [vmem:[%s6196_s1 + $0x1f0] sm:$0xff]  ;;  %v3549_v6 = vld [vmem:[%s6196_s1 + $0x1e8] sm:$0xff]  ;;  %s4180_s17 = smul.u32 72, %s6203_s15  ;;  %vm2142_vm1 = vcmask 1045504   ;;  %s6205_s8 = smov (!%p269_p4, %s3532_s8), 63 }
   0xd   : > { %1051 = vmatpush1.msra.mxu0 %v3551_v1  ;;  %3829 = vmatpush3.msra.mxu1 %v3583_v0  ;;  %v3580_v7 = vld [vmem:[%s6196_s1 + $0x2e0] sm:$0xff]  ;;  %v3579_v9 = vld [vmem:[%s6196_s1 + $0x2d8] sm:$0xff]  ;;  %v3578_v11 = vld [vmem:[%s6196_s1 + $0x2d0] sm:$0xff]  ;;  %s3533_s9 = sshll.u32 %s6205_s8, 3 }
   0xe   : > { %1052 = vmatprep.subr.mxu0 %v4250_v3  ;;  %3830 = vmatprep.subr.mxu1 %v3582_v2  ;;  %v3548_v8 = vld [vmem:[%s6196_s1 + $0x1e0] sm:$0xff]  ;;  %v3547_v10 = vld [vmem:[%s6196_s1 + $0x1d8] sm:$0xff]  ;;  %v3546_v12 = vld [vmem:[%s6196_s1 + $0x1d0] sm:$0xff]  ;;  %s4378_s29 = scalar_lea.vmem %s6195_s0, %s4180_s17  ;;  %s6084_s12 = scalar_lea.vmem %s6200_s5, %s3533_s9 }
   0xf   : > { %1053 = vmatpush1.msra.mxu0 %v3550_v4  ;;  %3831 = vmatpush3.msra.mxu1 %v3582_v2  ;;  %v3577_v13 = vld [vmem:[%s6196_s1 + $0x2c8] sm:$0xff]  ;;  %v3576_v15 = vld [vmem:[%s6196_s1 + $0x2c0] sm:$0xff]  ;;  %v3575_v17 = vld [vmem:[%s6196_s1 + $0x2b8] sm:$0xff]  ;;  %s6098_s17 = scalar_lea.vmem %s6201_s6, %s3533_s9 }
  0x10   : > { %1054 = vmatprep.subr.mxu0 %v4250_v3  ;;  %3832 = vmatprep.subr.mxu1 %v3581_v5  ;;  %v3545_v14 = vld [vmem:[%s6196_s1 + $0x1c8] sm:$0xff]  ;;  %v3544_v16 = vld [vmem:[%s6196_s1 + $0x1c0] sm:$0xff]  ;;  %v3543_v18 = vld [vmem:[%s6196_s1 + $0x1b8] sm:$0xff] }
  0x11   : > { %1055 = vmatpush1.msra.mxu0 %v3549_v6  ;;  %3833 = vmatpush3.msra.mxu1 %v3581_v5  ;;  %v3574_v19 = vld [vmem:[%s6196_s1 + $0x2b0] sm:$0xff]  ;;  %v3573_v21 = vld [vmem:[%s6196_s1 + $0x2a8] sm:$0xff]  ;;  %v3572_v23 = vld [vmem:[%s6196_s1 + $0x2a0] sm:$0xff] }
  0x12   : > { %1056 = vmatprep.subr.mxu0 %v4250_v3  ;;  %3834 = vmatprep.subr.mxu1 %v3580_v7  ;;  %v3542_v20 = vld [vmem:[%s6196_s1 + $0x1b0] sm:$0xff]  ;;  %v3541_v22 = vld [vmem:[%s6196_s1 + $0x1a8] sm:$0xff]  ;;  %v3540_v24 = vld [vmem:[%s6196_s1 + $0x1a0] sm:$0xff] }
  0x13   : > { %1057 = vmatpush1.msra.mxu0 %v3548_v8  ;;  %3835 = vmatpush3.msra.mxu1 %v3580_v7  ;;  %v3571_v25 = vld [vmem:[%s6196_s1 + $0x298] sm:$0xff]  ;;  %v285_v27 = vld [vmem:[%s4378_s29 + $0x28] sm:$0xff]  ;;  %v426_v28 = vld [vmem:[%s4378_s29 + $0x10] sm:$0xfe] }
  0x14   : > { %1058 = vmatprep.subr.mxu0 %v4250_v3  ;;  %3836 = vmatprep.subr.mxu1 %v3579_v9  ;;  %v3539_v26 = vld [vmem:[%s6196_s1 + $0x198] sm:$0xff]  ;;  %v3570_v29 = vld [vmem:[%s6196_s1 + $0x290] sm:$0xff]  ;;  %v429_v30 = vld [vmem:[%s4378_s29 + $0x40] sm:$0x1]  ;;  %v671_v33 = vrot.slane %v426_v28, 1  ;;  %v672_v34 = vrot.slane %v285_v27, 1 }
  0x15   : > { %1059 = vmatpush1.msra.mxu0 %v3547_v10  ;;  %3837 = vmatpush3.msra.mxu1 %v3579_v9  ;;  %v3538_v31 = vld [vmem:[%s6196_s1 + $0x190] sm:$0xff]  ;;  %v3569_v32 = vld [vmem:[%s6196_s1 + $0x288] sm:$0xff]  ;;  %v678_v36 = vrot.slane %v429_v30, 1  ;;  %v432_v38 = vld [vmem:[%s4378_s29 + $0x58] sm:$0xfe] }
  0x16   : > { %1060 = vmatprep.subr.mxu0 %v4250_v3  ;;  %3838 = vmatprep.subr.mxu1 %v3578_v11  ;;  %v3537_v35 = vld [vmem:[%s6196_s1 + $0x188] sm:$0xff]  ;;  %v291_v37 = vld [vmem:[%s4378_s29 + $0x70] sm:$0xff]  ;;  %v3568_v39 = vld [vmem:[%s6196_s1 + $0x280] sm:$0xff]  ;;  %v673_v42 = vsel %vm664_vm0, %v671_v33, %v672_v34  ;;  %v686_v43 = vrot.slane %v432_v38, 1 }
  0x17   : > { %1061 = vmatpush1.msra.mxu0 %v3546_v12  ;;  %3839 = vmatpush3.msra.mxu1 %v3578_v11  ;;  %v3536_v40 = vld [vmem:[%s6196_s1 + $0x180] sm:$0xff]  ;;  %v435_v41 = vld [vmem:[%s4378_s29 + $0x88] sm:$0x1]  ;;  %v687_v44 = vrot.slane %v291_v37, 1  ;;  %v679_v45 = vsel %vm664_vm0, %v672_v34, %v678_v36  ;;  %v3567_v46 = vld [vmem:[%s6196_s1 + $0x278] sm:$0xff] }
  0x18   : > { %1062 = vmatprep.subr.mxu0 %v4250_v3  ;;  %3840 = vmatprep.subr.mxu1 %v3577_v13  ;;  %v391_v47 = vld [vmem:[%s6196_s1 + $0x78] sm:$0xff]  ;;  %v693_v48 = vrot.slane %v435_v41, 1  ;;  %v438_v50 = vld [vmem:[%s4378_s29 + $0xa0] sm:$0xfe]  ;;  %v3566_v51 = vld [vmem:[%s6196_s1 + $0x270] sm:$0xff] }
  0x19   : > { %1063 = vmatpush1.msra.mxu0 %v3545_v14  ;;  %3841 = vmatpush3.msra.mxu1 %v3577_v13  ;;  %v297_v49 = vld [vmem:[%s4378_s29 + $0xb8] sm:$0xff]  ;;  %v688_v52 = vsel %vm664_vm0, %v686_v43, %v687_v44  ;;  %v441_v53 = vld [vmem:[%s4378_s29 + $0xd0] sm:$0x1]  ;;  %v701_v55 = vrot.slane %v438_v50, 1  ;;  %v3565_v58 = vld [vmem:[%s6196_s1 + $0x268] sm:$0xff] }
  0x1a   : > { %1064 = vmatprep.subr.mxu0 %v4250_v3  ;;  %3842 = vmatprep.subr.mxu1 %v3576_v15  ;;  %v390_v54 = vld [vmem:[%s6196_s1 + $0x70] sm:$0xff]  ;;  %v702_v56 = vrot.slane %v297_v49, 1  ;;  %v694_v57 = vsel %vm664_vm0, %v687_v44, %v693_v48  ;;  %v389_v59 = vld [vmem:[%s6196_s1 + $0x68] sm:$0xff]  ;;  %v708_v60 = vrot.slane %v441_v53, 1  ;;  %v303_v61 = vld [vmem:[%s4378_s29 + $0x100] sm:$0xff] }
  0x1b   : > { %1065 = vmatpush1.msra.mxu0 %v3544_v16  ;;  %3843 = vmatpush3.msra.mxu1 %v3576_v15  ;;  %v444_v62 = vld [vmem:[%s4378_s29 + $0xe8] sm:$0xfe]  ;;  %v3564_v63 = vld [vmem:[%s6196_s1 + $0x260] sm:$0xff]  ;;  %v447_v1 = vld [vmem:[%s4378_s29 + $0x118] sm:$0x1]  ;;  %v717_v5 = vrot.slane %v303_v61, 1 }
  0x1c   : > { %1066 = vmatprep.subr.mxu0 %v4250_v3  ;;  %3844 = vmatprep.subr.mxu1 %v3575_v17  ;;  %v703_v0 = vsel %vm664_vm0, %v701_v55, %v702_v56  ;;  %v388_v2 = vld [vmem:[%s6196_s1 + $0x60] sm:$0xff]  ;;  %v716_v4 = vrot.slane %v444_v62, 1  ;;  %v709_v6 = vsel %vm664_vm0, %v702_v56, %v708_v60  ;;  %v3563_v7 = vld [vmem:[%s6196_s1 + $0x258] sm:$0xff]  ;;  %v723_v9 = vrot.slane %v447_v1, 1  ;;  %v309_v10 = vld [vmem:[%s4378_s29 + $0x148] sm:$0xff] }
  0x1d   : > { %1067 = vmatpush1.msra.mxu0 %v3543_v18  ;;  %3845 = vmatpush3.msra.mxu1 %v3575_v17  ;;  %v387_v8 = vld [vmem:[%s6196_s1 + $0x58] sm:$0xff]  ;;  %v450_v11 = vld [vmem:[%s4378_s29 + $0x130] sm:$0xfe]  ;;  %v453_v14 = vld [vmem:[%s4378_s29 + $0x160] sm:$0x1]  ;;  %v732_v17 = vrot.slane %v309_v10, 1 }
  0x1e   : > { %1068 = vmatprep.subr.mxu0 %v4250_v3  ;;  %3846 = vmatprep.subr.mxu1 %v3574_v19  ;;  %v3562_v12 = vld [vmem:[%s6196_s1 + $0x250] sm:$0xff]  ;;  %v718_v13 = vsel %vm664_vm0, %v716_v4, %v717_v5  ;;  %v731_v16 = vrot.slane %v450_v11, 1  ;;  %v724_v18 = vsel %vm664_vm0, %v717_v5, %v723_v9  ;;  %v384_v27 = vld [vmem:[%s6196_s1 + $0x40] sm:$0xff]  ;;  %v321_v34 = vld [vmem:[%s4378_s29 + $0x1d8] sm:$0xff] }
  0x1f   : > { %1069 = vmatpush1.msra.mxu0 %v3542_v20  ;;  %3847 = vmatpush3.msra.mxu1 %v3574_v19  ;;  %v386_v15 = vld [vmem:[%s6196_s1 + $0x50] sm:$0xff]  ;;  %v3561_v19 = vld [vmem:[%s6196_s1 + $0x248] sm:$0xff]  ;;  %v762_v41 = vrot.slane %v321_v34, 1  ;;  %v3556_v48 = vld [vmem:[%s6196_s1 + $0x220] sm:$0xff] }
  0x20   : > { %1070 = vmatprep.subr.mxu0 %v4250_v3  ;;  %3848 = vmatprep.subr.mxu1 %v3573_v21  ;;  %v385_v20 = vld [vmem:[%s6196_s1 + $0x48] sm:$0xff]  ;;  %v3558_v36 = vld [vmem:[%s6196_s1 + $0x230] sm:$0xff]  ;;  %v471_v50 = vld [vmem:[%s4378_s29 + $0x238] sm:$0x1] }
  0x21   : > { %1071 = vmatpush1.msra.mxu0 %v3541_v22  ;;  %3849 = vmatpush3.msra.mxu1 %v3573_v21  ;;  %v738_v21 = vrot.slane %v453_v14, 1  ;;  %v315_v22 = vld [vmem:[%s4378_s29 + $0x190] sm:$0xff]  ;;  %v3557_v43 = vld [vmem:[%s6196_s1 + $0x228] sm:$0xff]  ;;  %v3555_v55 = vld [vmem:[%s6196_s1 + $0x218] sm:$0xff] }
  0x22   : > { %1072 = vmatprep.subr.mxu0 %v4250_v3  ;;  %3850 = vmatprep.subr.mxu1 %v3572_v23  ;;  %v465_v38 = vld [vmem:[%s4378_s29 + $0x1f0] sm:$0x1]  ;;  %v381_v44 = vld [vmem:[%s6196_s1 + $0x28] sm:$0xff]  ;;  %v379_v56 = vld [vmem:[%s6196_s1 + $0x18] sm:$0xff] }
  0x23   : > { %1073 = vmatpush1.msra.mxu0 %v3540_v24  ;;  %3851 = vmatpush3.msra.mxu1 %v3572_v23  ;;  %v456_v23 = vld [vmem:[%s4378_s29 + $0x178] sm:$0xfe]  ;;  %v3560_v24 = vld [vmem:[%s6196_s1 + $0x240] sm:$0xff]  ;;  %v739_v30 = vsel %vm664_vm0, %v732_v17, %v738_v21  ;;  %v3554_v60 = vld [vmem:[%s6196_s1 + $0x210] sm:$0xff] }
  0x24   : > { %1074 = vmatprep.subr.mxu0 %v4250_v3  ;;  %3852 = vmatprep.subr.mxu1 %v3571_v25  ;;  %v746_v28 = vrot.slane %v456_v23, 1  ;;  %v333_v61 = vld [vmem:[%s4378_s29 + $0x268] sm:$0xff]  ;;  %v474_v62 = vld [vmem:[%s4378_s29 + $0x250] sm:$0xfe]  ;;  %v424_v1 = vld [vmem:[%s4378_s29] sm:$0xfe] }
  0x25   : > { %1075 = vmatpush1.msra.mxu0 %v3539_v26  ;;  %3853 = vmatpush3.msra.mxu1 %v3571_v25  ;;  %v733_v25 = vsel %vm664_vm0, %v731_v16, %v732_v17  ;;  %v459_v26 = vld [vmem:[%s4378_s29 + $0x1a8] sm:$0x1]  ;;  %v378_v4 = vld [vmem:[%s6196_s1 + $0x10] sm:$0xff]  ;;  %v791_v9 = vrot.slane %v474_v62, 1  ;;  %v792_v10 = vrot.slane %v333_v61, 1 }
  0x26   : > { %1076 = vmatprep.subr.mxu0 %v4250_v3  ;;  %3854 = vmatprep.subr.mxu1 %v3570_v29  ;;  %v753_v33 = vrot.slane %v459_v26, 1  ;;  %v4579_v11 = vld [vmem:[%s4378_s29 + $0x2b0] sm:$0xff]  ;;  %v377_v14 = vld [vmem:[%s6196_s1 + $0x8] sm:$0xff]  ;;  %v376_v26 = vld [vmem:[%s6196_s1] sm:$0xff] }
  0x27   : > { %1077 = vmatpush1.msra.mxu0 %v3538_v31  ;;  %3855 = vmatpush3.msra.mxu1 %v3570_v29  ;;  %v747_v29 = vrot.slane %v315_v22, 1  ;;  %v3559_v31 = vld [vmem:[%s6196_s1 + $0x238] sm:$0xff]  ;;  %v807_v23 = vrot.slane %v4579_v11, 1  ;;  %v4660_v11 = vld [vmem:[%s4378_s29 + $0xa8] sm:$0xff] }
  0x28   : > { %1078 = vmatprep.subr.mxu0 %v4250_v3  ;;  %3856 = vmatprep.subr.mxu1 %v3569_v32 }
  0x29   : > { %1079 = vmatpush1.msra.mxu0 %v3537_v35  ;;  %3857 = vmatpush3.msra.mxu1 %v3569_v32  ;;  %v383_v32 = vld [vmem:[%s6196_s1 + $0x38] sm:$0xff]  ;;  %v462_v35 = vld [vmem:[%s4378_s29 + $0x1c0] sm:$0xfe]  ;;  %v748_v37 = vsel %vm664_vm0, %v746_v28, %v747_v29  ;;  %v431_v28 = vld [vmem:[%s4378_s29 + $0x50] sm:$0xfe] }
  0x2a   : > { %1080 = vmatprep.subr.mxu0 %v4250_v3  ;;  %3858 = vmatprep.subr.mxu1 %v3568_v39 }
  0x2b   : > { %1081 = vmatpush1.msra.mxu0 %v3536_v40  ;;  %3859 = vmatpush3.msra.mxu1 %v3568_v39  ;;  %v382_v39 = vld [vmem:[%s6196_s1 + $0x30] sm:$0xff]  ;;  %v761_v40 = vrot.slane %v462_v35, 1 }
  0x2c   : > { %3860 = vmatprep.mubr.f32.mxu1 %v673_v42  ;;  %1082 = vmatprep.subr.mxu0 %v4250_v3  ;;  %v754_v42 = vsel %vm664_vm0, %v747_v29, %v753_v33  ;;  %v486_v33 = vld [vmem:[%s4378_s29 + $0x2e0] sm:$0xfe] }
  0x2d   : > { %3861 = vmatmul.mubr.f32.vlgmr.msra.gmra.mxu1 %v679_v45  ;;  %1500 = vmatprep.subr.mxu1 %v4250_v3  ;;  %v768_v45 = vrot.slane %v465_v38, 1  ;;  %v763_v49 = vsel %vm664_vm0, %v761_v40, %v762_v41  ;;  %v407_v38 = vld [vmem:[%s6196_s1 + $0xf8] sm:$0xff]  ;;  %v683_v40 = vrot.slane %v431_v28, 1 }
  0x2e   : > { %1083 = vmatpush2.msra.mxu0 %v3567_v46  ;;  %1501 = vmatpush1.msra.mxu1 %v391_v47  ;;  %v327_v46 = vld [vmem:[%s4378_s29 + $0x220] sm:$0xff]  ;;  %v468_v47 = vld [vmem:[%s4378_s29 + $0x208] sm:$0xfe]  ;;  %v504_v28 = vld [vmem:[%s4378_s29 + $0x3b8] sm:$0xfe] }
  0x2f   : > { %1084 = vmatprep.subr.mxu0 %v4250_v3  ;;  %1502 = vmatprep.subr.mxu1 %v4250_v3  ;;  %v777_v53 = vrot.slane %v327_v46, 1  ;;  %v4627_v46 = vld [vmem:[%s6196_s1 + $0x178] sm:$0xff] }
  0x30   : > { %1085 = vmatpush2.msra.mxu0 %v3566_v51  ;;  %3863 = vmatprep.mubr.f32.mxu1 %v688_v52  ;;  %v380_v51 = vld [vmem:[%s6196_s1 + $0x20] sm:$0xff]  ;;  %v776_v52 = vrot.slane %v468_v47, 1  ;;  %v406_v47 = vld [vmem:[%s6196_s1 + $0xf0] sm:$0xff] }
  0x31   : > { %1503 = vmatpush1.msra.mxu1 %v390_v54  ;;  %1086 = vmatprep.subr.mxu0 %v4250_v3  ;;  %v769_v54 = vsel %vm664_vm0, %v762_v41, %v768_v45  ;;  %v434_v45 = vld [vmem:[%s4378_s29 + $0x80] sm:$0x1] }
  0x32   : > { %3864 = vmatmul.mubr.f32.gmra.mxu1 %v694_v57  ;;  %1504 = vmatprep.subr.mxu1 %v4250_v3  ;;  %v783_v57 = vrot.slane %v471_v50, 1 }
  0x33   : > { %1087 = vmatpush2.msra.mxu0 %v3565_v58  ;;  %1505 = vmatpush1.msra.mxu1 %v389_v59  ;;  %v4554_v58 = vld [vmem:[%s4378_s29 + $0x20] sm:$0xff]  ;;  %v425_v59 = vld [vmem:[%s4378_s29 + $0x8] sm:$0xfe] }
  0x34   : > { %1088 = vmatprep.subr.mxu0 %v4250_v3  ;;  %1506 = vmatprep.subr.mxu1 %v4250_v3  ;;  %v668_v5 = vrot.slane %v425_v59, 1  ;;  %v691_v59 = vrot.slane %v434_v45, 1  ;;  %v369_v45 = vld [vmem:[%s4378_s29 + $0x418] sm:$0xff] }
  0x35   : > { %1089 = vmatpush2.msra.mxu0 %v3564_v63  ;;  %3866 = vmatprep.mubr.f32.mxu1 %v703_v0  ;;  %v778_v63 = vsel %vm664_vm0, %v776_v52, %v777_v53  ;;  %v4566_v0 = vld [vmem:[%s4378_s29 + $0x18] sm:$0xff]  ;;  %v492_v52 = vld [vmem:[%s4378_s29 + $0x328] sm:$0xfe] }
  0x36   : > { %1507 = vmatpush1.msra.mxu1 %v388_v2  ;;  %1090 = vmatprep.subr.mxu0 %v4250_v3  ;;  %v477_v2 = vld [vmem:[%s4378_s29 + $0x280] sm:$0x1]  ;;  %v666_v16 = vrot.slane %v4566_v0, 1  ;;  %v836_v62 = vrot.slane %v492_v52, 1  ;;  %v399_v52 = vld [vmem:[%s6196_s1 + $0xb8] sm:$0xff] }
  0x37   : > { %3867 = vmatmul.mubr.f32.gmra.mxu1 %v709_v6  ;;  %1508 = vmatprep.subr.mxu1 %v4250_v3  ;;  %v669_v6 = vrot.slane %v4554_v58, 1  ;;  %v798_v17 = vrot.slane %v477_v2, 1  ;;  %v437_v2 = vld [vmem:[%s4378_s29 + $0x98] sm:$0xfe] }
  0x38   : > { %1091 = vmatpush2.msra.mxu0 %v3563_v7  ;;  %1509 = vmatpush1.msra.mxu1 %v387_v8  ;;  %v428_v7 = vld [vmem:[%s4378_s29 + $0x38] sm:$0x1]  ;;  %v784_v8 = vsel %vm664_vm0, %v777_v53, %v783_v57 }
  0x39   : > { %1092 = vmatprep.subr.mxu0 %v4250_v3  ;;  %1510 = vmatprep.subr.mxu1 %v4250_v3  ;;  %v670_v21 = vsel %vm664_vm0, %v668_v5, %v669_v6 }
  0x3a   : > { %1093 = vmatpush2.msra.mxu0 %v3562_v12  ;;  %3869 = vmatprep.mubr.f32.mxu1 %v718_v13  ;;  %v480_v12 = vld [vmem:[%s4378_s29 + $0x298] sm:$0xfe]  ;;  %v3553_v13 = vld [vmem:[%s6196_s1 + $0x208] sm:$0xff] }
  0x3b   : > { %1511 = vmatpush1.msra.mxu1 %v386_v15  ;;  %1094 = vmatprep.subr.mxu0 %v4250_v3  ;;  %v665_v15 = vrot.slane %v424_v1, 1  ;;  %v806_v22 = vrot.slane %v480_v12, 1  ;;  %v4648_v1 = vld [vmem:[%s4378_s29 + $0xb0] sm:$0xff] }
  0x3c   : > { %3870 = vmatmul.mubr.f32.gmra.mxu1 %v724_v18  ;;  %1512 = vmatprep.subr.mxu1 %v4250_v3  ;;  %v676_v18 = vrot.slane %v428_v7, 1  ;;  %v357_v7 = vld [vmem:[%s4378_s29 + $0x388] sm:$0xff]  ;;  %v436_v12 = vld [vmem:[%s4378_s29 + $0x90] sm:$0xfe] }
  0x3d   : > { %1095 = vmatpush2.msra.mxu0 %v3561_v19  ;;  %1513 = vmatpush1.msra.mxu1 %v385_v20  ;;  %v427_v19 = vld [vmem:[%s4378_s29 + $0x30] sm:$0x1]  ;;  %v3552_v20 = vld [vmem:[%s6196_s1 + $0x200] sm:$0xff]  ;;  %v667_v29 = vsel %vm664_vm0, %v665_v15, %v666_v16  ;;  %v698_v15 = vrot.slane %v437_v2, 1 }
  0x3e   : > { %1096 = vmatprep.subr.mxu0 %v4250_v3  ;;  %1514 = vmatprep.subr.mxu1 %v4250_v3  ;;  %v677_v34 = vsel %vm664_vm0, %v669_v6, %v676_v18 }
  0x3f   : > { %1097 = vmatpush2.msra.mxu0 %v3560_v24  ;;  %3872 = vmatprep.mubr.f32.mxu1 %v733_v25  ;;  %v483_v24 = vld [vmem:[%s4378_s29 + $0x2c8] sm:$0x1]  ;;  %v793_v25 = vsel %vm664_vm0, %v791_v9, %v792_v10 }
  0x40   : > { %1515 = vmatpush1.msra.mxu1 %v384_v27  ;;  %1098 = vmatprep.subr.mxu0 %v4250_v3  ;;  %v4603_v27 = vld [vmem:[%s4378_s29 + $0x68] sm:$0xff]  ;;  %v813_v35 = vrot.slane %v483_v24, 1  ;;  %v695_v24 = vrot.slane %v436_v12, 1 }
  0x41   : > { %3873 = vmatmul.mubr.f32.gmra.mxu1 %v739_v30  ;;  %1516 = vmatprep.subr.mxu1 %v4250_v3  ;;  %v799_v30 = vsel %vm664_vm0, %v792_v10, %v798_v17  ;;  %v684_v41 = vrot.slane %v4603_v27, 1  ;;  %v501_v17 = vld [vmem:[%s4378_s29 + $0x3a0] sm:$0x1] }
  0x42   : > { %1099 = vmatpush2.msra.mxu0 %v3559_v31  ;;  %1517 = vmatpush1.msra.mxu1 %v383_v32  ;;  %v674_v31 = vrot.slane %v427_v19, 1  ;;  %v345_v32 = vld [vmem:[%s4378_s29 + $0x2f8] sm:$0xff]  ;;  %v814_v53 = vsel %vm664_vm0, %v807_v23, %v813_v35  ;;  %v507_v35 = vld [vmem:[%s4378_s29 + $0x3e8] sm:$0x1] }
  0x43   : > { %1100 = vmatprep.subr.mxu0 %v4250_v3  ;;  %1518 = vmatprep.subr.mxu1 %v4250_v3  ;;  %v685_v57 = vsel %vm664_vm0, %v683_v40, %v684_v41  ;;  %v4690_v40 = vld [vmem:[%s4378_s29 + $0xf8] sm:$0xff] }
  0x44   : > { %1101 = vmatpush2.msra.mxu0 %v3558_v36  ;;  %3875 = vmatprep.mubr.f32.mxu1 %v748_v37  ;;  %v4614_v36 = vld [vmem:[%s4378_s29 + $0x60] sm:$0xff]  ;;  %v430_v37 = vld [vmem:[%s4378_s29 + $0x48] sm:$0xfe] }
  0x45   : > { %1519 = vmatpush1.msra.mxu1 %v382_v39  ;;  %1102 = vmatprep.subr.mxu0 %v4250_v3  ;;  %v808_v39 = vsel %vm664_vm0, %v806_v22, %v807_v23  ;;  %v681_v50 = vrot.slane %v4614_v36, 1  ;;  %v402_v22 = vld [vmem:[%s6196_s1 + $0xd0] sm:$0xff] }
  0x46   : > { %3876 = vmatmul.mubr.f32.gmra.mxu1 %v754_v42  ;;  %1520 = vmatprep.subr.mxu1 %v4250_v3  ;;  %v489_v42 = vld [vmem:[%s4378_s29 + $0x310] sm:$0x1] }
  0x47   : > { %1103 = vmatpush2.msra.mxu0 %v3557_v43  ;;  %1521 = vmatpush1.msra.mxu1 %v381_v44  ;;  %v821_v43 = vrot.slane %v486_v33, 1  ;;  %v822_v44 = vrot.slane %v345_v32, 1  ;;  %v401_v32 = vld [vmem:[%s6196_s1 + $0xc8] sm:$0xff] }
  0x48   : > { %1104 = vmatprep.subr.mxu0 %v4250_v3  ;;  %1522 = vmatprep.subr.mxu1 %v4250_v3 }
  0x49   : > { %1105 = vmatpush2.msra.mxu0 %v3556_v48  ;;  %3878 = vmatprep.mubr.f32.mxu1 %v763_v49  ;;  %v675_v48 = vsel %vm664_vm0, %v666_v16, %v674_v31  ;;  %v680_v49 = vrot.slane %v430_v37, 1  ;;  %v823_v61 = vsel %vm664_vm0, %v821_v43, %v822_v44  ;;  %v699_v16 = vrot.slane %v4648_v1, 1  ;;  %v439_v31 = vld [vmem:[%s4378_s29 + $0xc0] sm:$0x1] }
  0x4a   : > { %1523 = vmatpush1.msra.mxu1 %v380_v51  ;;  %1106 = vmatprep.subr.mxu0 %v4250_v3  ;;  %v351_v51 = vld [vmem:[%s4378_s29 + $0x340] sm:$0xff] }
  0x4b   : > { %3879 = vmatmul.mubr.f32.gmra.mxu1 %v769_v54  ;;  %1524 = vmatprep.subr.mxu1 %v4250_v3  ;;  %v828_v54 = vrot.slane %v489_v42, 1  ;;  %v682_v5 = vsel %vm664_vm0, %v680_v49, %v681_v50  ;;  %v700_v33 = vsel %vm664_vm0, %v698_v15, %v699_v16  ;;  %v400_v42 = vld [vmem:[%s6196_s1 + $0xc0] sm:$0xff]  ;;  %v873_v49 = vrot.slane %v507_v35, 1 }
  0x4c   : > { %1107 = vmatpush2.msra.mxu0 %v3555_v55  ;;  %1525 = vmatpush1.msra.mxu1 %v379_v56  ;;  %v433_v55 = vld [vmem:[%s4378_s29 + $0x78] sm:$0x1]  ;;  %v405_v56 = vld [vmem:[%s6196_s1 + $0xe8] sm:$0xff] }
  0x4d   : > { %1108 = vmatprep.subr.mxu0 %v4250_v3  ;;  %1526 = vmatprep.subr.mxu1 %v4250_v3  ;;  %v689_v6 = vrot.slane %v433_v55, 1  ;;  %v829_v9 = vsel %vm664_vm0, %v822_v44, %v828_v54  ;;  %v704_v44 = vrot.slane %v439_v31, 1  ;;  %v714_v55 = vrot.slane %v4690_v40, 1 }
  0x4e   : > { %1109 = vmatpush2.msra.mxu0 %v3554_v60  ;;  %3881 = vmatprep.mubr.f32.mxu1 %v778_v63  ;;  %v495_v60 = vld [vmem:[%s4378_s29 + $0x358] sm:$0x1]  ;;  %v837_v63 = vrot.slane %v351_v51, 1  ;;  %v442_v51 = vld [vmem:[%s4378_s29 + $0xd8] sm:$0xfe] }
  0x4f   : > { %1527 = vmatpush1.msra.mxu1 %v378_v4  ;;  %1110 = vmatprep.subr.mxu0 %v4250_v3  ;;  %v404_v4 = vld [vmem:[%s6196_s1 + $0xe0] sm:$0xff]  ;;  %v843_v10 = vrot.slane %v495_v60, 1  ;;  %v690_v23 = vsel %vm664_vm0, %v681_v50, %v689_v6  ;;  %v4702_v50 = vld [vmem:[%s4378_s29 + $0xf0] sm:$0xff]  ;;  %v882_v60 = vrot.slane %v369_v45, 1  ;;  %v710_v2 = vrot.slane %v442_v51, 1  ;;  %v4767_v45 = vld [vmem:[%s4378_s29 + $0x188] sm:$0xff] }
  0x50   : > { %3882 = vmatmul.mubr.f32.gmra.mxu1 %v784_v8  ;;  %1528 = vmatprep.subr.mxu1 %v4250_v3  ;;  %v498_v8 = vld [vmem:[%s4378_s29 + $0x370] sm:$0xfe]  ;;  %v838_v18 = vsel %vm664_vm0, %v836_v62, %v837_v63  ;;  %v516_v6 = vld [vmem:[%s4378_s29 + $0x448] sm:$0xfe] }
  0x51   : > { %1111 = vmatpush2.msra.mxu0 %v3553_v13  ;;  %1529 = vmatpush1.msra.mxu1 %v377_v14  ;;  %v403_v13 = vld [vmem:[%s6196_s1 + $0xd8] sm:$0xff]  ;;  %v692_v14 = vsel %vm664_vm0, %v684_v41, %v691_v59  ;;  %v851_v19 = vrot.slane %v498_v8, 1  ;;  %v443_v41 = vld [vmem:[%s4378_s29 + $0xe0] sm:$0xfe]  ;;  %v398_v62 = vld [vmem:[%s6196_s1 + $0xb0] sm:$0xff] }
  0x52   : > { %1112 = vmatprep.subr.mxu0 %v4250_v3  ;;  %1530 = vmatprep.subr.mxu1 %v4250_v3  ;;  %v713_v54 = vrot.slane %v443_v41, 1  ;;  %v451_v41 = vld [vmem:[%s4378_s29 + $0x150] sm:$0x1] }
  0x53   : > { %1113 = vmatpush2.msra.mxu0 %v3552_v20  ;;  %1114 = vmatprep.mubr.f32.mxu0 %v670_v21  ;;  %v852_v20 = vrot.slane %v357_v7, 1  ;;  %v440_v21 = vld [vmem:[%s4378_s29 + $0xc8] sm:$0x1] }
  0x54   : > { %3884 = vmatprep.mubr.f32.mxu1 %v793_v25  ;;  %1531 = vmatpush1.msra.mxu1 %v376_v26  ;;  %v696_v25 = vrot.slane %v4660_v11, 1  ;;  %v363_v26 = vld [vmem:[%s4378_s29 + $0x3d0] sm:$0xff]  ;;  %v715_v12 = vsel %vm664_vm0, %v713_v54, %v714_v55 }
  0x55   : > { %1115 = vmatmul.mubr.f32.vlgmr.msra.gmra.mxu0 %v667_v29  ;;  %3885 = vmatmul.mubr.f32.gmra.mxu1 %v799_v30  ;;  %v844_v29 = vsel %vm664_vm0, %v837_v63, %v843_v10  ;;  %v858_v30 = vrot.slane %v501_v17, 1  ;;  %v853_v37 = vsel %vm664_vm0, %v851_v19, %v852_v20  ;;  %v397_v10 = vld [vmem:[%s6196_s1 + $0xa8] sm:$0xff] }
  0x56   : > { %1532 = vmatprep.subr.mxu1 %v4250_v3  ;;  %1119 = vmatprep.mubr.f32.mxu0 %v677_v34  ;;  %v706_v34 = vrot.slane %v440_v21, 1  ;;  %v697_v43 = vsel %vm664_vm0, %v695_v24, %v696_v25  ;;  %v705_v63 = vsel %vm664_vm0, %v696_v25, %v704_v44  ;;  %v449_v19 = vld [vmem:[%s4378_s29 + $0x128] sm:$0xfe]  ;;  %v4742_v25 = vld [vmem:[%s4378_s29 + $0x138] sm:$0xff] }
  0x57   : > { %1533 = vmatpush2.msra.mxu1 %v407_v38  ;;  %3887 = vmatprep.mubr.f32.mxu1 %v808_v39  ;;  %v866_v38 = vrot.slane %v504_v28, 1  ;;  %v867_v39 = vrot.slane %v363_v26, 1  ;;  %v448_v26 = vld [vmem:[%s4378_s29 + $0x120] sm:$0xfe]  ;;  %v395_v28 = vld [vmem:[%s6196_s1 + $0x98] sm:$0xff] }
  0x58   : > { %1534 = vmatprep.subr.mxu1 %v4250_v3  ;;  %3908 = vmatprep.subr.mxu0 %v4627_v46 }
  0x59   : > { %1535 = vmatpush2.msra.mxu1 %v406_v47  ;;  %1120 = vmatmul.mubr.f32.gmra.mxu0 %v675_v48  ;;  %v510_v47 = vld [vmem:[%s4378_s29 + $0x400] sm:$0xfe]  ;;  %v859_v48 = vsel %vm664_vm0, %v852_v20, %v858_v30  ;;  %v874_v7 = vsel %vm664_vm0, %v867_v39, %v873_v49  ;;  %v728_v30 = vrot.slane %v449_v19, 1  ;;  %v4813_v19 = vld [vmem:[%s4378_s29 + $0x1c8] sm:$0xff] }
  0x5a   : > { %3888 = vmatmul.mubr.f32.gmra.mxu1 %v814_v53  ;;  %1536 = vmatprep.subr.mxu1 %v4250_v3  ;;  %v707_v53 = vsel %vm664_vm0, %v699_v16, %v706_v34  ;;  %v881_v59 = vrot.slane %v510_v47, 1  ;;  %v896_v16 = vrot.slane %v516_v6, 1  ;;  %v396_v20 = vld [vmem:[%s6196_s1 + $0xa0] sm:$0xff]  ;;  %v394_v34 = vld [vmem:[%s6196_s1 + $0x90] sm:$0xff] }
  0x5b   : > { %1537 = vmatpush2.msra.mxu1 %v405_v56  ;;  %1124 = vmatprep.mubr.f32.mxu0 %v685_v57  ;;  %v513_v56 = vld [vmem:[%s4378_s29 + $0x430] sm:$0x1]  ;;  %v868_v57 = vsel %vm664_vm0, %v866_v38, %v867_v39  ;;  %v726_v38 = vrot.slane %v4742_v25, 1  ;;  %v455_v47 = vld [vmem:[%s4378_s29 + $0x170] sm:$0xfe]  ;;  %v392_v49 = vld [vmem:[%s6196_s1 + $0x80] sm:$0xff] }
  0x5c   : > { %1538 = vmatprep.subr.mxu1 %v4250_v3  ;;  %3890 = vmatprep.mubr.f32.mxu1 %v823_v61  ;;  %v446_v61 = vld [vmem:[%s4378_s29 + $0x110] sm:$0x1]  ;;  %v888_v8 = vrot.slane %v513_v56, 1  ;;  %v883_v15 = vsel %vm664_vm0, %v881_v59, %v882_v60  ;;  %v743_v54 = vrot.slane %v455_v47, 1  ;;  %v4779_v56 = vld [vmem:[%s4378_s29 + $0x180] sm:$0xff]  ;;  %v3599_v59 = vld [vmem:[%s6196_s1 + $0x378] sm:$0xff] }
  0x5d   : > { %1539 = vmatpush2.msra.mxu1 %v404_v4  ;;  %1125 = vmatmul.mubr.f32.gmra.mxu0 %v682_v5  ;;  %v711_v4 = vrot.slane %v4702_v50, 1  ;;  %v375_v5 = vld [vmem:[%s4378_s29 + $0x460] sm:$0xff]  ;;  %v421_v47 = vld [vmem:[%s6196_s1 + $0x168] sm:$0xff] }
  0x5e   : > { %3891 = vmatmul.mubr.f32.gmra.mxu1 %v829_v9  ;;  %1540 = vmatprep.subr.mxu1 %v4250_v3  ;;  %v445_v9 = vld [vmem:[%s4378_s29 + $0x108] sm:$0x1]  ;;  %v897_v17 = vrot.slane %v375_v5, 1 }
  0x5f   : > { %1541 = vmatpush2.msra.mxu1 %v403_v13  ;;  %1129 = vmatprep.mubr.f32.mxu0 %v692_v14  ;;  %v721_v13 = vrot.slane %v446_v61, 1  ;;  %v519_v14 = vld [vmem:[%s4378_s29 + $0x478] sm:$0x1]  ;;  %v712_v21 = vsel %vm664_vm0, %v710_v2, %v711_v4  ;;  %v458_v61 = vld [vmem:[%s4378_s29 + $0x1a0] sm:$0x1] }
  0x60   : > { %1542 = vmatprep.subr.mxu1 %v4250_v3  ;;  %3893 = vmatprep.mubr.f32.mxu1 %v838_v18  ;;  %v4732_v18 = vld [vmem:[%s4378_s29 + $0x140] sm:$0xff]  ;;  %v903_v24 = vrot.slane %v519_v14, 1  ;;  %v751_v6 = vrot.slane %v458_v61, 1  ;;  %v286_v14 = vld [vmem:[%s4378_s29 + $0x48] sm:$0xff] }
  0x61   : > { %1543 = vmatpush2.msra.mxu1 %v402_v22  ;;  %1130 = vmatmul.mubr.f32.gmra.mxu0 %v690_v23  ;;  %v719_v22 = vrot.slane %v445_v9, 1  ;;  %v889_v23 = vsel %vm664_vm0, %v882_v60, %v888_v8  ;;  %v729_v31 = vrot.slane %v4732_v18, 1  ;;  %v287_v8 = vld [vmem:[%s4378_s29 + $0x50] sm:$0xff] }
  0x62   : > { %3894 = vmatmul.mubr.f32.gmra.mxu1 %v844_v29  ;;  %1544 = vmatprep.subr.mxu1 %v4250_v3  ;;  %v722_v29 = vsel %vm664_vm0, %v714_v55, %v721_v13  ;;  %v904_v39 = vsel %vm664_vm0, %v897_v17, %v903_v24  ;;  %v744_v55 = vrot.slane %v4767_v45, 1  ;;  %v4800_v9 = vld [vmem:[%s4378_s29 + $0x1d0] sm:$0xff] }
  0x63   : > { %1545 = vmatpush2.msra.mxu1 %v401_v32  ;;  %1134 = vmatprep.mubr.f32.mxu0 %v700_v33  ;;  %v898_v32 = vsel %vm664_vm0, %v896_v16, %v897_v17  ;;  %v452_v33 = vld [vmem:[%s4378_s29 + $0x158] sm:$0x1]  ;;  %v720_v35 = vsel %vm664_vm0, %v711_v4, %v719_v22  ;;  %v741_v4 = vrot.slane %v4779_v56, 1  ;;  %v759_v17 = vrot.slane %v4800_v9, 1  ;;  %v422_v22 = vld [vmem:[%s6196_s1 + $0x170] sm:$0xff] }
  0x64   : > { %1546 = vmatprep.subr.mxu1 %v4250_v3  ;;  %3896 = vmatprep.mubr.f32.mxu1 %v853_v37  ;;  %v725_v37 = vrot.slane %v448_v26, 1  ;;  %v736_v44 = vrot.slane %v452_v33, 1  ;;  %v745_v5 = vsel %vm664_vm0, %v743_v54, %v744_v55  ;;  %v756_v26 = vrot.slane %v4813_v19, 1  ;;  %v467_v33 = vld [vmem:[%s4378_s29 + $0x200] sm:$0xfe] }
  0x65   : > { %1547 = vmatpush2.msra.mxu1 %v400_v42  ;;  %1135 = vmatmul.mubr.f32.gmra.mxu0 %v697_v43  ;;  %v393_v42 = vld [vmem:[%s6196_s1 + $0x88] sm:$0xff]  ;;  %v730_v43 = vsel %vm664_vm0, %v728_v30, %v729_v31  ;;  %v463_v30 = vld [vmem:[%s4378_s29 + $0x1e0] sm:$0x1] }
  0x66   : > { %3897 = vmatmul.mubr.f32.gmra.mxu1 %v859_v48  ;;  %1548 = vmatprep.subr.mxu1 %v4250_v3  ;;  %v281_v48 = vld [vmem:[%s4378_s29 + $0x8] sm:$0xff]  ;;  %v727_v51 = vsel %vm664_vm0, %v725_v37, %v726_v38  ;;  %v737_v60 = vsel %vm664_vm0, %v729_v31, %v736_v44  ;;  %v293_v31 = vld [vmem:[%s4378_s29 + $0x98] sm:$0xff]  ;;  %v292_v37 = vld [vmem:[%s4378_s29 + $0x90] sm:$0xff] }
  0x67   : > { %1549 = vmatpush2.msra.mxu1 %v399_v52  ;;  %1139 = vmatprep.mubr.f32.mxu0 %v707_v53  ;;  %v734_v52 = vrot.slane %v451_v41, 1  ;;  %v280_v53 = vld [vmem:[%s4378_s29] sm:$0xff]  ;;  %v470_v44 = vld [vmem:[%s4378_s29 + $0x230] sm:$0x1] }
  0x68   : > { %1550 = vmatprep.subr.mxu1 %v4250_v3  ;;  %3899 = vmatprep.mubr.f32.mxu1 %v868_v57  ;;  %v454_v57 = vld [vmem:[%s4378_s29 + $0x168] sm:$0xfe]  ;;  %v781_v54 = vrot.slane %v470_v44, 1  ;;  %v3586_v44 = vld [vmem:[%s6196_s1 + $0x310] sm:$0xff] }
  0x69   : > { %1551 = vmatpush2.msra.mxu1 %v398_v62  ;;  %1140 = vmatmul.mubr.f32.gmra.mxu0 %v705_v63  ;;  %v735_v62 = vsel %vm664_vm0, %v726_v38, %v734_v52  ;;  %v3598_v63 = vld [vmem:[%s6196_s1 + $0x370] sm:$0xff]  ;;  %v740_v2 = vrot.slane %v454_v57, 1  ;;  %v3592_v52 = vld [vmem:[%s6196_s1 + $0x340] sm:$0xff] }
  0x6a   : > { %3900 = vmatmul.mubr.f32.gmra.mxu1 %v874_v7  ;;  %1552 = vmatprep.subr.mxu1 %v4250_v3  ;;  %v457_v7 = vld [vmem:[%s4378_s29 + $0x198] sm:$0x1]  ;;  %v299_v57 = vld [vmem:[%s4378_s29 + $0xe0] sm:$0xff] }
  0x6b   : > { %1553 = vmatpush2.msra.mxu1 %v397_v10  ;;  %1144 = vmatprep.mubr.f32.mxu0 %v715_v12  ;;  %v461_v10 = vld [vmem:[%s4378_s29 + $0x1b8] sm:$0xfe]  ;;  %v3597_v12 = vld [vmem:[%s6196_s1 + $0x368] sm:$0xff]  ;;  %v749_v13 = vrot.slane %v457_v7, 1  ;;  %v472_v7 = vld [vmem:[%s4378_s29 + $0x240] sm:$0xfe] }
  0x6c   : > { %1554 = vmatprep.subr.mxu1 %v4250_v3  ;;  %3902 = vmatprep.mubr.f32.mxu1 %v883_v15  ;;  %v752_v15 = vsel %vm664_vm0, %v744_v55, %v751_v6  ;;  %v758_v16 = vrot.slane %v461_v10, 1  ;;  %v469_v55 = vld [vmem:[%s4378_s29 + $0x228] sm:$0x1]  ;;  %v4883_v6 = vld [vmem:[%s4378_s29 + $0x258] sm:$0xff]  ;;  %v420_v10 = vld [vmem:[%s6196_s1 + $0x160] sm:$0xff] }
  0x6d   : > { %1555 = vmatpush2.msra.mxu1 %v396_v20  ;;  %1145 = vmatmul.mubr.f32.gmra.mxu0 %v712_v21  ;;  %v460_v20 = vld [vmem:[%s4378_s29 + $0x1b0] sm:$0xfe]  ;;  %v464_v21 = vld [vmem:[%s4378_s29 + $0x1e8] sm:$0x1] }
  0x6e   : > { %3903 = vmatmul.mubr.f32.gmra.mxu1 %v889_v23  ;;  %1556 = vmatprep.subr.mxu1 %v4250_v3  ;;  %v750_v23 = vsel %vm664_vm0, %v741_v4, %v749_v13  ;;  %v755_v24 = vrot.slane %v460_v20, 1  ;;  %v786_v13 = vrot.slane %v4883_v6, 1  ;;  %v305_v20 = vld [vmem:[%s4378_s29 + $0x128] sm:$0xff] }
  0x6f   : > { %1557 = vmatpush2.msra.mxu1 %v395_v28  ;;  %1149 = vmatprep.mubr.f32.mxu0 %v722_v29  ;;  %v760_v28 = vsel %vm664_vm0, %v758_v16, %v759_v17  ;;  %v766_v29 = vrot.slane %v464_v21, 1  ;;  %v479_v21 = vld [vmem:[%s4378_s29 + $0x290] sm:$0xfe] }
  0x70   : > { %1558 = vmatprep.subr.mxu1 %v4250_v3  ;;  %3905 = vmatprep.mubr.f32.mxu1 %v898_v32  ;;  %v4836_v32 = vld [vmem:[%s4378_s29 + $0x218] sm:$0xff] }
  0x71   : > { %1559 = vmatpush2.msra.mxu1 %v394_v34  ;;  %1150 = vmatmul.mubr.f32.gmra.mxu0 %v720_v35  ;;  %v757_v34 = vsel %vm664_vm0, %v755_v24, %v756_v26  ;;  %v764_v35 = vrot.slane %v463_v30, 1  ;;  %v767_v38 = vsel %vm664_vm0, %v759_v17, %v766_v29  ;;  %v774_v41 = vrot.slane %v4836_v32, 1  ;;  %v475_v17 = vld [vmem:[%s4378_s29 + $0x270] sm:$0x1]  ;;  %v3588_v24 = vld [vmem:[%s6196_s1 + $0x320] sm:$0xff] }
  0x72   : > { %3906 = vmatmul.mubr.f32.gmra.mxu1 %v904_v39  ;;  %1560 = vmatprep.subr.mxu1 %v4250_v3  ;;  %v773_v39 = vrot.slane %v467_v33, 1  ;;  %v4921_v30 = vld [vmem:[%s4378_s29 + $0x2a0] sm:$0xff]  ;;  %v3587_v33 = vld [vmem:[%s6196_s1 + $0x318] sm:$0xff] }
  0x73   : > { %1561 = vmatpush2.msra.mxu1 %v393_v42  ;;  %1154 = vmatprep.mubr.f32.mxu0 %v730_v43  ;;  %v4849_v42 = vld [vmem:[%s4378_s29 + $0x210] sm:$0xff]  ;;  %v466_v43 = vld [vmem:[%s4378_s29 + $0x1f8] sm:$0xfe] }
  0x74   : > { %1562 = vmatprep.subr.mxu1 %v4250_v3  ;;  %1564 = vmatprep.mubr.f32.mxu1 %v281_v48  ;;  %v765_v48 = vsel %vm664_vm0, %v756_v26, %v764_v35  ;;  %v304_v26 = vld [vmem:[%s4378_s29 + $0x120] sm:$0xff]  ;;  %v801_v35 = vrot.slane %v4921_v30, 1 }
  0x75   : > { %1563 = vmatpush2.msra.mxu1 %v392_v49  ;;  %1155 = vmatmul.mubr.f32.gmra.mxu0 %v727_v51  ;;  %v770_v49 = vrot.slane %v466_v43, 1  ;;  %v771_v51 = vrot.slane %v4849_v42, 1  ;;  %v4937_v43 = vld [vmem:[%s4378_s29 + $0x2f0] sm:$0xff] }
  0x76   : > { %1565 = vmatmul.mubr.f32.vlgmr.msra.gmra.mxu1 %v280_v53  ;;  %2528 = vmatprep.subr.mxu1 %v4250_v3  ;;  %v775_v53 = vsel %vm664_vm0, %v773_v39, %v774_v41 }
  0x77   : > { %2529 = vmatpush1.msra.mxu1 %v3599_v59  ;;  %1159 = vmatprep.mubr.f32.mxu0 %v737_v60  ;;  %v4871_v59 = vld [vmem:[%s4378_s29 + $0x260] sm:$0xff]  ;;  %v473_v60 = vld [vmem:[%s4378_s29 + $0x248] sm:$0xfe]  ;;  %v772_v61 = vsel %vm664_vm0, %v770_v49, %v771_v51 }
  0x78   : > { %1569 = vmatprep.mubr.f32.mxu1 %v4554_v58  ;;  %2530 = vmatprep.subr.mxu1 %v4250_v3  ;;  %v742_v58 = vsel %vm664_vm0, %v740_v2, %v741_v4  ;;  %v782_v2 = vsel %vm664_vm0, %v774_v41, %v781_v54  ;;  %v788_v4 = vrot.slane %v473_v60, 1  ;;  %v481_v41 = vld [vmem:[%s4378_s29 + $0x2b8] sm:$0x1]  ;;  %v3585_v49 = vld [vmem:[%s6196_s1 + $0x308] sm:$0xff]  ;;  %v819_v54 = vrot.slane %v4937_v43, 1 }
  0x79   : > { %1160 = vmatmul.mubr.f32.gmra.mxu0 %v735_v62  ;;  %2531 = vmatpush1.msra.mxu1 %v3598_v63  ;;  %v779_v62 = vrot.slane %v469_v55, 1  ;;  %v298_v63 = vld [vmem:[%s4378_s29 + $0xd8] sm:$0xff]  ;;  %v4956_v55 = vld [vmem:[%s4378_s29 + $0x2e8] sm:$0xff] }
  0x7a   : > { %1570 = vmatmul.mubr.f32.gmra.mxu1 %v4566_v0  ;;  %1164 = vmatprep.mubr.f32.mxu0 %v745_v5  ;;  %v3596_v0 = vld [vmem:[%s6196_s1 + $0x360] sm:$0xff]  ;;  %v789_v5 = vrot.slane %v4871_v59, 1  ;;  %v417_v60 = vld [vmem:[%s6196_s1 + $0x148] sm:$0xff] }
  0x7b   : > { %1574 = vmatprep.mubr.f32.mxu1 %v287_v8  ;;  %2532 = vmatprep.subr.mxu1 %v4250_v3  ;;  %v3590_v8 = vld [vmem:[%s6196_s1 + $0x330] sm:$0xff] }
  0x7c   : > { %2533 = vmatpush1.msra.mxu1 %v3597_v12  ;;  %3909 = vmatpush3.msra.mxu0 %v4627_v46  ;;  %v3595_v46 = vld [vmem:[%s6196_s1 + $0x358] sm:$0xff]  ;;  %v780_v12 = vsel %vm664_vm0, %v771_v51, %v779_v62  ;;  %v310_v51 = vld [vmem:[%s4378_s29 + $0x168] sm:$0xff]  ;;  %v816_v62 = vrot.slane %v4956_v55, 1 }
  0x7d   : > { %1165 = vmatmul.mubr.f32.gmra.mxu0 %v742_v58  ;;  %2534 = vmatprep.subr.mxu1 %v4250_v3  ;;  %v785_v58 = vrot.slane %v472_v7, 1  ;;  %v317_v7 = vld [vmem:[%s4378_s29 + $0x1b8] sm:$0xff] }
  0x7e   : > { %1575 = vmatmul.mubr.f32.gmra.mxu1 %v286_v14  ;;  %1169 = vmatprep.mubr.f32.mxu0 %v752_v15  ;;  %v3589_v14 = vld [vmem:[%s6196_s1 + $0x328] sm:$0xff]  ;;  %v790_v15 = vsel %vm664_vm0, %v788_v4, %v789_v5 }
  0x7f   : > { %1579 = vmatprep.mubr.f32.mxu1 %v4603_v27  ;;  %2535 = vmatpush1.msra.mxu1 %v3596_v0  ;;  %v3594_v27 = vld [vmem:[%s6196_s1 + $0x350] sm:$0xff]  ;;  %v4905_v0 = vld [vmem:[%s4378_s29 + $0x2a8] sm:$0xff] }
  0x80   : > { %2536 = vmatprep.subr.mxu1 %v4250_v3  ;;  %3910 = vmatprep.subr.mxu0 %v422_v22  ;;  %v804_v29 = vrot.slane %v4905_v0, 1 }
  0x81   : > { %1170 = vmatmul.mubr.f32.gmra.mxu0 %v750_v23  ;;  %2537 = vmatpush1.msra.mxu1 %v3595_v46  ;;  %v794_v23 = vrot.slane %v475_v17, 1  ;;  %v490_v17 = vld [vmem:[%s4378_s29 + $0x318] sm:$0xfe] }
  0x82   : > { %1580 = vmatmul.mubr.f32.gmra.mxu1 %v4614_v36  ;;  %1174 = vmatprep.mubr.f32.mxu0 %v760_v28  ;;  %v3593_v36 = vld [vmem:[%s6196_s1 + $0x348] sm:$0xff]  ;;  %v803_v28 = vrot.slane %v479_v21, 1  ;;  %v416_v21 = vld [vmem:[%s6196_s1 + $0x140] sm:$0xff] }
  0x83   : > { %1584 = vmatprep.mubr.f32.mxu1 %v293_v31  ;;  %2538 = vmatprep.subr.mxu1 %v4250_v3  ;;  %v478_v31 = vld [vmem:[%s4378_s29 + $0x288] sm:$0xfe] }
  0x84   : > { %2539 = vmatpush1.msra.mxu1 %v3594_v27  ;;  %3911 = vmatpush3.msra.mxu0 %v422_v22  ;;  %v787_v22 = vsel %vm664_vm0, %v785_v58, %v786_v13  ;;  %v795_v27 = vsel %vm664_vm0, %v786_v13, %v794_v23  ;;  %v316_v58 = vld [vmem:[%s4378_s29 + $0x1b0] sm:$0xff] }
  0x85   : > { %1175 = vmatmul.mubr.f32.gmra.mxu0 %v757_v34  ;;  %2540 = vmatprep.subr.mxu1 %v4250_v3  ;;  %v800_v34 = vrot.slane %v478_v31, 1  ;;  %v5009_v31 = vld [vmem:[%s4378_s29 + $0x380] sm:$0xff] }
  0x86   : > { %1585 = vmatmul.mubr.f32.gmra.mxu1 %v292_v37  ;;  %1179 = vmatprep.mubr.f32.mxu0 %v767_v38  ;;  %v805_v37 = vsel %vm664_vm0, %v803_v28, %v804_v29  ;;  %v311_v38 = vld [vmem:[%s4378_s29 + $0x170] sm:$0xff]  ;;  %v493_v28 = vld [vmem:[%s4378_s29 + $0x348] sm:$0x1] }
  0x87   : > { %1589 = vmatprep.mubr.f32.mxu1 %v4648_v1  ;;  %2541 = vmatpush1.msra.mxu1 %v3593_v36  ;;  %v3591_v1 = vld [vmem:[%s6196_s1 + $0x338] sm:$0xff] }
  0x88   : > { %2542 = vmatprep.subr.mxu1 %v4250_v3  ;;  %3912 = vmatprep.subr.mxu0 %v421_v47  ;;  %v485_v36 = vld [vmem:[%s4378_s29 + $0x2d8] sm:$0xfe] }
  0x89   : > { %1180 = vmatmul.mubr.f32.gmra.mxu0 %v765_v48  ;;  %2543 = vmatpush1.msra.mxu1 %v3592_v52  ;;  %v809_v48 = vrot.slane %v481_v41, 1  ;;  %v5025_v41 = vld [vmem:[%s4378_s29 + $0x378] sm:$0xff] }
  0x8a   : > { %1590 = vmatmul.mubr.f32.gmra.mxu1 %v4660_v11  ;;  %1184 = vmatprep.mubr.f32.mxu0 %v775_v53  ;;  %v476_v11 = vld [vmem:[%s4378_s29 + $0x278] sm:$0x1]  ;;  %v818_v53 = vrot.slane %v485_v36, 1  ;;  %v496_v36 = vld [vmem:[%s4378_s29 + $0x360] sm:$0xfe] }
  0x8b   : > { %1594 = vmatprep.mubr.f32.mxu1 %v299_v57  ;;  %2544 = vmatprep.subr.mxu1 %v4250_v3  ;;  %v796_v16 = vrot.slane %v476_v11, 1  ;;  %v484_v57 = vld [vmem:[%s4378_s29 + $0x2d0] sm:$0xfe]  ;;  %v4974_v11 = vld [vmem:[%s4378_s29 + $0x338] sm:$0xff] }
  0x8c   : > { %3913 = vmatpush3.msra.mxu0 %v421_v47  ;;  %2545 = vmatpush1.msra.mxu1 %v3591_v1  ;;  %v802_v47 = vsel %vm664_vm0, %v800_v34, %v801_v35  ;;  %v810_v1 = vsel %vm664_vm0, %v801_v35, %v809_v48  ;;  %v3612_v34 = vld [vmem:[%s6196_s1 + $0x3e0] sm:$0xff]  ;;  %v322_v35 = vld [vmem:[%s4378_s29 + $0x1f8] sm:$0xff]  ;;  %v846_v48 = vrot.slane %v5025_v41, 1 }
  0x8d   : > { %1185 = vmatmul.mubr.f32.gmra.mxu0 %v772_v61  ;;  %2546 = vmatprep.subr.mxu1 %v4250_v3  ;;  %v797_v46 = vsel %vm664_vm0, %v789_v5, %v796_v16  ;;  %v815_v61 = vrot.slane %v484_v57, 1  ;;  %v487_v5 = vld [vmem:[%s4378_s29 + $0x300] sm:$0x1]  ;;  %v4987_v16 = vld [vmem:[%s4378_s29 + $0x330] sm:$0xff]  ;;  %v5044_v57 = vld [vmem:[%s4378_s29 + $0x3c8] sm:$0xff] }
  0x8e   : > { %1595 = vmatmul.mubr.f32.gmra.mxu1 %v298_v63  ;;  %1189 = vmatprep.mubr.f32.mxu0 %v782_v2  ;;  %v3584_v63 = vld [vmem:[%s6196_s1 + $0x300] sm:$0xff]  ;;  %v820_v2 = vsel %vm664_vm0, %v818_v53, %v819_v54  ;;  %v831_v23 = vrot.slane %v4987_v16, 1  ;;  %v499_v53 = vld [vmem:[%s4378_s29 + $0x390] sm:$0x1] }
  0x8f   : > { %1599 = vmatprep.mubr.f32.mxu1 %v4690_v40  ;;  %2547 = vmatpush1.msra.mxu1 %v3590_v8  ;;  %v419_v40 = vld [vmem:[%s6196_s1 + $0x158] sm:$0xff]  ;;  %v491_v8 = vld [vmem:[%s4378_s29 + $0x320] sm:$0xfe] }
  0x90   : > { %3914 = vmatprep.subr.mxu0 %v420_v10  ;;  %2548 = vmatprep.subr.mxu1 %v4250_v3 }
  0x91   : > { %1190 = vmatmul.mubr.f32.gmra.mxu0 %v780_v12  ;;  %2549 = vmatpush1.msra.mxu1 %v3589_v14  ;;  %v824_v12 = vrot.slane %v487_v5, 1  ;;  %v833_v14 = vrot.slane %v491_v8, 1  ;;  %v5059_v5 = vld [vmem:[%s4378_s29 + $0x3c0] sm:$0xff] }
  0x92   : > { %1600 = vmatmul.mubr.f32.gmra.mxu1 %v4702_v50  ;;  %1194 = vmatprep.mubr.f32.mxu0 %v790_v15  ;;  %v482_v50 = vld [vmem:[%s4378_s29 + $0x2c0] sm:$0x1]  ;;  %v834_v15 = vrot.slane %v4974_v11, 1 }
  0x93   : > { %1604 = vmatprep.mubr.f32.mxu1 %v305_v20  ;;  %3915 = vmatpush3.msra.mxu0 %v420_v10  ;;  %v811_v39 = vrot.slane %v482_v50, 1  ;;  %v817_v10 = vsel %vm664_vm0, %v815_v61, %v816_v62  ;;  %v494_v20 = vld [vmem:[%s4378_s29 + $0x350] sm:$0x1]  ;;  %v497_v50 = vld [vmem:[%s4378_s29 + $0x368] sm:$0xfe]  ;;  %v412_v8 = vld [vmem:[%s6196_s1 + $0x120] sm:$0xff] }
  0x94   : > { %2550 = vmatprep.subr.mxu1 %v4250_v3  ;;  %3916 = vmatprep.subr.mxu0 %v419_v40  ;;  %v3610_v61 = vld [vmem:[%s6196_s1 + $0x3d0] sm:$0xff] }
  0x95   : > { %1195 = vmatmul.mubr.f32.gmra.mxu0 %v787_v22  ;;  %2551 = vmatpush1.msra.mxu1 %v3588_v24  ;;  %v812_v52 = vsel %vm664_vm0, %v804_v29, %v811_v39  ;;  %v830_v22 = vrot.slane %v490_v17, 1  ;;  %v3613_v24 = vld [vmem:[%s6196_s1 + $0x3e8] sm:$0xff]  ;;  %v323_v29 = vld [vmem:[%s4378_s29 + $0x200] sm:$0xff]  ;;  %v849_v39 = vrot.slane %v5009_v31, 1  ;;  %v335_v17 = vld [vmem:[%s4378_s29 + $0x290] sm:$0xff] }
  0x96   : > { %1605 = vmatmul.mubr.f32.gmra.mxu1 %v304_v26  ;;  %1199 = vmatprep.mubr.f32.mxu0 %v797_v46  ;;  %v835_v26 = vsel %vm664_vm0, %v833_v14, %v834_v15  ;;  %v841_v46 = vrot.slane %v494_v20, 1  ;;  %v5077_v20 = vld [vmem:[%s4378_s29 + $0x410] sm:$0xff] }
  0x97   : > { %1609 = vmatprep.mubr.f32.mxu1 %v4732_v18  ;;  %2552 = vmatprep.subr.mxu1 %v4250_v3  ;;  %v418_v18 = vld [vmem:[%s6196_s1 + $0x150] sm:$0xff] }
  0x98   : > { %3917 = vmatpush3.msra.mxu0 %v419_v40  ;;  %2553 = vmatpush1.msra.mxu1 %v3587_v33  ;;  %v825_v40 = vsel %vm664_vm0, %v816_v62, %v824_v12  ;;  %v832_v33 = vsel %vm664_vm0, %v830_v22, %v831_v23  ;;  %v328_v62 = vld [vmem:[%s4378_s29 + $0x240] sm:$0xff]  ;;  %v861_v12 = vrot.slane %v5059_v5, 1 }
  0x99   : > { %1200 = vmatmul.mubr.f32.gmra.mxu0 %v795_v27  ;;  %2554 = vmatprep.subr.mxu1 %v4250_v3  ;;  %v839_v27 = vrot.slane %v493_v28, 1  ;;  %v3608_v22 = vld [vmem:[%s6196_s1 + $0x3c0] sm:$0xff]  ;;  %v5093_v28 = vld [vmem:[%s4378_s29 + $0x408] sm:$0xff] }
  0x9a   : > { %1610 = vmatmul.mubr.f32.gmra.mxu1 %v4742_v25  ;;  %1204 = vmatprep.mubr.f32.mxu0 %v805_v37  ;;  %v488_v25 = vld [vmem:[%s4378_s29 + $0x308] sm:$0x1]  ;;  %v842_v37 = vsel %vm664_vm0, %v834_v15, %v841_v46  ;;  %v505_v15 = vld [vmem:[%s4378_s29 + $0x3d8] sm:$0x1]  ;;  %v879_v46 = vrot.slane %v5077_v20, 1 }
  0x9b   : > { %1614 = vmatprep.mubr.f32.mxu1 %v311_v38  ;;  %2555 = vmatpush1.msra.mxu1 %v3586_v44  ;;  %v826_v4 = vrot.slane %v488_v25, 1  ;;  %v848_v38 = vrot.slane %v497_v50, 1  ;;  %v3611_v44 = vld [vmem:[%s6196_s1 + $0x3d8] sm:$0xff]  ;;  %v503_v25 = vld [vmem:[%s4378_s29 + $0x3b0] sm:$0xfe] }
  0x9c   : > { %3918 = vmatprep.subr.mxu0 %v418_v18  ;;  %2556 = vmatprep.subr.mxu1 %v4250_v3  ;;  %v410_v50 = vld [vmem:[%s6196_s1 + $0x110] sm:$0xff] }
  0x9d   : > { %1205 = vmatmul.mubr.f32.gmra.mxu0 %v802_v47  ;;  %2557 = vmatpush1.msra.mxu1 %v3585_v49  ;;  %v827_v13 = vsel %vm664_vm0, %v819_v54, %v826_v4  ;;  %v845_v47 = vrot.slane %v496_v36, 1  ;;  %v414_v49 = vld [vmem:[%s6196_s1 + $0x130] sm:$0xff]  ;;  %v329_v54 = vld [vmem:[%s4378_s29 + $0x248] sm:$0xff]  ;;  %v864_v4 = vrot.slane %v5044_v57, 1  ;;  %v5111_v36 = vld [vmem:[%s4378_s29 + $0x458] sm:$0xff] }
  0x9e   : > { %1615 = vmatmul.mubr.f32.gmra.mxu1 %v310_v51  ;;  %1209 = vmatprep.mubr.f32.mxu0 %v812_v52  ;;  %v850_v51 = vsel %vm664_vm0, %v848_v38, %v849_v39  ;;  %v511_v38 = vld [vmem:[%s4378_s29 + $0x420] sm:$0x1] }
  0x9f   : > { %1619 = vmatprep.mubr.f32.mxu1 %v4767_v45  ;;  %3919 = vmatpush3.msra.mxu0 %v418_v18  ;;  %v3615_v45 = vld [vmem:[%s6196_s1 + $0x3f8] sm:$0xff]  ;;  %v840_v18 = vsel %vm664_vm0, %v831_v23, %v839_v27  ;;  %v334_v23 = vld [vmem:[%s4378_s29 + $0x288] sm:$0xff]  ;;  %v876_v27 = vrot.slane %v5093_v28, 1 }
  0xa0   : > { %2558 = vmatprep.subr.mxu1 %v4250_v3  ;;  %3920 = vmatprep.subr.mxu0 %v417_v60 }
  0xa1   : > { %1210 = vmatmul.mubr.f32.gmra.mxu0 %v810_v1  ;;  %2559 = vmatpush1.msra.mxu1 %v3584_v63  ;;  %v854_v1 = vrot.slane %v499_v53, 1  ;;  %v5127_v53 = vld [vmem:[%s4378_s29 + $0x450] sm:$0xff] }
  0xa2   : > { %1620 = vmatmul.mubr.f32.gmra.mxu1 %v4779_v56  ;;  %1214 = vmatprep.mubr.f32.mxu0 %v820_v2  ;;  %v3614_v56 = vld [vmem:[%s6196_s1 + $0x3f0] sm:$0xff]  ;;  %v863_v2 = vrot.slane %v503_v25, 1  ;;  %v408_v25 = vld [vmem:[%s6196_s1 + $0x100] sm:$0xff] }
  0xa3   : > { %1624 = vmatprep.mubr.f32.mxu1 %v317_v7  ;;  %2560 = vmatprep.subr.mxu1 %v4250_v3  ;;  %v502_v7 = vld [vmem:[%s4378_s29 + $0x3a8] sm:$0xfe] }
  0xa4   : > { %3921 = vmatpush3.msra.mxu0 %v417_v60  ;;  %2561 = vmatpush2.msra.mxu1 %v3615_v45  ;;  %v847_v60 = vsel %vm664_vm0, %v845_v47, %v846_v48  ;;  %v855_v45 = vsel %vm664_vm0, %v846_v48, %v854_v1  ;;  %v3606_v47 = vld [vmem:[%s6196_s1 + $0x3b0] sm:$0xff]  ;;  %v891_v1 = vrot.slane %v5127_v53, 1 }
  0xa5   : > { %1215 = vmatmul.mubr.f32.gmra.mxu0 %v817_v10  ;;  %2562 = vmatprep.subr.mxu1 %v4250_v3  ;;  %v860_v10 = vrot.slane %v502_v7, 1  ;;  %v340_v48 = vld [vmem:[%s4378_s29 + $0x2d0] sm:$0xff]  ;;  %v5148_v7 = vld [vmem:[%s6196_s1 + $0x478] sm:$0xff] }
  0xa6   : > { %1625 = vmatmul.mubr.f32.gmra.mxu1 %v316_v58  ;;  %1219 = vmatprep.mubr.f32.mxu0 %v827_v13  ;;  %v3609_v58 = vld [vmem:[%s6196_s1 + $0x3c8] sm:$0xff]  ;;  %v865_v13 = vsel %vm664_vm0, %v863_v2, %v864_v4 }
  0xa7   : > { %1629 = vmatprep.mubr.f32.mxu1 %v4800_v9  ;;  %2563 = vmatpush2.msra.mxu1 %v3614_v56  ;;  %v415_v9 = vld [vmem:[%s6196_s1 + $0x138] sm:$0xff]  ;;  %v517_v2 = vld [vmem:[%s4378_s29 + $0x468] sm:$0x1] }
  0xa8   : > { %3922 = vmatprep.subr.mxu0 %v416_v21  ;;  %2564 = vmatprep.subr.mxu1 %v4250_v3  ;;  %v509_v56 = vld [vmem:[%s4378_s29 + $0x3f8] sm:$0xfe] }
  0xa9   : > { %1220 = vmatmul.mubr.f32.gmra.mxu0 %v825_v40  ;;  %2565 = vmatpush2.msra.mxu1 %v3613_v24  ;;  %v869_v40 = vrot.slane %v505_v15, 1  ;;  %v352_v15 = vld [vmem:[%s4378_s29 + $0x360] sm:$0xff] }
  0xaa   : > { %1630 = vmatmul.mubr.f32.gmra.mxu1 %v4813_v19  ;;  %1224 = vmatprep.mubr.f32.mxu0 %v835_v26  ;;  %v500_v19 = vld [vmem:[%s4378_s29 + $0x398] sm:$0x1]  ;;  %v878_v26 = vrot.slane %v509_v56, 1  ;;  %v5179_v56 = vld [vmem:[%s4378_s29 + $0x28] sm:$0xff] }
  0xab   : > { %1634 = vmatprep.mubr.f32.mxu1 %v323_v29  ;;  %3923 = vmatpush3.msra.mxu0 %v416_v21  ;;  %v856_v52 = vrot.slane %v500_v19, 1  ;;  %v862_v21 = vsel %vm664_vm0, %v860_v10, %v861_v12  ;;  %v508_v29 = vld [vmem:[%s4378_s29 + $0x3f0] sm:$0xfe]  ;;  %v515_v19 = vld [vmem:[%s4378_s29 + $0x440] sm:$0xfe] }
  0xac   : > { %2566 = vmatprep.subr.mxu1 %v4250_v3  ;;  %3924 = vmatprep.subr.mxu0 %v415_v9 }
  0xad   : > { %1225 = vmatmul.mubr.f32.gmra.mxu0 %v832_v33  ;;  %2567 = vmatpush2.msra.mxu1 %v3612_v34  ;;  %v857_v63 = vsel %vm664_vm0, %v849_v39, %v856_v52  ;;  %v875_v33 = vrot.slane %v508_v29, 1  ;;  %v3607_v34 = vld [vmem:[%s6196_s1 + $0x3b8] sm:$0xff]  ;;  %v894_v52 = vrot.slane %v5111_v36, 1  ;;  %v5226_v29 = vld [vmem:[%s4378_s29 + $0x100] sm:$0xff] }
  0xae   : > { %1635 = vmatmul.mubr.f32.gmra.mxu1 %v322_v35  ;;  %1229 = vmatprep.mubr.f32.mxu0 %v842_v37  ;;  %v880_v35 = vsel %vm664_vm0, %v878_v26, %v879_v46  ;;  %v341_v39 = vld [vmem:[%s4378_s29 + $0x2d8] sm:$0xff]  ;;  %v306_v26 = vld [vmem:[%s4378_s29 + $0x130] sm:$0xff] }
  0xaf   : > { %1639 = vmatprep.mubr.f32.mxu1 %v4836_v32  ;;  %2568 = vmatprep.subr.mxu1 %v4250_v3  ;;  %v413_v32 = vld [vmem:[%s6196_s1 + $0x128] sm:$0xff] }
  0xb0   : > { %3925 = vmatpush3.msra.mxu0 %v415_v9  ;;  %2569 = vmatpush2.msra.mxu1 %v3611_v44  ;;  %v870_v9 = vsel %vm664_vm0, %v861_v12, %v869_v40  ;;  %v877_v44 = vsel %vm664_vm0, %v875_v33, %v876_v27  ;;  %v5193_v40 = vld [vmem:[%s6196_s1 + $0x470] sm:$0xff] }
  0xb1   : > { %1230 = vmatmul.mubr.f32.gmra.mxu0 %v840_v18  ;;  %3926 = vmatprep.subr.mxu0 %v414_v49  ;;  %v884_v18 = vrot.slane %v511_v38, 1  ;;  %v5246_v33 = vld [vmem:[%s6196_s1 + $0x450] sm:$0xff]  ;;  %v324_v38 = vld [vmem:[%s4378_s29 + $0x208] sm:$0xff] }
  0xb2   : > { %1640 = vmatmul.mubr.f32.gmra.mxu1 %v4849_v42  ;;  %1234 = vmatprep.mubr.f32.mxu0 %v850_v51  ;;  %v506_v42 = vld [vmem:[%s4378_s29 + $0x3e0] sm:$0x1]  ;;  %v893_v51 = vrot.slane %v515_v19, 1 }
  0xb3   : > { %1644 = vmatprep.mubr.f32.mxu1 %v329_v54  ;;  %3927 = vmatpush3.msra.mxu0 %v414_v49  ;;  %v871_v14 = vrot.slane %v506_v42, 1  ;;  %v514_v54 = vld [vmem:[%s4378_s29 + $0x438] sm:$0xfe]  ;;  %v899_v42 = vrot.slane %v517_v2, 1  ;;  %v4196_v19 = vld [vmem:[%s4378_s29 + $0x20] sm:$0xff] }
  0xb4   : > { %3928 = vmatprep.subr.mxu0 %v413_v32  ;;  %2570 = vmatprep.subr.mxu1 %v4250_v3  ;;  %v336_v2 = vld [vmem:[%s4378_s29 + $0x298] sm:$0xff] }
  0xb5   : > { %1235 = vmatmul.mubr.f32.gmra.mxu0 %v847_v60  ;;  %2571 = vmatpush2.msra.mxu1 %v3610_v61  ;;  %v872_v24 = vsel %vm664_vm0, %v864_v4, %v871_v14  ;;  %v890_v60 = vrot.slane %v514_v54, 1  ;;  %v3605_v61 = vld [vmem:[%s6196_s1 + $0x3a8] sm:$0xff]  ;;  %v347_v4 = vld [vmem:[%s4378_s29 + $0x320] sm:$0xff]  ;;  %v900_v12 = vsel %vm664_vm0, %v891_v1, %v899_v42  ;;  %v3602_v14 = vld [vmem:[%s6196_s1 + $0x390] sm:$0xff] }
  0xb6   : > { %1645 = vmatmul.mubr.f32.gmra.mxu1 %v328_v62  ;;  %1239 = vmatprep.mubr.f32.mxu0 %v857_v63  ;;  %v895_v62 = vsel %vm664_vm0, %v893_v51, %v894_v52 }
  0xb7   : > { %1649 = vmatprep.mubr.f32.mxu1 %v4871_v59  ;;  %3929 = vmatpush3.msra.mxu0 %v413_v32  ;;  %v411_v59 = vld [vmem:[%s6196_s1 + $0x118] sm:$0xff]  ;;  %v885_v32 = vsel %vm664_vm0, %v876_v27, %v884_v18  ;;  %v371_v27 = vld [vmem:[%s4378_s29 + $0x440] sm:$0xff] }
  0xb8   : > { %3930 = vmatprep.subr.mxu0 %v412_v8  ;;  %2572 = vmatprep.subr.mxu1 %v4250_v3  ;;  %v5271_v18 = vld [vmem:[%s4378_s29 + $0x1d8] sm:$0xff] }
  0xb9   : > { %1240 = vmatmul.mubr.f32.gmra.mxu0 %v855_v45  ;;  %2573 = vmatpush2.msra.mxu1 %v3609_v58  ;;  %v346_v45 = vld [vmem:[%s4378_s29 + $0x318] sm:$0xff]  ;;  %v282_v58 = vld [vmem:[%s4378_s29 + $0x10] sm:$0xff] }
  0xba   : > { %1650 = vmatmul.mubr.f32.gmra.mxu1 %v4883_v6  ;;  %1244 = vmatprep.mubr.f32.mxu0 %v865_v13  ;;  %v512_v6 = vld [vmem:[%s4378_s29 + $0x428] sm:$0x1] }
  0xbb   : > { %1654 = vmatprep.mubr.f32.mxu1 %v335_v17  ;;  %3931 = vmatpush3.msra.mxu0 %v412_v8  ;;  %v886_v37 = vrot.slane %v512_v6, 1  ;;  %v3604_v8 = vld [vmem:[%s6196_s1 + $0x3a0] sm:$0xff]  ;;  %v353_v13 = vld [vmem:[%s4378_s29 + $0x368] sm:$0xff]  ;;  %v288_v17 = vld [vmem:[%s4378_s29 + $0x58] sm:$0xff] }
  0xbc   : > { %3932 = vmatprep.subr.mxu0 %v411_v59  ;;  %2574 = vmatprep.subr.mxu1 %v4250_v3  ;;  %v5232_v6 = vld [vmem:[%s6196_s1 + $0x458] sm:$0xff] }
  0xbd   : > { %1245 = vmatmul.mubr.f32.gmra.mxu0 %v862_v21  ;;  %2575 = vmatpush2.msra.mxu1 %v3608_v22  ;;  %v887_v49 = vsel %vm664_vm0, %v879_v46, %v886_v37  ;;  %v359_v21 = vld [vmem:[%s4378_s29 + $0x3b0] sm:$0xff]  ;;  %v365_v46 = vld [vmem:[%s4378_s29 + $0x3f8] sm:$0xff]  ;;  %v5261_v37 = vld [vmem:[%s6196_s1 + $0x448] sm:$0xff] }
  0xbe   : > { %1655 = vmatmul.mubr.f32.gmra.mxu1 %v334_v23  ;;  %1249 = vmatprep.mubr.f32.mxu0 %v872_v24  ;;  %v5196_v22 = vld [vmem:[%s4378_s29 + $0x70] sm:$0xff]  ;;  %v300_v23 = vld [vmem:[%s4378_s29 + $0xe8] sm:$0xff]  ;;  %v5211_v24 = vld [vmem:[%s4378_s29 + $0xb8] sm:$0xff] }
  0xbf   : > { %1659 = vmatprep.mubr.f32.mxu1 %v4905_v0  ;;  %3933 = vmatpush3.msra.mxu0 %v411_v59  ;;  %v409_v0 = vld [vmem:[%s6196_s1 + $0x108] sm:$0xff]  ;;  %v294_v59 = vld [vmem:[%s4378_s29 + $0xa0] sm:$0xff] }
  0xc0   : > { %3934 = vmatprep.subr.mxu0 %v410_v50  ;;  %2576 = vmatprep.subr.mxu1 %v4250_v3 }
  0xc1   : > { %1250 = vmatmul.mubr.f32.gmra.mxu0 %v870_v9  ;;  %2577 = vmatpush2.msra.mxu1 %v3607_v34  ;;  %v5240_v9 = vld [vmem:[%s4378_s29 + $0x148] sm:$0xff]  ;;  %v5254_v34 = vld [vmem:[%s4378_s29 + $0x190] sm:$0xff] }
  0xc2   : > { %1660 = vmatmul.mubr.f32.gmra.mxu1 %v4921_v30  ;;  %1254 = vmatprep.mubr.f32.mxu0 %v880_v35  ;;  %v518_v30 = vld [vmem:[%s4378_s29 + $0x470] sm:$0x1]  ;;  %v1951_v35 = vld [vmem:[%s4378_s29 + $0x8] sm:$0xfc] }
  0xc3   : > { %1664 = vmatprep.mubr.f32.mxu1 %v341_v39  ;;  %3935 = vmatpush3.msra.mxu0 %v410_v50  ;;  %v901_v63 = vrot.slane %v518_v30, 1  ;;  %v312_v50 = vld [vmem:[%s4378_s29 + $0x178] sm:$0xff]  ;;  %v2146_v39 = vrot.slane %v1951_v35, 2  ;;  %v4204_v35 = vld [vmem:[%s4378_s29 + $0xb0] sm:$0xff] }
  0xc4   : > { %3936 = vmatprep.subr.mxu0 %v409_v0  ;;  %2578 = vmatprep.subr.mxu1 %v4250_v3 }
  0xc5   : > { %1255 = vmatmul.mubr.f32.gmra.mxu0 %v877_v44  ;;  %2579 = vmatpush2.msra.mxu1 %v3606_v47  ;;  %v902_v10 = vsel %vm664_vm0, %v894_v52, %v901_v63  ;;  %v1950_v44 = vld [vmem:[%s4378_s29] sm:$0xfc]  ;;  %v1954_v47 = vld [vmem:[%s4378_s29 + $0x38] sm:$0x3] }
  0xc6   : > { %1665 = vmatmul.mubr.f32.gmra.mxu1 %v340_v48  ;;  %1259 = vmatprep.mubr.f32.mxu0 %v887_v49  ;;  %v5280_v48 = vld [vmem:[%s6196_s1 + $0x440] sm:$0xff]  ;;  %v330_v49 = vld [vmem:[%s4378_s29 + $0x250] sm:$0xff]  ;;  %v2143_v51 = vrot.slane %v1950_v44, 2  ;;  %v4198_v52 = vld [vmem:[%s4378_s29 + $0x18] sm:$0xff] }
  0xc7   : > { %1669 = vmatprep.mubr.f32.mxu1 %v4937_v43  ;;  %3937 = vmatpush3.msra.mxu0 %v409_v0  ;;  %v892_v43 = vsel %vm664_vm0, %v890_v60, %v891_v1  ;;  %v2147_v0 = vrot.slane %v4196_v19, 2  ;;  %v2144_v54 = vrot.slane %v4198_v52, 2  ;;  %v1953_v60 = vld [vmem:[%s4378_s29 + $0x30] sm:$0x3]  ;;  %v5292_v1 = vld [vmem:[%s4378_s29 + $0x220] sm:$0xff] }
  0xc8   : > { %3938 = vmatprep.subr.mxu0 %v408_v25  ;;  %2580 = vmatprep.subr.mxu1 %v4250_v3  ;;  %v1966_v19 = vld [vmem:[%s4378_s29 + $0xc8] sm:$0x3] }
  0xc9   : > { %1260 = vmatmul.mubr.f32.gmra.mxu0 %v885_v32  ;;  %2581 = vmatpush2.msra.mxu1 %v3605_v61  ;;  %v2154_v32 = vrot.slane %v1954_v47, 2  ;;  %v5299_v61 = vld [vmem:[%s6196_s1 + $0x438] sm:$0xff]  ;;  %v2145_v63 = vsel %vm2142_vm1, %v2143_v51, %v2144_v54  ;;  %v354_v47 = vld [vmem:[%s4378_s29 + $0x370] sm:$0xff]  ;;  %v4206_v51 = vld [vmem:[%s4378_s29 + $0xa8] sm:$0xff] }
  0xca   : > { %1670 = vmatmul.mubr.f32.gmra.mxu1 %v4956_v55  ;;  %1264 = vmatprep.mubr.f32.mxu0 %v895_v62  ;;  %v3603_v55 = vld [vmem:[%s6196_s1 + $0x398] sm:$0xff]  ;;  %v2174_v52 = vrot.slane %v4206_v51, 2 }
  0xcb   : > { %1674 = vmatprep.mubr.f32.mxu1 %v347_v4  ;;  %3939 = vmatpush3.msra.mxu0 %v408_v25  ;;  %v2148_v25 = vsel %vm2142_vm1, %v2146_v39, %v2147_v0  ;;  %v2152_v4 = vrot.slane %v1953_v60, 2  ;;  %v5352_v39 = vld [vmem:[%s4378_s29 + $0x2f8] sm:$0xff]  ;;  %v5373_v60 = vld [vmem:[%s4378_s29 + $0x340] sm:$0xff] }
  0xcc   : > { %2582 = vmatprep.subr.mxu1 %v4250_v3  ;;  %3988 = vmatprep.subr.mxu0 %v5148_v7 }
  0xcd   : > { %1265 = vmatmul.mubr.f32.gmra.mxu0 %v892_v43  ;;  %2583 = vmatpush2.msra.mxu1 %v3604_v8  ;;  %v2155_v43 = vsel %vm2142_vm1, %v2147_v0, %v2154_v32  ;;  %v5359_v0 = vld [vmem:[%s6196_s1 + $0x428] sm:$0xff]  ;;  %v1965_v32 = vld [vmem:[%s4378_s29 + $0xc0] sm:$0x3] }
  0xce   : > { %1675 = vmatmul.mubr.f32.gmra.mxu1 %v346_v45  ;;  %1269 = vmatprep.mubr.f32.mxu0 %v902_v10  ;;  %v4200_v45 = vld [vmem:[%s4378_s29 + $0x68] sm:$0xff] }
  0xcf   : > { %1679 = vmatprep.mubr.f32.mxu1 %v4974_v11  ;;  %2584 = vmatprep.subr.mxu1 %v4250_v3  ;;  %v3601_v11 = vld [vmem:[%s6196_s1 + $0x388] sm:$0xff] }
  0xd0   : > { %2585 = vmatpush2.msra.mxu1 %v3603_v55  ;;  %v1956_v10 = vld [vmem:[%s4378_s29 + $0x48] sm:$0xfc] }
  0xd1   : > { %1270 = vmatmul.mubr.f32.gmra.mxu0 %v900_v12  ;;  %2586 = vmatprep.subr.mxu1 %v4250_v3  ;;  %v5314_v55 = vld [vmem:[%s4378_s29 + $0x268] sm:$0xff]  ;;  %v1960_v12 = vld [vmem:[%s4378_s29 + $0x80] sm:$0x3] }
  0xd2   : > { %1680 = vmatmul.mubr.f32.gmra.mxu1 %v4987_v16  ;;  %3940 = vmatprep.mubr.f32.mxu0 %v282_v58  ;;  %v3600_v16 = vld [vmem:[%s6196_s1 + $0x380] sm:$0xff]  ;;  %v2153_v58 = vsel %vm2142_vm1, %v2144_v54, %v2152_v4 }
  0xd3   : > { %1684 = vmatprep.mubr.f32.mxu1 %v353_v13  ;;  %2587 = vmatpush2.msra.mxu1 %v3602_v14  ;;  %v342_v13 = vld [vmem:[%s4378_s29 + $0x2e0] sm:$0xff] }
  0xd4   : > { %2588 = vmatprep.subr.mxu1 %v4250_v3 }
  0xd5   : > { %3941 = vmatmul.mubr.f32.vlgmr.msra.gmra.mxu0 %v5179_v56  ;;  %2589 = vmatpush2.msra.mxu1 %v3601_v11  ;;  %v2158_v11 = vrot.slane %v1956_v10, 2  ;;  %v4208_v10 = vld [vmem:[%s4378_s29 + $0xf8] sm:$0xff] }
  0xd6   : > { %1685 = vmatmul.mubr.f32.gmra.mxu1 %v352_v15  ;;  %3943 = vmatprep.mubr.f32.mxu0 %v288_v17  ;;  %v4202_v15 = vld [vmem:[%s4378_s29 + $0x60] sm:$0xff] }
  0xd7   : > { %1689 = vmatprep.mubr.f32.mxu1 %v5009_v31  ;;  %2590 = vmatprep.subr.mxu1 %v4250_v3  ;;  %v5204_v3 = vld [vmem:[%s6196_s1 + $0x468] sm:$0xff]  ;;  %v2159_v17 = vrot.slane %v4202_v15, 2  ;;  %v1972_v15 = vld [vmem:[%s4378_s29 + $0x110] sm:$0x3] }
  0xd8   : > { %2591 = vmatpush2.msra.mxu1 %v3600_v16  ;;  %3989 = vmatpush3.msra.mxu0 %v5148_v7  ;;  %v358_v31 = vld [vmem:[%s4378_s29 + $0x3a8] sm:$0xff] }
  0xd9   : > { %3944 = vmatmul.mubr.f32.gmra.mxu0 %v5196_v22  ;;  %4148 = vmatprep.subr.mxu1 %v5148_v7 }
  0xda   : > { %1690 = vmatmul.mubr.f32.gmra.mxu1 %v5025_v41  ;;  %3946 = vmatprep.mubr.f32.mxu0 %v294_v59  ;;  %v5218_v41 = vld [vmem:[%s6196_s1 + $0x460] sm:$0xff]  ;;  %v2169_v59 = vrot.slane %v1960_v12, 2  ;;  %v2192_v12 = vrot.slane %v4208_v10, 2  ;;  %v1978_v10 = vld [vmem:[%s4378_s29 + $0x158] sm:$0x3] }
  0xdb   : > { %1694 = vmatprep.mubr.f32.mxu1 %v359_v21  ;;  %3990 = vmatprep.subr.mxu0 %v5193_v40  ;;  %v1959_v21 = vld [vmem:[%s4378_s29 + $0x78] sm:$0x3] }
  0xdc   : > { %3991 = vmatpush3.msra.mxu0 %v5193_v40 }
  0xdd   : > { %3947 = vmatmul.mubr.f32.gmra.mxu0 %v5211_v24  ;;  %3992 = vmatprep.subr.mxu0 %v5204_v3 }
  0xde   : > { %1695 = vmatmul.mubr.f32.gmra.mxu1 %v358_v31  ;;  %3949 = vmatprep.mubr.f32.mxu0 %v300_v23  ;;  %v1963_v23 = vld [vmem:[%s4378_s29 + $0x98] sm:$0xfc] }
  0xdf   : > { %1699 = vmatprep.mubr.f32.mxu1 %v5044_v57  ;;  %3993 = vmatpush3.msra.mxu0 %v5204_v3  ;;  %v364_v57 = vld [vmem:[%s4378_s29 + $0x3f0] sm:$0xff] }
  0xe0   : > { %3994 = vmatprep.subr.mxu0 %v5218_v41 }
  0xe1   : > { %3950 = vmatmul.mubr.f32.gmra.mxu0 %v5226_v29 }
  0xe2   : > { %1700 = vmatmul.mubr.f32.gmra.mxu1 %v5059_v5  ;;  %3952 = vmatprep.mubr.f32.mxu0 %v306_v26  ;;  %v318_v5 = vld [vmem:[%s4378_s29 + $0x1c0] sm:$0xff]  ;;  %v5339_v26 = vld [vmem:[%s6196_s1 + $0x430] sm:$0xff] }
  0xe3   : > { %1704 = vmatprep.mubr.f32.mxu1 %v365_v46  ;;  %3995 = vmatpush3.msra.mxu0 %v5218_v41  ;;  %v2160_v46 = vsel %vm2142_vm1, %v2158_v11, %v2159_v17  ;;  %v5399_v11 = vld [vmem:[%s6196_s1 + $0x418] sm:$0xff] }
  0xe4   : > { %3996 = vmatprep.subr.mxu0 %v5232_v6 }
  0xe5   : > { %3953 = vmatmul.mubr.f32.gmra.mxu0 %v5240_v9 }
  0xe6   : > { %1705 = vmatmul.mubr.f32.gmra.mxu1 %v364_v57  ;;  %3955 = vmatprep.mubr.f32.mxu0 %v312_v50  ;;  %v348_v57 = vld [vmem:[%s4378_s29 + $0x328] sm:$0xff]  ;;  %v2167_v50 = vrot.slane %v1959_v21, 2  ;;  %v4210_v21 = vld [vmem:[%s4378_s29 + $0xf0] sm:$0xff] }
  0xe7   : > { %1709 = vmatprep.mubr.f32.mxu1 %v5077_v20  ;;  %3997 = vmatpush3.msra.mxu0 %v5232_v6  ;;  %v370_v20 = vld [vmem:[%s4378_s29 + $0x438] sm:$0xff] }
  0xe8   : > { %3998 = vmatprep.subr.mxu0 %v5246_v33 }
  0xe9   : > { %3956 = vmatmul.mubr.f32.gmra.mxu0 %v5254_v34 }
  0xea   : > { %1710 = vmatmul.mubr.f32.gmra.mxu1 %v5093_v28  ;;  %3958 = vmatprep.mubr.f32.mxu0 %v318_v5 }
  0xeb   : > { %1714 = vmatprep.mubr.f32.mxu1 %v371_v27  ;;  %3999 = vmatpush3.msra.mxu0 %v5246_v33  ;;  %v2176_v27 = vrot.slane %v1963_v23, 2  ;;  %v2189_v23 = vrot.slane %v4210_v21, 2 }
  0xec   : > { %4000 = vmatprep.subr.mxu0 %v5261_v37 }
  0xed   : > { %3959 = vmatmul.mubr.f32.gmra.mxu0 %v5271_v18  ;;  %v5274_v28 = vpop.f32.mrf.mxu1 }
  0xee   : > { %1715 = vmatmul.mubr.f32.gmra.mxu1 %v370_v20  ;;  %3961 = vmatprep.mubr.f32.mxu0 %v324_v38  ;;  %v2177_v20 = vrot.slane %v4204_v35, 2  ;;  %v1962_v38 = vld [vmem:[%s4378_s29 + $0x90] sm:$0xfc] }
  0xef   : > { %1719 = vmatprep.mubr.f32.mxu1 %v5111_v36  ;;  %v5285_v30 = vpop.f32.mrf.mxu1  ;;  %4001 = vmatpush3.msra.mxu0 %v5261_v37  ;;  %v1957_v36 = vld [vmem:[%s4378_s29 + $0x50] sm:$0xfc] }
  0xf0   : > { %4002 = vmatprep.subr.mxu0 %v5280_v48  ;;  %v2161_v8 = vrot.slane %v1957_v36, 2  ;;  %v2178_v54 = vsel %vm2142_vm1, %v2176_v27, %v2177_v20  ;;  %v4211_v27 = vld [vmem:[%s4378_s29 + $0x3d0] sm:$0xff] }
  0xf1   : > { %3962 = vmatmul.mubr.f32.gmra.mxu0 %v5292_v1  ;;  %v5419_v35 = vld [vmem:[%s6196_s1 + $0x410] sm:$0xff] }
  0xf2   : > { %1720 = vmatmul.mubr.f32.gmra.mxu1 %v5127_v53  ;;  %3964 = vmatprep.mubr.f32.mxu0 %v330_v49  ;;  %v5302_v62 = vpop.f32.mrf.mxu1  ;;  %v2162_v53 = vrot.slane %v4200_v45, 2  ;;  %v2173_v49 = vrot.slane %v1962_v38, 2 }
  0xf3   : > { %2592 = vmatprep.mubr.f32.mxu1 %v2148_v25  ;;  %4003 = vmatpush3.msra.mxu0 %v5280_v48  ;;  %v2184_v25 = vrot.slane %v1966_v19, 2  ;;  %v1952_v19 = vld [vmem:[%s4378_s29 + $0x10] sm:$0xfc] }
  0xf4   : > { %v5308_v42 = vpop.f32.mrf.mxu1  ;;  %4004 = vmatprep.subr.mxu0 %v5299_v61  ;;  %v2163_v16 = vsel %vm2142_vm1, %v2161_v8, %v2162_v53  ;;  %v2182_v8 = vrot.slane %v1965_v32, 2  ;;  %v1974_v32 = vld [vmem:[%s4378_s29 + $0x120] sm:$0xfc] }
  0xf5   : > { %3965 = vmatmul.mubr.f32.gmra.mxu0 %v5314_v55  ;;  %v2185_v45 = vsel %vm2142_vm1, %v2177_v20, %v2184_v25  ;;  %v1975_v20 = vld [vmem:[%s4378_s29 + $0x128] sm:$0xfc] }
  0xf6   : > { %2593 = vmatmul.mubr.f32.vlgmr.msra.gmra.mxu1 %v2145_v63  ;;  %3967 = vmatprep.mubr.f32.mxu0 %v336_v2  ;;  %v5381_v63 = vld [vmem:[%s6196_s1 + $0x420] sm:$0xff] }
  0xf7   : > { %4164 = vmatpush3.msra.mxu1 %v5148_v7  ;;  %2597 = vmatprep.mubr.f32.mxu1 %v2155_v43  ;;  %v5321_v14 = vpop.f32.mrf.mxu1  ;;  %v5329_v7 = vld [vmem:[%s4378_s29 + $0x2b0] sm:$0xff]  ;;  %v1969_v2 = vld [vmem:[%s4378_s29 + $0xe0] sm:$0xfc]  ;;  %v360_v43 = vld [vmem:[%s4378_s29 + $0x3b8] sm:$0xff] }
  0xf8   : > { %4149 = vmatprep.subr.mxu1 %v5193_v40  ;;  %4005 = vmatpush3.msra.mxu0 %v5299_v61 }
  0xf9   : > { %3968 = vmatmul.mubr.f32.gmra.mxu0 %v5329_v7  ;;  %4165 = vmatpush3.msra.mxu1 %v5193_v40  ;;  %v5333_v31 = vpop.f32.mrf.mxu1  ;;  %v2170_v40 = vsel %vm2142_vm1, %v2162_v53, %v2169_v59  ;;  %v2191_v53 = vrot.slane %v1969_v2, 2  ;;  %v1958_v2 = vld [vmem:[%s4378_s29 + $0x58] sm:$0xfc] }
  0xfa   : > { %2598 = vmatmul.mubr.f32.gmra.mxu1 %v2153_v58  ;;  %3970 = vmatprep.mubr.f32.mxu0 %v342_v13  ;;  %v1968_v58 = vld [vmem:[%s4378_s29 + $0xd8] sm:$0xfc]  ;;  %v4209_v13 = vld [vmem:[%s4378_s29 + $0x388] sm:$0xff] }
  0xfb   : > { %2602 = vmatprep.mubr.f32.mxu1 %v2163_v16  ;;  %4150 = vmatprep.subr.mxu1 %v5204_v3  ;;  %v366_v16 = vld [vmem:[%s4378_s29 + $0x400] sm:$0xff]  ;;  %v2188_v59 = vrot.slane %v1968_v58, 2  ;;  %v1977_v58 = vld [vmem:[%s4378_s29 + $0x150] sm:$0x3] }
  0xfc   : > { %v5345_v5 = vpop.f32.mrf.mxu1  ;;  %4166 = vmatpush3.msra.mxu1 %v5204_v3  ;;  %4006 = vmatprep.subr.mxu0 %v5339_v26  ;;  %v2168_v3 = vsel %vm2142_vm1, %v2159_v17, %v2167_v50  ;;  %v2193_v50 = vsel %vm2142_vm1, %v2191_v53, %v2192_v12  ;;  %v2150_v53 = vrot.slane %v5179_v56, 2  ;;  %v2165_v56 = vrot.slane %v5196_v22, 2 }
  0xfd   : > { %3971 = vmatmul.mubr.f32.gmra.mxu0 %v5352_v39  ;;  %4151 = vmatprep.subr.mxu1 %v5218_v41 }
  0xfe   : > { %2603 = vmatmul.mubr.f32.gmra.mxu1 %v2160_v46  ;;  %3973 = vmatprep.mubr.f32.mxu0 %v348_v57  ;;  %v5362_v44 = vpop.f32.mrf.mxu1  ;;  %v1971_v46 = vld [vmem:[%s4378_s29 + $0x108] sm:$0x3] }
  0xff   : > { %2607 = vmatprep.mubr.f32.mxu1 %v2170_v40  ;;  %4007 = vmatpush3.msra.mxu0 %v5339_v26  ;;  %v2199_v40 = vrot.slane %v1972_v15, 2  ;;  %v2197_v38 = vrot.slane %v1971_v46, 2  ;;  %v4214_v15 = vld [vmem:[%s4378_s29 + $0x138] sm:$0xff] }
 0x100   : > { %4008 = vmatprep.subr.mxu0 %v5359_v0  ;;  %4167 = vmatpush3.msra.mxu1 %v5218_v41  ;;  %v2175_v41 = vsel %vm2142_vm1, %v2173_v49, %v2174_v52  ;;  %v1955_v49 = vld [vmem:[%s4378_s29 + $0x40] sm:$0x3] }
 0x101   : > { %3974 = vmatmul.mubr.f32.gmra.mxu0 %v5373_v60  ;;  %v5376_v36 = vpop.f32.mrf.mxu1  ;;  %4152 = vmatprep.subr.mxu1 %v5232_v6  ;;  %v2200_v51 = vsel %vm2142_vm1, %v2192_v12, %v2199_v40  ;;  %v2156_v12 = vrot.slane %v1955_v49, 2  ;;  %v1964_v40 = vld [vmem:[%s4378_s29 + $0xa0] sm:$0xfc] }
 0x102   : > { %2608 = vmatmul.mubr.f32.gmra.mxu1 %v2168_v3  ;;  %3976 = vmatprep.mubr.f32.mxu0 %v354_v47  ;;  %v2190_v3 = vsel %vm2142_vm1, %v2188_v59, %v2189_v23  ;;  %v372_v47 = vld [vmem:[%s4378_s29 + $0x448] sm:$0xff] }
 0x103   : > { %2612 = vmatprep.mubr.f32.mxu1 %v2178_v54  ;;  %v5386_v4 = vpop.f32.mrf.mxu1  ;;  %4009 = vmatpush3.msra.mxu0 %v5359_v0  ;;  %v4212_v54 = vld [vmem:[%s4378_s29 + $0x140] sm:$0xff]  ;;  %v1961_v59 = vld [vmem:[%s4378_s29 + $0x88] sm:$0x3] }
 0x104   : > { %4010 = vmatprep.subr.mxu0 %v5381_v63  ;;  %4168 = vmatpush3.msra.mxu1 %v5232_v6  ;;  %v2183_v6 = vsel %vm2142_vm1, %v2174_v52, %v2182_v8  ;;  %v2206_v52 = vrot.slane %v1975_v20, 2  ;;  %v2207_v25 = vrot.slane %v4212_v54, 2  ;;  %v5442_v8 = vld [vmem:[%s6196_s1 + $0x408] sm:$0xff]  ;;  %v2212_v20 = vrot.slane %v1977_v58, 2 }
 0x105   : > { %3977 = vmatmul.mubr.f32.gmra.mxu0 %v4209_v13  ;;  %4153 = vmatprep.subr.mxu1 %v5246_v33  ;;  %v2203_v13 = vrot.slane %v1974_v32, 2  ;;  %v1980_v54 = vld [vmem:[%s4378_s29 + $0x168] sm:$0xfc]  ;;  %v1967_v32 = vld [vmem:[%s4378_s29 + $0xd0] sm:$0x3] }
 0x106   : > { %2613 = vmatmul.mubr.f32.gmra.mxu1 %v2175_v41  ;;  %3979 = vmatprep.mubr.f32.mxu0 %v360_v43  ;;  %v5403_v17 = vpop.f32.mrf.mxu1  ;;  %v4213_v41 = vld [vmem:[%s4378_s29 + $0x418] sm:$0xff]  ;;  %v2208_v46 = vsel %vm2142_vm1, %v2206_v52, %v2207_v25  ;;  %v2180_v52 = vrot.slane %v5211_v24, 2  ;;  %v1984_v24 = vld [vmem:[%s4378_s29 + $0x1a0] sm:$0x3] }
 0x107   : > { %2617 = vmatprep.mubr.f32.mxu1 %v2185_v45  ;;  %4011 = vmatpush3.msra.mxu0 %v5381_v63  ;;  %v2149_v45 = vrot.slane %v1952_v19, 2 }
 0x108   : > { %v5410_v57 = vpop.f32.mrf.mxu1  ;;  %4012 = vmatprep.subr.mxu0 %v5399_v11  ;;  %4169 = vmatpush3.msra.mxu1 %v5246_v33 }
 0x109   : > { %3980 = vmatmul.mubr.f32.gmra.mxu0 %v4211_v27  ;;  %4154 = vmatprep.subr.mxu1 %v5261_v37  ;;  %v4215_v27 = vld [vmem:[%s4378_s29 + $0x460] sm:$0xff]  ;;  %v2151_v22 = vsel %vm2142_vm1, %v2149_v45, %v2150_v53  ;;  %v4216_v45 = vld [vmem:[%s4378_s29 + $0x188] sm:$0xff] }
 0x10a   : > { %2618 = vmatmul.mubr.f32.gmra.mxu1 %v2183_v6  ;;  %3982 = vmatprep.mubr.f32.mxu0 %v366_v16  ;;  %v2204_v6 = vrot.slane %v4214_v15, 2  ;;  %v2164_v16 = vrot.slane %v1958_v2, 2  ;;  %v2218_v15 = vrot.slane %v1980_v54, 2 }
 0x10b   : > { %2622 = vmatprep.mubr.f32.mxu1 %v2193_v50  ;;  %v5424_v33 = vpop.f32.mrf.mxu1  ;;  %4013 = vmatpush3.msra.mxu0 %v5399_v11  ;;  %v2214_v50 = vrot.slane %v1978_v10, 2  ;;  %v1970_v10 = vld [vmem:[%s4378_s29 + $0xe8] sm:$0xfc] }
 0x10c   : > { %4014 = vmatprep.subr.mxu0 %v5419_v35  ;;  %4170 = vmatpush3.msra.mxu1 %v5261_v37  ;;  %v2198_v37 = vsel %vm2142_vm1, %v2189_v23, %v2197_v38  ;;  %v5459_v23 = vld [vmem:[%s6196_s1 + $0x400] sm:$0xff]  ;;  %v1981_v38 = vld [vmem:[%s4378_s29 + $0x170] sm:$0xfc]  ;;  %v2166_v49 = vsel %vm2142_vm1, %v2164_v16, %v2165_v56  ;;  %v2213_v58 = vsel %vm2142_vm1, %v2204_v6, %v2212_v20  ;;  %v2186_v16 = vrot.slane %v1967_v32, 2 }
 0x10d   : > { %3983 = vmatmul.mubr.f32.gmra.mxu0 %v4213_v41  ;;  %v5437_v43 = vpop.f32.mrf.mxu1  ;;  %4155 = vmatprep.subr.mxu1 %v5280_v48  ;;  %v2215_v2 = vsel %vm2142_vm1, %v2207_v25, %v2214_v50  ;;  %v2221_v41 = vrot.slane %v1981_v38, 2  ;;  %v2229_v20 = vrot.slane %v1984_v24, 2  ;;  %v1976_v38 = vld [vmem:[%s4378_s29 + $0x130] sm:$0xfc] }
 0x10e   : > { %2623 = vmatmul.mubr.f32.gmra.mxu1 %v2190_v3  ;;  %3985 = vmatprep.mubr.f32.mxu0 %v372_v47  ;;  %v2157_v3 = vsel %vm2142_vm1, %v2150_v53, %v2156_v12  ;;  %v2205_v47 = vsel %vm2142_vm1, %v2203_v13, %v2204_v6  ;;  %v2222_v53 = vrot.slane %v4216_v45, 2  ;;  %v1986_v45 = vld [vmem:[%s4378_s29 + $0x1b0] sm:$0xfc] }
 0x10f   : > { %2627 = vmatprep.mubr.f32.mxu1 %v2200_v51  ;;  %4015 = vmatpush3.msra.mxu0 %v5419_v35  ;;  %v2179_v51 = vrot.slane %v1964_v40, 2  ;;  %v4218_v24 = vld [vmem:[%s4378_s29 + $0x1d0] sm:$0xff] }
 0x110   : > { %v5453_v21 = vpop.f32.mrf.mxu1  ;;  %4016 = vmatprep.subr.mxu0 %v5442_v8  ;;  %4171 = vmatpush3.msra.mxu1 %v5280_v48  ;;  %v2171_v48 = vrot.slane %v1961_v59, 2  ;;  %v1983_v59 = vld [vmem:[%s4378_s29 + $0x198] sm:$0x3] }
 0x111   : > { %3986 = vmatmul.mubr.f32.gmra.mxu0 %v4215_v27  ;;  %4156 = vmatprep.subr.mxu1 %v5299_v61  ;;  %v2181_v6 = vsel %vm2142_vm1, %v2179_v51, %v2180_v52  ;;  %v2194_v27 = vrot.slane %v1970_v10, 2  ;;  %v2187_v51 = vsel %vm2142_vm1, %v2180_v52, %v2186_v16  ;;  %v1979_v10 = vld [vmem:[%s4378_s29 + $0x160] sm:$0x3]  ;;  %v2230_v52 = vsel %vm2142_vm1, %v2222_v53, %v2229_v20  ;;  %v1982_v16 = vld [vmem:[%s4378_s29 + $0x178] sm:$0xfc] }
 0x112   : > { %2628 = vmatmul.mubr.f32.gmra.mxu1 %v2198_v37  ;;  %4017 = vmatpush3.msra.mxu0 %v5442_v8  ;;  %v5469_v19 = vpop.f32.mrf.mxu1  ;;  %v2172_v25 = vsel %vm2142_vm1, %v2165_v56, %v2171_v48  ;;  %v2223_v56 = vsel %vm2142_vm1, %v2221_v41, %v2222_v53  ;;  %v2227_v48 = vrot.slane %v1983_v59, 2  ;;  %v2209_v41 = vrot.slane %v1976_v38, 2  ;;  %v1990_v59 = vld [vmem:[%s4378_s29 + $0x1e8] sm:$0x3] }
 0x113   : > { %4018 = vmatprep.subr.mxu0 %v5459_v23  ;;  %2632 = vmatprep.mubr.f32.mxu1 %v2208_v46  ;;  %v2224_v20 = vrot.slane %v1982_v16, 2  ;;  %v1985_v38 = vld [vmem:[%s4378_s29 + $0x1a8] sm:$0x3] }
 0x114   : > { %4019 = vmatpush3.msra.mxu0 %v5459_v23  ;;  %4020 = vmatprep.mubr.f32.mxu0 %v2151_v22  ;;  %v1973_v22 = vld [vmem:[%s4378_s29 + $0x118] sm:$0x3] }
 0x115   : > { %v1116_v37 = vpop.f32.mrf.mxu0  ;;  %v5482_v12 = vpop.f32.mrf.mxu1  ;;  %4021 = vmatmul.mubr.f32.vlgmr.msra.gmra.mxu0 %v2157_v3  ;;  %4172 = vmatpush3.msra.mxu1 %v5299_v61  ;;  %v4217_v61 = vld [vmem:[%s4378_s29 + $0x180] sm:$0xff] }
 0x116   : > { %v5488_v13 = vadd.f32 %v5285_v30, %v1116_v37  ;;  %2633 = vmatmul.mubr.f32.gmra.mxu1 %v2205_v47  ;;  %4023 = vmatprep.mubr.f32.mxu0 %v2166_v49  ;;  %v2219_v40 = vrot.slane %v4217_v61, 2  ;;  %v2195_v30 = vrot.slane %v5226_v29, 2  ;;  %v1987_v47 = vld [vmem:[%s4378_s29 + $0x1b8] sm:$0xfc]  ;;  %v2216_v61 = vrot.slane %v1979_v10, 2 }
 0x117   : > { %v1118_v46 = vpop.f32.mrf.mxu0  ;;  %v5492_v50 = vpop.f32.mrf.mxu1  ;;  %2637 = vmatprep.mubr.f32.mxu1 %v2215_v2  ;;  %4157 = vmatprep.subr.mxu1 %v5339_v26 }
 0x118   : > { %4173 = vmatpush3.msra.mxu1 %v5339_v26  ;;  %v2201_v26 = vrot.slane %v1973_v22, 2  ;;  %v2220_v32 = vsel %vm2142_vm1, %v2218_v15, %v2219_v40  ;;  %v2196_v2 = vsel %vm2142_vm1, %v2194_v27, %v2195_v30  ;;  %v1989_v27 = vld [vmem:[%s4378_s29 + $0x1e0] sm:$0x3] }
 0x119   : > { %v1121_v3 = vpop.f32.mrf.mxu0  ;;  %4024 = vmatmul.mubr.f32.gmra.mxu0 %v2172_v25  ;;  %4158 = vmatprep.subr.mxu1 %v5359_v0  ;;  %v2237_v25 = vrot.slane %v4218_v24, 2  ;;  %v1991_v24 = vld [vmem:[%s4378_s29 + $0x1f0] sm:$0x3] }
 0x11a   : > { %v5505_v49 = vadd.f32 %v5274_v28, %v1121_v3  ;;  %v5507_v29 = vpop.f32.mrf.mxu1  ;;  %2638 = vmatmul.mubr.f32.gmra.mxu1 %v2213_v58  ;;  %4026 = vmatprep.mubr.f32.mxu0 %v2181_v6  ;;  %v2210_v28 = vrot.slane %v5240_v9, 2  ;;  %v2236_v58 = vrot.slane %v1987_v47, 2  ;;  %v2228_v9 = vsel %vm2142_vm1, %v2219_v40, %v2227_v48  ;;  %v1988_v47 = vld [vmem:[%s4378_s29 + $0x1c0] sm:$0xfc] }
 0x11b   : > { %v1123_v54 = vpop.f32.mrf.mxu0  ;;  %2642 = vmatprep.mubr.f32.mxu1 %v2223_v56  ;;  %4174 = vmatpush3.msra.mxu1 %v5359_v0  ;;  %v2202_v46 = vsel %vm2142_vm1, %v2195_v30, %v2201_v26  ;;  %v2233_v6 = vrot.slane %v1986_v45, 2  ;;  %v2244_v48 = vrot.slane %v1990_v59, 2  ;;  %v2242_v26 = vrot.slane %v1989_v27, 2 }
 0x11c   : > { %v5516_v37 = vpop.f32.mrf.mxu1  ;;  %4159 = vmatprep.subr.mxu1 %v5381_v63  ;;  %v2211_v40 = vsel %vm2142_vm1, %v2209_v41, %v2210_v28  ;;  %v2238_v30 = vsel %vm2142_vm1, %v2236_v58, %v2237_v25  ;;  %v1993_v54 = vld [vmem:[%s4378_s29 + $0x200] sm:$0xfc]  ;;  %v1992_v58 = vld [vmem:[%s4378_s29 + $0x1f8] sm:$0xfc] }
 0x11d   : > { %v1126_v15 = vpop.f32.mrf.mxu0  ;;  %4027 = vmatmul.mubr.f32.gmra.mxu0 %v2187_v51  ;;  %4175 = vmatpush3.msra.mxu1 %v5381_v63  ;;  %v4219_v63 = vld [vmem:[%s4378_s29 + $0x1c8] sm:$0xff] }
 0x11e   : > { %v5526_v0 = vadd.f32 %v5308_v42, %v1126_v15  ;;  %v5528_v53 = vpop.f32.mrf.mxu1  ;;  %2643 = vmatmul.mubr.f32.gmra.mxu1 %v2220_v32  ;;  %4029 = vmatprep.mubr.f32.mxu0 %v2196_v2  ;;  %v2234_v56 = vrot.slane %v4219_v63, 2  ;;  %v2225_v42 = vrot.slane %v5254_v34, 2  ;;  %v2217_v2 = vsel %vm2142_vm1, %v2210_v28, %v2216_v61  ;;  %v1996_v61 = vld [vmem:[%s4378_s29 + $0x230] sm:$0x3]  ;;  %v1995_v63 = vld [vmem:[%s4378_s29 + $0x228] sm:$0x3] }
 0x11f   : > { %v1128_v22 = vpop.f32.mrf.mxu0  ;;  %2647 = vmatprep.mubr.f32.mxu1 %v2230_v52  ;;  %4160 = vmatprep.subr.mxu1 %v5399_v11  ;;  %v2239_v52 = vrot.slane %v1988_v47, 2  ;;  %v2245_v28 = vsel %vm2142_vm1, %v2237_v25, %v2244_v48  ;;  %v2251_v15 = vrot.slane %v1993_v54, 2  ;;  %v1997_v48 = vld [vmem:[%s4378_s29 + $0x238] sm:$0x3] }
 0x120   : > { %v5537_v3 = vpop.f32.mrf.mxu1  ;;  %4176 = vmatpush3.msra.mxu1 %v5399_v11  ;;  %v2231_v11 = vrot.slane %v1985_v38, 2  ;;  %v2235_v45 = vsel %vm2142_vm1, %v2233_v6, %v2234_v56  ;;  %v2226_v10 = vsel %vm2142_vm1, %v2224_v20, %v2225_v42  ;;  %v2248_v22 = vrot.slane %v1992_v58, 2 }
 0x121   : > { %v1131_v51 = vpop.f32.mrf.mxu0  ;;  %4030 = vmatmul.mubr.f32.gmra.mxu0 %v2202_v46  ;;  %4161 = vmatprep.subr.mxu1 %v5419_v35  ;;  %v1994_v46 = vld [vmem:[%s4378_s29 + $0x208] sm:$0xfc] }
 0x122   : > { %v5545_v34 = vadd.f32 %v5302_v62, %v1131_v51  ;;  %v5547_v32 = vpop.f32.mrf.mxu1  ;;  %2648 = vmatmul.mubr.f32.gmra.mxu1 %v2228_v9  ;;  %4032 = vmatprep.mubr.f32.mxu0 %v2211_v40  ;;  %v2240_v62 = vrot.slane %v5271_v18, 2  ;;  %v4220_v9 = vld [vmem:[%s4378_s29 + $0x218] sm:$0xff]  ;;  %v2243_v18 = vsel %vm2142_vm1, %v2234_v56, %v2242_v26  ;;  %v2232_v27 = vsel %vm2142_vm1, %v2225_v42, %v2231_v11  ;;  %v2000_v26 = vld [vmem:[%s4378_s29 + $0x250] sm:$0xfc]  ;;  %v1999_v11 = vld [vmem:[%s4378_s29 + $0x248] sm:$0xfc] }
 0x123   : > { %v1133_v41 = vpop.f32.mrf.mxu0  ;;  %2652 = vmatprep.mubr.f32.mxu1 %v2238_v30  ;;  %4177 = vmatpush3.msra.mxu1 %v5419_v35  ;;  %v2252_v59 = vrot.slane %v4220_v9, 2  ;;  %v2246_v40 = vrot.slane %v1991_v24, 2  ;;  %v2254_v30 = vrot.slane %v1994_v46, 2  ;;  %v2259_v51 = vrot.slane %v1996_v61, 2  ;;  %v2006_v61 = vld [vmem:[%s4378_s29 + $0x298] sm:$0xfc] }
 0x124   : > { %v5556_v16 = vpop.f32.mrf.mxu1  ;;  %4162 = vmatprep.subr.mxu1 %v5442_v8  ;;  %v2241_v56 = vsel %vm2142_vm1, %v2239_v52, %v2240_v62  ;;  %v2269_v24 = vrot.slane %v2000_v26, 2  ;;  %v2285_v26 = vrot.slane %v5329_v7, 2 }
 0x125   : > { %v1136_v6 = vpop.f32.mrf.mxu0  ;;  %4033 = vmatmul.mubr.f32.gmra.mxu0 %v2217_v2  ;;  %4178 = vmatpush3.msra.mxu1 %v5442_v8  ;;  %v4221_v8 = vld [vmem:[%s4378_s29 + $0x210] sm:$0xff]  ;;  %v2253_v42 = vsel %vm2142_vm1, %v2251_v15, %v2252_v59  ;;  %v2257_v2 = vrot.slane %v1995_v63, 2  ;;  %v2003_v15 = vld [vmem:[%s4378_s29 + $0x280] sm:$0x3]  ;;  %v2260_v46 = vsel %vm2142_vm1, %v2252_v59, %v2259_v51 }
 0x126   : > { %v5566_v35 = vadd.f32 %v5333_v31, %v1136_v6  ;;  %v5568_v25 = vpop.f32.mrf.mxu1  ;;  %2653 = vmatmul.mubr.f32.gmra.mxu1 %v2235_v45  ;;  %4035 = vmatprep.mubr.f32.mxu0 %v2226_v10  ;;  %v2249_v38 = vrot.slane %v4221_v8, 2  ;;  %v2255_v31 = vrot.slane %v5292_v1, 2  ;;  %v2247_v45 = vsel %vm2142_vm1, %v2240_v62, %v2246_v40  ;;  %v4222_v62 = vld [vmem:[%s4378_s29 + $0x260] sm:$0xff]  ;;  %v2002_v40 = vld [vmem:[%s4378_s29 + $0x278] sm:$0x3] }
 0x127   : > { %v1138_v20 = vpop.f32.mrf.mxu0  ;;  %2657 = vmatprep.mubr.f32.mxu1 %v2245_v28  ;;  %4163 = vmatprep.subr.mxu1 %v5459_v23  ;;  %v2261_v10 = vrot.slane %v1997_v48, 2  ;;  %v1998_v28 = vld [vmem:[%s4378_s29 + $0x240] sm:$0xfc]  ;;  %v2266_v6 = vrot.slane %v1999_v11, 2  ;;  %v2001_v8 = vld [vmem:[%s4378_s29 + $0x270] sm:$0x3] }
 0x128   : > { %v5577_v47 = vpop.f32.mrf.mxu1  ;;  %4179 = vmatpush3.msra.mxu1 %v5459_v23  ;;  %v2250_v23 = vsel %vm2142_vm1, %v2248_v22, %v2249_v38  ;;  %v2256_v58 = vsel %vm2142_vm1, %v2254_v30, %v2255_v31  ;;  %v2258_v22 = vsel %vm2142_vm1, %v2249_v38, %v2257_v2  ;;  %v2263_v20 = vrot.slane %v1998_v28, 2  ;;  %v2009_v30 = vld [vmem:[%s4378_s29 + $0x2c8] sm:$0x3] }
 0x129   : > { %v1141_v54 = vpop.f32.mrf.mxu0  ;;  %4036 = vmatmul.mubr.f32.gmra.mxu0 %v2232_v27  ;;  %v2262_v59 = vsel %vm2142_vm1, %v2255_v31, %v2261_v10  ;;  %v2274_v11 = vrot.slane %v2002_v40, 2  ;;  %v2012_v31 = vld [vmem:[%s4378_s29 + $0x2e0] sm:$0xfc]  ;;  %v2272_v10 = vrot.slane %v2001_v8, 2 }
 0x12a   : > { %v5584_v41 = vadd.f32 %v5321_v14, %v1141_v54  ;;  %v5586_v1 = vpop.f32.mrf.mxu1  ;;  %2658 = vmatmul.mubr.f32.gmra.mxu1 %v2243_v18  ;;  %4038 = vmatprep.mubr.f32.mxu0 %v2241_v56  ;;  %v2270_v14 = vrot.slane %v5314_v55, 2  ;;  %v2267_v18 = vrot.slane %v4222_v62, 2  ;;  %v2276_v56 = vrot.slane %v2003_v15, 2 }
 0x12b   : > { %v1143_v52 = vpop.f32.mrf.mxu0  ;;  %2662 = vmatprep.mubr.f32.mxu1 %v2253_v42  ;;  %v4223_v42 = vld [vmem:[%s4378_s29 + $0x258] sm:$0xff]  ;;  %v2299_v62 = vrot.slane %v2012_v31, 2 }
 0x12c   : > { %v5594_v9 = vpop.f32.mrf.mxu1  ;;  %v2271_v38 = vsel %vm2142_vm1, %v2269_v24, %v2270_v14  ;;  %v2264_v51 = vrot.slane %v4223_v42, 2  ;;  %v2268_v2 = vsel %vm2142_vm1, %v2266_v6, %v2267_v18  ;;  %v2291_v52 = vrot.slane %v2009_v30, 2  ;;  %v2004_v6 = vld [vmem:[%s4378_s29 + $0x288] sm:$0xfc]  ;;  %v4225_v42 = vld [vmem:[%s4378_s29 + $0x2a0] sm:$0xff] }
 0x12d   : > { %v1146_v27 = vpop.f32.mrf.mxu0  ;;  %4039 = vmatmul.mubr.f32.gmra.mxu0 %v2247_v45  ;;  %v2277_v7 = vsel %vm2142_vm1, %v2270_v14, %v2276_v56  ;;  %v2018_v56 = vld [vmem:[%s4378_s29 + $0x328] sm:$0xfc] }
 0x12e   : > { %v5602_v55 = vadd.f32 %v5362_v44, %v1146_v27  ;;  %v5604_v63 = vpop.f32.mrf.mxu1  ;;  %2663 = vmatmul.mubr.f32.gmra.mxu1 %v2250_v23  ;;  %4041 = vmatprep.mubr.f32.mxu0 %v2256_v58  ;;  %v2284_v44 = vrot.slane %v2006_v61, 2  ;;  %v2005_v23 = vld [vmem:[%s4378_s29 + $0x290] sm:$0xfc]  ;;  %v2265_v15 = vsel %vm2142_vm1, %v2263_v20, %v2264_v51  ;;  %v2015_v61 = vld [vmem:[%s4378_s29 + $0x310] sm:$0x3]  ;;  %v2273_v20 = vsel %vm2142_vm1, %v2264_v51, %v2272_v10 }
 0x12f   : > { %v1148_v48 = vpop.f32.mrf.mxu0  ;;  %2667 = vmatprep.mubr.f32.mxu1 %v2260_v46  ;;  %v2281_v40 = vrot.slane %v2005_v23, 2  ;;  %v2292_v30 = vsel %vm2142_vm1, %v2285_v26, %v2291_v52  ;;  %v2314_v31 = vrot.slane %v2018_v56, 2 }
 0x130   : > { %v5612_v54 = vpop.f32.mrf.mxu1  ;;  %v2286_v46 = vsel %vm2142_vm1, %v2284_v44, %v2285_v26  ;;  %v2008_v48 = vld [vmem:[%s4378_s29 + $0x2c0] sm:$0x3]  ;;  %v2279_v44 = vrot.slane %v4225_v42, 2 }
 0x131   : > { %v1151_v45 = vpop.f32.mrf.mxu0  ;;  %4042 = vmatmul.mubr.f32.gmra.mxu0 %v2262_v59  ;;  %v4224_v59 = vld [vmem:[%s4378_s29 + $0x2a8] sm:$0xff]  ;;  %v2289_v23 = vrot.slane %v2008_v48, 2 }
 0x132   : > { %v5618_v58 = vadd.f32 %v5345_v5, %v1151_v45  ;;  %v5620_v24 = vpop.f32.mrf.mxu1  ;;  %2668 = vmatmul.mubr.f32.gmra.mxu1 %v2258_v22  ;;  %4044 = vmatprep.mubr.f32.mxu0 %v2271_v38  ;;  %v2300_v5 = vrot.slane %v5352_v39, 2  ;;  %v2275_v22 = vsel %vm2142_vm1, %v2267_v18, %v2274_v11  ;;  %v2282_v14 = vrot.slane %v4224_v59, 2  ;;  %v2021_v45 = vld [vmem:[%s4378_s29 + $0x358] sm:$0x3] }
 0x133   : > { %v1153_v28 = vpop.f32.mrf.mxu0  ;;  %2672 = vmatprep.mubr.f32.mxu1 %v2268_v2  ;;  %v2278_v18 = vrot.slane %v2004_v6, 2  ;;  %v2306_v2 = vrot.slane %v2015_v61, 2 }
 0x134   : > { %v5628_v27 = vpop.f32.mrf.mxu1  ;;  %v2301_v26 = vsel %vm2142_vm1, %v2299_v62, %v2300_v5  ;;  %v2283_v52 = vsel %vm2142_vm1, %v2281_v40, %v2282_v14  ;;  %v2290_v56 = vsel %vm2142_vm1, %v2282_v14, %v2289_v23  ;;  %v2013_v23 = vld [vmem:[%s4378_s29 + $0x300] sm:$0x3] }
 0x135   : > { %v1156_v8 = vpop.f32.mrf.mxu0  ;;  %4045 = vmatmul.mubr.f32.gmra.mxu0 %v2277_v7  ;;  %v2007_v7 = vld [vmem:[%s4378_s29 + $0x2b8] sm:$0x3]  ;;  %v2307_v6 = vsel %vm2142_vm1, %v2300_v5, %v2306_v2  ;;  %v2010_v5 = vld [vmem:[%s4378_s29 + $0x2d0] sm:$0xfc] }
 0x136   : > { %v5637_v39 = vadd.f32 %v5386_v4, %v1156_v8  ;;  %v1566_v38 = vpop.f32.mrf.mxu1  ;;  %2673 = vmatmul.mubr.f32.gmra.mxu1 %v2265_v15  ;;  %4047 = vmatprep.mubr.f32.mxu0 %v2286_v46  ;;  %v2315_v4 = vrot.slane %v5373_v60, 2  ;;  %v2011_v15 = vld [vmem:[%s4378_s29 + $0x2d8] sm:$0xfc]  ;;  %v2321_v60 = vrot.slane %v2021_v45, 2  ;;  %v2287_v40 = vrot.slane %v2007_v7, 2 }
 0x137   : > { %v5641_v11 = vadd.f32 %v1566_v38, %v5488_v13  ;;  %v1158_v51 = vpop.f32.mrf.mxu0  ;;  %2677 = vmatprep.mubr.f32.mxu1 %v2275_v22  ;;  %v2280_v22 = vsel %vm2142_vm1, %v2278_v18, %v2279_v44  ;;  %v2296_v8 = vrot.slane %v2011_v15, 2  ;;  %v2014_v38 = vld [vmem:[%s4378_s29 + $0x308] sm:$0x3] }
 0x138   : > { %v1568_v10 = vpop.f32.mrf.mxu1  ;;  %v2316_v59 = vsel %vm2142_vm1, %v2314_v31, %v2315_v4  ;;  %v2322_v18 = vsel %vm2142_vm1, %v2315_v4, %v2321_v60  ;;  %v2288_v51 = vsel %vm2142_vm1, %v2279_v44, %v2287_v40  ;;  %v4227_v31 = vld [vmem:[%s4378_s29 + $0x2e8] sm:$0xff]  ;;  %v2302_v60 = vrot.slane %v2013_v23, 2 }
 0x139   : > { %v1161_v28 = vpop.f32.mrf.mxu0  ;;  %4048 = vmatmul.mubr.f32.gmra.mxu0 %v2292_v30  ;;  %v2294_v45 = vrot.slane %v4227_v31, 2 }
 0x13a   : > { %v5650_v13 = vadd.f32 %v5376_v36, %v1161_v28  ;;  %v1571_v46 = vpop.f32.mrf.mxu1  ;;  %2678 = vmatmul.mubr.f32.gmra.mxu1 %v2273_v20  ;;  %4050 = vmatprep.mubr.f32.mxu0 %v2301_v26  ;;  %v4226_v20 = vld [vmem:[%s4378_s29 + $0x2f0] sm:$0xff]  ;;  %v2293_v26 = vrot.slane %v2010_v5, 2  ;;  %v2017_v28 = vld [vmem:[%s4378_s29 + $0x320] sm:$0xfc] }
 0x13b   : > { %v5654_v62 = vadd.f32 %v1571_v46, %v5505_v49  ;;  %v1163_v61 = vpop.f32.mrf.mxu0  ;;  %2682 = vmatprep.mubr.f32.mxu1 %v2283_v52  ;;  %v2297_v30 = vrot.slane %v4226_v20, 2  ;;  %v2304_v52 = vrot.slane %v2014_v38, 2  ;;  %v2311_v40 = vrot.slane %v2017_v28, 2  ;;  %v3094_v20 = vld [vmem:[%s6198_s3 + $0x68] sm:$0xff] }
 0x13c   : > { %v1573_v36 = vpop.f32.mrf.mxu1  ;;  %v3095_v61 = vld [vmem:[%s6198_s3 + $0x70] sm:$0xff] }
 0x13d   : > { %v1166_v48 = vpop.f32.mrf.mxu0  ;;  %4051 = vmatmul.mubr.f32.gmra.mxu0 %v2307_v6  ;;  %v2295_v6 = vsel %vm2142_vm1, %v2293_v26, %v2294_v45 }
 0x13e   : > { %v5663_v49 = vadd.f32 %v5410_v57, %v1166_v48  ;;  %v1576_v42 = vpop.f32.mrf.mxu1  ;;  %2683 = vmatmul.mubr.f32.gmra.mxu1 %v2280_v22  ;;  %4053 = vmatprep.mubr.f32.mxu0 %v2316_v59  ;;  %v2298_v57 = vsel %vm2142_vm1, %v2296_v8, %v2297_v30  ;;  %v2305_v22 = vsel %vm2142_vm1, %v2297_v30, %v2304_v52  ;;  %v4228_v59 = vld [vmem:[%s4378_s29 + $0x338] sm:$0xff]  ;;  %v2020_v8 = vld [vmem:[%s4378_s29 + $0x350] sm:$0x3]  ;;  %v2023_v52 = vld [vmem:[%s4378_s29 + $0x368] sm:$0xfc] }
 0x13f   : > { %v5667_v14 = vadd.f32 %v1576_v42, %v5526_v0  ;;  %v1168_v2 = vpop.f32.mrf.mxu0  ;;  %2687 = vmatprep.mubr.f32.mxu1 %v2290_v56  ;;  %v3096_v0 = vld [vmem:[%s6198_s3 + $0x78] sm:$0xff]  ;;  %v2312_v36 = vrot.slane %v4228_v59, 2  ;;  %v2303_v42 = vsel %vm2142_vm1, %v2294_v45, %v2302_v60 }
 0x140   : > { %v1578_v10 = vpop.f32.mrf.mxu1  ;;  %4068 = vmatprep.subr.mxu0 %v3096_v0  ;;  %v2016_v56 = vld [vmem:[%s4378_s29 + $0x318] sm:$0xfc]  ;;  %v4229_v2 = vld [vmem:[%s4378_s29 + $0x330] sm:$0xff]  ;;  %v2026_v59 = vld [vmem:[%s4378_s29 + $0x398] sm:$0x3] }
 0x141   : > { %v1171_v7 = vpop.f32.mrf.mxu0  ;;  %4054 = vmatmul.mubr.f32.gmra.mxu0 %v2322_v18  ;;  %v2308_v18 = vrot.slane %v2016_v56, 2  ;;  %v2313_v31 = vsel %vm2142_vm1, %v2311_v40, %v2312_v36  ;;  %v2319_v10 = vrot.slane %v2020_v8, 2  ;;  %v3092_v45 = vld [vmem:[%s6198_s3 + $0x58] sm:$0xff]  ;;  %v2022_v40 = vld [vmem:[%s4378_s29 + $0x360] sm:$0xfc]  ;;  %v3090_v56 = vld [vmem:[%s6198_s3 + $0x48] sm:$0xff] }
 0x142   : > { %v5678_v4 = vadd.f32 %v5403_v17, %v1171_v7  ;;  %v1581_v44 = vpop.f32.mrf.mxu1  ;;  %2688 = vmatmul.mubr.f32.gmra.mxu1 %v2288_v51  ;;  %4069 = vmatpush3.msra.mxu0 %v3096_v0  ;;  %v2309_v51 = vrot.slane %v4229_v2, 2 }
 0x143   : > { %v5681_v15 = vadd.f32 %v1581_v44, %v5545_v34  ;;  %v1173_v46 = vpop.f32.mrf.mxu0  ;;  %2692 = vmatprep.mubr.f32.mxu1 %v2298_v57  ;;  %4070 = vmatprep.subr.mxu0 %v3095_v61  ;;  %v2019_v57 = vld [vmem:[%s4378_s29 + $0x348] sm:$0x3]  ;;  %v2320_v60 = vsel %vm2142_vm1, %v2312_v36, %v2319_v10  ;;  %v2029_v10 = vld [vmem:[%s4378_s29 + $0x3b0] sm:$0xfc] }
 0x144   : > { %v1583_v17 = vpop.f32.mrf.mxu1  ;;  %4071 = vmatpush3.msra.mxu0 %v3095_v61  ;;  %v2310_v44 = vsel %vm2142_vm1, %v2308_v18, %v2309_v51  ;;  %v2317_v46 = vrot.slane %v2019_v57, 2  ;;  %v2326_v61 = vrot.slane %v2023_v52, 2 }
 0x145   : > { %v1176_v34 = vpop.f32.mrf.mxu0  ;;  %4072 = vmatprep.subr.mxu0 %v3094_v20  ;;  %v4230_v17 = vld [vmem:[%s4378_s29 + $0x380] sm:$0xff] }
 0x146   : > { %v5695_v5 = vadd.f32 %v5437_v43, %v1176_v34  ;;  %v1586_v48 = vpop.f32.mrf.mxu1  ;;  %2693 = vmatmul.mubr.f32.gmra.mxu1 %v2295_v6  ;;  %4073 = vmatpush3.msra.mxu0 %v3094_v20  ;;  %v3093_v43 = vld [vmem:[%s6198_s3 + $0x60] sm:$0xff]  ;;  %v3091_v6 = vld [vmem:[%s6198_s3 + $0x50] sm:$0xff] }
 0x147   : > { %v5698_v30 = vadd.f32 %v1586_v48, %v5566_v35  ;;  %v1178_v38 = vpop.f32.mrf.mxu0  ;;  %2697 = vmatprep.mubr.f32.mxu1 %v2305_v22  ;;  %4074 = vmatprep.subr.mxu0 %v3093_v43  ;;  %v2327_v22 = vrot.slane %v4230_v17, 2  ;;  %v2318_v48 = vsel %vm2142_vm1, %v2309_v51, %v2317_v46  ;;  %v3088_v51 = vld [vmem:[%s6198_s3 + $0x38] sm:$0xff]  ;;  %v2032_v17 = vld [vmem:[%s4378_s29 + $0x3e0] sm:$0x3] }
 0x148   : > { %v1588_v26 = vpop.f32.mrf.mxu1  ;;  %4075 = vmatpush3.msra.mxu0 %v3093_v43  ;;  %v2323_v38 = vrot.slane %v2022_v40, 2  ;;  %v3086_v40 = vld [vmem:[%s6198_s3 + $0x28] sm:$0xff] }
 0x149   : > { %v1181_v35 = vpop.f32.mrf.mxu0  ;;  %4076 = vmatprep.subr.mxu0 %v3092_v45  ;;  %v2328_v43 = vsel %vm2142_vm1, %v2326_v61, %v2327_v22  ;;  %v2334_v26 = vrot.slane %v2026_v59, 2  ;;  %v2028_v61 = vld [vmem:[%s4378_s29 + $0x3a8] sm:$0xfc] }
 0x14a   : > { %v5712_v23 = vadd.f32 %v5424_v33, %v1181_v35  ;;  %v1591_v7 = vpop.f32.mrf.mxu1  ;;  %2698 = vmatmul.mubr.f32.gmra.mxu1 %v2303_v42  ;;  %4077 = vmatpush3.msra.mxu0 %v3092_v45  ;;  %v4231_v42 = vld [vmem:[%s4378_s29 + $0x378] sm:$0xff] }
 0x14b   : > { %v5715_v28 = vadd.f32 %v1591_v7, %v5584_v41  ;;  %v1183_v0 = vpop.f32.mrf.mxu0  ;;  %2702 = vmatprep.mubr.f32.mxu1 %v2313_v31  ;;  %4078 = vmatprep.subr.mxu0 %v3091_v6  ;;  %v2324_v18 = vrot.slane %v4231_v42, 2  ;;  %v2025_v31 = vld [vmem:[%s4378_s29 + $0x390] sm:$0x3]  ;;  %v2335_v46 = vsel %vm2142_vm1, %v2327_v22, %v2334_v26  ;;  %v2035_v26 = vld [vmem:[%s4378_s29 + $0x3f8] sm:$0xfc] }
 0x14c   : > { %v1593_v33 = vpop.f32.mrf.mxu1  ;;  %4079 = vmatpush3.msra.mxu0 %v3091_v6  ;;  %v2332_v0 = vrot.slane %v2025_v31, 2  ;;  %v2341_v6 = vrot.slane %v2029_v10, 2 }
 0x14d   : > { %v1186_v41 = vpop.f32.mrf.mxu0  ;;  %4080 = vmatprep.subr.mxu0 %v3090_v56  ;;  %v2325_v7 = vsel %vm2142_vm1, %v2323_v38, %v2324_v18  ;;  %v4232_v33 = vld [vmem:[%s4378_s29 + $0x3c8] sm:$0xff] }
 0x14e   : > { %v5729_v34 = vadd.f32 %v5469_v19, %v1186_v41  ;;  %v1596_v8 = vpop.f32.mrf.mxu1  ;;  %2703 = vmatmul.mubr.f32.gmra.mxu1 %v2310_v44  ;;  %4081 = vmatpush3.msra.mxu0 %v3090_v56  ;;  %v3089_v19 = vld [vmem:[%s6198_s3 + $0x40] sm:$0xff]  ;;  %v3087_v44 = vld [vmem:[%s6198_s3 + $0x30] sm:$0xff] }
 0x14f   : > { %v5732_v36 = vadd.f32 %v1596_v8, %v5602_v55  ;;  %v1188_v20 = vpop.f32.mrf.mxu0  ;;  %2707 = vmatprep.mubr.f32.mxu1 %v2320_v60  ;;  %4082 = vmatprep.subr.mxu0 %v3089_v19  ;;  %v2342_v60 = vrot.slane %v4232_v33, 2  ;;  %v2333_v8 = vsel %vm2142_vm1, %v2324_v18, %v2332_v0  ;;  %v3084_v18 = vld [vmem:[%s6198_s3 + $0x18] sm:$0xff]  ;;  %v2038_v33 = vld [vmem:[%s4378_s29 + $0x428] sm:$0x3] }
 0x150   : > { %v1598_v2 = vpop.f32.mrf.mxu1  ;;  %4083 = vmatpush3.msra.mxu0 %v3089_v19  ;;  %v2338_v20 = vrot.slane %v2028_v61, 2  ;;  %v3082_v61 = vld [vmem:[%s6198_s3 + $0x8] sm:$0xff] }
 0x151   : > { %v1191_v55 = vpop.f32.mrf.mxu0  ;;  %4084 = vmatprep.subr.mxu0 %v3088_v51  ;;  %v2343_v19 = vsel %vm2142_vm1, %v2341_v6, %v2342_v60  ;;  %v2349_v2 = vrot.slane %v2032_v17, 2  ;;  %v2034_v6 = vld [vmem:[%s4378_s29 + $0x3f0] sm:$0xfc] }
 0x152   : > { %v5746_v57 = vadd.f32 %v5453_v21, %v1191_v55  ;;  %v1601_v35 = vpop.f32.mrf.mxu1  ;;  %2708 = vmatmul.mubr.f32.gmra.mxu1 %v2318_v48  ;;  %4085 = vmatpush3.msra.mxu0 %v3088_v51  ;;  %v4233_v48 = vld [vmem:[%s4378_s29 + $0x3c0] sm:$0xff] }
 0x153   : > { %v5749_v52 = vadd.f32 %v1601_v35, %v5618_v58  ;;  %v1193_v45 = vpop.f32.mrf.mxu0  ;;  %2712 = vmatprep.mubr.f32.mxu1 %v2328_v43  ;;  %4086 = vmatprep.subr.mxu0 %v3087_v44  ;;  %v2339_v38 = vrot.slane %v4233_v48, 2  ;;  %v2031_v43 = vld [vmem:[%s4378_s29 + $0x3d8] sm:$0x3]  ;;  %v2350_v0 = vsel %vm2142_vm1, %v2342_v60, %v2349_v2  ;;  %v2041_v2 = vld [vmem:[%s4378_s29 + $0x440] sm:$0xfc] }
 0x154   : > { %v1603_v21 = vpop.f32.mrf.mxu1  ;;  %4087 = vmatpush3.msra.mxu0 %v3087_v44  ;;  %v2347_v35 = vrot.slane %v2031_v43, 2  ;;  %v3083_v45 = vld [vmem:[%s6198_s3 + $0x10] sm:$0xff]  ;;  %v2356_v44 = vrot.slane %v2035_v26, 2 }
 0x155   : > { %v1196_v58 = vpop.f32.mrf.mxu0  ;;  %4088 = vmatprep.subr.mxu0 %v3086_v40  ;;  %v2340_v51 = vsel %vm2142_vm1, %v2338_v20, %v2339_v38  ;;  %v4234_v21 = vld [vmem:[%s4378_s29 + $0x410] sm:$0xff] }
 0x156   : > { %v5763_v41 = vadd.f32 %v5492_v50, %v1196_v58  ;;  %v1606_v59 = vpop.f32.mrf.mxu1  ;;  %2713 = vmatmul.mubr.f32.gmra.mxu1 %v2325_v7  ;;  %4089 = vmatpush3.msra.mxu0 %v3086_v40  ;;  %v3085_v50 = vld [vmem:[%s6198_s3 + $0x20] sm:$0xff] }
 0x157   : > { %v5766_v22 = vadd.f32 %v1606_v59, %v5637_v39  ;;  %v1198_v56 = vpop.f32.mrf.mxu0  ;;  %2717 = vmatprep.mubr.f32.mxu1 %v2335_v46  ;;  %4090 = vmatprep.subr.mxu0 %v3085_v50  ;;  %v2357_v46 = vrot.slane %v4234_v21, 2  ;;  %v2348_v59 = vsel %vm2142_vm1, %v2339_v38, %v2347_v35  ;;  %v2371_v35 = vrot.slane %v2041_v2, 2  ;;  %v2044_v21 = vld [vmem:[%s4378_s29 + $0x470] sm:$0x3] }
 0x158   : > { %v1608_v42 = vpop.f32.mrf.mxu1  ;;  %4091 = vmatpush3.msra.mxu0 %v3085_v50  ;;  %v2353_v56 = vrot.slane %v2034_v6, 2 }
 0x159   : > { %v5775_v39 = vpop.f32.mrf.mxu0  ;;  %4092 = vmatprep.subr.mxu0 %v3084_v18  ;;  %v2358_v50 = vsel %vm2142_vm1, %v2356_v44, %v2357_v46  ;;  %v2364_v42 = vrot.slane %v2038_v33, 2 }
 0x15a   : > { %v1611_v31 = vpop.f32.mrf.mxu1  ;;  %2718 = vmatmul.mubr.f32.gmra.mxu1 %v2333_v8  ;;  %4093 = vmatpush3.msra.mxu0 %v3084_v18  ;;  %v4235_v8 = vld [vmem:[%s4378_s29 + $0x408] sm:$0xff] }
 0x15b   : > { %v5782_v55 = vadd.f32 %v1611_v31, %v5650_v13  ;;  %v1203_v10 = vpop.f32.mrf.mxu0  ;;  %2722 = vmatprep.mubr.f32.mxu1 %v2343_v19  ;;  %4094 = vmatprep.subr.mxu0 %v3083_v45  ;;  %v2354_v20 = vrot.slane %v4235_v8, 2  ;;  %v2037_v19 = vld [vmem:[%s4378_s29 + $0x420] sm:$0x3]  ;;  %v2043_v8 = vld [vmem:[%s4378_s29 + $0x468] sm:$0x3] }
 0x15c   : > { %v1613_v7 = vpop.f32.mrf.mxu1  ;;  %4095 = vmatpush3.msra.mxu0 %v3083_v45  ;;  %v2362_v31 = vrot.slane %v2037_v19, 2  ;;  %v4236_v45 = vld [vmem:[%s4378_s29 + $0x458] sm:$0xff]  ;;  %v2377_v19 = vrot.slane %v2043_v8, 2 }
 0x15d   : > { %v1206_v13 = vpop.f32.mrf.mxu0  ;;  %4096 = vmatprep.subr.mxu0 %v3082_v61  ;;  %v2355_v18 = vsel %vm2142_vm1, %v2353_v56, %v2354_v20  ;;  %v2372_v7 = vrot.slane %v4236_v45, 2  ;;  %v2379_v56 = vrot.slane %v2044_v21, 2 }
 0x15e   : > { %v5796_v58 = vadd.f32 %v5516_v37, %v1206_v13  ;;  %v1616_v17 = vpop.f32.mrf.mxu1  ;;  %2723 = vmatmul.mubr.f32.gmra.mxu1 %v2340_v51  ;;  %4097 = vmatpush3.msra.mxu0 %v3082_v61  ;;  %v3081_v37 = vld [vmem:[%s6198_s3] sm:$0xff]  ;;  %v2365_v51 = vsel %vm2142_vm1, %v2357_v46, %v2364_v42  ;;  %v2363_v33 = vsel %vm2142_vm1, %v2354_v20, %v2362_v31  ;;  %v4237_v46 = vld [vmem:[%s4378_s29 + $0x450] sm:$0xff] }
 0x15f   : > { %v5799_v60 = vadd.f32 %v1616_v17, %v5663_v49  ;;  %v1208_v40 = vpop.f32.mrf.mxu0  ;;  %2727 = vmatprep.mubr.f32.mxu1 %v2350_v0  ;;  %4098 = vmatprep.subr.mxu0 %v3081_v37  ;;  %v2040_v0 = vld [vmem:[%s4378_s29 + $0x438] sm:$0xfc]  ;;  %v2369_v17 = vrot.slane %v4237_v46, 2 }
 0x160   : > { %v1618_v48 = vpop.f32.mrf.mxu1  ;;  %4099 = vmatpush3.msra.mxu0 %v3081_v37  ;;  %v2368_v61 = vrot.slane %v2040_v0, 2 }
 0x161   : > { %v5808_v49 = vpop.f32.mrf.mxu0  ;;  %v2024_v48 = vld [vmem:[%s4378_s29 + $0x370] sm:$0xfc]  ;;  %v2378_v21 = vsel %vm2142_vm1, %v2369_v17, %v2377_v19 }
 0x162   : > { %v1621_v38 = vpop.f32.mrf.mxu1  ;;  %2728 = vmatmul.mubr.f32.gmra.mxu1 %v2348_v59  ;;  %v2373_v59 = vsel %vm2142_vm1, %v2371_v35, %v2372_v7  ;;  %v2370_v42 = vsel %vm2142_vm1, %v2368_v61, %v2369_v17  ;;  %v2030_v35 = vld [vmem:[%s4378_s29 + $0x3b8] sm:$0xfc]  ;;  %v4239_v61 = vld [vmem:[%s4378_s29 + $0x3d0] sm:$0xff] }
 0x163   : > { %v5812_v43 = vadd.f32 %v1621_v38, %v5678_v4  ;;  %v1213_v26 = vpop.f32.mrf.mxu0  ;;  %2732 = vmatprep.mubr.f32.mxu1 %v2358_v50  ;;  %v2380_v38 = vsel %vm2142_vm1, %v2372_v7, %v2379_v56  ;;  %v2345_v46 = vrot.slane %v4239_v61, 2  ;;  %v2036_v56 = vld [vmem:[%s4378_s29 + $0x400] sm:$0xfc]  ;;  %v2045_v61 = vld [vmem:[%s4378_s29 + $0x478] sm:$0x3] }
 0x164   : > { %v1623_v10 = vpop.f32.mrf.mxu1  ;;  %v2329_v26 = vrot.slane %v2024_v48, 2  ;;  %v2359_v19 = vrot.slane %v2036_v56, 2 }
 0x165   : > { %v5818_v44 = vpop.f32.mrf.mxu0  ;;  %v2027_v10 = vld [vmem:[%s4378_s29 + $0x3a0] sm:$0x3] }
 0x166   : > { %v1626_v4 = vpop.f32.mrf.mxu1  ;;  %2733 = vmatmul.mubr.f32.gmra.mxu1 %v2355_v18  ;;  %v4238_v18 = vld [vmem:[%s4378_s29 + $0x388] sm:$0xff]  ;;  %v2336_v7 = vrot.slane %v2027_v10, 2 }
 0x167   : > { %v5822_v6 = vadd.f32 %v1626_v4, %v5695_v5  ;;  %v1218_v13 = vpop.f32.mrf.mxu0  ;;  %2737 = vmatprep.mubr.f32.mxu1 %v2365_v51  ;;  %v2330_v31 = vrot.slane %v4238_v18, 2  ;;  %v2042_v10 = vld [vmem:[%s4378_s29 + $0x448] sm:$0xfc] }
 0x168   : > { %v1628_v40 = vpop.f32.mrf.mxu1 }
 0x169   : > { %v5828_v37 = vpop.f32.mrf.mxu0  ;;  %v2331_v13 = vsel %vm2142_vm1, %v2329_v26, %v2330_v31  ;;  %v2033_v40 = vld [vmem:[%s4378_s29 + $0x3e8] sm:$0x3]  ;;  %v2337_v48 = vsel %vm2142_vm1, %v2330_v31, %v2336_v7  ;;  %v2039_v26 = vld [vmem:[%s4378_s29 + $0x430] sm:$0x3] }
 0x16a   : > { %v1631_v5 = vpop.f32.mrf.mxu1  ;;  %2738 = vmatmul.mubr.f32.gmra.mxu1 %v2363_v33  ;;  %v2344_v33 = vrot.slane %v2030_v35, 2 }
 0x16b   : > { %v5832_v50 = vadd.f32 %v1631_v5, %v5712_v23  ;;  %v1223_v20 = vpop.f32.mrf.mxu0  ;;  %2742 = vmatprep.mubr.f32.mxu1 %v2373_v59  ;;  %v2351_v5 = vrot.slane %v2033_v40, 2  ;;  %v1427_v40 = vadd.f32 %v5482_v12, %v5775_v39 }
 0x16c   : > { %v1633_v2 = vpop.f32.mrf.mxu1 }
 0x16d   : > { %v5838_v51 = vpop.f32.mrf.mxu0  ;;  %v4240_v2 = vld [vmem:[%s4378_s29 + $0x418] sm:$0xff]  ;;  %v2352_v31 = vsel %vm2142_vm1, %v2345_v46, %v2351_v5 }
 0x16e   : > { %v1636_v23 = vpop.f32.mrf.mxu1  ;;  %2743 = vmatmul.mubr.f32.gmra.mxu1 %v2370_v42  ;;  %v2346_v42 = vsel %vm2142_vm1, %v2344_v33, %v2345_v46 }
 0x16f   : > { %v5842_v45 = vadd.f32 %v1636_v23, %v5729_v34  ;;  %v1228_v0 = vpop.f32.mrf.mxu0  ;;  %2747 = vmatprep.mubr.f32.mxu1 %v2380_v38  ;;  %v2360_v38 = vrot.slane %v4240_v2, 2 }
 0x170   : > { %v1638_v4 = vpop.f32.mrf.mxu1  ;;  %v2366_v0 = vrot.slane %v2039_v26, 2 }
 0x171   : > { %v5848_v59 = vpop.f32.mrf.mxu0  ;;  %v2361_v7 = vsel %vm2142_vm1, %v2359_v19, %v2360_v38  ;;  %v2374_v4 = vrot.slane %v2042_v10, 2  ;;  %v1437_v10 = vadd.f32 %v5507_v29, %v5808_v49 }
 0x172   : > { %v1641_v34 = vpop.f32.mrf.mxu1  ;;  %2748 = vmatmul.mubr.f32.gmra.mxu1 %v2378_v21  ;;  %v2367_v46 = vsel %vm2142_vm1, %v2360_v38, %v2366_v0 }
 0x173   : > { %v5852_v8 = vadd.f32 %v1641_v34, %v5746_v57  ;;  %v1233_v17 = vpop.f32.mrf.mxu0  ;;  %4056 = vmatprep.mubr.f32.mxu1 %v2331_v13  ;;  %v4241_v13 = vld [vmem:[%s4378_s29 + $0x460] sm:$0xff] }
 0x174   : > { %v1643_v20 = vpop.f32.mrf.mxu1  ;;  %v2375_v33 = vrot.slane %v4241_v13, 2 }
 0x175   : > { %v5858_v18 = vpop.f32.mrf.mxu0 }
 0x176   : > { %v1646_v35 = vpop.f32.mrf.mxu1  ;;  %4057 = vmatmul.mubr.f32.vlgmr.msra.gmra.mxu1 %v2337_v48  ;;  %v2381_v48 = vrot.slane %v2045_v61, 2  ;;  %v2376_v20 = vsel %vm2142_vm1, %v2374_v4, %v2375_v33  ;;  %v1447_v61 = vadd.f32 %v5528_v53, %v5828_v37 }
 0x177   : > { %v5862_v57 = vadd.f32 %v1646_v35, %v5763_v41  ;;  %v1238_v23 = vpop.f32.mrf.mxu0  ;;  %4059 = vmatprep.mubr.f32.mxu1 %v2346_v42 }
 0x178   : > { %v1648_v21 = vpop.f32.mrf.mxu1  ;;  %v2382_v39 = vsel %vm2142_vm1, %v2375_v33, %v2381_v48 }
 0x179   : > { %v1241_v56 = vpop.f32.mrf.mxu0  ;;  %v1442_v21 = vadd.f32 %v5537_v3, %v5818_v44 }
 0x17a   : > { %v1651_v34 = vpop.f32.mrf.mxu1  ;;  %4060 = vmatmul.mubr.f32.gmra.mxu1 %v2352_v31 }
 0x17b   : > { %v5870_v41 = vadd.f32 %v1651_v34, %v1427_v40  ;;  %v1243_v17 = vpop.f32.mrf.mxu0  ;;  %4062 = vmatprep.mubr.f32.mxu1 %v2361_v7 }
 0x17c   : > { %v1653_v5 = vpop.f32.mrf.mxu1 }
 0x17d   : > { %v1246_v42 = vpop.f32.mrf.mxu0 }
 0x17e   : > { %v1656_v19 = vpop.f32.mrf.mxu1  ;;  %4063 = vmatmul.mubr.f32.gmra.mxu1 %v2367_v46  ;;  %v1452_v46 = vadd.f32 %v5556_v16, %v5838_v51 }
 0x17f   : > { %v5875_v2 = vadd.f32 %v1656_v19, %v5796_v58  ;;  %v1248_v12 = vpop.f32.mrf.mxu0  ;;  %4065 = vmatprep.mubr.f32.mxu1 %v2376_v20  ;;  %v1457_v19 = vadd.f32 %v5547_v32, %v5848_v59  ;;  %v1467_v59 = vadd.f32 %v5568_v25, %v1241_v56 }
 0x180   : > { %v1658_v26 = vpop.f32.mrf.mxu1 }
 0x181   : > { %v1251_v35 = vpop.f32.mrf.mxu0 }
 0x182   : > { %v1661_v38 = vpop.f32.mrf.mxu1  ;;  %4066 = vmatmul.mubr.f32.gmra.mxu1 %v2382_v39 }
 0x183   : > { %v5880_v23 = vadd.f32 %v1661_v38, %v1437_v10  ;;  %v1253_v31 = vpop.f32.mrf.mxu0  ;;  %v1462_v10 = vadd.f32 %v5577_v47, %v5858_v18 }
 0x184   : > { %v1663_v0 = vpop.f32.mrf.mxu1 }
 0x185   : > { %v1256_v58 = vpop.f32.mrf.mxu0 }
 0x186   : > { %v1666_v7 = vpop.f32.mrf.mxu1 }
 0x187   : > { %v5884_v4 = vadd.f32 %v1666_v7, %v1442_v21  ;;  %v1258_v13 = vpop.f32.mrf.mxu0 }
 0x188   : > { %v1668_v33 = vpop.f32.mrf.mxu1 }
 0x189   : > { %v1261_v29 = vpop.f32.mrf.mxu0 }
 0x18a   : > { %v1671_v49 = vpop.f32.mrf.mxu1 }
 0x18b   : > { %v5888_v40 = vadd.f32 %v1671_v49, %v1447_v61  ;;  %v1263_v34 = vpop.f32.mrf.mxu0  ;;  %v1472_v49 = vadd.f32 %v5594_v9, %v1246_v42 }
 0x18c   : > { %v1673_v17 = vpop.f32.mrf.mxu1 }
 0x18d   : > { %v1266_v48 = vpop.f32.mrf.mxu0 }
 0x18e   : > { %v1676_v3 = vpop.f32.mrf.mxu1 }
 0x18f   : > { %v5892_v44 = vadd.f32 %v1676_v3, %v1452_v46  ;;  %v1268_v5 = vpop.f32.mrf.mxu0  ;;  %v1477_v3 = vadd.f32 %v5586_v1, %v1251_v35 }
 0x190   : > { %v1678_v20 = vpop.f32.mrf.mxu1 }
 0x191   : > { %v1271_v12 = vpop.f32.mrf.mxu0 }
 0x192   : > { %v1681_v53 = vpop.f32.mrf.mxu1 }
 0x193   : > { %v5896_v37 = vadd.f32 %v1681_v53, %v1457_v19  ;;  %v1273_v39 = vpop.f32.mrf.mxu0  ;;  %v1482_v53 = vadd.f32 %v5612_v54, %v1256_v58 }
 0x194   : > { %v1683_v26 = vpop.f32.mrf.mxu1 }
 0x195   : > { %v3942_v38 = vpop.f32.mrf.mxu0 }
 0x196   : > { %v1686_v16 = vpop.f32.mrf.mxu1  ;;  %v5901_v51 = vadd.f32 %v3942_v38, %v5654_v62  ;;  %v1487_v38 = vadd.f32 %v5604_v63, %v1261_v29 }
 0x197   : > { %v5903_v31 = vadd.f32 %v1686_v16, %v1462_v10  ;;  %v1791_v0 = vpop.f32.mrf.mxu0 }
 0x198   : > { %v1688_v21 = vpop.f32.mrf.mxu1  ;;  %v5906_v32 = vadd.f32 %v1791_v0, %v5641_v11 }
 0x199   : > { %v3945_v7 = vpop.f32.mrf.mxu0 }
 0x19a   : > { %v1691_v13 = vpop.f32.mrf.mxu1  ;;  %v5910_v33 = vadd.f32 %v3945_v7, %v5681_v15 }
 0x19b   : > { %v5912_v47 = vadd.f32 %v1691_v13, %v1467_v59  ;;  %v1801_v18 = vpop.f32.mrf.mxu0  ;;  %v1492_v59 = vadd.f32 %v5628_v27, %v1266_v48 }
 0x19c   : > { %v1693_v61 = vpop.f32.mrf.mxu1  ;;  %v5915_v62 = vadd.f32 %v1801_v18, %v5667_v14 }
 0x19d   : > { %v3948_v34 = vpop.f32.mrf.mxu0 }
 0x19e   : > { %v1696_v17 = vpop.f32.mrf.mxu1  ;;  %v5919_v11 = vadd.f32 %v3948_v34, %v5715_v28 }
 0x19f   : > { %v5921_v25 = vadd.f32 %v1696_v17, %v1472_v49  ;;  %v1811_v56 = vpop.f32.mrf.mxu0 }
 0x1a0   : > { %v1698_v46 = vpop.f32.mrf.mxu1  ;;  %v5924_v15 = vadd.f32 %v1811_v56, %v5698_v30 }
 0x1a1   : > { %v3951_v5 = vpop.f32.mrf.mxu0 }
 0x1a2   : > { %v1701_v20 = vpop.f32.mrf.mxu1  ;;  %v5928_v14 = vadd.f32 %v3951_v5, %v5749_v52 }
 0x1a3   : > { %v5930_v9 = vadd.f32 %v1701_v20, %v1477_v3  ;;  %v1821_v42 = vpop.f32.mrf.mxu0 }
 0x1a4   : > { %v1703_v19 = vpop.f32.mrf.mxu1  ;;  %v5933_v28 = vadd.f32 %v1821_v42, %v5732_v36 }
 0x1a5   : > { %v3954_v39 = vpop.f32.mrf.mxu0 }
 0x1a6   : > { %v1706_v26 = vpop.f32.mrf.mxu1  ;;  %v5937_v30 = vadd.f32 %v3954_v39, %v5782_v55 }
 0x1a7   : > { %v5939_v1 = vadd.f32 %v1706_v26, %v1482_v53  ;;  %v1831_v35 = vpop.f32.mrf.mxu0 }
 0x1a8   : > { %v1708_v10 = vpop.f32.mrf.mxu1  ;;  %v5942_v52 = vadd.f32 %v1831_v35, %v5766_v22 }
 0x1a9   : > { %v3957_v16 = vpop.f32.mrf.mxu0 }
 0x1aa   : > { %v1711_v0 = vpop.f32.mrf.mxu1  ;;  %v5946_v36 = vadd.f32 %v3957_v16, %v5812_v43  ;;  %v1497_v43 = vadd.f32 %v5620_v24, %v1271_v12 }
 0x1ab   : > { %v1712_v54 = vadd.f32 %v1711_v0, %v1487_v38  ;;  %v1841_v58 = vpop.f32.mrf.mxu0 }
 0x1ac   : > { %v1713_v21 = vpop.f32.mrf.mxu1  ;;  %v5949_v55 = vadd.f32 %v1841_v58, %v5799_v60 }
 0x1ad   : > { %v3960_v7 = vpop.f32.mrf.mxu0 }
 0x1ae   : > { %v1716_v13 = vpop.f32.mrf.mxu1  ;;  %v5953_v22 = vadd.f32 %v3960_v7, %v5832_v50 }
 0x1af   : > { %v1717_v18 = vadd.f32 %v1716_v13, %v1492_v59  ;;  %v1851_v63 = vpop.f32.mrf.mxu0 }
 0x1b0   : > { %v1718_v29 = vpop.f32.mrf.mxu1  ;;  %v5956_v61 = vadd.f32 %v1851_v63, %v5822_v6 }
 0x1b1   : > { %v3963_v49 = vpop.f32.mrf.mxu0 }
 0x1b2   : > { %v1721_v34 = vpop.f32.mrf.mxu1  ;;  %v5960_v60 = vadd.f32 %v3963_v49, %v5852_v8 }
 0x1b3   : > { %v1722_v17 = vadd.f32 %v1721_v34, %v1497_v43  ;;  %v1861_v27 = vpop.f32.mrf.mxu0 }
 0x1b4   : > { %v1723_v48 = vpop.f32.mrf.mxu1  ;;  %v5963_v56 = vadd.f32 %v1861_v27, %v5842_v45 }
 0x1b5   : > { %v3966_v50 = vpop.f32.mrf.mxu0 }
 0x1b6   : > { %v5966_v46 = vadd.f32 %v3966_v50, %v5870_v41  ;;  %v2594_v3 = vpop.f32.mrf.mxu1 }
 0x1b7   : > { %v1871_v6 = vpop.f32.mrf.mxu0 }
 0x1b8   : > { %v5969_v5 = vadd.f32 %v1871_v6, %v5862_v57  ;;  %v2596_v24 = vpop.f32.mrf.mxu1 }
 0x1b9   : > { %v3969_v12 = vpop.f32.mrf.mxu0 }
 0x1ba   : > { %v5972_v8 = vadd.f32 %v3969_v12, %v5880_v23  ;;  %v2599_v20 = vpop.f32.mrf.mxu1 }
 0x1bb   : > { %v1881_v42 = vpop.f32.mrf.mxu0 }
 0x1bc   : > { %v5975_v19 = vadd.f32 %v1881_v42, %v5875_v2  ;;  %v2601_v45 = vpop.f32.mrf.mxu1 }
 0x1bd   : > { %v3972_v53 = vpop.f32.mrf.mxu0 }
 0x1be   : > { %v5978_v41 = vadd.f32 %v3972_v53, %v5888_v40  ;;  %v2604_v39 = vpop.f32.mrf.mxu1 }
 0x1bf   : > { %v1891_v26 = vpop.f32.mrf.mxu0 }
 0x1c0   : > { %v5981_v57 = vadd.f32 %v1891_v26, %v5884_v4  ;;  %v2606_v35 = vpop.f32.mrf.mxu1 }
 0x1c1   : > { %v3975_v10 = vpop.f32.mrf.mxu0 }
 0x1c2   : > { %v5984_v23 = vadd.f32 %v3975_v10, %v5896_v37  ;;  %v2609_v38 = vpop.f32.mrf.mxu1 }
 0x1c3   : > { %v1901_v16 = vpop.f32.mrf.mxu0 }
 0x1c4   : > { %v5987_v2 = vadd.f32 %v1901_v16, %v5892_v44  ;;  %v2611_v0 = vpop.f32.mrf.mxu1 }
 0x1c5   : > { %v3978_v58 = vpop.f32.mrf.mxu0 }
 0x1c6   : > { %v5990_v40 = vadd.f32 %v3978_v58, %v5912_v47  ;;  %v2614_v21 = vpop.f32.mrf.mxu1 }
 0x1c7   : > { %v1911_v59 = vpop.f32.mrf.mxu0 }
 0x1c8   : > { %v5993_v4 = vadd.f32 %v1911_v59, %v5903_v31  ;;  %v2616_v7 = vpop.f32.mrf.mxu1 }
 0x1c9   : > { %v3981_v13 = vpop.f32.mrf.mxu0 }
 0x1ca   : > { %v5996_v37 = vadd.f32 %v3981_v13, %v5930_v9  ;;  %v2619_v63 = vpop.f32.mrf.mxu1 }
 0x1cb   : > { %v1921_v29 = vpop.f32.mrf.mxu0 }
 0x1cc   : > { %v5999_v44 = vadd.f32 %v1921_v29, %v5921_v25  ;;  %v2621_v43 = vpop.f32.mrf.mxu1 }
 0x1cd   : > { %v3984_v49 = vpop.f32.mrf.mxu0 }
 0x1ce   : > { %v6001_v34 = vadd.f32 %v3984_v49, %v1712_v54  ;;  %v2624_v47 = vpop.f32.mrf.mxu1 }
 0x1cf   : > { %v1931_v27 = vpop.f32.mrf.mxu0 }
 0x1d0   : > { %v6004_v48 = vadd.f32 %v1931_v27, %v5939_v1  ;;  %v2626_v31 = vpop.f32.mrf.mxu1  ;;  %v6014_v1 = vld [vmem:[%s6197_s2] ss:$0 sm:$0xff] }
 0x1d1   : > { %v3987_v50 = vpop.f32.mrf.mxu0 }
 0x1d2   : > { %v6006_v6 = vadd.f32 %v3987_v50, %v1722_v17  ;;  %v2629_v9 = vpop.f32.mrf.mxu1 }
 0x1d3   : > { %v1941_v24 = vpop.f32.mrf.mxu0 }
 0x1d4   : > { %v6008_v12 = vadd.f32 %v1941_v24, %v1717_v18  ;;  %v2631_v42 = vpop.f32.mrf.mxu1 }
 0x1d5   : > { %v4022_v25 = vpop.f32.mrf.mxu0 }
 0x1d6   : > { %v2634_v45 = vpop.f32.mrf.mxu1  ;;  %v2825_v53 = vadd.f32 %v4022_v25, %v2599_v20 }
 0x1d7   : > { %v2819_v26 = vpop.f32.mrf.mxu0 }
 0x1d8   : > { %v2979_v54 = vadd.f32 %v2825_v53, %v5901_v51  ;;  %v2636_v35 = vpop.f32.mrf.mxu1  ;;  %v2820_v10 = vadd.f32 %v2819_v26, %v2594_v3 }
 0x1d9   : > { %v4025_v17 = vpop.f32.mrf.mxu0 }
 0x1da   : > { %v2978_v16 = vadd.f32 %v2820_v10, %v5906_v32  ;;  %v2639_v0 = vpop.f32.mrf.mxu1  ;;  %v2835_v18 = vadd.f32 %v4025_v17, %v2609_v38  ;;  %v3018_v58 = vadd.f32 %v6014_v1, %v2979_v54 }
 0x1db   : > { %v2829_v59 = vpop.f32.mrf.mxu0 }
 0x1dc   : > { %v2981_v20 = vadd.f32 %v2835_v18, %v5910_v33  ;;  %v2641_v7 = vpop.f32.mrf.mxu1  ;;  %v2830_v13 = vadd.f32 %v2829_v59, %v2604_v39  ;;  %v3017_v51 = vadd.f32 %v6014_v1, %v2978_v16  ;;  %v3050_v31 = vmax.f32 %v3018_v58, 0.0 }
 0x1dd   : > { %v4028_v29 = vpop.f32.mrf.mxu0 }
 0x1de   : > { %v2980_v43 = vadd.f32 %v2830_v13, %v5915_v62  ;;  %v2644_v49 = vpop.f32.mrf.mxu1  ;;  %v2845_v27 = vadd.f32 %v4028_v29, %v2619_v63  ;;  %v3049_v3 = vmax.f32 %v3017_v51, 0.0  ;;  %v3020_v32 = vadd.f32 %v6014_v1, %v2981_v20 }
 0x1df   : > { %v2839_v50 = vpop.f32.mrf.mxu0 }
 0x1e0   : > { %v2983_v38 = vadd.f32 %v2845_v27, %v5919_v11  ;;  %v2646_v24 = vpop.f32.mrf.mxu1  ;;  %v2840_v42 = vadd.f32 %v2839_v50, %v2614_v21  ;;  %4100 = vmatprep.mubr.f32.mxu0 %v3049_v3  ;;  %v3019_v33 = vadd.f32 %v6014_v1, %v2980_v43  ;;  %v3052_v63 = vmax.f32 %v3020_v32, 0.0 }
 0x1e1   : > { %v4031_v39 = vpop.f32.mrf.mxu0  ;;  %4101 = vmatmul.mubr.f32.vlgmr.msra.gmra.mxu0 %v3050_v31 }
 0x1e2   : > { %v2982_v25 = vadd.f32 %v2840_v42, %v5924_v15  ;;  %v2649_v53 = vpop.f32.mrf.mxu1  ;;  %v2855_v62 = vadd.f32 %v4031_v39, %v2629_v9  ;;  %v3051_v26 = vmax.f32 %v3019_v33, 0.0  ;;  %v3022_v54 = vadd.f32 %v6014_v1, %v2983_v38 }
 0x1e3   : > { %v2849_v35 = vpop.f32.mrf.mxu0 }
 0x1e4   : > { %v2985_v10 = vadd.f32 %v2855_v62, %v5928_v14  ;;  %v2651_v17 = vpop.f32.mrf.mxu1  ;;  %v2850_v11 = vadd.f32 %v2849_v35, %v2624_v47  ;;  %4103 = vmatprep.mubr.f32.mxu0 %v3051_v26  ;;  %v3021_v21 = vadd.f32 %v6014_v1, %v2982_v25  ;;  %v3054_v9 = vmax.f32 %v3022_v54, 0.0 }
 0x1e5   : > { %v4034_v16 = vpop.f32.mrf.mxu0  ;;  %4104 = vmatmul.mubr.f32.gmra.mxu0 %v3052_v63 }
 0x1e6   : > { %v2984_v18 = vadd.f32 %v2850_v11, %v5933_v28  ;;  %v2654_v58 = vpop.f32.mrf.mxu1  ;;  %v2865_v15 = vadd.f32 %v4034_v16, %v2639_v0  ;;  %v3053_v59 = vmax.f32 %v3021_v21, 0.0  ;;  %v3024_v20 = vadd.f32 %v6014_v1, %v2985_v10 }
 0x1e7   : > { %v2859_v7 = vpop.f32.mrf.mxu0 }
 0x1e8   : > { %v2987_v13 = vadd.f32 %v2865_v15, %v5937_v30  ;;  %v2656_v51 = vpop.f32.mrf.mxu1  ;;  %v2860_v14 = vadd.f32 %v2859_v7, %v2634_v45  ;;  %4106 = vmatprep.mubr.f32.mxu0 %v3053_v59  ;;  %v3023_v47 = vadd.f32 %v6014_v1, %v2984_v18  ;;  %v3056_v0 = vmax.f32 %v3024_v20, 0.0 }
 0x1e9   : > { %v4037_v29 = vpop.f32.mrf.mxu0  ;;  %4107 = vmatmul.mubr.f32.gmra.mxu0 %v3054_v9 }
 0x1ea   : > { %v2986_v43 = vadd.f32 %v2860_v14, %v5942_v52  ;;  %v2659_v27 = vpop.f32.mrf.mxu1  ;;  %v2875_v28 = vadd.f32 %v4037_v29, %v2649_v53  ;;  %v3055_v3 = vmax.f32 %v3023_v47, 0.0  ;;  %v3026_v31 = vadd.f32 %v6014_v1, %v2987_v13 }
 0x1eb   : > { %v2869_v32 = vpop.f32.mrf.mxu0 }
 0x1ec   : > { %v2989_v50 = vadd.f32 %v2875_v28, %v5946_v36  ;;  %v2661_v38 = vpop.f32.mrf.mxu1  ;;  %v2870_v30 = vadd.f32 %v2869_v32, %v2644_v49  ;;  %4109 = vmatprep.mubr.f32.mxu0 %v3055_v3  ;;  %v3025_v45 = vadd.f32 %v6014_v1, %v2986_v43  ;;  %v3058_v25 = vmax.f32 %v3026_v31, 0.0 }
 0x1ed   : > { %v4040_v24 = vpop.f32.mrf.mxu0  ;;  %4110 = vmatmul.mubr.f32.gmra.mxu0 %v3056_v0 }
 0x1ee   : > { %v2988_v42 = vadd.f32 %v2870_v30, %v5949_v55  ;;  %v2664_v33 = vpop.f32.mrf.mxu1  ;;  %v2885_v52 = vadd.f32 %v4040_v24, %v2659_v27  ;;  %v3057_v39 = vmax.f32 %v3025_v45, 0.0  ;;  %v3028_v53 = vadd.f32 %v6014_v1, %v2989_v50 }
 0x1ef   : > { %v2879_v62 = vpop.f32.mrf.mxu0 }
 0x1f0   : > { %v2991_v26 = vadd.f32 %v2885_v52, %v5953_v22  ;;  %v2666_v63 = vpop.f32.mrf.mxu1  ;;  %v2880_v36 = vadd.f32 %v2879_v62, %v2654_v58  ;;  %4112 = vmatprep.mubr.f32.mxu0 %v3057_v39  ;;  %v3027_v49 = vadd.f32 %v6014_v1, %v2988_v42  ;;  %v3060_v17 = vmax.f32 %v3028_v53, 0.0 }
 0x1f1   : > { %v4043_v54 = vpop.f32.mrf.mxu0  ;;  %4113 = vmatmul.mubr.f32.gmra.mxu0 %v3058_v25 }
 0x1f2   : > { %v2990_v35 = vadd.f32 %v2880_v36, %v5956_v61  ;;  %v2669_v10 = vpop.f32.mrf.mxu1  ;;  %v3059_v55 = vmax.f32 %v3027_v49, 0.0  ;;  %v3030_v11 = vadd.f32 %v6014_v1, %v2991_v26 }
 0x1f3   : > { %v2895_v21 = vadd.f32 %v4043_v54, %v2669_v10  ;;  %v2889_v16 = vpop.f32.mrf.mxu0 }
 0x1f4   : > { %v2671_v18 = vpop.f32.mrf.mxu1  ;;  %v2890_v15 = vadd.f32 %v2889_v16, %v2664_v33  ;;  %4115 = vmatprep.mubr.f32.mxu0 %v3059_v55  ;;  %v3029_v22 = vadd.f32 %v6014_v1, %v2990_v35  ;;  %v3062_v7 = vmax.f32 %v3030_v11, 0.0 }
 0x1f5   : > { %v2993_v58 = vadd.f32 %v2895_v21, %v5960_v60  ;;  %v4046_v59 = vpop.f32.mrf.mxu0  ;;  %4116 = vmatmul.mubr.f32.gmra.mxu0 %v3060_v17 }
 0x1f6   : > { %v2992_v9 = vadd.f32 %v2890_v15, %v5963_v56  ;;  %v2674_v20 = vpop.f32.mrf.mxu1  ;;  %v3061_v61 = vmax.f32 %v3029_v22, 0.0 }
 0x1f7   : > { %v3032_v13 = vadd.f32 %v6014_v1, %v2993_v58  ;;  %v2899_v51 = vpop.f32.mrf.mxu0 }
 0x1f8   : > { %v2676_v14 = vpop.f32.mrf.mxu1  ;;  %v2900_v47 = vadd.f32 %v2899_v51, %v2674_v20  ;;  %4118 = vmatprep.mubr.f32.mxu0 %v3061_v61  ;;  %v3031_v29 = vadd.f32 %v6014_v1, %v2992_v9 }
 0x1f9   : > { %4119 = vmatmul.mubr.f32.gmra.mxu0 %v3062_v7  ;;  %v4049_v43 = vpop.f32.mrf.mxu0  ;;  %v3064_v3 = vmax.f32 %v3032_v13, 0.0 }
 0x1fa   : > { %v2994_v27 = vadd.f32 %v2900_v47, %v5969_v5  ;;  %v2679_v60 = vpop.f32.mrf.mxu1  ;;  %v3063_v28 = vmax.f32 %v3031_v29, 0.0 }
 0x1fb   : > { %v2905_v0 = vadd.f32 %v4046_v59, %v2679_v60  ;;  %v2909_v31 = vpop.f32.mrf.mxu0 }
 0x1fc   : > { %v2681_v56 = vpop.f32.mrf.mxu1  ;;  %4121 = vmatprep.mubr.f32.mxu0 %v3063_v28  ;;  %v3033_v32 = vadd.f32 %v6014_v1, %v2994_v27 }
 0x1fd   : > { %v2995_v50 = vadd.f32 %v2905_v0, %v5966_v46  ;;  %4122 = vmatmul.mubr.f32.gmra.mxu0 %v3064_v3  ;;  %v4052_v5 = vpop.f32.mrf.mxu0 }
 0x1fe   : > { %v2684_v38 = vpop.f32.mrf.mxu1  ;;  %v3065_v30 = vmax.f32 %v3033_v32, 0.0 }
 0x1ff   : > { %v3034_v45 = vadd.f32 %v6014_v1, %v2995_v50  ;;  %v2910_v24 = vadd.f32 %v2909_v31, %v2684_v38  ;;  %v2919_v26 = vpop.f32.mrf.mxu0 }
 0x200   : > { %v2686_v42 = vpop.f32.mrf.mxu1  ;;  %4124 = vmatprep.mubr.f32.mxu0 %v3065_v30 }
 0x201   : > { %v3066_v33 = vmax.f32 %v3034_v45, 0.0  ;;  %v2996_v52 = vadd.f32 %v2910_v24, %v5975_v19  ;;  %v4055_v10 = vpop.f32.mrf.mxu0 }
 0x202   : > { %v2689_v39 = vpop.f32.mrf.mxu1 }
 0x203   : > { %v2915_v25 = vadd.f32 %v4049_v43, %v2689_v39  ;;  %4125 = vmatmul.mubr.f32.gmra.mxu0 %v3066_v33  ;;  %v3035_v53 = vadd.f32 %v6014_v1, %v2996_v52  ;;  %v2929_v18 = vpop.f32.mrf.mxu0 }
 0x204   : > { %v2691_v62 = vpop.f32.mrf.mxu1 }
 0x205   : > { %v2997_v46 = vadd.f32 %v2915_v25, %v5972_v8  ;;  %v3067_v63 = vmax.f32 %v3035_v53, 0.0 }
 0x206   : > { %v2694_v36 = vpop.f32.mrf.mxu1 }
 0x207   : > { %v3036_v49 = vadd.f32 %v6014_v1, %v2997_v46  ;;  %v2920_v54 = vadd.f32 %v2919_v26, %v2694_v36  ;;  %4127 = vmatprep.mubr.f32.mxu0 %v3067_v63 }
 0x208   : > { %v2696_v35 = vpop.f32.mrf.mxu1 }
 0x209   : > { %v3068_v55 = vmax.f32 %v3036_v49, 0.0  ;;  %v2998_v19 = vadd.f32 %v2920_v54, %v5981_v57 }
 0x20a   : > { %v2699_v17 = vpop.f32.mrf.mxu1 }
 0x20b   : > { %v2925_v11 = vadd.f32 %v4052_v5, %v2699_v17  ;;  %4128 = vmatmul.mubr.f32.gmra.mxu0 %v3068_v55  ;;  %v3037_v21 = vadd.f32 %v6014_v1, %v2998_v19 }
 0x20c   : > { %v2701_v16 = vpop.f32.mrf.mxu1 }
 0x20d   : > { %v2999_v8 = vadd.f32 %v2925_v11, %v5978_v41  ;;  %v3069_v15 = vmax.f32 %v3037_v21, 0.0 }
 0x20e   : > { %v2704_v22 = vpop.f32.mrf.mxu1 }
 0x20f   : > { %v3038_v58 = vadd.f32 %v6014_v1, %v2999_v8  ;;  %v2930_v59 = vadd.f32 %v2929_v18, %v2704_v22  ;;  %4130 = vmatprep.mubr.f32.mxu0 %v3069_v15 }
 0x210   : > { %v2706_v9 = vpop.f32.mrf.mxu1 }
 0x211   : > { %v3070_v20 = vmax.f32 %v3038_v58, 0.0  ;;  %v3000_v61 = vadd.f32 %v2930_v59, %v5987_v2 }
 0x212   : > { %v2709_v57 = vpop.f32.mrf.mxu1 }
 0x213   : > { %v2935_v7 = vadd.f32 %v4055_v10, %v2709_v57  ;;  %4131 = vmatmul.mubr.f32.gmra.mxu0 %v3070_v20  ;;  %v3039_v13 = vadd.f32 %v6014_v1, %v3000_v61 }
 0x214   : > { %v2711_v51 = vpop.f32.mrf.mxu1 }
 0x215   : > { %v3001_v14 = vadd.f32 %v2935_v7, %v5984_v23  ;;  %v3071_v47 = vmax.f32 %v3039_v13, 0.0 }
 0x216   : > { %v2714_v41 = vpop.f32.mrf.mxu1 }
 0x217   : > { %v3040_v29 = vadd.f32 %v6014_v1, %v3001_v14  ;;  %4133 = vmatprep.mubr.f32.mxu0 %v3071_v47  ;;  %v3329_v47 = vld [vmem:[%s6084_s12] sm:$0xff] }
 0x218   : > { %v2716_v43 = vpop.f32.mrf.mxu1 }
 0x219   : > { %v3072_v27 = vmax.f32 %v3040_v29, 0.0 }
 0x21a   : > { %v2719_v60 = vpop.f32.mrf.mxu1 }
 0x21b   : > { %4134 = vmatmul.mubr.f32.gmra.mxu0 %v3072_v27  ;;  %v3332_v27 = vld [vmem:[%s6084_s12 + $0x18] sm:$0xff] }
 0x21c   : > { %v2721_v28 = vpop.f32.mrf.mxu1 }
 0x21e   : > { %v2724_v3 = vpop.f32.mrf.mxu1 }
 0x220   : > { %v2726_v2 = vpop.f32.mrf.mxu1 }
 0x222   : > { %v2729_v0 = vpop.f32.mrf.mxu1 }
 0x224   : > { %v2731_v56 = vpop.f32.mrf.mxu1 }
 0x226   : > { %v2734_v31 = vpop.f32.mrf.mxu1 }
 0x228   : > { %v2736_v32 = vpop.f32.mrf.mxu1 }
 0x22a   : > { %v2739_v50 = vpop.f32.mrf.mxu1 }
 0x22c   : > { %v2741_v38 = vpop.f32.mrf.mxu1 }
 0x22d   : > { %v3334_v38 = vld [vmem:[%s6084_s12 + $0x28] sm:$0xff] }
 0x22e   : > { %v2744_v30 = vpop.f32.mrf.mxu1 }
 0x230   : > { %v2746_v23 = vpop.f32.mrf.mxu1 }
 0x232   : > { %v2749_v45 = vpop.f32.mrf.mxu1 }
 0x234   : > { %v2751_v24 = vpop.f32.mrf.mxu1 }
 0x236   : > { %v4058_v42 = vpop.f32.mrf.mxu1 }
 0x237   : > { %v2945_v5 = vadd.f32 %v4058_v42, %v2719_v60  ;;  %v3333_v42 = vld [vmem:[%s6084_s12 + $0x20] sm:$0xff] }
 0x238   : > { %v2939_v33 = vpop.f32.mrf.mxu1 }
 0x239   : > { %v3003_v52 = vadd.f32 %v2945_v5, %v5990_v40  ;;  %v2940_v39 = vadd.f32 %v2939_v33, %v2714_v41 }
 0x23a   : > { %v4061_v25 = vpop.f32.mrf.mxu1 }
 0x23b   : > { %v3002_v53 = vadd.f32 %v2940_v39, %v5993_v4  ;;  %v2955_v62 = vadd.f32 %v4061_v25, %v2729_v0  ;;  %v3042_v26 = vadd.f32 %v6014_v1, %v3003_v52  ;;  %v3331_v0 = vld [vmem:[%s6084_s12 + $0x10] sm:$0xff]  ;;  %v3336_v25 = vld [vmem:[%s6084_s12 + $0x38] sm:$0xff] }
 0x23c   : > { %v2949_v46 = vpop.f32.mrf.mxu1 }
 0x23d   : > { %v3005_v63 = vadd.f32 %v2955_v62, %v5996_v37  ;;  %v2950_v36 = vadd.f32 %v2949_v46, %v2724_v3  ;;  %v3041_v49 = vadd.f32 %v6014_v1, %v3002_v53  ;;  %v3074_v19 = vmax.f32 %v3042_v26, 0.0 }
 0x23e   : > { %v4064_v54 = vpop.f32.mrf.mxu1 }
 0x23f   : > { %v3004_v35 = vadd.f32 %v2950_v36, %v5999_v44  ;;  %v2965_v10 = vadd.f32 %v4064_v54, %v2739_v50  ;;  %v3073_v55 = vmax.f32 %v3041_v49, 0.0  ;;  %v3044_v40 = vadd.f32 %v6014_v1, %v3005_v63  ;;  %v3335_v63 = vld [vmem:[%s6084_s12 + $0x30] sm:$0xff] }
 0x240   : > { %v2959_v17 = vpop.f32.mrf.mxu1 }
 0x241   : > { %v3007_v4 = vadd.f32 %v2965_v10, %v6001_v34  ;;  %v2960_v11 = vadd.f32 %v2959_v17, %v2734_v31  ;;  %4136 = vmatprep.mubr.f32.mxu0 %v3073_v55  ;;  %v3043_v21 = vadd.f32 %v6014_v1, %v3004_v35  ;;  %v3076_v15 = vmax.f32 %v3044_v40, 0.0  ;;  %v3338_v10 = vld [vmem:[%s6084_s12 + $0x48] sm:$0xff] }
 0x242   : > { %v4067_v16 = vpop.f32.mrf.mxu1  ;;  %4137 = vmatmul.mubr.f32.gmra.mxu0 %v3074_v19 }
 0x243   : > { %v3006_v37 = vadd.f32 %v2960_v11, %v6004_v48  ;;  %v2975_v18 = vadd.f32 %v4067_v16, %v2749_v45  ;;  %v3075_v8 = vmax.f32 %v3043_v21, 0.0  ;;  %v3046_v44 = vadd.f32 %v6014_v1, %v3007_v4  ;;  %v3337_v4 = vld [vmem:[%s6084_s12 + $0x40] sm:$0xff] }
 0x244   : > { %v2969_v22 = vpop.f32.mrf.mxu1 }
 0x245   : > { %v3009_v58 = vadd.f32 %v2975_v18, %v6006_v6  ;;  %v2970_v59 = vadd.f32 %v2969_v22, %v2744_v30  ;;  %4139 = vmatprep.mubr.f32.mxu0 %v3075_v8  ;;  %v3045_v34 = vadd.f32 %v6014_v1, %v3006_v37  ;;  %v3078_v61 = vmax.f32 %v3046_v44, 0.0  ;;  %v6089_v6 = vld [vmem:[%s6199_s4] ss:$0 sm:$0xff]  ;;  %v3340_v18 = vld [vmem:[%s6084_s12 + $0x58] sm:$0xff] }
 0x246   : > { %4140 = vmatmul.mubr.f32.gmra.mxu0 %v3076_v15 }
 0x247   : > { %v3008_v9 = vadd.f32 %v2970_v59, %v6008_v12  ;;  %v3077_v20 = vmax.f32 %v3045_v34, 0.0  ;;  %v3048_v48 = vadd.f32 %v6014_v1, %v3009_v58  ;;  %v3339_v58 = vld [vmem:[%s6084_s12 + $0x50] sm:$0xff] }
 0x249   : > { %4142 = vmatprep.mubr.f32.mxu0 %v3077_v20  ;;  %v3047_v57 = vadd.f32 %v6014_v1, %v3008_v9  ;;  %v3080_v13 = vmax.f32 %v3048_v48, 0.0  ;;  %v3330_v1 = vld [vmem:[%s6084_s12 + $0x8] sm:$0xff] }
 0x24a   : > { %4143 = vmatmul.mubr.f32.gmra.mxu0 %v3078_v61  ;;  %v3342_v61 = vld [vmem:[%s6084_s12 + $0x68] sm:$0xff] }
 0x24b   : > { %v3079_v7 = vmax.f32 %v3047_v57, 0.0 }
 0x24d   : > { %4145 = vmatprep.mubr.f32.mxu0 %v3079_v7 }
 0x24e   : > { %4146 = vmatmul.mubr.f32.gmra.mxu0 %v3080_v13 }
 0x2a1   : > { %v4102_v12 = vpop.f32.mrf.mxu0 }
 0x2a2   : > { %v3176_v51 = vadd.f32 %v4102_v12, %v6089_v6  ;;  %v3341_v12 = vld [vmem:[%s6084_s12 + $0x60] sm:$0xff] }
 0x2a3   : > { %v3170_v14 = vpop.f32.mrf.mxu0 }
 0x2a4   : > { %v3362_v41 = vadd.f32 %v3330_v1, %v3176_v51  ;;  %v3171_v29 = vadd.f32 %v6089_v6, %v3170_v14 }
 0x2a5   : > { %v4105_v43 = vpop.f32.mrf.mxu0 }
 0x2a6   : > { %v3394_v60 = vmax.f32 %v3362_v41, 0.0  ;;  %v3361_v28 = vadd.f32 %v3329_v47, %v3171_v29  ;;  %v3186_v3 = vadd.f32 %v4105_v43, %v6089_v6  ;;  %v3344_v41 = vld [vmem:[%s6084_s12 + $0x78] sm:$0xff] }
 0x2a7   : > { %v3180_v2 = vpop.f32.mrf.mxu0 }
 0x2a8   : > { %3426 = vst [vmem:[%s6098_s17 + $0x8] sm:$0xff] %v3394_v60  ;;  %v3393_v56 = vmax.f32 %v3361_v28, 0.0  ;;  %v3364_v31 = vadd.f32 %v3332_v27, %v3186_v3  ;;  %v3181_v32 = vadd.f32 %v6089_v6, %v3180_v2  ;;  %v3343_v28 = vld [vmem:[%s6084_s12 + $0x70] sm:$0xff] }
 0x2a9   : > { %v4108_v50 = vpop.f32.mrf.mxu0 }
 0x2aa   : > { %3425 = vst [vmem:[%s6098_s17] sm:$0xff] %v3393_v56  ;;  %v3396_v30 = vmax.f32 %v3364_v31, 0.0  ;;  %v3363_v23 = vadd.f32 %v3331_v0, %v3181_v32  ;;  %v3196_v45 = vadd.f32 %v4108_v50, %v6089_v6  ;;  %v3346_v50 = vld [vmem:[%s6084_s12 + $0x88] sm:$0xff] }
 0x2ab   : > { %v3190_v24 = vpop.f32.mrf.mxu0 }
 0x2ac   : > { %3428 = vst [vmem:[%s6098_s17 + $0x18] sm:$0xff] %v3396_v30  ;;  %v3395_v5 = vmax.f32 %v3363_v23, 0.0  ;;  %v3366_v33 = vadd.f32 %v3334_v38, %v3196_v45  ;;  %v3191_v52 = vadd.f32 %v6089_v6, %v3190_v24  ;;  %v3345_v45 = vld [vmem:[%s6084_s12 + $0x80] sm:$0xff] }
 0x2ad   : > { %v4111_v39 = vpop.f32.mrf.mxu0 }
 0x2ae   : > { %3427 = vst [vmem:[%s6098_s17 + $0x10] sm:$0xff] %v3395_v5  ;;  %v3398_v53 = vmax.f32 %v3366_v33, 0.0  ;;  %v3365_v62 = vadd.f32 %v3333_v42, %v3191_v52  ;;  %v3206_v26 = vadd.f32 %v4111_v39, %v6089_v6 }
 0x2af   : > { %v3200_v46 = vpop.f32.mrf.mxu0 }
 0x2b0   : > { %3430 = vst [vmem:[%s6098_s17 + $0x28] sm:$0xff] %v3398_v53  ;;  %v3397_v36 = vmax.f32 %v3365_v62, 0.0  ;;  %v3368_v49 = vadd.f32 %v3336_v25, %v3206_v26  ;;  %v3201_v54 = vadd.f32 %v6089_v6, %v3200_v46  ;;  %v3348_v25 = vld [vmem:[%s6084_s12 + $0x98] sm:$0xff]  ;;  %v3347_v26 = vld [vmem:[%s6084_s12 + $0x90] sm:$0xff] }
 0x2b1   : > { %v4114_v35 = vpop.f32.mrf.mxu0 }
 0x2b2   : > { %3429 = vst [vmem:[%s6098_s17 + $0x20] sm:$0xff] %v3397_v36  ;;  %v3400_v55 = vmax.f32 %v3368_v49, 0.0  ;;  %v3367_v19 = vadd.f32 %v3335_v63, %v3201_v54  ;;  %v3216_v40 = vadd.f32 %v4114_v35, %v6089_v6 }
 0x2b3   : > { %v3210_v17 = vpop.f32.mrf.mxu0 }
 0x2b4   : > { %3432 = vst [vmem:[%s6098_s17 + $0x38] sm:$0xff] %v3400_v55  ;;  %v3399_v11 = vmax.f32 %v3367_v19, 0.0  ;;  %v3370_v21 = vadd.f32 %v3338_v10, %v3216_v40  ;;  %v3211_v16 = vadd.f32 %v6089_v6, %v3210_v17  ;;  %v3350_v10 = vld [vmem:[%s6084_s12 + $0xa8] sm:$0xff]  ;;  %v3349_v40 = vld [vmem:[%s6084_s12 + $0xa0] sm:$0xff] }
 0x2b5   : > { %v4117_v37 = vpop.f32.mrf.mxu0 }
 0x2b6   : > { %3431 = vst [vmem:[%s6098_s17 + $0x30] sm:$0xff] %v3399_v11  ;;  %v3402_v8 = vmax.f32 %v3370_v21, 0.0  ;;  %v3369_v15 = vadd.f32 %v3337_v4, %v3211_v16  ;;  %v3226_v44 = vadd.f32 %v4117_v37, %v6089_v6 }
 0x2b7   : > { %v3220_v22 = vpop.f32.mrf.mxu0 }
 0x2b8   : > { %3434 = vst [vmem:[%s6098_s17 + $0x48] sm:$0xff] %v3402_v8  ;;  %v3401_v59 = vmax.f32 %v3369_v15, 0.0  ;;  %v3372_v34 = vadd.f32 %v3340_v18, %v3226_v44  ;;  %v3221_v9 = vadd.f32 %v6089_v6, %v3220_v22  ;;  %v3352_v18 = vld [vmem:[%s6084_s12 + $0xb8] sm:$0xff]  ;;  %v3351_v44 = vld [vmem:[%s6084_s12 + $0xb0] sm:$0xff] }
 0x2b9   : > { %v4120_v20 = vpop.f32.mrf.mxu0 }
 0x2ba   : > { %3433 = vst [vmem:[%s6098_s17 + $0x40] sm:$0xff] %v3401_v59  ;;  %v3404_v48 = vmax.f32 %v3372_v34, 0.0  ;;  %v3371_v57 = vadd.f32 %v3339_v58, %v3221_v9  ;;  %v3236_v7 = vadd.f32 %v4120_v20, %v6089_v6 }
 0x2bb   : > { %v3230_v13 = vpop.f32.mrf.mxu0 }
 0x2bc   : > { %3436 = vst [vmem:[%s6098_s17 + $0x58] sm:$0xff] %v3404_v48  ;;  %v3403_v1 = vmax.f32 %v3371_v57, 0.0  ;;  %v3374_v51 = vadd.f32 %v3342_v61, %v3236_v7  ;;  %v3231_v14 = vadd.f32 %v6089_v6, %v3230_v13  ;;  %v3354_v61 = vld [vmem:[%s6084_s12 + $0xc8] sm:$0xff]  ;;  %v3353_v7 = vld [vmem:[%s6084_s12 + $0xc0] sm:$0xff] }
 0x2bd   : > { %v4123_v47 = vpop.f32.mrf.mxu0 }
 0x2be   : > { %3435 = vst [vmem:[%s6098_s17 + $0x50] sm:$0xff] %v3403_v1  ;;  %v3406_v29 = vmax.f32 %v3374_v51, 0.0  ;;  %v3373_v43 = vadd.f32 %v3341_v12, %v3231_v14  ;;  %v3246_v27 = vadd.f32 %v4123_v47, %v6089_v6  ;;  %v3356_v51 = vld [vmem:[%s6084_s12 + $0xd8] sm:$0xff] }
 0x2bf   : > { %v3240_v60 = vpop.f32.mrf.mxu0 }
 0x2c0   : > { %3438 = vst [vmem:[%s6098_s17 + $0x68] sm:$0xff] %v3406_v29  ;;  %v3405_v3 = vmax.f32 %v3373_v43, 0.0  ;;  %v3376_v2 = vadd.f32 %v3344_v41, %v3246_v27  ;;  %v3241_v0 = vadd.f32 %v6089_v6, %v3240_v60  ;;  %v3355_v43 = vld [vmem:[%s6084_s12 + $0xd0] sm:$0xff] }
 0x2c2   : > { %3437 = vst [vmem:[%s6098_s17 + $0x60] sm:$0xff] %v3405_v3  ;;  %v3408_v56 = vmax.f32 %v3376_v2, 0.0  ;;  %v3375_v31 = vadd.f32 %v3343_v28, %v3241_v0  ;;  %v3358_v2 = vld [vmem:[%s6084_s12 + $0xe8] sm:$0xff] }
 0x2c3   : > { %v4126_v32 = vpop.f32.mrf.mxu0 }
 0x2c4   : > { %3440 = vst [vmem:[%s6098_s17 + $0x78] sm:$0xff] %v3408_v56  ;;  %v3407_v38 = vmax.f32 %v3375_v31, 0.0  ;;  %v3256_v30 = vadd.f32 %v4126_v32, %v6089_v6 }
 0x2c5   : > { %v3250_v23 = vpop.f32.mrf.mxu0 }
 0x2c6   : > { %3439 = vst [vmem:[%s6098_s17 + $0x70] sm:$0xff] %v3407_v38  ;;  %v3378_v24 = vadd.f32 %v3346_v50, %v3256_v30  ;;  %v3251_v42 = vadd.f32 %v6089_v6, %v3250_v23  ;;  %v3357_v50 = vld [vmem:[%s6084_s12 + $0xe0] sm:$0xff] }
 0x2c8   : > { %v3410_v5 = vmax.f32 %v3378_v24, 0.0  ;;  %v3377_v33 = vadd.f32 %v3345_v45, %v3251_v42  ;;  %v3360_v24 = vld [vmem:[%s6084_s12 + $0xf8] sm:$0xff] }
 0x2ca   : > { %3442 = vst [vmem:[%s6098_s17 + $0x88] sm:$0xff] %v3410_v5  ;;  %v3409_v52 = vmax.f32 %v3377_v33, 0.0 }
 0x2cb   : > { %v4129_v39 = vpop.f32.mrf.mxu0 }
 0x2cc   : > { %3441 = vst [vmem:[%s6098_s17 + $0x80] sm:$0xff] %v3409_v52  ;;  %v3266_v53 = vadd.f32 %v4129_v39, %v6089_v6  ;;  %v3359_v39 = vld [vmem:[%s6084_s12 + $0xf0] sm:$0xff] }
 0x2cd   : > { %v3260_v62 = vpop.f32.mrf.mxu0 }
 0x2ce   : > { %v3380_v46 = vadd.f32 %v3348_v25, %v3266_v53  ;;  %v3261_v63 = vadd.f32 %v6089_v6, %v3260_v62 }
 0x2d0   : > { %v3412_v36 = vmax.f32 %v3380_v46, 0.0  ;;  %v3379_v49 = vadd.f32 %v3347_v26, %v3261_v63 }
 0x2d2   : > { %3444 = vst [vmem:[%s6098_s17 + $0x98] sm:$0xff] %v3412_v36  ;;  %v3411_v54 = vmax.f32 %v3379_v49, 0.0 }
 0x2d3   : > { %v4132_v35 = vpop.f32.mrf.mxu0 }
 0x2d4   : > { %3443 = vst [vmem:[%s6098_s17 + $0x90] sm:$0xff] %v3411_v54  ;;  %v3276_v55 = vadd.f32 %v4132_v35, %v6089_v6 }
 0x2d5   : > { %v3270_v19 = vpop.f32.mrf.mxu0 }
 0x2d6   : > { %v3382_v17 = vadd.f32 %v3350_v10, %v3276_v55  ;;  %v3271_v4 = vadd.f32 %v6089_v6, %v3270_v19 }
 0x2d8   : > { %v3414_v11 = vmax.f32 %v3382_v17, 0.0  ;;  %v3381_v21 = vadd.f32 %v3349_v40, %v3271_v4 }
 0x2da   : > { %3446 = vst [vmem:[%s6098_s17 + $0xa8] sm:$0xff] %v3414_v11  ;;  %v3413_v16 = vmax.f32 %v3381_v21, 0.0 }
 0x2db   : > { %v4135_v37 = vpop.f32.mrf.mxu0 }
 0x2dc   : > { %3445 = vst [vmem:[%s6098_s17 + $0xa0] sm:$0xff] %v3413_v16  ;;  %v3286_v8 = vadd.f32 %v4135_v37, %v6089_v6 }
 0x2dd   : > { %v3280_v15 = vpop.f32.mrf.mxu0 }
 0x2de   : > { %v3384_v22 = vadd.f32 %v3352_v18, %v3286_v8  ;;  %v3281_v58 = vadd.f32 %v6089_v6, %v3280_v15 }
 0x2e0   : > { %v3416_v59 = vmax.f32 %v3384_v22, 0.0  ;;  %v3383_v34 = vadd.f32 %v3351_v44, %v3281_v58 }
 0x2e2   : > { %3448 = vst [vmem:[%s6098_s17 + $0xb8] sm:$0xff] %v3416_v59  ;;  %v3415_v9 = vmax.f32 %v3383_v34, 0.0 }
 0x2e4   : > { %3447 = vst [vmem:[%s6098_s17 + $0xb0] sm:$0xff] %v3415_v9 }
 0x302   : > { %v4138_v20 = vpop.f32.mrf.mxu0 }
 0x303   : > { %v3296_v48 = vadd.f32 %v4138_v20, %v6089_v6 }
 0x304   : > { %v3290_v57 = vpop.f32.mrf.mxu0 }
 0x305   : > { %v3386_v13 = vadd.f32 %v3354_v61, %v3296_v48  ;;  %v3291_v12 = vadd.f32 %v6089_v6, %v3290_v57 }
 0x306   : > { %v4141_v1 = vpop.f32.mrf.mxu0 }
 0x307   : > { %v3418_v14 = vmax.f32 %v3386_v13, 0.0  ;;  %v3385_v47 = vadd.f32 %v3353_v7, %v3291_v12  ;;  %v3306_v41 = vadd.f32 %v4141_v1, %v6089_v6 }
 0x308   : > { %v3300_v29 = vpop.f32.mrf.mxu0 }
 0x309   : > { %3450 = vst [vmem:[%s6098_s17 + $0xc8] sm:$0xff] %v3418_v14  ;;  %v3417_v27 = vmax.f32 %v3385_v47, 0.0  ;;  %v3388_v60 = vadd.f32 %v3356_v51, %v3306_v41  ;;  %v3301_v28 = vadd.f32 %v6089_v6, %v3300_v29 }
 0x30a   : > { %v4144_v3 = vpop.f32.mrf.mxu0 }
 0x30b   : > { %3449 = vst [vmem:[%s6098_s17 + $0xc0] sm:$0xff] %v3417_v27  ;;  %v3420_v0 = vmax.f32 %v3388_v60, 0.0  ;;  %v3387_v56 = vadd.f32 %v3355_v43, %v3301_v28  ;;  %v3316_v31 = vadd.f32 %v4144_v3, %v6089_v6 }
 0x30c   : > { %v3310_v32 = vpop.f32.mrf.mxu0 }
 0x30d   : > { %3452 = vst [vmem:[%s6098_s17 + $0xd8] sm:$0xff] %v3420_v0  ;;  %v3419_v38 = vmax.f32 %v3387_v56, 0.0  ;;  %v3390_v30 = vadd.f32 %v3358_v2, %v3316_v31  ;;  %v3311_v23 = vadd.f32 %v6089_v6, %v3310_v32 }
 0x30e   : > { %v4147_v45 = vpop.f32.mrf.mxu0 }
 0x30f   : > { %3451 = vst [vmem:[%s6098_s17 + $0xd0] sm:$0xff] %v3419_v38  ;;  %v3422_v42 = vmax.f32 %v3390_v30, 0.0  ;;  %v3389_v5 = vadd.f32 %v3357_v50, %v3311_v23  ;;  %v3326_v33 = vadd.f32 %v4147_v45, %v6089_v6 }
 0x310   : > { %v3320_v52 = vpop.f32.mrf.mxu0 }
 0x311   : > { %3454 = vst [vmem:[%s6098_s17 + $0xe8] sm:$0xff] %v3422_v42  ;;  %v3421_v25 = vmax.f32 %v3389_v5, 0.0  ;;  %v3392_v53 = vadd.f32 %v3360_v24, %v3326_v33  ;;  %v3321_v62 = vadd.f32 %v6089_v6, %v3320_v52 }
 0x313   : > { %3453 = vst [vmem:[%s6098_s17 + $0xe0] sm:$0xff] %v3421_v25  ;;  %v3424_v26 = vmax.f32 %v3392_v53, 0.0  ;;  %v3391_v46 = vadd.f32 %v3359_v39, %v3321_v62 }
 0x315   : > { %3456 = vst [vmem:[%s6098_s17 + $0xf8] sm:$0xff] %v3424_v26  ;;  %v3423_v63 = vmax.f32 %v3391_v46, 0.0 }
 0x317   : > { %3455 = vst [vmem:[%s6098_s17 + $0xf0] sm:$0xff] %v3423_v63 }
 0x318 PF: > { %s16_s21 = sadd.s32 1, %s4248_s21  }
 0x319   : > { %p13_p5 = scmp.ge.s32.totalorder %s16_s21, 4  }
 0x31b   :  { %15 = sbr.rel (!%p13_p5) target bundleno = 1 (0x1), region = 79 }

</bundles_post_ra>
